<compile_context>
chip_gen: v7x
topology: tpu7x:2x2x1
jax: 0.10.0
libtpu: 0.0.40
codegen_flags: <defaults>
</compile_context>

<pallas_src>
import functools

import jax
import jax.numpy as jnp
import numpy as np
from jax.experimental import pallas as pl
from jax.experimental.pallas import tpu as pltpu


# Model dimensions (synthetic "timm" backbone). Channel widths are multiples of
# 128 so every matmul and every store in the kernel is lane-dense.
C1 = 128        # conv1 output channels
C2 = 128        # conv2 output channels
CIN_PAD = 128   # input channels zero-padded to one full lane group (in VMEM only)
OUT_PAD = 128   # classifier head zero-padded to one full lane group


# ---------------------------------------------------------------------------
# Fused Pallas kernel: conv3x3+ReLU -> conv3x3+ReLU -> GAP -> linear head
# ---------------------------------------------------------------------------
def _fused_cnn_kernel(x_ref, w1_ref, b1_ref, w2_ref, b2_ref, wh_ref, bh_ref,
                      o_ref, x_pad, y1_pad, col,
                      *, H: int, W: int, cin: int, nb: int):
    """Processes NB images per grid step.

    x_ref  : (nb, H, W, cin)          bf16  un-padded NHWC input block
    w1_ref : (9*CIN_PAD, C1)          bf16  conv1 taps, K-stacked (tap-major)
    b1_ref : (1, C1)                  f32
    w2_ref : (9*C1, C2)               bf16  conv2 taps, K-stacked
    b2_ref : (1, C2)                  f32
    wh_ref : (C2, OUT_PAD)            f32   head weight, pre-scaled by 1/(H*W)
    bh_ref : (1, OUT_PAD)             f32
    o_ref  : (nb, 1, OUT_PAD)         f32
    x_pad  : (nb, H+2, W+2, CIN_PAD)  bf16  VMEM scratch: lane-padded input + halo
    y1_pad : (nb, H+2, W+2, C1)       bf16  VMEM scratch: conv1 output + halo
    col    : (nb*H*W, 9*128)          bf16  VMEM scratch: K-stacked im2col slab
    """
    HW = H * W
    M = nb * HW
    c1 = y1_pad.shape[3]

    # Zero the padded scratches every step (bf16, ~20 vector stores per image).
    # NOTE: a "zero only at program_id == 0" scheme is not used because the
    # batch grid axis is "parallel" and may be sharded across TensorCores,
    # each with its own scratch.
    x_pad[...] = jnp.zeros(x_pad.shape, x_pad.dtype)
    y1_pad[...] = jnp.zeros(y1_pad.shape, y1_pad.dtype)

    # Write the un-padded bf16 input into the interior of the 128-lane padded
    # scratch; channels [cin:128] and the 1-px halo stay zero.
    x_pad[:, 1:H + 1, 1:W + 1, :cin] = x_ref[...]

    # ---- conv1 (3x3, pad 1): build the K-stacked im2col slab, one MXU matmul
    # with K = 9*128 (fills the 256-deep MXU), f32 accumulation.
    for ki in range(3):
        for kj in range(3):
            tap = ki * 3 + kj
            col[:, tap * 128:(tap + 1) * 128] = (
                x_pad[:, ki:ki + H, kj:kj + W, :].reshape(M, CIN_PAD))
    y1 = jnp.dot(col[...], w1_ref[...], preferred_element_type=jnp.float32)
    y1 = jnp.maximum(y1 + b1_ref[...], 0.0).astype(jnp.bfloat16)   # (M, C1) bf16

    # conv1 activation stays resident in VMEM (bf16, no HBM round trip) with a
    # 1-pixel zero halo for the second 3x3 conv.
    y1_pad[:, 1:H + 1, 1:W + 1, :] = y1.reshape(nb, H, W, c1)

    # ---- conv2 (3x3, pad 1): same K-stacked single matmul, reusing `col`.
    for ki in range(3):
        for kj in range(3):
            tap = ki * 3 + kj
            col[:, tap * 128:(tap + 1) * 128] = (
                y1_pad[:, ki:ki + H, kj:kj + W, :].reshape(M, c1))
    y2 = jnp.dot(col[...], w2_ref[...], preferred_element_type=jnp.float32)
    y2 = jnp.maximum(y2 + b2_ref[...], 0.0)                         # (M, C2) f32

    # ---- global average pool (1/(H*W) folded into wh) + classifier head.
    pooled = jnp.sum(y2.reshape(nb, HW, -1), axis=1)                # (nb, C2)
    out = jnp.dot(pooled, wh_ref[...], preferred_element_type=jnp.float32)
    o_ref[...] = (out + bh_ref[...]).reshape(nb, 1, -1)


# ---------------------------------------------------------------------------
# Forward pass (Timm.forward equivalent)
# ---------------------------------------------------------------------------
def timm_forward(params, x_nchw, *, out_channels: int):
    # NCHW (PyTorch) -> NHWC, bf16, NO channel/spatial padding in HBM.
    x = jnp.transpose(x_nchw, (0, 2, 3, 1)).astype(jnp.bfloat16)
    N, H, W, cin = x.shape

    # NB images per grid step; keep >= 2 grid steps so both v7x cores get work.
    nb = max(1, min(8, N // 2))
    n_blocks = -(-N // nb)
    n_pad = n_blocks * nb
    if n_pad != N:
        x = jnp.pad(x, ((0, n_pad - N), (0, 0), (0, 0), (0, 0)))

    # Fold the global-average-pool 1/(H*W) into the head weight.
    wh_scaled = params["wh"] * (1.0 / (H * W))

    kernel = functools.partial(_fused_cnn_kernel, H=H, W=W, cin=cin, nb=nb)

    out_padded = pl.pallas_call(
        kernel,
        out_shape=jax.ShapeDtypeStruct((n_pad, 1, OUT_PAD), jnp.float32),
        grid=(n_blocks,),
        in_specs=[
            pl.BlockSpec((nb, H, W, cin), lambda n: (n, 0, 0, 0)),
            pl.BlockSpec((9 * CIN_PAD, C1), lambda n: (0, 0)),
            pl.BlockSpec((1, C1), lambda n: (0, 0)),
            pl.BlockSpec((9 * C1, C2), lambda n: (0, 0)),
            pl.BlockSpec((1, C2), lambda n: (0, 0)),
            pl.BlockSpec((C2, OUT_PAD), lambda n: (0, 0)),
            pl.BlockSpec((1, OUT_PAD), lambda n: (0, 0)),
        ],
        out_specs=pl.BlockSpec((nb, 1, OUT_PAD), lambda n: (n, 0, 0)),
        scratch_shapes=[
            pltpu.VMEM((nb, H + 2, W + 2, CIN_PAD), jnp.bfloat16),  # x_pad
            pltpu.VMEM((nb, H + 2, W + 2, C1), jnp.bfloat16),       # y1_pad
            pltpu.VMEM((nb * H * W, 9 * C1), jnp.bfloat16),         # im2col slab
        ],
        compiler_params=pltpu.CompilerParams(
            dimension_semantics=("parallel",),
            vmem_limit_bytes=32 * 1024 * 1024,
        ),
    )(x, params["w1"], params["b1"], params["w2"], params["b2"],
      wh_scaled, params["bh"])

    return out_padded.reshape(n_pad, OUT_PAD)[:N, :out_channels]


# ---------------------------------------------------------------------------
# Deterministic parameter init (synthetic "timm" backbone)
# ---------------------------------------------------------------------------
def init_params(key, in_channels, out_channels):
    k1, k2, k3 = jax.random.split(key, 3)

    # conv1: (3,3,Cin,C1) He init, input channels zero-padded to CIN_PAD (the
    # padded rows see zeroed activations, so they contribute exact zeros),
    # stored K-stacked as (9*CIN_PAD, C1) with row index = tap*CIN_PAD + c.
    w1 = jax.random.normal(k1, (3, 3, in_channels, C1), jnp.float32)
    w1 = w1 * (2.0 / (9 * in_channels)) ** 0.5
    w1 = jnp.pad(w1, ((0, 0), (0, 0), (0, CIN_PAD - in_channels), (0, 0)))
    w1 = w1.reshape(9 * CIN_PAD, C1)
    b1 = jnp.zeros((1, C1), jnp.float32)

    w2 = jax.random.normal(k2, (3, 3, C1, C2), jnp.float32)
    w2 = w2 * (2.0 / (9 * C1)) ** 0.5
    w2 = w2.reshape(9 * C1, C2)
    b2 = jnp.zeros((1, C2), jnp.float32)

    wh = jax.random.normal(k3, (C2, out_channels), jnp.float32) * (1.0 / C2) ** 0.5
    wh = jnp.pad(wh, ((0, 0), (0, OUT_PAD - out_channels)))
    bh = jnp.zeros((1, OUT_PAD), jnp.float32)

    return dict(
        w1=w1.astype(jnp.bfloat16), b1=b1,
        w2=w2.astype(jnp.bfloat16), b2=b2,
        wh=wh, bh=bh,
    )


# ---------------------------------------------------------------------------
# Pure-JAX reference (mirrors the kernel's bf16 operand rounding)
# ---------------------------------------------------------------------------
def timm_reference(params, x_nchw, *, out_channels: int):
    x = jnp.transpose(x_nchw, (0, 2, 3, 1)).astype(jnp.bfloat16).astype(jnp.float32)
    N, H, W, cin = x.shape
    xp = jnp.pad(x, ((0, 0), (1, 1), (1, 1), (0, CIN_PAD - cin)))
    w1 = params["w1"].astype(jnp.float32).reshape(3, 3, CIN_PAD, C1)
    w2 = params["w2"].astype(jnp.float32).reshape(3, 3, C1, C2)
    hi = jax.lax.Precision.HIGHEST

    acc1 = jnp.zeros((N, H, W, C1), jnp.float32)
    for ki in range(3):
        for kj in range(3):
            acc1 = acc1 + jnp.einsum("nhwc,cd->nhwd",
                                     xp[:, ki:ki + H, kj:kj + W, :],
                                     w1[ki, kj], precision=hi)
    y1 = jnp.maximum(acc1 + params["b1"][0], 0.0)
    y1 = y1.astype(jnp.bfloat16).astype(jnp.float32)

    y1p = jnp.pad(y1, ((0, 0), (1, 1), (1, 1), (0, 0)))
    acc2 = jnp.zeros((N, H, W, C2), jnp.float32)
    for ki in range(3):
        for kj in range(3):
            acc2 = acc2 + jnp.einsum("nhwc,cd->nhwd",
                                     y1p[:, ki:ki + H, kj:kj + W, :],
                                     w2[ki, kj], precision=hi)
    y2 = jnp.maximum(acc2 + params["b2"][0], 0.0)

    pooled = jnp.mean(y2, axis=(1, 2))                     # (N, C2)
    out = jnp.dot(pooled, params["wh"], precision=hi) + params["bh"][0]
    return out[:, :out_channels]


# ---------------------------------------------------------------------------
if __name__ == "__main__":
    key = jax.random.PRNGKey(0)
    k_x, k_p = jax.random.split(key)

    batch, in_channels, H, W = 2, 4, 16, 16
    out_channels = 5

    x = jax.random.normal(k_x, (batch, in_channels, H, W), jnp.float32)
    params = init_params(k_p, in_channels, out_channels)

    fwd = jax.jit(functools.partial(timm_forward, out_channels=out_channels))
    out = fwd(params, x)
    jax.block_until_ready(out)

    assert out.shape == (batch, out_channels), out.shape
    assert out.dtype == jnp.float32

    ref = timm_reference(params, x, out_channels=out_channels)
    np.testing.assert_allclose(np.asarray(out), np.asarray(ref),
                               rtol=2e-2, atol=2e-2)

    print("KERNEL_OK")
</pallas_src>

<mosaic_0001>
module attributes {stable_mosaic.version = 11 : i64} {
  func.func @_fused_cnn_kernel(%arg0: i32, %arg1: memref<1x16x16x4xbf16, #tpu.memory_space<vmem>>, %arg2: memref<1152x128xbf16, #tpu.memory_space<vmem>>, %arg3: memref<1x128xf32, #tpu.memory_space<vmem>>, %arg4: memref<1152x128xbf16, #tpu.memory_space<vmem>>, %arg5: memref<1x128xf32, #tpu.memory_space<vmem>>, %arg6: memref<128x128xf32, #tpu.memory_space<vmem>>, %arg7: memref<1x128xf32, #tpu.memory_space<vmem>>, %arg8: memref<1x1x128xf32, #tpu.memory_space<vmem>>, %arg9: memref<1x18x18x128xbf16, #tpu.memory_space<vmem>>, %arg10: memref<1x18x18x128xbf16, #tpu.memory_space<vmem>>, %arg11: memref<256x1152xbf16, #tpu.memory_space<vmem>>) attributes {dimension_semantics = [#tpu.dimension_semantics<parallel>], iteration_bounds = array<i64: 2>, scalar_prefetch = 0 : i64, scratch_operands = 3 : i64, tpu.core_type = #tpu.core_type<tc>, window_params = [{transform_indices = @transform_0, window_bounds = array<i64: 1, 16, 16, 4>}, {pipeline_mode = #tpu.pipeline_mode<synchronous>, transform_indices = @transform_1, window_bounds = array<i64: 1152, 128>}, {pipeline_mode = #tpu.pipeline_mode<synchronous>, transform_indices = @transform_2, window_bounds = array<i64: 1, 128>}, {pipeline_mode = #tpu.pipeline_mode<synchronous>, transform_indices = @transform_3, window_bounds = array<i64: 1152, 128>}, {pipeline_mode = #tpu.pipeline_mode<synchronous>, transform_indices = @transform_4, window_bounds = array<i64: 1, 128>}, {pipeline_mode = #tpu.pipeline_mode<synchronous>, transform_indices = @transform_5, window_bounds = array<i64: 128, 128>}, {pipeline_mode = #tpu.pipeline_mode<synchronous>, transform_indices = @transform_6, window_bounds = array<i64: 1, 128>}, {transform_indices = @transform_7, window_bounds = array<i64: 1, 1, 128>}]} {
    %cst = arith.constant 0.000000e+00 : bf16
    %0 = vector.broadcast %cst : bf16 to vector<1x18x18x128xbf16>
    %c0 = arith.constant 0 : index
    %c0_0 = arith.constant 0 : index
    %c0_1 = arith.constant 0 : index
    %c0_2 = arith.constant 0 : index
    %1 = vector.load %arg9[%c0, %c0_0, %c0_1, %c0_2] : memref<1x18x18x128xbf16, #tpu.memory_space<vmem>>, vector<1x18x18x128xbf16>
    tpu.vector_store %arg9[%c0, %c0_0, %c0_1, %c0_2], %0 {strides = array<i32>} : memref<1x18x18x128xbf16, #tpu.memory_space<vmem>>, vector<1x18x18x128xbf16>,
    %cst_3 = arith.constant 0.000000e+00 : bf16
    %2 = vector.broadcast %cst_3 : bf16 to vector<1x18x18x128xbf16>
    %c0_4 = arith.constant 0 : index
    %c0_5 = arith.constant 0 : index
    %c0_6 = arith.constant 0 : index
    %c0_7 = arith.constant 0 : index
    %3 = vector.load %arg10[%c0_4, %c0_5, %c0_6, %c0_7] : memref<1x18x18x128xbf16, #tpu.memory_space<vmem>>, vector<1x18x18x128xbf16>
    tpu.vector_store %arg10[%c0_4, %c0_5, %c0_6, %c0_7], %2 {strides = array<i32>} : memref<1x18x18x128xbf16, #tpu.memory_space<vmem>>, vector<1x18x18x128xbf16>,
    %c0_8 = arith.constant 0 : index
    %c0_9 = arith.constant 0 : index
    %c0_10 = arith.constant 0 : index
    %c0_11 = arith.constant 0 : index
    %4 = vector.load %arg1[%c0_8, %c0_9, %c0_10, %c0_11] : memref<1x16x16x4xbf16, #tpu.memory_space<vmem>>, vector<1x16x16x4xbf16>
    %c0_12 = arith.constant 0 : index
    %c1 = arith.constant 1 : index
    %c1_13 = arith.constant 1 : index
    %c0_14 = arith.constant 0 : index
    %5 = vector.load %arg9[%c0_12, %c1, %c1_13, %c0_14] : memref<1x18x18x128xbf16, #tpu.memory_space<vmem>>, vector<1x16x16x4xbf16>
    tpu.vector_store %arg9[%c0_12, %c1, %c1_13, %c0_14], %4 {strides = array<i32>} : memref<1x18x18x128xbf16, #tpu.memory_space<vmem>>, vector<1x16x16x4xbf16>,
    %c0_15 = arith.constant 0 : index
    %c0_16 = arith.constant 0 : index
    %c0_17 = arith.constant 0 : index
    %c0_18 = arith.constant 0 : index
    %6 = vector.load %arg9[%c0_15, %c0_16, %c0_17, %c0_18] : memref<1x18x18x128xbf16, #tpu.memory_space<vmem>>, vector<1x16x16x128xbf16>
    %7 = vector.shape_cast %6 : vector<1x16x16x128xbf16> to vector<256x128xbf16>
    %c0_19 = arith.constant 0 : index
    %c0_20 = arith.constant 0 : index
    %8 = vector.load %arg11[%c0_19, %c0_20] : memref<256x1152xbf16, #tpu.memory_space<vmem>>, vector<256x128xbf16>
    tpu.vector_store %arg11[%c0_19, %c0_20], %7 {strides = array<i32>} : memref<256x1152xbf16, #tpu.memory_space<vmem>>, vector<256x128xbf16>,
    %c0_21 = arith.constant 0 : index
    %c0_22 = arith.constant 0 : index
    %c1_23 = arith.constant 1 : index
    %c0_24 = arith.constant 0 : index
    %9 = vector.load %arg9[%c0_21, %c0_22, %c1_23, %c0_24] : memref<1x18x18x128xbf16, #tpu.memory_space<vmem>>, vector<1x16x16x128xbf16>
    %10 = vector.shape_cast %9 : vector<1x16x16x128xbf16> to vector<256x128xbf16>
    %c0_25 = arith.constant 0 : index
    %c128 = arith.constant 128 : index
    %11 = vector.load %arg11[%c0_25, %c128] : memref<256x1152xbf16, #tpu.memory_space<vmem>>, vector<256x128xbf16>
    tpu.vector_store %arg11[%c0_25, %c128], %10 {strides = array<i32>} : memref<256x1152xbf16, #tpu.memory_space<vmem>>, vector<256x128xbf16>,
    %c0_26 = arith.constant 0 : index
    %c0_27 = arith.constant 0 : index
    %c2 = arith.constant 2 : index
    %c0_28 = arith.constant 0 : index
    %12 = vector.load %arg9[%c0_26, %c0_27, %c2, %c0_28] : memref<1x18x18x128xbf16, #tpu.memory_space<vmem>>, vector<1x16x16x128xbf16>
    %13 = vector.shape_cast %12 : vector<1x16x16x128xbf16> to vector<256x128xbf16>
    %c0_29 = arith.constant 0 : index
    %c256 = arith.constant 256 : index
    %14 = vector.load %arg11[%c0_29, %c256] : memref<256x1152xbf16, #tpu.memory_space<vmem>>, vector<256x128xbf16>
    tpu.vector_store %arg11[%c0_29, %c256], %13 {strides = array<i32>} : memref<256x1152xbf16, #tpu.memory_space<vmem>>, vector<256x128xbf16>,
    %c0_30 = arith.constant 0 : index
    %c1_31 = arith.constant 1 : index
    %c0_32 = arith.constant 0 : index
    %c0_33 = arith.constant 0 : index
    %15 = vector.load %arg9[%c0_30, %c1_31, %c0_32, %c0_33] : memref<1x18x18x128xbf16, #tpu.memory_space<vmem>>, vector<1x16x16x128xbf16>
    %16 = vector.shape_cast %15 : vector<1x16x16x128xbf16> to vector<256x128xbf16>
    %c0_34 = arith.constant 0 : index
    %c384 = arith.constant 384 : index
    %17 = vector.load %arg11[%c0_34, %c384] : memref<256x1152xbf16, #tpu.memory_space<vmem>>, vector<256x128xbf16>
    tpu.vector_store %arg11[%c0_34, %c384], %16 {strides = array<i32>} : memref<256x1152xbf16, #tpu.memory_space<vmem>>, vector<256x128xbf16>,
    %c0_35 = arith.constant 0 : index
    %c1_36 = arith.constant 1 : index
    %c1_37 = arith.constant 1 : index
    %c0_38 = arith.constant 0 : index
    %18 = vector.load %arg9[%c0_35, %c1_36, %c1_37, %c0_38] : memref<1x18x18x128xbf16, #tpu.memory_space<vmem>>, vector<1x16x16x128xbf16>
    %19 = vector.shape_cast %18 : vector<1x16x16x128xbf16> to vector<256x128xbf16>
    %c0_39 = arith.constant 0 : index
    %c512 = arith.constant 512 : index
    %20 = vector.load %arg11[%c0_39, %c512] : memref<256x1152xbf16, #tpu.memory_space<vmem>>, vector<256x128xbf16>
    tpu.vector_store %arg11[%c0_39, %c512], %19 {strides = array<i32>} : memref<256x1152xbf16, #tpu.memory_space<vmem>>, vector<256x128xbf16>,
    %c0_40 = arith.constant 0 : index
    %c1_41 = arith.constant 1 : index
    %c2_42 = arith.constant 2 : index
    %c0_43 = arith.constant 0 : index
    %21 = vector.load %arg9[%c0_40, %c1_41, %c2_42, %c0_43] : memref<1x18x18x128xbf16, #tpu.memory_space<vmem>>, vector<1x16x16x128xbf16>
    %22 = vector.shape_cast %21 : vector<1x16x16x128xbf16> to vector<256x128xbf16>
    %c0_44 = arith.constant 0 : index
    %c640 = arith.constant 640 : index
    %23 = vector.load %arg11[%c0_44, %c640] : memref<256x1152xbf16, #tpu.memory_space<vmem>>, vector<256x128xbf16>
    tpu.vector_store %arg11[%c0_44, %c640], %22 {strides = array<i32>} : memref<256x1152xbf16, #tpu.memory_space<vmem>>, vector<256x128xbf16>,
    %c0_45 = arith.constant 0 : index
    %c2_46 = arith.constant 2 : index
    %c0_47 = arith.constant 0 : index
    %c0_48 = arith.constant 0 : index
    %24 = vector.load %arg9[%c0_45, %c2_46, %c0_47, %c0_48] : memref<1x18x18x128xbf16, #tpu.memory_space<vmem>>, vector<1x16x16x128xbf16>
    %25 = vector.shape_cast %24 : vector<1x16x16x128xbf16> to vector<256x128xbf16>
    %c0_49 = arith.constant 0 : index
    %c768 = arith.constant 768 : index
    %26 = vector.load %arg11[%c0_49, %c768] : memref<256x1152xbf16, #tpu.memory_space<vmem>>, vector<256x128xbf16>
    tpu.vector_store %arg11[%c0_49, %c768], %25 {strides = array<i32>} : memref<256x1152xbf16, #tpu.memory_space<vmem>>, vector<256x128xbf16>,
    %c0_50 = arith.constant 0 : index
    %c2_51 = arith.constant 2 : index
    %c1_52 = arith.constant 1 : index
    %c0_53 = arith.constant 0 : index
    %27 = vector.load %arg9[%c0_50, %c2_51, %c1_52, %c0_53] : memref<1x18x18x128xbf16, #tpu.memory_space<vmem>>, vector<1x16x16x128xbf16>
    %28 = vector.shape_cast %27 : vector<1x16x16x128xbf16> to vector<256x128xbf16>
    %c0_54 = arith.constant 0 : index
    %c896 = arith.constant 896 : index
    %29 = vector.load %arg11[%c0_54, %c896] : memref<256x1152xbf16, #tpu.memory_space<vmem>>, vector<256x128xbf16>
    tpu.vector_store %arg11[%c0_54, %c896], %28 {strides = array<i32>} : memref<256x1152xbf16, #tpu.memory_space<vmem>>, vector<256x128xbf16>,
    %c0_55 = arith.constant 0 : index
    %c2_56 = arith.constant 2 : index
    %c2_57 = arith.constant 2 : index
    %c0_58 = arith.constant 0 : index
    %30 = vector.load %arg9[%c0_55, %c2_56, %c2_57, %c0_58] : memref<1x18x18x128xbf16, #tpu.memory_space<vmem>>, vector<1x16x16x128xbf16>
    %31 = vector.shape_cast %30 : vector<1x16x16x128xbf16> to vector<256x128xbf16>
    %c0_59 = arith.constant 0 : index
    %c1024 = arith.constant 1024 : index
    %32 = vector.load %arg11[%c0_59, %c1024] : memref<256x1152xbf16, #tpu.memory_space<vmem>>, vector<256x128xbf16>
    tpu.vector_store %arg11[%c0_59, %c1024], %31 {strides = array<i32>} : memref<256x1152xbf16, #tpu.memory_space<vmem>>, vector<256x128xbf16>,
    %c0_60 = arith.constant 0 : index
    %c0_61 = arith.constant 0 : index
    %33 = vector.load %arg11[%c0_60, %c0_61] : memref<256x1152xbf16, #tpu.memory_space<vmem>>, vector<256x1152xbf16>
    %c0_62 = arith.constant 0 : index
    %c0_63 = arith.constant 0 : index
    %34 = vector.load %arg2[%c0_62, %c0_63] : memref<1152x128xbf16, #tpu.memory_space<vmem>>, vector<1152x128xbf16>
    %cst_64 = arith.constant dense<0.000000e+00> : vector<256x128xf32>
    %35 = tpu.matmul %33, %34, %cst_64 {dimension_numbers = #tpu.dot_dimension_numbers<[1], [0], [0], [1], [0, 0, 1, 1], [], []>} : vector<256x1152xbf16>, vector<1152x128xbf16>, vector<256x128xf32> -> vector<256x128xf32>
    %c0_65 = arith.constant 0 : index
    %c0_66 = arith.constant 0 : index
    %36 = vector.load %arg3[%c0_65, %c0_66] : memref<1x128xf32, #tpu.memory_space<vmem>>, vector<1x128xf32>
    %37 = vector.broadcast %36 : vector<1x128xf32> to vector<256x128xf32>
    %38 = arith.addf %35, %37 : vector<256x128xf32>
    %cst_67 = arith.constant 0.000000e+00 : f32
    %39 = vector.broadcast %cst_67 : f32 to vector<256x128xf32>
    %40 = arith.maximumf %38, %39 : vector<256x128xf32>
    %41 = arith.truncf %40 : vector<256x128xf32> to vector<256x128xbf16>
    %42 = vector.shape_cast %41 : vector<256x128xbf16> to vector<1x16x16x128xbf16>
    %c0_68 = arith.constant 0 : index
    %c1_69 = arith.constant 1 : index
    %c1_70 = arith.constant 1 : index
    %c0_71 = arith.constant 0 : index
    %43 = vector.load %arg10[%c0_68, %c1_69, %c1_70, %c0_71] : memref<1x18x18x128xbf16, #tpu.memory_space<vmem>>, vector<1x16x16x128xbf16>
    tpu.vector_store %arg10[%c0_68, %c1_69, %c1_70, %c0_71], %42 {strides = array<i32>} : memref<1x18x18x128xbf16, #tpu.memory_space<vmem>>, vector<1x16x16x128xbf16>,
    %c0_72 = arith.constant 0 : index
    %c0_73 = arith.constant 0 : index
    %c0_74 = arith.constant 0 : index
    %c0_75 = arith.constant 0 : index
    %44 = vector.load %arg10[%c0_72, %c0_73, %c0_74, %c0_75] : memref<1x18x18x128xbf16, #tpu.memory_space<vmem>>, vector<1x16x16x128xbf16>
    %45 = vector.shape_cast %44 : vector<1x16x16x128xbf16> to vector<256x128xbf16>
    %c0_76 = arith.constant 0 : index
    %c0_77 = arith.constant 0 : index
    %46 = vector.load %arg11[%c0_76, %c0_77] : memref<256x1152xbf16, #tpu.memory_space<vmem>>, vector<256x128xbf16>
    tpu.vector_store %arg11[%c0_76, %c0_77], %45 {strides = array<i32>} : memref<256x1152xbf16, #tpu.memory_space<vmem>>, vector<256x128xbf16>,
    %c0_78 = arith.constant 0 : index
    %c0_79 = arith.constant 0 : index
    %c1_80 = arith.constant 1 : index
    %c0_81 = arith.constant 0 : index
    %47 = vector.load %arg10[%c0_78, %c0_79, %c1_80, %c0_81] : memref<1x18x18x128xbf16, #tpu.memory_space<vmem>>, vector<1x16x16x128xbf16>
    %48 = vector.shape_cast %47 : vector<1x16x16x128xbf16> to vector<256x128xbf16>
    %c0_82 = arith.constant 0 : index
    %c128_83 = arith.constant 128 : index
    %49 = vector.load %arg11[%c0_82, %c128_83] : memref<256x1152xbf16, #tpu.memory_space<vmem>>, vector<256x128xbf16>
    tpu.vector_store %arg11[%c0_82, %c128_83], %48 {strides = array<i32>} : memref<256x1152xbf16, #tpu.memory_space<vmem>>, vector<256x128xbf16>,
    %c0_84 = arith.constant 0 : index
    %c0_85 = arith.constant 0 : index
    %c2_86 = arith.constant 2 : index
    %c0_87 = arith.constant 0 : index
    %50 = vector.load %arg10[%c0_84, %c0_85, %c2_86, %c0_87] : memref<1x18x18x128xbf16, #tpu.memory_space<vmem>>, vector<1x16x16x128xbf16>
    %51 = vector.shape_cast %50 : vector<1x16x16x128xbf16> to vector<256x128xbf16>
    %c0_88 = arith.constant 0 : index
    %c256_89 = arith.constant 256 : index
    %52 = vector.load %arg11[%c0_88, %c256_89] : memref<256x1152xbf16, #tpu.memory_space<vmem>>, vector<256x128xbf16>
    tpu.vector_store %arg11[%c0_88, %c256_89], %51 {strides = array<i32>} : memref<256x1152xbf16, #tpu.memory_space<vmem>>, vector<256x128xbf16>,
    %c0_90 = arith.constant 0 : index
    %c1_91 = arith.constant 1 : index
    %c0_92 = arith.constant 0 : index
    %c0_93 = arith.constant 0 : index
    %53 = vector.load %arg10[%c0_90, %c1_91, %c0_92, %c0_93] : memref<1x18x18x128xbf16, #tpu.memory_space<vmem>>, vector<1x16x16x128xbf16>
    %54 = vector.shape_cast %53 : vector<1x16x16x128xbf16> to vector<256x128xbf16>
    %c0_94 = arith.constant 0 : index
    %c384_95 = arith.constant 384 : index
    %55 = vector.load %arg11[%c0_94, %c384_95] : memref<256x1152xbf16, #tpu.memory_space<vmem>>, vector<256x128xbf16>
    tpu.vector_store %arg11[%c0_94, %c384_95], %54 {strides = array<i32>} : memref<256x1152xbf16, #tpu.memory_space<vmem>>, vector<256x128xbf16>,
    %c0_96 = arith.constant 0 : index
    %c1_97 = arith.constant 1 : index
    %c1_98 = arith.constant 1 : index
    %c0_99 = arith.constant 0 : index
    %56 = vector.load %arg10[%c0_96, %c1_97, %c1_98, %c0_99] : memref<1x18x18x128xbf16, #tpu.memory_space<vmem>>, vector<1x16x16x128xbf16>
    %57 = vector.shape_cast %56 : vector<1x16x16x128xbf16> to vector<256x128xbf16>
    %c0_100 = arith.constant 0 : index
    %c512_101 = arith.constant 512 : index
    %58 = vector.load %arg11[%c0_100, %c512_101] : memref<256x1152xbf16, #tpu.memory_space<vmem>>, vector<256x128xbf16>
    tpu.vector_store %arg11[%c0_100, %c512_101], %57 {strides = array<i32>} : memref<256x1152xbf16, #tpu.memory_space<vmem>>, vector<256x128xbf16>,
    %c0_102 = arith.constant 0 : index
    %c1_103 = arith.constant 1 : index
    %c2_104 = arith.constant 2 : index
    %c0_105 = arith.constant 0 : index
    %59 = vector.load %arg10[%c0_102, %c1_103, %c2_104, %c0_105] : memref<1x18x18x128xbf16, #tpu.memory_space<vmem>>, vector<1x16x16x128xbf16>
    %60 = vector.shape_cast %59 : vector<1x16x16x128xbf16> to vector<256x128xbf16>
    %c0_106 = arith.constant 0 : index
    %c640_107 = arith.constant 640 : index
    %61 = vector.load %arg11[%c0_106, %c640_107] : memref<256x1152xbf16, #tpu.memory_space<vmem>>, vector<256x128xbf16>
    tpu.vector_store %arg11[%c0_106, %c640_107], %60 {strides = array<i32>} : memref<256x1152xbf16, #tpu.memory_space<vmem>>, vector<256x128xbf16>,
    %c0_108 = arith.constant 0 : index
    %c2_109 = arith.constant 2 : index
    %c0_110 = arith.constant 0 : index
    %c0_111 = arith.constant 0 : index
    %62 = vector.load %arg10[%c0_108, %c2_109, %c0_110, %c0_111] : memref<1x18x18x128xbf16, #tpu.memory_space<vmem>>, vector<1x16x16x128xbf16>
    %63 = vector.shape_cast %62 : vector<1x16x16x128xbf16> to vector<256x128xbf16>
    %c0_112 = arith.constant 0 : index
    %c768_113 = arith.constant 768 : index
    %64 = vector.load %arg11[%c0_112, %c768_113] : memref<256x1152xbf16, #tpu.memory_space<vmem>>, vector<256x128xbf16>
    tpu.vector_store %arg11[%c0_112, %c768_113], %63 {strides = array<i32>} : memref<256x1152xbf16, #tpu.memory_space<vmem>>, vector<256x128xbf16>,
    %c0_114 = arith.constant 0 : index
    %c2_115 = arith.constant 2 : index
    %c1_116 = arith.constant 1 : index
    %c0_117 = arith.constant 0 : index
    %65 = vector.load %arg10[%c0_114, %c2_115, %c1_116, %c0_117] : memref<1x18x18x128xbf16, #tpu.memory_space<vmem>>, vector<1x16x16x128xbf16>
    %66 = vector.shape_cast %65 : vector<1x16x16x128xbf16> to vector<256x128xbf16>
    %c0_118 = arith.constant 0 : index
    %c896_119 = arith.constant 896 : index
    %67 = vector.load %arg11[%c0_118, %c896_119] : memref<256x1152xbf16, #tpu.memory_space<vmem>>, vector<256x128xbf16>
    tpu.vector_store %arg11[%c0_118, %c896_119], %66 {strides = array<i32>} : memref<256x1152xbf16, #tpu.memory_space<vmem>>, vector<256x128xbf16>,
    %c0_120 = arith.constant 0 : index
    %c2_121 = arith.constant 2 : index
    %c2_122 = arith.constant 2 : index
    %c0_123 = arith.constant 0 : index
    %68 = vector.load %arg10[%c0_120, %c2_121, %c2_122, %c0_123] : memref<1x18x18x128xbf16, #tpu.memory_space<vmem>>, vector<1x16x16x128xbf16>
    %69 = vector.shape_cast %68 : vector<1x16x16x128xbf16> to vector<256x128xbf16>
    %c0_124 = arith.constant 0 : index
    %c1024_125 = arith.constant 1024 : index
    %70 = vector.load %arg11[%c0_124, %c1024_125] : memref<256x1152xbf16, #tpu.memory_space<vmem>>, vector<256x128xbf16>
    tpu.vector_store %arg11[%c0_124, %c1024_125], %69 {strides = array<i32>} : memref<256x1152xbf16, #tpu.memory_space<vmem>>, vector<256x128xbf16>,
    %c0_126 = arith.constant 0 : index
    %c0_127 = arith.constant 0 : index
    %71 = vector.load %arg11[%c0_126, %c0_127] : memref<256x1152xbf16, #tpu.memory_space<vmem>>, vector<256x1152xbf16>
    %c0_128 = arith.constant 0 : index
    %c0_129 = arith.constant 0 : index
    %72 = vector.load %arg4[%c0_128, %c0_129] : memref<1152x128xbf16, #tpu.memory_space<vmem>>, vector<1152x128xbf16>
    %cst_130 = arith.constant dense<0.000000e+00> : vector<256x128xf32>
    %73 = tpu.matmul %71, %72, %cst_130 {dimension_numbers = #tpu.dot_dimension_numbers<[1], [0], [0], [1], [0, 0, 1, 1], [], []>} : vector<256x1152xbf16>, vector<1152x128xbf16>, vector<256x128xf32> -> vector<256x128xf32>
    %c0_131 = arith.constant 0 : index
    %c0_132 = arith.constant 0 : index
    %74 = vector.load %arg5[%c0_131, %c0_132] : memref<1x128xf32, #tpu.memory_space<vmem>>, vector<1x128xf32>
    %75 = vector.broadcast %74 : vector<1x128xf32> to vector<256x128xf32>
    %76 = arith.addf %73, %75 : vector<256x128xf32>
    %cst_133 = arith.constant 0.000000e+00 : f32
    %77 = vector.broadcast %cst_133 : f32 to vector<256x128xf32>
    %78 = arith.maximumf %76, %77 : vector<256x128xf32>
    %79 = vector.shape_cast %78 : vector<256x128xf32> to vector<1x256x128xf32>
    %cst_134 = arith.constant dense<0.000000e+00> : vector<1x128xf32>
    %80 = vector.multi_reduction <add>, %79, %cst_134 [1] : vector<1x256x128xf32> to vector<1x128xf32>
    %c0_135 = arith.constant 0 : index
    %c0_136 = arith.constant 0 : index
    %81 = vector.load %arg6[%c0_135, %c0_136] : memref<128x128xf32, #tpu.memory_space<vmem>>, vector<128x128xf32>
    %cst_137 = arith.constant dense<0.000000e+00> : vector<1x128xf32>
    %82 = tpu.matmul %80, %81, %cst_137 {dimension_numbers = #tpu.dot_dimension_numbers<[1], [0], [0], [1], [0, 0, 1, 1], [], []>} : vector<1x128xf32>, vector<128x128xf32>, vector<1x128xf32> -> vector<1x128xf32>
    %c0_138 = arith.constant 0 : index
    %c0_139 = arith.constant 0 : index
    %83 = vector.load %arg7[%c0_138, %c0_139] : memref<1x128xf32, #tpu.memory_space<vmem>>, vector<1x128xf32>
    %84 = arith.addf %82, %83 : vector<1x128xf32>
    %85 = vector.shape_cast %84 : vector<1x128xf32> to vector<1x1x128xf32>
    %c0_140 = arith.constant 0 : index
    %c0_141 = arith.constant 0 : index
    %c0_142 = arith.constant 0 : index
    %86 = vector.load %arg8[%c0_140, %c0_141, %c0_142] : memref<1x1x128xf32, #tpu.memory_space<vmem>>, vector<1x1x128xf32>
    tpu.vector_store %arg8[%c0_140, %c0_141, %c0_142], %85 {strides = array<i32>} : memref<1x1x128xf32, #tpu.memory_space<vmem>>, vector<1x1x128xf32>,
    return
  }
  func.func @transform_0(%arg0: i32) -> (i32, i32, i32, i32) {
    %c0_i32 = arith.constant 0 : i32
    %c0_i32_0 = arith.constant 0 : i32
    %c0_i32_1 = arith.constant 0 : i32
    %c0_i32_2 = arith.constant 0 : i32
    return %arg0, %c0_i32, %c0_i32_0, %c0_i32_1 : i32, i32, i32, i32
  }
  func.func @transform_1(%arg0: i32) -> (i32, i32) {
    %c0_i32 = arith.constant 0 : i32
    %c0_i32_0 = arith.constant 0 : i32
    %c0_i32_1 = arith.constant 0 : i32
    return %c0_i32, %c0_i32_0 : i32, i32
  }
  func.func @transform_2(%arg0: i32) -> (i32, i32) {
    %c0_i32 = arith.constant 0 : i32
    %c0_i32_0 = arith.constant 0 : i32
    %c0_i32_1 = arith.constant 0 : i32
    return %c0_i32, %c0_i32_0 : i32, i32
  }
  func.func @transform_3(%arg0: i32) -> (i32, i32) {
    %c0_i32 = arith.constant 0 : i32
    %c0_i32_0 = arith.constant 0 : i32
    %c0_i32_1 = arith.constant 0 : i32
    return %c0_i32, %c0_i32_0 : i32, i32
  }
  func.func @transform_4(%arg0: i32) -> (i32, i32) {
    %c0_i32 = arith.constant 0 : i32
    %c0_i32_0 = arith.constant 0 : i32
    %c0_i32_1 = arith.constant 0 : i32
    return %c0_i32, %c0_i32_0 : i32, i32
  }
  func.func @transform_5(%arg0: i32) -> (i32, i32) {
    %c0_i32 = arith.constant 0 : i32
    %c0_i32_0 = arith.constant 0 : i32
    %c0_i32_1 = arith.constant 0 : i32
    return %c0_i32, %c0_i32_0 : i32, i32
  }
  func.func @transform_6(%arg0: i32) -> (i32, i32) {
    %c0_i32 = arith.constant 0 : i32
    %c0_i32_0 = arith.constant 0 : i32
    %c0_i32_1 = arith.constant 0 : i32
    return %c0_i32, %c0_i32_0 : i32, i32
  }
  func.func @transform_7(%arg0: i32) -> (i32, i32, i32) {
    %c0_i32 = arith.constant 0 : i32
    %c0_i32_0 = arith.constant 0 : i32
    %c0_i32_1 = arith.constant 0 : i32
    return %arg0, %c0_i32, %c0_i32_0 : i32, i32, i32
  }
}

</mosaic_0001>

<bundles_post_ra>
// kernel: timm_forward.1
= control target key start
LH: loop header
LB: loop body
LE: loop exit
PB: predicated region body
PF: predicated region fallthrough
CT: control target
= control target key end

     0   :  { %12 = vsyncpa [#allocation6], 0  ;;  %s15804_s0 = inlined_call_operand.vmem [shape: bf16[2,16,16,4], index: 0, kind: input, shape index: {}]   ;;  %s15805_s1 = inlined_call_operand.vmem [shape: bf16[1152,128], index: 1, kind: input, shape index: {}]   ;;  %s15806_s2 = inlined_call_operand.vmem [shape: f32[1,128], index: 2, kind: input, shape index: {}]   ;;  %s15807_s3 = inlined_call_operand.hbm [shape: bf16[1152,128], index: 3, kind: input, shape index: {}]   ;;  %s15808_s4 = inlined_call_operand.vmem [shape: f32[1,128], index: 4, kind: input, shape index: {}]   ;;  %s15809_s5 = inlined_call_operand.vmem [shape: f32[128,128], index: 5, kind: input, shape index: {}]   ;;  %s15810_s6 = inlined_call_operand.vmem [shape: f32[1,128], index: 6, kind: input, shape index: {}]   ;;  %s15811_s7 = inlined_call_operand.hbm [shape: f32[2,1,128], index: 7, kind: output, shape index: {}]  }
   0x1   :  { %13 = vsyncpa [#allocation7], 0 }
   0x2   :  { %15 = vsyncpa [#allocation7 + $0x1], 0  ;;  %s12576_s24 = smov 0   ;;  %s12578_s25 = smov 0  }
   0x3   :  { %s12580_s26 = smov 0   ;;  %s12582_s27 = smov 0  }
   0x4 LB: > { %s12597_s28 = sadd.s32 4294967295, %s12526_s27   ;;  %s10412_s29 = sadd.s32 4294967294, %s12526_s27   ;;  %s12526_s27 = sphi %s12582_s27, %s15976_s27   ;;  %s12522_s26 = sphi %s12580_s26, %s15975_s26   ;;  %s12518_s25 = sphi %s12578_s25, %s15974_s25   ;;  %s12514_s24 = sphi %s12576_s24, %s15973_s24  }
   0x5   : > { %s12601_s30 = sadd.s32 1, %s12526_s27   ;;  %s180_s8 = sadd.s32 1, %s12522_s26 }
   0x6   : > { %s177_s9 = ssub.s32 %s12526_s27, %s12601_s30  ;;  %p190_p0 = scmp.ne.s32.totalorder %s12522_s26, %s12518_s25 }
   0x7   : > { %p178_p1 = scmp.eq.s32.totalorder %s177_s9, 0  ;;  %p191_p2 = scmp.eq.s32.totalorder %s12597_s28, 1 }
   0x8   : > { %p196_p3 = scmp.ne.s32.totalorder %s12518_s25, %s12514_s24  ;;  %p197_p4 = scmp.eq.s32.totalorder %s10412_s29, 1 }
   0x9   : > { %s12612_s10 = scalar_select %p178_p1, %s12522_s26, %s180_s8  }
   0xa   : > { %p12614_p5 = por %p191_p2, %p190_p0  ;;  %p12618_p6 = por %p197_p4, %p196_p3 }
   0xb   : > { %p10413_p7 = scmp.ge.s32.totalorder %s12526_s27, 1  ;;  %p204_p8 = scmp.lt.s32.totalorder %s12526_s27, 3 }
   0xc   : > { %s15819_s11 = scalar_select %p12614_p5, 1, 0 }
   0xd   : > { %s15820_s12 = scalar_select %p12618_p6, 1, 0 }
   0xe   : > { %p15812_p9 = scmp.eq.s32.totalorder %s12597_s28, 0  ;;  %p12625_p10 = pnand %p10413_p7, %p204_p8 }
   0xf   : > { %s12528_s14 = smov [#allocation5]   ;;  %s12432_s19 = scalar_lea.hbm %s15807_s3, 9216 }
  0x10   : > { %s15821_s13 = scalar_select %p12625_p10, 1, 0 }
  0x11   : > { %s222_s15 = sshll.u32 %s12528_s14, 4  ;;  %p12140_p11 = pneg %p12625_p10  ;;  %s223_s15 = int_to_ptr.vmem [resolvable:$true] %s222_s15 }
  0x12   : > { %p12433_p13 = scmp.ne.s32.totalorder %s15807_s3, %s12432_s19  ;;  %p12439_p3 = scmp.lt.u32.totalorder %s12432_s19, %s15807_s3 }
  0x13   : > { %p12633_p12 = pnand %p15812_p9, %p12140_p11 }
  0x15   : > { %p12434_p0 = pneg %p12633_p12 }
  0x17   : > { %p12435_p1 = pnand %p12434_p0, %p12433_p13 }
  0x19   : > { %p12436_p2 = pneg %p12435_p1 }
  0x1b   : > { %p12441_p4 = pnand %p12439_p3, %p12436_p2 }
  0x1d   : > { %12444 = shalt.err (!%p12441_p4)
}
  0x1e   : > { %s12445_s29 = scalar_lea.vmem %s223_s15, 9216  ;;  %p12453_p9 = scmp.lt.s32.totalorder %s223_s15, %s223_s15 }
  0x1f   : > { %p12446_p7 = scmp.ne.s32.totalorder %s223_s15, %s12445_s29  ;;  %p12454_p6 = scmp.lt.s32.totalorder %s12445_s29, %s12445_s29 }
  0x21   : > { %p12448_p8 = pnand %p12446_p7, %p12434_p0  ;;  %p12455_p5 = por %p12454_p6, %p12453_p9 }
  0x23   : > { %p12449_p11 = pneg %p12448_p8 }
  0x25   : > { %p12456_p10 = pnand %p12455_p5, %p12449_p11 }
  0x27   : > { %12459 = shalt.err (!%p12456_p10)
}
  0x28   : > { %s12529_s8 = smov 64   ;;  %s12530_s9 = smov 4  }
  0x29   : > { %12143 = dma.hbm_to_vmem [thread:$0]  (!%p12633_p12), %s15807_s3, 9216, %s223_s15, [#allocation6], %s12529_s8, %s12529_s8, %s12530_s9  }
  0x2a   : > { %p15823_p13 = scmp.ne.s32.totalorder %s15821_s13, 0 }
  0x2c   : > { %255 = sbr.rel (%p15823_p13) target bundleno = 1539 (0x603), region = 48 }
  0x33   : > { %p15824_p1 = scmp.eq.s32.totalorder %s12597_s28, 0 }
  0x35   : > { %12505 = dma.done.wait (%p15824_p1), [#allocation6], 9216   ;;  %p15825_p0 = pmov %p15824_p1 }
  0x36   : > { %v12531_v0 = vmov 0   ;;  %v12190_v1 = vld [vmem:[%s15805_s1 + $0x40] sm:$0xff]   ;;  %v12194_v5 = vld [vmem:[%s15805_s1 + $0x48] sm:$0xff]   ;;  %v12198_v9 = vld [vmem:[%s15805_s1 + $0x50] sm:$0xff]   ;;  %p286_p5 = scmp.lt.s32.totalorder %s12597_s28, 1  ;;  %vm756_vm5 = vcmask 27648  }
  0x37   : > { %12507 = vsyncadd (%p15825_p0), [#allocation6], 4294958080  ;;  %292 = vst [vmem:[#allocation2] sm:$0xf] %v12531_v0  ;;  %v12191_v2 = vld [vmem:[%s15805_s1] sm:$0xff]   ;;  %11018 = vmatprep.subr.bf16.mxu0 %v12190_v1  ;;  %v12195_v6 = vld [vmem:[%s15805_s1 + $0x8] sm:$0xff]  }
  0x38   : > { %293 = vst [vmem:[#allocation2 + $0x4] sm:$0xf] %v12531_v0  ;;  %294 = vst [vmem:[#allocation2 + $0x8] sm:$0x1] %v12531_v0  ;;  %v12192_v3 = vld [vmem:[%s15805_s1 + $0xc0] sm:$0xff]   ;;  %11019 = vmatpush3.bf16.msra.mxu0 %v12191_v2  ;;  %v12196_v7 = vld [vmem:[%s15805_s1 + $0xc8] sm:$0xff]  }
  0x39   : > { %295 = vst [vmem:[#allocation2 + $0xc] sm:$0xf] %v12531_v0  ;;  %296 = vst [vmem:[#allocation2 + $0x10] sm:$0xf] %v12531_v0  ;;  %v12193_v4 = vld [vmem:[%s15805_s1 + $0x80] sm:$0xff]   ;;  %11130 = vmatprep.subr.bf16.mxu1 %v12192_v3  ;;  %11020 = vmatprep.subr.bf16.mxu0 %v12194_v5  ;;  %v12197_v8 = vld [vmem:[%s15805_s1 + $0x88] sm:$0xff]  }
  0x3a   : > { %297 = vst [vmem:[#allocation2 + $0x14] sm:$0x1] %v12531_v0  ;;  %298 = vst [vmem:[#allocation2 + $0x18] sm:$0xf] %v12531_v0  ;;  %11131 = vmatpush3.bf16.msra.mxu1 %v12193_v4  ;;  %v12199_v10 = vld [vmem:[%s15805_s1 + $0x10] sm:$0xff]   ;;  %v12202_v13 = vld [vmem:[%s15805_s1 + $0x58] sm:$0xff]  }
  0x3b   : > { %299 = vst [vmem:[#allocation2 + $0x1c] sm:$0xf] %v12531_v0  ;;  %300 = vst [vmem:[#allocation2 + $0x20] sm:$0x1] %v12531_v0  ;;  %11132 = vmatprep.subr.bf16.mxu1 %v12196_v7  ;;  %v12200_v11 = vld [vmem:[%s15805_s1 + $0xd0] sm:$0xff]   ;;  %v12203_v14 = vld [vmem:[%s15805_s1 + $0x18] sm:$0xff]  }
  0x3c   : > { %301 = vst [vmem:[#allocation2 + $0x24] sm:$0xf] %v12531_v0  ;;  %302 = vst [vmem:[#allocation2 + $0x28] sm:$0xf] %v12531_v0  ;;  %11021 = vmatpush3.bf16.msra.mxu0 %v12195_v6  ;;  %v12201_v12 = vld [vmem:[%s15805_s1 + $0x90] sm:$0xff]   ;;  %v12204_v15 = vld [vmem:[%s15805_s1 + $0xd8] sm:$0xff]  }
  0x3d   : > { %303 = vst [vmem:[#allocation2 + $0x2c] sm:$0x1] %v12531_v0  ;;  %304 = vst [vmem:[#allocation2 + $0x30] sm:$0xf] %v12531_v0  ;;  %11022 = vmatprep.subr.bf16.mxu0 %v12198_v9  ;;  %v12205_v16 = vld [vmem:[%s15805_s1 + $0x98] sm:$0xff]   ;;  %v12206_v17 = vld [vmem:[%s15805_s1 + $0x60] sm:$0xff]  }
  0x3e   : > { %305 = vst [vmem:[#allocation2 + $0x34] sm:$0xf] %v12531_v0  ;;  %306 = vst [vmem:[#allocation2 + $0x38] sm:$0x1] %v12531_v0  ;;  %11133 = vmatpush3.bf16.msra.mxu1 %v12197_v8  ;;  %v12207_v18 = vld [vmem:[%s15805_s1 + $0x20] sm:$0xff]   ;;  %v12210_v21 = vld [vmem:[%s15805_s1 + $0x68] sm:$0xff]  }
  0x3f   : > { %307 = vst [vmem:[#allocation2 + $0x3c] sm:$0xf] %v12531_v0  ;;  %308 = vst [vmem:[#allocation2 + $0x40] sm:$0xf] %v12531_v0  ;;  %11134 = vmatprep.subr.bf16.mxu1 %v12200_v11  ;;  %v12208_v19 = vld [vmem:[%s15805_s1 + $0xe0] sm:$0xff]   ;;  %v12211_v22 = vld [vmem:[%s15805_s1 + $0x28] sm:$0xff]  }
  0x40   : > { %309 = vst [vmem:[#allocation2 + $0x44] sm:$0x1] %v12531_v0  ;;  %310 = vst [vmem:[#allocation2 + $0x48] sm:$0xf] %v12531_v0  ;;  %11023 = vmatpush3.bf16.msra.mxu0 %v12199_v10  ;;  %v12209_v20 = vld [vmem:[%s15805_s1 + $0xa0] sm:$0xff]   ;;  %v12212_v23 = vld [vmem:[%s15805_s1 + $0xe8] sm:$0xff]  }
  0x41   : > { %311 = vst [vmem:[#allocation2 + $0x4c] sm:$0xf] %v12531_v0  ;;  %312 = vst [vmem:[#allocation2 + $0x50] sm:$0x1] %v12531_v0  ;;  %11024 = vmatprep.subr.bf16.mxu0 %v12202_v13  ;;  %v12213_v24 = vld [vmem:[%s15805_s1 + $0xa8] sm:$0xff]   ;;  %v12214_v25 = vld [vmem:[%s15805_s1 + $0x70] sm:$0xff]  }
  0x42   : > { %313 = vst [vmem:[#allocation2 + $0x54] sm:$0xf] %v12531_v0  ;;  %314 = vst [vmem:[#allocation2 + $0x58] sm:$0xf] %v12531_v0  ;;  %11135 = vmatpush3.bf16.msra.mxu1 %v12201_v12  ;;  %vm1066_vm0 = vsmask.f32 3328 }
  0x43   : > { %315 = vst [vmem:[#allocation2 + $0x5c] sm:$0x1] %v12531_v0  ;;  %316 = vst [vmem:[#allocation2 + $0x60] sm:$0xf] %v12531_v0  ;;  %11136 = vmatprep.subr.bf16.mxu1 %v12204_v15  ;;  %vm1067_vm1 = vsmask.f32 7440 }
  0x44   : > { %317 = vst [vmem:[#allocation2 + $0x64] sm:$0xf] %v12531_v0  ;;  %318 = vst [vmem:[#allocation2 + $0x68] sm:$0x1] %v12531_v0  ;;  %11025 = vmatpush3.bf16.msra.mxu0 %v12203_v14  ;;  %v12215_v26 = vld [vmem:[%s15805_s1 + $0x30] sm:$0xff]   ;;  %s287_s14 = scalar_select %p286_p5, %s12597_s28, 1 }
  0x45   : > { %319 = vst [vmem:[#allocation2 + $0x6c] sm:$0xf] %v12531_v0  ;;  %320 = vst [vmem:[#allocation2 + $0x70] sm:$0xf] %v12531_v0  ;;  %11026 = vmatprep.subr.bf16.mxu0 %v12206_v17  ;;  %v12216_v27 = vld [vmem:[%s15805_s1 + $0xf0] sm:$0xff]   ;;  %v12218_v29 = vld [vmem:[%s15805_s1 + $0x78] sm:$0xff]  }
  0x46   : > { %321 = vst [vmem:[#allocation2 + $0x74] sm:$0x1] %v12531_v0  ;;  %322 = vst [vmem:[#allocation2 + $0x78] sm:$0xf] %v12531_v0  ;;  %11137 = vmatpush3.bf16.msra.mxu1 %v12205_v16  ;;  %vm432_vm2 = vsmask.f32 256 }
  0x47   : > { %323 = vst [vmem:[#allocation2 + $0x7c] sm:$0xf] %v12531_v0  ;;  %324 = vst [vmem:[#allocation2 + $0x80] sm:$0x1] %v12531_v0  ;;  %11138 = vmatprep.subr.bf16.mxu1 %v12208_v19  ;;  %vm433_vm3 = vsmask.f32 4368 }
  0x48   : > { %325 = vst [vmem:[#allocation2 + $0x84] sm:$0xf] %v12531_v0  ;;  %326 = vst [vmem:[#allocation2 + $0x88] sm:$0xf] %v12531_v0  ;;  %11027 = vmatpush3.bf16.msra.mxu0 %v12207_v18  ;;  %v12217_v28 = vld [vmem:[%s15805_s1 + $0xb0] sm:$0xff]   ;;  %v12219_v30 = vld [vmem:[%s15805_s1 + $0x38] sm:$0xff]  }
  0x49   : > { %327 = vst [vmem:[#allocation2 + $0x8c] sm:$0x1] %v12531_v0  ;;  %328 = vst [vmem:[#allocation2 + $0x90] sm:$0xf] %v12531_v0  ;;  %11028 = vmatprep.subr.bf16.mxu0 %v12210_v21  ;;  %vm757_vm4 = vsmask.f32 7938 }
  0x4a   : > { %329 = vst [vmem:[#allocation2 + $0x94] sm:$0xf] %v12531_v0  ;;  %330 = vst [vmem:[#allocation2 + $0x98] sm:$0x1] %v12531_v0  ;;  %11139 = vmatpush3.bf16.msra.mxu1 %v12209_v20  ;;  %v12220_v31 = vld [vmem:[%s15805_s1 + $0xf8] sm:$0xff]   ;;  %s10985_s22 = sshll.u32 %s287_s14, 7 }
  0x4b   : > { %331 = vst [vmem:[#allocation2 + $0x9c] sm:$0xf] %v12531_v0  ;;  %332 = vst [vmem:[#allocation2 + $0xa0] sm:$0xf] %v12531_v0  ;;  %11140 = vmatprep.subr.bf16.mxu1 %v12212_v23  ;;  %v1018_v32 = vld [vmem:[#allocation2] sm:$0xf]  ;;  %s12868_s17 = scalar_lea.vmem %s15804_s0, %s10985_s22 }
  0x4c   : > { %333 = vst [vmem:[#allocation2 + $0xa4] sm:$0x1] %v12531_v0  ;;  %334 = vst [vmem:[#allocation2 + $0xa8] sm:$0xf] %v12531_v0  ;;  %11029 = vmatpush3.bf16.msra.mxu0 %v12211_v22  ;;  %v1019_v33 = vld [vmem:[#allocation2 + $0x4] sm:$0xf] }
  0x4d   : > { %335 = vst [vmem:[#allocation2 + $0xac] sm:$0xf] %v12531_v0  ;;  %336 = vst [vmem:[#allocation2 + $0xb0] sm:$0x1] %v12531_v0  ;;  %11030 = vmatprep.subr.bf16.mxu0 %v12214_v25  ;;  %v1020_v34 = vld [vmem:[#allocation2 + $0x8] sm:$0x1] }
  0x4e   : > { %337 = vst [vmem:[#allocation2 + $0xb4] sm:$0xf] %v12531_v0  ;;  %338 = vst [vmem:[#allocation2 + $0xb8] sm:$0xf] %v12531_v0  ;;  %11141 = vmatpush3.bf16.msra.mxu1 %v12213_v24  ;;  %vm1629_vm6 = vcmask 1042432   ;;  %v1070_v35 = vshrl.u32 %v1018_v32, 16 }
  0x4f   : > { %339 = vst [vmem:[#allocation2 + $0xbc] sm:$0x1] %v12531_v0  ;;  %340 = vst [vmem:[#allocation2 + $0xc0] sm:$0xf] %v12531_v0  ;;  %11142 = vmatprep.subr.bf16.mxu1 %v12216_v27  ;;  %v1073_v36 = vshll.u32 %v1018_v32, 16  ;;  %v1079_v37 = vshll.u32 %v1019_v33, 16 }
  0x50   : > { %341 = vst [vmem:[#allocation2 + $0xc4] sm:$0xf] %v12531_v0  ;;  %342 = vst [vmem:[#allocation2 + $0xc8] sm:$0x1] %v12531_v0  ;;  %11031 = vmatpush3.bf16.msra.mxu0 %v12215_v26  ;;  %v1083_v38 = vshrl.u32 %v1019_v33, 16  ;;  %v1089_v39 = vshll.u32 %v1020_v34, 16 }
  0x51   : > { %343 = vst [vmem:[#allocation2 + $0xcc] sm:$0xf] %v12531_v0  ;;  %344 = vst [vmem:[#allocation2 + $0xd0] sm:$0xf] %v12531_v0  ;;  %11032 = vmatprep.subr.bf16.mxu0 %v12218_v29  ;;  %v12221_v40 = vld [vmem:[%s15805_s1 + $0xb8] sm:$0xff]   ;;  %v1072_v41 = vrot.slane %v1070_v35, 4 }
  0x52   : > { %345 = vst [vmem:[#allocation2 + $0xd4] sm:$0x1] %v12531_v0  ;;  %346 = vst [vmem:[#allocation3] sm:$0xf] %v12531_v0  ;;  %11143 = vmatpush3.bf16.msra.mxu1 %v12217_v28  ;;  %v1075_v42 = vrot.slane %v1073_v36, 5  ;;  %v1081_v43 = vrot.slane %v1079_v37, 5 }
  0x53   : > { %347 = vst [vmem:[#allocation3 + $0x4] sm:$0xf] %v12531_v0  ;;  %348 = vst [vmem:[#allocation3 + $0x8] sm:$0x1] %v12531_v0  ;;  %11144 = vmatprep.subr.bf16.mxu1 %v12220_v31  ;;  %v1085_v44 = vrot.slane %v1083_v38, 4  ;;  %v15826_v45 = vmov 0 }
  0x54   : > { %349 = vst [vmem:[#allocation3 + $0xc] sm:$0xf] %v12531_v0  ;;  %350 = vst [vmem:[#allocation3 + $0x10] sm:$0xf] %v12531_v0  ;;  %11033 = vmatpush3.bf16.msra.mxu0 %v12219_v30  ;;  %vm1630_vm8 = vcmask 1046532   ;;  %vm764_vm9 = vcmask 24576   ;;  %v1076_v46 = vor.u32 %v1075_v42, %v1072_v41 }
  0x55   : > { %351 = vst [vmem:[#allocation3 + $0x14] sm:$0x1] %v12531_v0  ;;  %352 = vst [vmem:[#allocation3 + $0x18] sm:$0xf] %v12531_v0  ;;  %v1086_v47 = vor.u32 %v1085_v44, %v1081_v43  ;;  %v1091_v48 = vrot.slane %v1089_v39, 5  ;;  %v12223_v49 = vld [vmem:[%s15805_s1 + $0x140] sm:$0xff]  }
  0x56   : > { %353 = vst [vmem:[#allocation3 + $0x1c] sm:$0xf] %v12531_v0  ;;  %354 = vst [vmem:[#allocation3 + $0x20] sm:$0x1] %v12531_v0  ;;  %11145 = vmatpush3.bf16.msra.mxu1 %v12221_v40  ;;  %v400_v50 = vld [vmem:[%s12868_s17] sm:$0xf]  ;;  %11242 = vmatprep.subr.bf16.mxu0 %v12223_v49 }
  0x57   : > { %355 = vst [vmem:[#allocation3 + $0x24] sm:$0xf] %v12531_v0  ;;  %356 = vst [vmem:[#allocation3 + $0x28] sm:$0xf] %v12531_v0  ;;  %v401_v51 = vld [vmem:[%s12868_s17 + $0x4] sm:$0xf] }
  0x58   : > { %357 = vst [vmem:[#allocation3 + $0x2c] sm:$0x1] %v12531_v0  ;;  %358 = vst [vmem:[#allocation3 + $0x30] sm:$0xf] %v12531_v0  ;;  %v15829_v52 = vmov 0  ;;  %v436_v53 = vshrl.u32 %v400_v50, 16 }
  0x59   : > { %359 = vst [vmem:[#allocation3 + $0x34] sm:$0xf] %v12531_v0  ;;  %360 = vst [vmem:[#allocation3 + $0x38] sm:$0x1] %v12531_v0  ;;  %v439_v54 = vshll.u32 %v400_v50, 16  ;;  %v444_v55 = vshrl.u32 %v401_v51, 16 }
  0x5a   : > { %361 = vst [vmem:[#allocation3 + $0x3c] sm:$0xf] %v12531_v0  ;;  %362 = vst [vmem:[#allocation3 + $0x40] sm:$0xf] %v12531_v0  ;;  %v447_v56 = vshll.u32 %v401_v51, 16  ;;  %v1077_v57 = vrot.slane %v1076_v46, 4 }
  0x5b   : > { %363 = vst [vmem:[#allocation3 + $0x44] sm:$0x1] %v12531_v0  ;;  %364 = vst [vmem:[#allocation3 + $0x48] sm:$0xf] %v12531_v0  ;;  %v1087_v58 = vrot.slane %v1086_v47, 4  ;;  %v12222_v59 = vld [vmem:[#allocation2] sm:$0xff]  }
  0x5c   : > { %365 = vst [vmem:[#allocation3 + $0x4c] sm:$0xf] %v12531_v0  ;;  %366 = vst [vmem:[#allocation3 + $0x50] sm:$0x1] %v12531_v0  ;;  %v438_v61 = vrot.slane %v436_v53, 7  ;;  %v446_v62 = vrot.slane %v444_v55, 7 }
  0x5d   : > { %367 = vst [vmem:[#allocation3 + $0x54] sm:$0xf] %v12531_v0  ;;  %368 = vst [vmem:[#allocation3 + $0x58] sm:$0xf] %v12531_v0  ;;  %v759_v63 = vld [vmem:[#allocation2 + $0xc] sm:$0xf] }
  0x5e   : > { %369 = vst [vmem:[#allocation3 + $0x5c] sm:$0x1] %v12531_v0  ;;  %370 = vst [vmem:[#allocation3 + $0x60] sm:$0xf] %v12531_v0  ;;  %v12225_v4 = vld [vmem:[%s15805_s1 + $0x100] sm:$0xff]   ;;  %v441_v9 = vor.u32 %v439_v54, %v438_v61  ;;  %v442_v10 = vrot.slane %v438_v61, 4  ;;  %v449_v11 = vor.u32 %v447_v56, %v446_v62 }
  0x5f   : > { %371 = vst [vmem:[#allocation3 + $0x64] sm:$0xf] %v12531_v0  ;;  %372 = vst [vmem:[#allocation3 + $0x68] sm:$0x1] %v12531_v0  ;;  %v1534_v5 = vld [vmem:[#allocation2 + $0x4] sm:$0xf] }
  0x60   : > { %373 = vst [vmem:[#allocation3 + $0x6c] sm:$0xf] %v12531_v0  ;;  %374 = vst [vmem:[#allocation3 + $0x70] sm:$0xf] %v12531_v0  ;;  %v1535_v6 = vld [vmem:[#allocation2 + $0x8] sm:$0x1] }
  0x61   : > { %375 = vst [vmem:[#allocation3 + $0x74] sm:$0x1] %v12531_v0  ;;  %376 = vst [vmem:[#allocation3 + $0x78] sm:$0xf] %v12531_v0  ;;  %v766_v12 = vld [vmem:[#allocation2 + $0x14] sm:$0x1] }
  0x62   : > { %377 = vst [vmem:[#allocation3 + $0x7c] sm:$0xf] %v12531_v0  ;;  %378 = vst [vmem:[#allocation3 + $0x80] sm:$0x1] %v12531_v0  ;;  %v402_v13 = vld [vmem:[%s12868_s17 + $0x8] sm:$0xf] }
  0x63   : > { %379 = vst [vmem:[#allocation3 + $0x84] sm:$0xf] %v12531_v0  ;;  %380 = vst [vmem:[#allocation3 + $0x88] sm:$0xf] %v12531_v0  ;;  %v12229_v14 = vld [vmem:[%s15805_s1 + $0x148] sm:$0xff]   ;;  %v451_v15 = vrot.slane %v446_v62, 4 }
  0x64   : > { %381 = vst [vmem:[#allocation3 + $0x8c] sm:$0x1] %v12531_v0  ;;  %382 = vst [vmem:[#allocation3 + $0x90] sm:$0xf] %v12531_v0  ;;  %v1634_v17 = vrot.slane %v1534_v5, 5  ;;  %v1637_v18 = vrot.slane %v1535_v6, 5 }
  0x65   : > { %383 = vst [vmem:[#allocation3 + $0x94] sm:$0xf] %v12531_v0  ;;  %384 = vst [vmem:[#allocation3 + $0x98] sm:$0x1] %v12531_v0  ;;  %v403_v19 = vld [vmem:[%s12868_s17 + $0xc] sm:$0xf] }
  0x66   : > { %385 = vst [vmem:[#allocation3 + $0x9c] sm:$0xf] %v12531_v0  ;;  %386 = vst [vmem:[#allocation3 + $0xa0] sm:$0xf] %v12531_v0  ;;  %v453_v20 = vshrl.u32 %v402_v13, 16  ;;  %v456_v23 = vshll.u32 %v402_v13, 16 }
  0x67   : > { %387 = vst [vmem:[#allocation3 + $0xa4] sm:$0x1] %v12531_v0  ;;  %388 = vst [vmem:[#allocation3 + $0xa8] sm:$0xf] %v12531_v0  ;;  %v461_v24 = vshrl.u32 %v403_v19, 16  ;;  %v12231_v26 = vld [vmem:[%s15805_s1 + $0x108] sm:$0xff]  }
  0x68   : > { %389 = vst [vmem:[#allocation3 + $0xac] sm:$0xf] %v12531_v0  ;;  %390 = vst [vmem:[#allocation3 + $0xb0] sm:$0x1] %v12531_v0  ;;  %v769_v25 = vld [vmem:[#allocation2 + $0x18] sm:$0xf] }
  0x69   : > { %391 = vst [vmem:[#allocation3 + $0xb4] sm:$0xf] %v12531_v0  ;;  %392 = vst [vmem:[#allocation3 + $0xb8] sm:$0xf] %v12531_v0  ;;  %v1636_v27 = vrot.slane %v1634_v17, 4  ;;  %v455_v29 = vrot.slane %v453_v20, 7 }
  0x6a   : > { %393 = vst [vmem:[#allocation3 + $0xbc] sm:$0x1] %v12531_v0  ;;  %394 = vst [vmem:[#allocation3 + $0xc0] sm:$0xf] %v12531_v0  ;;  %v12235_v30 = vld [vmem:[%s15805_s1 + $0x150] sm:$0xff]   ;;  %v463_v32 = vrot.slane %v461_v24, 7 }
  0x6b   : > { %395 = vst [vmem:[#allocation3 + $0xc4] sm:$0xf] %v12531_v0  ;;  %396 = vst [vmem:[#allocation3 + $0xc8] sm:$0x1] %v12531_v0  ;;  %v464_v33 = vshll.u32 %v403_v19, 16  ;;  %v458_v37 = vor.u32 %v456_v23, %v455_v29  ;;  %v459_v38 = vrot.slane %v455_v29, 4 }
  0x6c   : > { %397 = vst [vmem:[#allocation3 + $0xcc] sm:$0xf] %v12531_v0  ;;  %398 = vst [vmem:[#allocation3 + $0xd0] sm:$0xf] %v12531_v0  ;;  %v404_v34 = vld [vmem:[%s12868_s17 + $0x10] sm:$0xf] }
  0x6d   : > { %399 = vst [vmem:[#allocation3 + $0xd4] sm:$0x1] %v12531_v0  ;;  %vm12872_vm7 = vmor %vm1066_vm0, %vm1067_vm1  ;;  %v1533_v0 = vld [vmem:[#allocation2] sm:$0xe]  ;;  %v405_v35 = vld [vmem:[%s12868_s17 + $0x14] sm:$0xf]  ;;  %v466_v41 = vor.u32 %v464_v33, %v463_v32 }
  0x6e   : > { %v15827_v45 = vsel %vm12872_vm7, 4294967295, %v15826_v45  ;;  %vm12883_vm10 = vmor %vm432_vm2, %vm433_vm3  ;;  %v1082_v2 = vsel %vm12872_vm7, %v1077_v57, %v1081_v43  ;;  %v1092_v3 = vsel %vm12872_vm7, %v1087_v58, %v1091_v48  ;;  %v10452_v7 = vrot.slane %v1533_v0, 9  ;;  %v773_v39 = vld [vmem:[#allocation2 + $0x20] sm:$0x1]  ;;  %v406_v49 = vld [vmem:[%s12868_s17 + $0x18] sm:$0xf] }
  0x6f   : > { %15828 = vst [vmem:[#allocation11_spill] sm:$0xff] %v15827_v45  ;;  %v15830_v52 = vsel %vm12883_vm10, 4294967295, %v15829_v52  ;;  %vm12889_vm11 = vmand %vm756_vm5, %vm757_vm4  ;;  %v10436_v8 = vcombine.low %v1082_v2, %v1092_v3  ;;  %v450_v21 = vsel %vm12883_vm10, %v442_v10, %v449_v11  ;;  %v470_v40 = vshrl.u32 %v404_v34, 16  ;;  %v776_v54 = vld [vmem:[#allocation2 + $0x24] sm:$0xf]  ;;  %v12237_v56 = vld [vmem:[%s15805_s1 + $0x110] sm:$0xff]  }
  0x70   : > { %15831 = vst [vmem:[#allocation12_spill] sm:$0xff] %v15830_v52  ;;  %vm12895_vm12 = vmand %vm764_vm9, %vm432_vm2  ;;  %v760_v22 = vsel %vm12889_vm11, %v441_v9, %v759_v63  ;;  %v468_v42 = vrot.slane %v463_v32, 4  ;;  %v473_v43 = vshll.u32 %v404_v34, 16  ;;  %v770_v44 = vsel %vm12889_vm11, %v458_v37, %v769_v25  ;;  %v12950_v61 = vld [vmem:[%s12868_s17 + $0x1c] sm:$0xf]  ;;  %s284_s29 = sand.u32 1, %s12518_s25  }
  0x71   : > { %vm12912_vm13 = vmor %vm1629_vm6, %vm1630_vm8  ;;  %4472 = vmatprep.mubr.bf16.mxu0 %v10436_v8  ;;  %761 = vst [vmem:[#allocation2 + $0xc] sm:$0xf] %v760_v22  ;;  %v767_v28 = vsel %vm12895_vm12, %v451_v15, %v766_v12  ;;  %v472_v46 = vrot.slane %v470_v40, 7  ;;  %v478_v47 = vshrl.u32 %v405_v35, 16  ;;  %v481_v48 = vshll.u32 %v405_v35, 16  ;;  %v12241_v63 = vld [vmem:[%s15805_s1 + $0x158] sm:$0xff]  }
  0x72   : > { %4473 = vmatmul.mubr.bf16.vlgmr.msra.gmra.mrb[0].mxu0 %v12222_v59  ;;  %763 = vst.msk [vmem:[#allocation2 + $0x10] sm:$0xf] %vm756_vm5, %v450_v21  ;;  %v1635_v31 = vsel %vm12912_vm13, %v10452_v7, %v1634_v17  ;;  %768 = vst [vmem:[#allocation2 + $0x14] sm:$0x1] %v767_v28  ;;  %v1638_v36 = vsel %vm12912_vm13, %v1636_v27, %v1637_v18  ;;  %v467_v51 = vsel %vm12883_vm10, %v459_v38, %v466_v41  ;;  %v783_v3 = vld [vmem:[#allocation2 + $0x30] sm:$0xf] }
  0x73   : > { %11243 = vmatpush3.bf16.msra.mxu0 %v12225_v4  ;;  %v10468_v50 = vcombine.low %v1635_v31, %v1638_v36  ;;  %771 = vst [vmem:[#allocation2 + $0x18] sm:$0xf] %v770_v44  ;;  %v774_v53 = vsel %vm12895_vm12, %v468_v42, %v773_v39  ;;  %v487_v55 = vshrl.u32 %v406_v49, 16  ;;  %772 = vst.msk [vmem:[#allocation2 + $0x1c] sm:$0xf] %vm756_vm5, %v467_v51  ;;  %v476_v58 = vrot.slane %v472_v46, 4 }
  0x74   : > { %11244 = vmatprep.subr.bf16.mxu0 %v12229_v14  ;;  %775 = vst [vmem:[#allocation2 + $0x20] sm:$0x1] %v774_v53  ;;  %v475_v57 = vor.u32 %v473_v43, %v472_v46  ;;  %v12947_v59 = vrot.slane %v478_v47, 7  ;;  %v490_v62 = vshll.u32 %v406_v49, 16  ;;  %v495_v18 = vshrl.u32 %v12950_v61, 16  ;;  %v12243_v41 = vld [vmem:[%s15805_s1 + $0x118] sm:$0xff]  }
  0x75   : > { %v12955_v2 = vrot.slane %v487_v55, 7  ;;  %v780_v47 = vld [vmem:[#allocation2 + $0x2c] sm:$0x1]  ;;  %vm5694_vm14 = vcmask 1043456   ;;  %vm5700_vm15 = vcmask 1040384   ;;  %s10982_s14 = sshll.u32 %s12597_s28, 4 }
  0x76   : > { %v483_v7 = vor.u32 %v481_v48, %v12947_v59  ;;  %v777_v8 = vsel %vm12889_vm11, %v475_v57, %v776_v54  ;;  %v12247_v54 = vld [vmem:[%s15805_s1 + $0x160] sm:$0xff]   ;;  %vm14351_vm0 = vmand %vm5694_vm14, %vm757_vm4  ;;  %s15762_s18 = scalar_lea.hbm %s15811_s7, %s10982_s14  ;;  %s10333_s19 = scalar_lea.sflag [#allocation7], %s284_s29 }
  0x77   : > { %11245 = vmatpush3.bf16.msra.mxu0 %v12231_v26  ;;  %778 = vst [vmem:[#allocation2 + $0x24] sm:$0xf] %v777_v8  ;;  %v492_v17 = vor.u32 %v490_v62, %v12955_v2  ;;  %vm14358_vm1 = vmand %vm5700_vm15, %vm432_vm2  ;;  %vm12533_vm2 = vmmov 0   ;;  %p15971_p9 = scmp.ne.s32.totalorder %s15819_s11, 0  ;;  %s12535_s28 = smov [#allocation8]  }
  0x78   : > { %11246 = vmatprep.subr.bf16.mxu0 %v12235_v30  ;;  %v1021_v4 = vld [vmem:[#allocation2 + $0xc] sm:$0xf]  ;;  %v484_v15 = vsel %vm12883_vm10, %v476_v58, %v483_v7  ;;  %s12464_s21 = sshll.u32 %s12535_s28, 4  ;;  %s12465_s21 = int_to_ptr.vmem [resolvable:$false] %s12464_s21 }
  0x79   : > { %v12224_v0 = vld [vmem:[#allocation2 + $0xc] sm:$0xff]   ;;  %v1023_v6 = vld [vmem:[#allocation2 + $0x14] sm:$0x1]  ;;  %v1094_v9 = vshrl.u32 %v1021_v4, 16  ;;  %v1097_v10 = vshll.u32 %v1021_v4, 16  ;;  %v784_v27 = vsel %vm12889_vm11, %v492_v17, %v783_v3  ;;  %v485_v4 = vrot.slane %v12947_v59, 4 }
  0x7a   : > { %v1022_v5 = vld [vmem:[#allocation2 + $0x10] sm:$0xf]  ;;  %4633 = vmatprep.mubr.bf16.mxu1 %v12224_v0  ;;  %v1113_v13 = vshll.u32 %v1023_v6, 16  ;;  %v1536_v14 = vld [vmem:[#allocation2 + $0xc] sm:$0xe]  ;;  %v12227_v30 = vld [vmem:[#allocation2 + $0x18] sm:$0xff]  }
  0x7b   : > { %v1103_v11 = vshll.u32 %v1022_v5, 16  ;;  %v1107_v12 = vshrl.u32 %v1022_v5, 16  ;;  %11247 = vmatpush3.bf16.msra.mxu0 %v12237_v56  ;;  %4634 = vmatmul.mubr.bf16.vlgmr.msra.gmra.mrb[0].mxu1 %v10468_v50  ;;  %v1096_v19 = vrot.slane %v1094_v9, 4  ;;  %v1099_v20 = vrot.slane %v1097_v10, 5  ;;  %v1537_v23 = vld [vmem:[#allocation2 + $0x10] sm:$0xf] }
  0x7c   : > { %11248 = vmatprep.subr.bf16.mxu0 %v12241_v63  ;;  %779 = vst.msk [vmem:[#allocation2 + $0x28] sm:$0xf] %vm756_vm5, %v484_v15  ;;  %v1115_v24 = vrot.slane %v1113_v13, 5  ;;  %v1538_v25 = vld [vmem:[#allocation2 + $0x14] sm:$0x1]  ;;  %v10453_v26 = vrot.slane %v1536_v14, 9  ;;  %4641 = vmatprep.mubr.bf16.mxu1 %v12227_v30  ;;  %v781_v13 = vsel %vm12895_vm12, %v485_v4, %v780_v47 }
  0x7d   : > { %v1105_v21 = vrot.slane %v1103_v11, 5  ;;  %v1109_v22 = vrot.slane %v1107_v12, 4  ;;  %v1100_v28 = vor.u32 %v1099_v20, %v1096_v19  ;;  %v1641_v31 = vrot.slane %v1537_v23, 5  ;;  %785 = vst [vmem:[#allocation2 + $0x30] sm:$0xf] %v784_v27  ;;  %v12226_v38 = vld [vmem:[#allocation2 + $0xc] sm:$0xff]  }
  0x7e   : > { %v1644_v32 = vrot.slane %v1538_v25, 5  ;;  %v1024_v33 = vld [vmem:[#allocation2 + $0x18] sm:$0xf]  ;;  %v1025_v34 = vld [vmem:[#allocation2 + $0x1c] sm:$0xf]  ;;  %v493_v30 = vrot.slane %v12955_v2, 4 }
  0x7f   : > { %v1110_v29 = vor.u32 %v1109_v22, %v1105_v21  ;;  %v1026_v35 = vld [vmem:[#allocation2 + $0x20] sm:$0x1]  ;;  %v1101_v36 = vrot.slane %v1100_v28, 4  ;;  %v1642_v39 = vsel %vm12912_vm13, %v10453_v26, %v1641_v31  ;;  %v1643_v40 = vrot.slane %v1641_v31, 4  ;;  %v1539_v53 = vld [vmem:[#allocation2 + $0x18] sm:$0xe]  ;;  %11249 = vmatpush3.bf16.msra.mxu0 %v12243_v41 }
  0x80   : > { %v1118_v42 = vshrl.u32 %v1024_v33, 16  ;;  %v1121_v43 = vshll.u32 %v1024_v33, 16  ;;  %v1127_v44 = vshll.u32 %v1025_v34, 16  ;;  %v1131_v46 = vshrl.u32 %v1025_v34, 16  ;;  %v1540_v5 = vld [vmem:[#allocation2 + $0x1c] sm:$0xf]  ;;  %11250 = vmatprep.subr.bf16.mxu0 %v12247_v54 }
  0x81   : > { %v1111_v37 = vrot.slane %v1110_v29, 4  ;;  %v1106_v48 = vsel %vm12872_vm7, %v1101_v36, %v1105_v21  ;;  %v1645_v50 = vsel %vm12912_vm13, %v1643_v40, %v1644_v32  ;;  %v1137_v51 = vshll.u32 %v1026_v35, 16  ;;  %v1541_v7 = vld [vmem:[#allocation2 + $0x20] sm:$0x1]  ;;  %v1027_v10 = vld [vmem:[#allocation2 + $0x24] sm:$0xf] }
  0x82   : > { %v10469_v56 = vcombine.low %v1642_v39, %v1645_v50  ;;  %v1120_v57 = vrot.slane %v1118_v42, 4  ;;  %v1123_v58 = vrot.slane %v1121_v43, 5  ;;  %v1129_v63 = vrot.slane %v1127_v44, 5  ;;  %782 = vst [vmem:[#allocation2 + $0x2c] sm:$0x1] %v781_v13  ;;  %v12249_v21 = vld [vmem:[%s15805_s1 + $0x120] sm:$0xff]  }
  0x83   : > { %v1116_v49 = vsel %vm12872_vm7, %v1111_v37, %v1115_v24  ;;  %v12230_v62 = vld [vmem:[#allocation2 + $0x24] sm:$0xff]   ;;  %v1133_v0 = vrot.slane %v1131_v46, 4  ;;  %v1139_v3 = vrot.slane %v1137_v51, 5  ;;  %v10454_v8 = vrot.slane %v1539_v53, 9  ;;  %v12228_v23 = vld [vmem:[#allocation2 + $0x18] sm:$0xff]   ;;  %11251 = vmatpush3.bf16.msra.mxu0 %v12249_v21  ;;  %s12466_s22 = scalar_lea.vmem %s12465_s21, 32 }
  0x84   : > { %v10437_v55 = vcombine.low %v1106_v48, %v1116_v49  ;;  %4642 = vmatmul.mubr.bf16.gmra.mrb[4].mxu1 %v10469_v56  ;;  %v1124_v6 = vor.u32 %v1123_v58, %v1120_v57  ;;  %v1648_v9 = vrot.slane %v1540_v5, 5  ;;  %v1651_v12 = vrot.slane %v1541_v7, 5  ;;  %v1028_v14 = vld [vmem:[#allocation2 + $0x28] sm:$0xf]  ;;  %v1542_v31 = vld [vmem:[#allocation2 + $0x24] sm:$0xe] }
  0x85   : > { %v1134_v11 = vor.u32 %v1133_v0, %v1129_v63  ;;  %4649 = vmatprep.mubr.bf16.mxu1 %v12230_v62  ;;  %v1142_v15 = vshrl.u32 %v1027_v10, 16  ;;  %v1145_v20 = vshll.u32 %v1027_v10, 16  ;;  %v1151_v25 = vshll.u32 %v1028_v14, 16  ;;  %v1543_v32 = vld [vmem:[#allocation2 + $0x28] sm:$0xf] }
  0x86   : > { %4480 = vmatprep.mubr.bf16.mxu0 %v10437_v55  ;;  %v1125_v17 = vrot.slane %v1124_v6, 4  ;;  %v1649_v59 = vsel %vm12912_vm13, %v10454_v8, %v1648_v9  ;;  %v1650_v19 = vrot.slane %v1648_v9, 4  ;;  %v1155_v26 = vshrl.u32 %v1028_v14, 16  ;;  %v1030_v37 = vld [vmem:[#allocation2 + $0x30] sm:$0xf]  ;;  %v12253_v47 = vld [vmem:[%s15805_s1 + $0x168] sm:$0xff]  }
  0x87   : > { %4481 = vmatmul.mubr.bf16.gmra.mrb[4].mxu0 %v12226_v38  ;;  %v1135_v22 = vrot.slane %v1134_v11, 4  ;;  %v1144_v24 = vrot.slane %v1142_v15, 4  ;;  %v1147_v29 = vrot.slane %v1145_v20, 5  ;;  %v1153_v35 = vrot.slane %v1151_v25, 5  ;;  %v787_v2 = vld [vmem:[#allocation2 + $0x38] sm:$0x1]  ;;  %11252 = vmatprep.subr.bf16.mxu0 %v12253_v47 }
  0x88   : > { %v1130_v27 = vsel %vm12872_vm7, %v1125_v17, %v1129_v63  ;;  %v1652_v28 = vsel %vm12912_vm13, %v1650_v19, %v1651_v12  ;;  %v1157_v36 = vrot.slane %v1155_v26, 4  ;;  %v497_v40 = vrot.slane %v495_v18, 7  ;;  %v408_v46 = vld [vmem:[%s12868_s17 + $0x20] sm:$0xf]  ;;  %v409_v53 = vld [vmem:[%s12868_s17 + $0x24] sm:$0xf] }
  0x89   : > { %v1140_v33 = vsel %vm12872_vm7, %v1135_v22, %v1139_v3  ;;  %v10470_v34 = vcombine.low %v1649_v59, %v1652_v28  ;;  %v1148_v39 = vor.u32 %v1147_v29, %v1144_v24  ;;  %v498_v41 = vshll.u32 %v12950_v61, 16  ;;  %v12255_v61 = vld [vmem:[%s15805_s1 + $0x128] sm:$0xff]   ;;  %v12259_v6 = vld [vmem:[%s15805_s1 + $0x170] sm:$0xff]   ;;  %v790_v59 = vld [vmem:[#allocation2 + $0x3c] sm:$0xf] }
  0x8a   : > { %v10438_v38 = vcombine.low %v1130_v27, %v1140_v33  ;;  %v1158_v42 = vor.u32 %v1157_v36, %v1153_v35  ;;  %v1655_v43 = vrot.slane %v1543_v32, 5  ;;  %v1166_v44 = vshrl.u32 %v1030_v37, 16  ;;  %v1029_v18 = vld [vmem:[#allocation2 + $0x2c] sm:$0x1]  ;;  %11253 = vmatpush3.bf16.msra.mxu0 %v12255_v61  ;;  %v13017_v11 = vld [vmem:[#allocation2 + $0x30] sm:$0xe] }
  0x8b   : > { %v1149_v48 = vrot.slane %v1148_v39, 4  ;;  %v500_v49 = vor.u32 %v498_v41, %v497_v40  ;;  %v502_v50 = vrot.slane %v497_v40, 4  ;;  %v1169_v51 = vshll.u32 %v1030_v37, 16  ;;  %v1544_v55 = vld [vmem:[#allocation2 + $0x2c] sm:$0x1]  ;;  %v12261_v12 = vld [vmem:[%s15805_s1 + $0x130] sm:$0xff]   ;;  %11254 = vmatprep.subr.bf16.mxu0 %v12259_v6 }
  0x8c   : > { %4488 = vmatprep.mubr.bf16.mxu0 %v10438_v38  ;;  %4650 = vmatmul.mubr.bf16.gmra.mrb[8].mxu1 %v10470_v34  ;;  %v1159_v54 = vrot.slane %v1158_v42, 4  ;;  %v10455_v56 = vrot.slane %v1542_v31, 9  ;;  %v1161_v57 = vshll.u32 %v1029_v18, 16  ;;  %v1657_v62 = vrot.slane %v1655_v43, 4  ;;  %v410_v19 = vld [vmem:[%s12868_s17 + $0x28] sm:$0xf] }
  0x8d   : > { %v501_v58 = vsel %vm12883_vm10, %v493_v30, %v500_v49  ;;  %v1658_v63 = vrot.slane %v1544_v55, 5  ;;  %v788_v0 = vsel %vm12895_vm12, %v502_v50, %v787_v2  ;;  %v1168_v3 = vrot.slane %v1166_v44, 4  ;;  %v12232_v21 = vld [vmem:[#allocation2 + $0x24] sm:$0xff]   ;;  %v411_v24 = vld [vmem:[%s12868_s17 + $0x2c] sm:$0xf] }
  0x8e   : > { %786 = vst.msk [vmem:[#allocation2 + $0x34] sm:$0xf] %vm756_vm5, %v501_v58  ;;  %v1171_v4 = vrot.slane %v1169_v51, 5  ;;  %v504_v5 = vshrl.u32 %v408_v46, 16  ;;  %v1154_v7 = vsel %vm12872_vm7, %v1149_v48, %v1153_v35  ;;  %v1163_v8 = vrot.slane %v1161_v57, 5  ;;  %11255 = vmatpush3.bf16.msra.mxu0 %v12261_v12  ;;  %v12262_v26 = vld [vmem:[%s15805_s1 + $0x1c0] sm:$0xff]  }
  0x8f   : > { %4489 = vmatmul.mubr.bf16.gmra.mrb[8].mxu0 %v12228_v23  ;;  %789 = vst [vmem:[#allocation2 + $0x38] sm:$0x1] %v788_v0  ;;  %v507_v9 = vshll.u32 %v408_v46, 16  ;;  %v512_v10 = vshrl.u32 %v409_v53, 16  ;;  %v1656_v13 = vsel %vm12912_vm13, %v10455_v56, %v1655_v43  ;;  %v515_v17 = vshll.u32 %v409_v53, 16  ;;  %11354 = vmatprep.subr.bf16.mxu1 %v12262_v26  ;;  %v12263_v37 = vld [vmem:[%s15805_s1 + $0x180] sm:$0xff]  }
  0x90   : > { %v1172_v14 = vor.u32 %v1171_v4, %v1168_v3  ;;  %v506_v15 = vrot.slane %v504_v5, 7  ;;  %v1164_v20 = vsel %vm12872_vm7, %v1159_v54, %v1163_v8  ;;  %v1659_v22 = vsel %vm12912_vm13, %v1657_v62, %v1658_v63  ;;  %v794_v31 = vld [vmem:[#allocation2 + $0x44] sm:$0x1]  ;;  %v797_v32 = vld [vmem:[#allocation2 + $0x48] sm:$0xf]  ;;  %11355 = vmatpush3.bf16.msra.mxu1 %v12263_v37 }
  0x91   : > { %v514_v23 = vrot.slane %v512_v10, 7  ;;  %v521_v25 = vshrl.u32 %v410_v19, 16  ;;  %v10439_v27 = vcombine.low %v1154_v7, %v1164_v20  ;;  %v10456_v30 = vrot.slane %v13017_v11, 9  ;;  %v13044_v2 = vld [vmem:[%s12868_s17 + $0x30] sm:$0xf]  ;;  %v12264_v10 = vld [vmem:[%s15805_s1 + $0x1c8] sm:$0xff]  }
  0x92   : > { %v509_v28 = vor.u32 %v507_v9, %v506_v15  ;;  %v510_v29 = vrot.slane %v506_v15, 4  ;;  %v524_v36 = vshll.u32 %v410_v19, 16  ;;  %v10471_v38 = vcombine.low %v1656_v13, %v1659_v22  ;;  %v13056_v63 = vld [vmem:[%s12868_s17 + $0x34] sm:$0xf]  ;;  %v801_v4 = vld [vmem:[#allocation2 + $0x50] sm:$0x1]  ;;  %11356 = vmatprep.subr.bf16.mxu1 %v12264_v10 }
  0x93   : > { %v517_v33 = vor.u32 %v515_v17, %v514_v23  ;;  %v519_v34 = vrot.slane %v514_v23, 4  ;;  %v13034_v35 = vrot.slane %v521_v25, 7  ;;  %4496 = vmatprep.mubr.bf16.mxu0 %v10439_v27  ;;  %v13039_v39 = vrot.slane %v1172_v14, 4  ;;  %v12265_v15 = vld [vmem:[%s15805_s1 + $0x188] sm:$0xff]   ;;  %v804_v22 = vld [vmem:[#allocation2 + $0x54] sm:$0xf] }
  0x94   : > { %v791_v40 = vsel %vm12889_vm11, %v509_v28, %v790_v59  ;;  %v529_v41 = vshrl.u32 %v411_v24, 16  ;;  %v532_v48 = vshll.u32 %v411_v24, 16  ;;  %v538_v5 = vshrl.u32 %v13044_v2, 16  ;;  %11357 = vmatpush3.bf16.msra.mxu1 %v12265_v15  ;;  %v2482_v60 = vld [vmem:[#allocation2 + $0x14] sm:$0x1] }
  0x95   : > { %v12233_v42 = vld [vmem:[#allocation2 + $0x30] sm:$0xff]   ;;  %v518_v44 = vsel %vm12883_vm10, %v510_v29, %v517_v33  ;;  %792 = vst [vmem:[#allocation2 + $0x3c] sm:$0xf] %v791_v40  ;;  %v795_v46 = vsel %vm12895_vm12, %v519_v34, %v794_v31  ;;  %v526_v47 = vor.u32 %v524_v36, %v13034_v35  ;;  %v527_v54 = vrot.slane %v13034_v35, 4 }
  0x96   : > { %v1031_v43 = vld [vmem:[#allocation2 + $0x34] sm:$0xf]  ;;  %v1032_v49 = vld [vmem:[#allocation2 + $0x38] sm:$0x1]  ;;  %793 = vst.msk [vmem:[#allocation2 + $0x40] sm:$0xf] %vm756_vm5, %v518_v44  ;;  %4657 = vmatprep.mubr.bf16.mxu1 %v12233_v42 }
  0x97   : > { %4497 = vmatmul.mubr.bf16.gmra.mrb[12].mxu0 %v12232_v21  ;;  %v1175_v50 = vshll.u32 %v1031_v43, 16  ;;  %v1179_v51 = vshrl.u32 %v1031_v43, 16  ;;  %796 = vst [vmem:[#allocation2 + $0x44] sm:$0x1] %v795_v46  ;;  %v1185_v53 = vshll.u32 %v1032_v49, 16  ;;  %v798_v55 = vsel %vm12889_vm11, %v526_v47, %v797_v32  ;;  %4658 = vmatmul.mubr.bf16.gmra.mrb[12].mxu1 %v10471_v38 }
  0x98   : > { %v1546_v61 = vld [vmem:[#allocation2 + $0x34] sm:$0xf]  ;;  %v1547_v18 = vld [vmem:[#allocation2 + $0x38] sm:$0x1]  ;;  %799 = vst [vmem:[#allocation2 + $0x48] sm:$0xf] %v798_v55 }
  0x99   : > { %v1177_v56 = vrot.slane %v1175_v50, 5  ;;  %v1181_v57 = vrot.slane %v1179_v51, 4  ;;  %v1662_v58 = vrot.slane %v1546_v61, 5  ;;  %v1665_v62 = vrot.slane %v1547_v18, 5 }
  0x9a   : > { %v1187_v0 = vrot.slane %v1185_v53, 5  ;;  %v531_v3 = vrot.slane %v529_v41, 7  ;;  %v541_v6 = vshll.u32 %v13044_v2, 16  ;;  %v13065_v13 = vrot.slane %v538_v5, 7 }
  0x9b   : > { %v1182_v7 = vor.u32 %v1181_v57, %v1177_v56  ;;  %v1663_v8 = vsel %vm12912_vm13, %v10456_v30, %v1662_v58  ;;  %v1664_v9 = vrot.slane %v1662_v58, 4  ;;  %v546_v14 = vshrl.u32 %v13056_v63, 16  ;;  %v12234_v30 = vld [vmem:[#allocation2 + $0x30] sm:$0xff]  }
  0x9c   : > { %v534_v11 = vor.u32 %v532_v48, %v531_v3  ;;  %v536_v12 = vrot.slane %v531_v3, 4  ;;  %v1178_v17 = vsel %vm12872_vm7, %v13039_v39, %v1177_v56  ;;  %v1033_v20 = vld [vmem:[#allocation2 + $0x3c] sm:$0xf]  ;;  %v549_v21 = vshll.u32 %v13056_v63, 16  ;;  %v12268_v57 = vld [vmem:[%s15805_s1 + $0x1d0] sm:$0xff]  }
  0x9d   : > { %v1183_v59 = vrot.slane %v1182_v7, 4  ;;  %v1666_v19 = vsel %vm12912_vm13, %v1664_v9, %v1665_v62  ;;  %v12236_v23 = vld [vmem:[#allocation2 + $0x3c] sm:$0xff]   ;;  %v1190_v26 = vshrl.u32 %v1033_v20, 16  ;;  %v1193_v32 = vshll.u32 %v1033_v20, 16  ;;  %11358 = vmatprep.subr.bf16.mxu1 %v12268_v57 }
  0x9e   : > { %v10472_v24 = vcombine.low %v1663_v8, %v1666_v19  ;;  %v1034_v25 = vld [vmem:[#allocation2 + $0x40] sm:$0xf]  ;;  %v535_v27 = vsel %vm12883_vm10, %v527_v54, %v534_v11  ;;  %v802_v28 = vsel %vm12895_vm12, %v536_v12, %v801_v4  ;;  %v1035_v31 = vld [vmem:[#allocation2 + $0x44] sm:$0x1]  ;;  %4665 = vmatprep.mubr.bf16.mxu1 %v12236_v23  ;;  %v543_v38 = vor.u32 %v541_v6, %v13065_v13  ;;  %v1548_v43 = vld [vmem:[#allocation2 + $0x3c] sm:$0xe] }
  0x9f   : > { %v1188_v29 = vsel %vm12872_vm7, %v1183_v59, %v1187_v0  ;;  %v1199_v33 = vshll.u32 %v1034_v25, 16  ;;  %v1203_v34 = vshrl.u32 %v1034_v25, 16  ;;  %800 = vst.msk [vmem:[#allocation2 + $0x4c] sm:$0xf] %vm756_vm5, %v535_v27  ;;  %803 = vst [vmem:[#allocation2 + $0x50] sm:$0x1] %v802_v28 }
  0xa0   : > { %v10440_v35 = vcombine.low %v1178_v17, %v1188_v29  ;;  %v1192_v36 = vrot.slane %v1190_v26, 4  ;;  %v1209_v37 = vshll.u32 %v1035_v31, 16  ;;  %4666 = vmatmul.mubr.bf16.gmra.mrb[16].mxu1 %v10472_v24  ;;  %v1195_v39 = vrot.slane %v1193_v32, 5  ;;  %v1549_v44 = vld [vmem:[#allocation2 + $0x40] sm:$0xf]  ;;  %v12269_v4 = vld [vmem:[%s15805_s1 + $0x190] sm:$0xff]  }
  0xa1   : > { %v1201_v40 = vrot.slane %v1199_v33, 5  ;;  %v1205_v41 = vrot.slane %v1203_v34, 4  ;;  %v544_v2 = vrot.slane %v13065_v13, 4  ;;  %v548_v46 = vrot.slane %v546_v14, 7  ;;  %v1550_v50 = vld [vmem:[#allocation2 + $0x44] sm:$0x1]  ;;  %11359 = vmatpush3.bf16.msra.mxu1 %v12269_v4 }
  0xa2   : > { %4504 = vmatprep.mubr.bf16.mxu0 %v10440_v35  ;;  %v1211_v42 = vrot.slane %v1209_v37, 5  ;;  %v805_v47 = vsel %vm12889_vm11, %v543_v38, %v804_v22  ;;  %v1196_v48 = vor.u32 %v1195_v39, %v1192_v36  ;;  %v10457_v51 = vrot.slane %v1548_v43, 9  ;;  %v1036_v61 = vld [vmem:[#allocation2 + $0x48] sm:$0xf]  ;;  %v808_v9 = vld [vmem:[#allocation2 + $0x5c] sm:$0x1] }
  0xa3   : > { %4505 = vmatmul.mubr.bf16.gmra.mrb[16].mxu0 %v12234_v30  ;;  %v1206_v49 = vor.u32 %v1205_v41, %v1201_v40  ;;  %v1669_v53 = vrot.slane %v1549_v44, 5  ;;  %806 = vst [vmem:[#allocation2 + $0x54] sm:$0xf] %v805_v47  ;;  %v1672_v18 = vrot.slane %v1550_v50, 5  ;;  %v1214_v54 = vshrl.u32 %v1036_v61, 16  ;;  %v12238_v12 = vld [vmem:[#allocation2 + $0x3c] sm:$0xff]  }
  0xa4   : > { %v1217_v55 = vshll.u32 %v1036_v61, 16  ;;  %v551_v56 = vor.u32 %v549_v21, %v548_v46  ;;  %v1197_v58 = vrot.slane %v1196_v48, 4  ;;  %v1551_v3 = vld [vmem:[#allocation2 + $0x48] sm:$0xe]  ;;  %v553_v25 = vrot.slane %v548_v46, 4  ;;  %v12270_v28 = vld [vmem:[%s15805_s1 + $0x1d8] sm:$0xff]  }
  0xa5   : > { %v1207_v62 = vrot.slane %v1206_v49, 4  ;;  %v1670_v63 = vsel %vm12912_vm13, %v10457_v51, %v1669_v53  ;;  %v1671_v0 = vrot.slane %v1669_v53, 4  ;;  %v1216_v7 = vrot.slane %v1214_v54, 4  ;;  %v414_v27 = vld [vmem:[%s12868_s17 + $0x38] sm:$0xf]  ;;  %11360 = vmatprep.subr.bf16.mxu1 %v12270_v28 }
  0xa6   : > { %v12239_v5 = vld [vmem:[#allocation2 + $0x48] sm:$0xff]   ;;  %v552_v8 = vsel %vm12883_vm10, %v544_v2, %v551_v56  ;;  %v1202_v10 = vsel %vm12872_vm7, %v1197_v58, %v1201_v40  ;;  %v1038_v14 = vld [vmem:[#allocation2 + $0x50] sm:$0x1]  ;;  %v1219_v15 = vrot.slane %v1217_v55, 5  ;;  %v10458_v26 = vrot.slane %v1551_v3, 9  ;;  %v12271_v44 = vld [vmem:[%s15805_s1 + $0x198] sm:$0xff]  }
  0xa7   : > { %v1037_v6 = vld [vmem:[#allocation2 + $0x4c] sm:$0xf]  ;;  %v1212_v11 = vsel %vm12872_vm7, %v1207_v62, %v1211_v42  ;;  %v1673_v13 = vsel %vm12912_vm13, %v1671_v0, %v1672_v18  ;;  %807 = vst.msk [vmem:[#allocation2 + $0x58] sm:$0xf] %vm756_vm5, %v552_v8  ;;  %4673 = vmatprep.mubr.bf16.mxu1 %v12239_v5  ;;  %v1553_v22 = vld [vmem:[#allocation2 + $0x50] sm:$0x1]  ;;  %v809_v35 = vsel %vm12895_vm12, %v553_v25, %v808_v9 }
  0xa8   : > { %v10441_v17 = vcombine.low %v1202_v10, %v1212_v11  ;;  %v10473_v59 = vcombine.low %v1670_v63, %v1673_v13  ;;  %v1223_v19 = vshll.u32 %v1037_v6, 16  ;;  %v1227_v20 = vshrl.u32 %v1037_v6, 16  ;;  %v1552_v21 = vld [vmem:[#allocation2 + $0x4c] sm:$0xf]  ;;  %810 = vst [vmem:[#allocation2 + $0x5c] sm:$0x1] %v809_v35  ;;  %11361 = vmatpush3.bf16.msra.mxu1 %v12271_v44 }
  0xa9   : > { %v1220_v23 = vor.u32 %v1219_v15, %v1216_v7  ;;  %v1233_v24 = vshll.u32 %v1038_v14, 16  ;;  %v1676_v31 = vrot.slane %v1552_v21, 5  ;;  %v1679_v32 = vrot.slane %v1553_v22, 5  ;;  %v415_v2 = vld [vmem:[%s12868_s17 + $0x3c] sm:$0xf]  ;;  %v12240_v53 = vld [vmem:[#allocation2 + $0x48] sm:$0xff]  }
  0xaa   : > { %4512 = vmatprep.mubr.bf16.mxu0 %v10441_v17  ;;  %4674 = vmatmul.mubr.bf16.gmra.mrb[20].mxu1 %v10473_v59  ;;  %v1225_v29 = vrot.slane %v1223_v19, 5  ;;  %v1229_v30 = vrot.slane %v1227_v20, 4  ;;  %v1039_v36 = vld [vmem:[#allocation2 + $0x54] sm:$0xf]  ;;  %v555_v42 = vshrl.u32 %v414_v27, 16  ;;  %v558_v43 = vshll.u32 %v414_v27, 16 }
  0xab   : > { %4513 = vmatmul.mubr.bf16.gmra.mrb[20].mxu0 %v12238_v12  ;;  %v1221_v33 = vrot.slane %v1220_v23, 4  ;;  %v1235_v34 = vrot.slane %v1233_v24, 5  ;;  %v1677_v38 = vsel %vm12912_vm13, %v10458_v26, %v1676_v31  ;;  %v1678_v39 = vrot.slane %v1676_v31, 4  ;;  %v13121_v51 = vld [vmem:[#allocation2 + $0x54] sm:$0xe]  ;;  %v12273_v3 = vld [vmem:[%s15805_s1 + $0x178] sm:$0xff]  }
  0xac   : > { %v1230_v37 = vor.u32 %v1229_v30, %v1225_v29  ;;  %v1238_v40 = vshrl.u32 %v1039_v36, 16  ;;  %v1241_v41 = vshll.u32 %v1039_v36, 16  ;;  %v557_v58 = vrot.slane %v555_v42, 7  ;;  %v811_v63 = vld [vmem:[#allocation2 + $0x60] sm:$0xf]  ;;  %11256 = vmatprep.subr.bf16.mxu0 %v12273_v3  ;;  %v12275_v13 = vld [vmem:[%s15805_s1 + $0x138] sm:$0xff]  }
  0xad   : > { %v1226_v46 = vsel %vm12872_vm7, %v1221_v33, %v1225_v29  ;;  %v1680_v49 = vsel %vm12912_vm13, %v1678_v39, %v1679_v32  ;;  %v563_v62 = vshrl.u32 %v415_v2, 16  ;;  %v566_v7 = vshll.u32 %v415_v2, 16  ;;  %v815_v8 = vld [vmem:[#allocation2 + $0x68] sm:$0x1]  ;;  %v416_v23 = vld [vmem:[%s12868_s17 + $0x40] sm:$0xf]  ;;  %11257 = vmatpush3.bf16.msra.mxu0 %v12275_v13 }
  0xae   : > { %v1231_v47 = vrot.slane %v1230_v37, 4  ;;  %v12242_v48 = vld [vmem:[#allocation2 + $0x54] sm:$0xff]   ;;  %v10474_v61 = vcombine.low %v1677_v38, %v1680_v49  ;;  %v1240_v18 = vrot.slane %v1238_v40, 4  ;;  %v1243_v54 = vrot.slane %v1241_v41, 5  ;;  %v417_v28 = vld [vmem:[%s12868_s17 + $0x44] sm:$0xf] }
  0xaf   : > { %v1040_v50 = vld [vmem:[#allocation2 + $0x58] sm:$0xf]  ;;  %4681 = vmatprep.mubr.bf16.mxu1 %v12242_v48  ;;  %v560_v10 = vor.u32 %v558_v43, %v557_v58  ;;  %v561_v11 = vrot.slane %v557_v58, 4  ;;  %v565_v12 = vrot.slane %v563_v62, 7  ;;  %v1041_v14 = vld [vmem:[#allocation2 + $0x5c] sm:$0x1] }
  0xb0   : > { %v1247_v55 = vshll.u32 %v1040_v50, 16  ;;  %v1236_v56 = vsel %vm12872_vm7, %v1231_v47, %v1235_v34  ;;  %v1251_v57 = vshrl.u32 %v1040_v50, 16  ;;  %v1555_v0 = vld [vmem:[#allocation2 + $0x58] sm:$0xf]  ;;  %v1244_v5 = vor.u32 %v1243_v54, %v1240_v18  ;;  %v1556_v17 = vld [vmem:[#allocation2 + $0x5c] sm:$0x1] }
  0xb1   : > { %v10442_v4 = vcombine.low %v1226_v46, %v1236_v56  ;;  %v10459_v59 = vrot.slane %v13121_v51, 9  ;;  %v1257_v20 = vshll.u32 %v1041_v14, 16  ;;  %v568_v21 = vor.u32 %v566_v7, %v565_v12  ;;  %v12244_v31 = vld [vmem:[#allocation2 + $0x54] sm:$0xff]   ;;  %v418_v37 = vld [vmem:[%s12868_s17 + $0x48] sm:$0xf]  ;;  %v12276_v38 = vld [vmem:[%s15805_s1 + $0x1e0] sm:$0xff]  }
  0xb2   : > { %v1249_v6 = vrot.slane %v1247_v55, 5  ;;  %4682 = vmatmul.mubr.bf16.gmra.mrb[24].mxu1 %v10474_v61  ;;  %v1253_v9 = vrot.slane %v1251_v57, 4  ;;  %v1245_v15 = vrot.slane %v1244_v5, 4  ;;  %v570_v22 = vrot.slane %v565_v12, 4  ;;  %v13150_v2 = vld [vmem:[%s12868_s17 + $0x4c] sm:$0xf]  ;;  %11362 = vmatprep.subr.bf16.mxu1 %v12276_v38 }
  0xb3   : > { %4520 = vmatprep.mubr.bf16.mxu0 %v10442_v4  ;;  %v812_v25 = vsel %vm12889_vm11, %v560_v10, %v811_v63  ;;  %v1683_v26 = vrot.slane %v1555_v0, 5  ;;  %v1686_v27 = vrot.slane %v1556_v17, 5  ;;  %v1259_v30 = vrot.slane %v1257_v20, 5  ;;  %v12277_v43 = vld [vmem:[%s15805_s1 + $0x1a0] sm:$0xff]   ;;  %v818_v47 = vld [vmem:[#allocation2 + $0x6c] sm:$0xf] }
  0xb4   : > { %4521 = vmatmul.mubr.bf16.gmra.mrb[24].mxu0 %v12240_v53  ;;  %v1254_v19 = vor.u32 %v1253_v9, %v1249_v6  ;;  %v1250_v24 = vsel %vm12872_vm7, %v1245_v15, %v1249_v6  ;;  %v569_v32 = vsel %vm12883_vm10, %v561_v11, %v568_v21  ;;  %813 = vst [vmem:[#allocation2 + $0x60] sm:$0xf] %v812_v25  ;;  %v572_v35 = vshrl.u32 %v416_v23, 16  ;;  %v822_v48 = vld [vmem:[#allocation2 + $0x74] sm:$0x1]  ;;  %v12278_v18 = vld [vmem:[%s15805_s1 + $0x1e8] sm:$0xff]  }
  0xb5   : > { %v816_v33 = vsel %vm12895_vm12, %v570_v22, %v815_v8  ;;  %814 = vst.msk [vmem:[#allocation2 + $0x64] sm:$0xf] %vm756_vm5, %v569_v32  ;;  %v1685_v34 = vrot.slane %v1683_v26, 4  ;;  %v575_v36 = vshll.u32 %v416_v23, 16  ;;  %v580_v40 = vshrl.u32 %v417_v28, 16  ;;  %11363 = vmatpush3.bf16.msra.mxu1 %v12277_v43 }
  0xb6   : > { %v1255_v29 = vrot.slane %v1254_v19, 4  ;;  %817 = vst [vmem:[#allocation2 + $0x68] sm:$0x1] %v816_v33  ;;  %v583_v41 = vshll.u32 %v417_v28, 16  ;;  %v589_v42 = vshrl.u32 %v418_v37, 16  ;;  %v574_v46 = vrot.slane %v572_v35, 7  ;;  %11364 = vmatprep.subr.bf16.mxu1 %v12278_v18 }
  0xb7   : > { %v592_v49 = vshll.u32 %v418_v37, 16  ;;  %v1684_v50 = vsel %vm12912_vm13, %v10459_v59, %v1683_v26  ;;  %v1687_v51 = vsel %vm12912_vm13, %v1685_v34, %v1686_v27  ;;  %v582_v53 = vrot.slane %v580_v40, 7  ;;  %v825_v57 = vld [vmem:[#allocation2 + $0x78] sm:$0xf]  ;;  %v13170_v6 = vld [vmem:[%s12868_s17 + $0x50] sm:$0xf] }
  0xb8   : > { %v1260_v39 = vsel %vm12872_vm7, %v1255_v29, %v1259_v30  ;;  %v13159_v61 = vrot.slane %v589_v42, 7  ;;  %v577_v54 = vor.u32 %v575_v36, %v574_v46  ;;  %v578_v55 = vrot.slane %v574_v46, 4  ;;  %v829_v27 = vld [vmem:[#allocation2 + $0x80] sm:$0x1] }
  0xb9   : > { %v10443_v44 = vcombine.low %v1250_v24, %v1260_v39  ;;  %v597_v56 = vshrl.u32 %v13150_v2, 16  ;;  %v585_v58 = vor.u32 %v583_v41, %v582_v53  ;;  %v587_v62 = vrot.slane %v582_v53, 4 }
  0xba   : > { %v594_v63 = vor.u32 %v592_v49, %v13159_v61  ;;  %v600_v0 = vshll.u32 %v13150_v2, 16  ;;  %v10475_v3 = vcombine.low %v1684_v50, %v1687_v51  ;;  %v819_v5 = vsel %vm12889_vm11, %v577_v54, %v818_v47 }
  0xbb   : > { %4528 = vmatprep.mubr.bf16.mxu0 %v10443_v44  ;;  %v1042_v4 = vld [vmem:[#allocation2 + $0x60] sm:$0xf]  ;;  %v586_v10 = vsel %vm12883_vm10, %v578_v55, %v585_v58  ;;  %820 = vst [vmem:[#allocation2 + $0x6c] sm:$0xf] %v819_v5  ;;  %v823_v11 = vsel %vm12895_vm12, %v587_v62, %v822_v48  ;;  %v595_v59 = vrot.slane %v13159_v61, 4  ;;  %v606_v32 = vshrl.u32 %v13170_v6, 16 }
  0xbc   : > { %4529 = vmatmul.mubr.bf16.gmra.mrb[28].mxu0 %v12244_v31  ;;  %v12245_v7 = vld [vmem:[#allocation2 + $0x60] sm:$0xff]   ;;  %v1262_v9 = vshrl.u32 %v1042_v4, 16  ;;  %v826_v12 = vsel %vm12889_vm11, %v594_v63, %v825_v57  ;;  %v1265_v14 = vshll.u32 %v1042_v4, 16  ;;  %821 = vst.msk [vmem:[#allocation2 + $0x70] sm:$0xf] %vm756_vm5, %v586_v10  ;;  %v599_v31 = vrot.slane %v597_v56, 7 }
  0xbd   : > { %v1043_v8 = vld [vmem:[#allocation2 + $0x64] sm:$0xf]  ;;  %v1044_v13 = vld [vmem:[#allocation2 + $0x68] sm:$0x1]  ;;  %824 = vst [vmem:[#allocation2 + $0x74] sm:$0x1] %v823_v11  ;;  %4689 = vmatprep.mubr.bf16.mxu1 %v12245_v7 }
  0xbe   : > { %v1271_v15 = vshll.u32 %v1043_v8, 16  ;;  %v1275_v17 = vshrl.u32 %v1043_v8, 16  ;;  %827 = vst [vmem:[#allocation2 + $0x78] sm:$0xf] %v826_v12  ;;  %v1264_v19 = vrot.slane %v1262_v9, 4  ;;  %v1281_v20 = vshll.u32 %v1044_v13, 16  ;;  %4690 = vmatmul.mubr.bf16.gmra.mrb[28].mxu1 %v10475_v3 }
  0xbf   : > { %v1557_v21 = vld [vmem:[#allocation2 + $0x60] sm:$0xe]  ;;  %v1267_v22 = vrot.slane %v1265_v14, 5  ;;  %v1558_v25 = vld [vmem:[#allocation2 + $0x64] sm:$0xf]  ;;  %v609_v36 = vshll.u32 %v13170_v6, 16  ;;  %v602_v39 = vor.u32 %v600_v0, %v599_v31 }
  0xc0   : > { %v1273_v23 = vrot.slane %v1271_v15, 5  ;;  %v1277_v24 = vrot.slane %v1275_v17, 4  ;;  %v10460_v26 = vrot.slane %v1557_v21, 9  ;;  %v1283_v28 = vrot.slane %v1281_v20, 5  ;;  %v1559_v29 = vld [vmem:[#allocation2 + $0x68] sm:$0x1] }
  0xc1   : > { %v1690_v30 = vrot.slane %v1558_v25, 5  ;;  %v1268_v33 = vor.u32 %v1267_v22, %v1264_v19  ;;  %v1693_v35 = vrot.slane %v1559_v29, 5  ;;  %v604_v40 = vrot.slane %v599_v31, 4  ;;  %v12246_v53 = vld [vmem:[#allocation2 + $0x60] sm:$0xff]   ;;  %v12279_v62 = vld [vmem:[%s15805_s1 + $0x1a8] sm:$0xff]   ;;  %v12282_v14 = vld [vmem:[%s15805_s1 + $0x1f0] sm:$0xff]  }
  0xc2   : > { %v1278_v34 = vor.u32 %v1277_v24, %v1273_v23  ;;  %v1045_v42 = vld [vmem:[#allocation2 + $0x6c] sm:$0xf]  ;;  %v603_v48 = vsel %vm12883_vm10, %v595_v59, %v602_v39  ;;  %11365 = vmatpush3.bf16.msra.mxu1 %v12279_v62  ;;  %v12283_v20 = vld [vmem:[%s15805_s1 + $0x1b0] sm:$0xff]   ;;  %v13207_v25 = vrot.slane %v606_v32, 7 }
  0xc3   : > { %v1691_v37 = vsel %vm12912_vm13, %v10460_v26, %v1690_v30  ;;  %v1692_v38 = vrot.slane %v1690_v30, 4  ;;  %v1269_v41 = vrot.slane %v1268_v33, 4  ;;  %v12248_v43 = vld [vmem:[#allocation2 + $0x6c] sm:$0xff]   ;;  %v1286_v47 = vshrl.u32 %v1045_v42, 16  ;;  %828 = vst.msk [vmem:[#allocation2 + $0x7c] sm:$0xf] %vm756_vm5, %v603_v48  ;;  %11366 = vmatprep.subr.bf16.mxu1 %v12282_v14 }
  0xc4   : > { %v1279_v2 = vrot.slane %v1278_v34, 4  ;;  %v1046_v46 = vld [vmem:[#allocation2 + $0x70] sm:$0xf]  ;;  %v830_v49 = vsel %vm12895_vm12, %v604_v40, %v829_v27  ;;  %v1047_v18 = vld [vmem:[#allocation2 + $0x74] sm:$0x1]  ;;  %v1289_v54 = vshll.u32 %v1045_v42, 16  ;;  %4697 = vmatprep.mubr.bf16.mxu1 %v12248_v43 }
  0xc5   : > { %v1694_v44 = vsel %vm12912_vm13, %v1692_v38, %v1693_v35  ;;  %v1274_v50 = vsel %vm12872_vm7, %v1269_v41, %v1273_v23  ;;  %831 = vst [vmem:[#allocation2 + $0x80] sm:$0x1] %v830_v49  ;;  %v1288_v56 = vrot.slane %v1286_v47, 4  ;;  %v1295_v57 = vshll.u32 %v1046_v46, 16  ;;  %v1560_v3 = vld [vmem:[#allocation2 + $0x6c] sm:$0xe] }
  0xc6   : > { %v1284_v51 = vsel %vm12872_vm7, %v1279_v2, %v1283_v28  ;;  %v10476_v61 = vcombine.low %v1691_v37, %v1694_v44  ;;  %v1299_v58 = vshrl.u32 %v1046_v46, 16  ;;  %v1291_v63 = vrot.slane %v1289_v54, 5  ;;  %v1561_v7 = vld [vmem:[#allocation2 + $0x70] sm:$0xf]  ;;  %v1562_v8 = vld [vmem:[#allocation2 + $0x74] sm:$0x1]  ;;  %11367 = vmatpush3.bf16.msra.mxu1 %v12283_v20 }
  0xc7   : > { %v10444_v55 = vcombine.low %v1274_v50, %v1284_v51  ;;  %v1305_v0 = vshll.u32 %v1047_v18, 16  ;;  %v1297_v4 = vrot.slane %v1295_v57, 5  ;;  %v10461_v11 = vrot.slane %v1560_v3, 9  ;;  %v1048_v13 = vld [vmem:[#allocation2 + $0x78] sm:$0xf]  ;;  %v12250_v38 = vld [vmem:[#allocation2 + $0x6c] sm:$0xff]  }
  0xc8   : > { %4698 = vmatmul.mubr.bf16.gmra.mrb[32].mxu1 %v10476_v61  ;;  %v1301_v5 = vrot.slane %v1299_v58, 4  ;;  %v1292_v9 = vor.u32 %v1291_v63, %v1288_v56  ;;  %v1697_v12 = vrot.slane %v1561_v7, 5  ;;  %v1700_v17 = vrot.slane %v1562_v8, 5  ;;  %v421_v24 = vld [vmem:[%s12868_s17 + $0x54] sm:$0xf]  ;;  %v12284_v26 = vld [vmem:[%s15805_s1 + $0x1f8] sm:$0xff]  }
  0xc9   : > { %4536 = vmatprep.mubr.bf16.mxu0 %v10444_v55  ;;  %v1307_v10 = vrot.slane %v1305_v0, 5  ;;  %v1310_v59 = vshrl.u32 %v1048_v13, 16  ;;  %v1313_v19 = vshll.u32 %v1048_v13, 16  ;;  %v832_v30 = vld [vmem:[#allocation2 + $0x84] sm:$0xf]  ;;  %11368 = vmatprep.subr.bf16.mxu1 %v12284_v26  ;;  %v12285_v42 = vld [vmem:[%s15805_s1 + $0x1b8] sm:$0xff]   ;;  %v611_v47 = vor.u32 %v609_v36, %v13207_v25 }
  0xca   : > { %4537 = vmatmul.mubr.bf16.gmra.mrb[32].mxu0 %v12246_v53  ;;  %v1302_v15 = vor.u32 %v1301_v5, %v1297_v4  ;;  %v1293_v21 = vrot.slane %v1292_v9, 4  ;;  %v1698_v22 = vsel %vm12912_vm13, %v10461_v11, %v1697_v12  ;;  %v1699_v23 = vrot.slane %v1697_v12, 4  ;;  %v12251_v28 = vld [vmem:[#allocation2 + $0x78] sm:$0xff]   ;;  %v13228_v50 = vld [vmem:[%s15805_s1 + $0x200] sm:$0xff]   ;;  %v836_v36 = vld [vmem:[#allocation2 + $0x8c] sm:$0x1]  ;;  %11369 = vmatpush3.bf16.msra.mxu1 %v12285_v42 }
  0xcb   : > { %v1049_v29 = vld [vmem:[#allocation2 + $0x7c] sm:$0xf]  ;;  %v1312_v32 = vrot.slane %v1310_v59, 4  ;;  %v1315_v35 = vrot.slane %v1313_v19, 5  ;;  %4705 = vmatprep.mubr.bf16.mxu1 %v12251_v28  ;;  %v422_v2 = vld [vmem:[%s12868_s17 + $0x58] sm:$0xf]  ;;  %v833_v6 = vsel %vm12889_vm11, %v611_v47, %v832_v30  ;;  %11979 = vmatprep.subr.bf16.mxu0 %v13228_v50 }
  0xcc   : > { %v1303_v27 = vrot.slane %v1302_v15, 4  ;;  %v1298_v31 = vsel %vm12872_vm7, %v1293_v21, %v1297_v4  ;;  %v1701_v33 = vsel %vm12912_vm13, %v1699_v23, %v1700_v17  ;;  %v1050_v34 = vld [vmem:[#allocation2 + $0x80] sm:$0x1]  ;;  %v1319_v40 = vshll.u32 %v1049_v29, 16  ;;  %v1563_v48 = vld [vmem:[#allocation2 + $0x78] sm:$0xe] }
  0xcd   : > { %v10477_v39 = vcombine.low %v1698_v22, %v1701_v33  ;;  %v1323_v41 = vshrl.u32 %v1049_v29, 16  ;;  %v1316_v44 = vor.u32 %v1315_v35, %v1312_v32  ;;  %v1329_v46 = vshll.u32 %v1050_v34, 16  ;;  %v1564_v49 = vld [vmem:[#allocation2 + $0x7c] sm:$0xf]  ;;  %v1565_v18 = vld [vmem:[#allocation2 + $0x80] sm:$0x1] }
  0xce   : > { %v1308_v37 = vsel %vm12872_vm7, %v1303_v27, %v1307_v10  ;;  %v1321_v51 = vrot.slane %v1319_v40, 5  ;;  %v614_v61 = vshrl.u32 %v421_v24, 16  ;;  %v612_v55 = vrot.slane %v13207_v25, 4  ;;  %v423_v57 = vld [vmem:[%s12868_s17 + $0x5c] sm:$0xf] }
  0xcf   : > { %v10445_v43 = vcombine.low %v1298_v31, %v1308_v37  ;;  %v1325_v53 = vrot.slane %v1323_v41, 4  ;;  %v1317_v54 = vrot.slane %v1316_v44, 4  ;;  %v617_v56 = vshll.u32 %v421_v24, 16  ;;  %834 = vst [vmem:[#allocation2 + $0x84] sm:$0xf] %v833_v6  ;;  %v12252_v20 = vld [vmem:[#allocation2 + $0x78] sm:$0xff]  }
  0xd0   : > { %4706 = vmatmul.mubr.bf16.gmra.mrb[36].mxu1 %v10477_v39  ;;  %v1331_v62 = vrot.slane %v1329_v46, 5  ;;  %v616_v63 = vrot.slane %v614_v61, 7  ;;  %v1704_v0 = vrot.slane %v1564_v49, 5  ;;  %v10462_v4 = vrot.slane %v1563_v48, 9  ;;  %v424_v12 = vld [vmem:[%s12868_s17 + $0x60] sm:$0xf] }
  0xd1   : > { %4544 = vmatprep.mubr.bf16.mxu0 %v10445_v43  ;;  %v1326_v58 = vor.u32 %v1325_v53, %v1321_v51  ;;  %v1322_v3 = vsel %vm12872_vm7, %v1317_v54, %v1321_v51  ;;  %v623_v5 = vshrl.u32 %v422_v2, 16  ;;  %v626_v7 = vshll.u32 %v422_v2, 16  ;;  %v839_v59 = vld [vmem:[#allocation2 + $0x90] sm:$0xf]  ;;  %v843_v26 = vld [vmem:[#allocation2 + $0x98] sm:$0x1] }
  0xd2   : > { %4545 = vmatmul.mubr.bf16.gmra.mrb[36].mxu0 %v12250_v38  ;;  %v619_v9 = vor.u32 %v617_v56, %v616_v63  ;;  %v621_v10 = vrot.slane %v616_v63, 4  ;;  %v1707_v11 = vrot.slane %v1565_v18, 5  ;;  %v1706_v13 = vrot.slane %v1704_v0, 4  ;;  %v425_v27 = vld [vmem:[%s12868_s17 + $0x64] sm:$0xf] }
  0xd3   : > { %v1327_v8 = vrot.slane %v1326_v58, 4  ;;  %v625_v14 = vrot.slane %v623_v5, 7  ;;  %v631_v15 = vshrl.u32 %v423_v57, 16  ;;  %v634_v17 = vshll.u32 %v423_v57, 16  ;;  %v846_v41 = vld [vmem:[#allocation2 + $0x9c] sm:$0xf] }
  0xd4   : > { %v620_v21 = vsel %vm12883_vm10, %v612_v55, %v619_v9  ;;  %v837_v22 = vsel %vm12895_vm12, %v621_v10, %v836_v36  ;;  %v640_v23 = vshrl.u32 %v424_v12, 16  ;;  %v643_v31 = vshll.u32 %v424_v12, 16  ;;  %v850_v54 = vld [vmem:[#allocation2 + $0xa4] sm:$0x1] }
  0xd5   : > { %v1332_v19 = vsel %vm12872_vm7, %v1327_v8, %v1331_v62  ;;  %835 = vst.msk [vmem:[#allocation2 + $0x88] sm:$0xf] %vm756_vm5, %v620_v21  ;;  %838 = vst [vmem:[#allocation2 + $0x8c] sm:$0x1] %v837_v22  ;;  %v628_v25 = vor.u32 %v626_v7, %v625_v14  ;;  %v629_v28 = vrot.slane %v625_v14, 4  ;;  %v633_v29 = vrot.slane %v631_v15, 7 }
  0xd6   : > { %v10446_v24 = vcombine.low %v1322_v3, %v1332_v19  ;;  %v642_v30 = vrot.slane %v640_v23, 7  ;;  %v1705_v33 = vsel %vm12912_vm13, %v10462_v4, %v1704_v0  ;;  %v1708_v34 = vsel %vm12912_vm13, %v1706_v13, %v1707_v11  ;;  %v1051_v32 = vld [vmem:[#allocation2 + $0x84] sm:$0xf] }
  0xd7   : > { %v840_v35 = vsel %vm12889_vm11, %v628_v25, %v839_v59  ;;  %v1334_v37 = vshrl.u32 %v1051_v32, 16  ;;  %v1337_v38 = vshll.u32 %v1051_v32, 16  ;;  %v636_v39 = vor.u32 %v634_v17, %v633_v29  ;;  %v1566_v2 = vld [vmem:[#allocation2 + $0x84] sm:$0xe] }
  0xd8   : > { %4552 = vmatprep.mubr.bf16.mxu0 %v10446_v24  ;;  %v638_v40 = vrot.slane %v633_v29, 4  ;;  %841 = vst [vmem:[#allocation2 + $0x90] sm:$0xf] %v840_v35  ;;  %v645_v42 = vor.u32 %v643_v31, %v642_v30  ;;  %v646_v43 = vrot.slane %v642_v30, 4  ;;  %v648_v44 = vshrl.u32 %v425_v27, 16 }
  0xd9   : > { %v1336_v46 = vrot.slane %v1334_v37, 4  ;;  %v1339_v47 = vrot.slane %v1337_v38, 5  ;;  %v637_v48 = vsel %vm12883_vm10, %v629_v28, %v636_v39  ;;  %v10478_v51 = vcombine.low %v1705_v33, %v1708_v34 }
  0xda   : > { %4553 = vmatmul.mubr.bf16.gmra.mrb[40].mxu0 %v12252_v20  ;;  %v844_v49 = vsel %vm12895_vm12, %v638_v40, %v843_v26  ;;  %842 = vst.msk [vmem:[#allocation2 + $0x94] sm:$0xf] %vm756_vm5, %v637_v48  ;;  %v650_v53 = vrot.slane %v648_v44, 7  ;;  %v651_v61 = vshll.u32 %v425_v27, 16  ;;  %v847_v18 = vsel %vm12889_vm11, %v645_v42, %v846_v41 }
  0xdb   : > { %845 = vst [vmem:[#allocation2 + $0x98] sm:$0x1] %v844_v49  ;;  %v1340_v6 = vor.u32 %v1339_v47, %v1336_v46  ;;  %848 = vst [vmem:[#allocation2 + $0x9c] sm:$0xf] %v847_v18  ;;  %v10463_v4 = vrot.slane %v1566_v2, 9 }
  0xdc   : > { %v12254_v55 = vld [vmem:[#allocation2 + $0x84] sm:$0xff]   ;;  %v1053_v36 = vld [vmem:[#allocation2 + $0x8c] sm:$0x1]  ;;  %v653_v62 = vor.u32 %v651_v61, %v650_v53  ;;  %v655_v5 = vrot.slane %v650_v53, 4 }
  0xdd   : > { %v1052_v56 = vld [vmem:[#allocation2 + $0x88] sm:$0xf]  ;;  %4713 = vmatprep.mubr.bf16.mxu1 %v12254_v55  ;;  %v1341_v63 = vrot.slane %v1340_v6, 4  ;;  %v1353_v0 = vshll.u32 %v1053_v36, 16  ;;  %v1568_v9 = vld [vmem:[#allocation2 + $0x8c] sm:$0x1] }
  0xde   : > { %v1343_v57 = vshll.u32 %v1052_v56, 16  ;;  %v1347_v58 = vshrl.u32 %v1052_v56, 16  ;;  %v1567_v3 = vld [vmem:[#allocation2 + $0x88] sm:$0xf]  ;;  %4714 = vmatmul.mubr.bf16.gmra.mrb[40].mxu1 %v10478_v51  ;;  %v654_v10 = vsel %vm12883_vm10, %v646_v43, %v653_v62  ;;  %v1714_v13 = vrot.slane %v1568_v9, 5 }
  0xdf   : > { %v1355_v11 = vrot.slane %v1353_v0, 5  ;;  %v1711_v12 = vrot.slane %v1567_v3, 5  ;;  %v1054_v14 = vld [vmem:[#allocation2 + $0x90] sm:$0xf]  ;;  %849 = vst.msk [vmem:[#allocation2 + $0xa0] sm:$0xf] %vm756_vm5, %v654_v10  ;;  %v851_v15 = vsel %vm12895_vm12, %v655_v5, %v850_v54 }
  0xe0   : > { %v1345_v7 = vrot.slane %v1343_v57, 5  ;;  %v1349_v8 = vrot.slane %v1347_v58, 4  ;;  %v1358_v59 = vshrl.u32 %v1054_v14, 16  ;;  %v1361_v19 = vshll.u32 %v1054_v14, 16  ;;  %v1569_v20 = vld [vmem:[#allocation2 + $0x90] sm:$0xe] }
  0xe1   : > { %852 = vst [vmem:[#allocation2 + $0xa4] sm:$0x1] %v851_v15  ;;  %v12257_v22 = vld [vmem:[#allocation2 + $0x90] sm:$0xff]   ;;  %v1712_v23 = vsel %vm12912_vm13, %v10463_v4, %v1711_v12  ;;  %v1713_v24 = vrot.slane %v1711_v12, 4  ;;  %v10464_v32 = vrot.slane %v1569_v20, 9  ;;  %v12256_v37 = vld [vmem:[#allocation2 + $0x84] sm:$0xff]  }
  0xe2   : > { %v1350_v17 = vor.u32 %v1349_v8, %v1345_v7  ;;  %v1346_v21 = vsel %vm12872_vm7, %v1341_v63, %v1345_v7  ;;  %v1055_v25 = vld [vmem:[#allocation2 + $0x94] sm:$0xf]  ;;  %v1056_v27 = vld [vmem:[#allocation2 + $0x98] sm:$0x1]  ;;  %v1360_v28 = vrot.slane %v1358_v59, 4  ;;  %v1363_v29 = vrot.slane %v1361_v19, 5  ;;  %4721 = vmatprep.mubr.bf16.mxu1 %v12257_v22 }
  0xe3   : > { %v1367_v30 = vshll.u32 %v1055_v25, 16  ;;  %v1715_v31 = vsel %vm12912_vm13, %v1713_v24, %v1714_v13  ;;  %v1371_v33 = vshrl.u32 %v1055_v25, 16  ;;  %v1377_v34 = vshll.u32 %v1056_v27, 16  ;;  %v1570_v41 = vld [vmem:[#allocation2 + $0x94] sm:$0xf] }
  0xe4   : > { %v1351_v26 = vrot.slane %v1350_v17, 4  ;;  %v10479_v38 = vcombine.low %v1712_v23, %v1715_v31  ;;  %v1364_v39 = vor.u32 %v1363_v29, %v1360_v28  ;;  %v1571_v43 = vld [vmem:[#allocation2 + $0x98] sm:$0x1]  ;;  %v1718_v44 = vrot.slane %v1570_v41, 5  ;;  %v1057_v18 = vld [vmem:[#allocation2 + $0x9c] sm:$0xf] }
  0xe5   : > { %v1369_v40 = vrot.slane %v1367_v30, 5  ;;  %v1373_v42 = vrot.slane %v1371_v33, 4  ;;  %v1721_v48 = vrot.slane %v1571_v43, 5  ;;  %v1379_v51 = vrot.slane %v1377_v34, 5  ;;  %v12258_v13 = vld [vmem:[#allocation2 + $0x90] sm:$0xff]  }
  0xe6   : > { %v1356_v35 = vsel %vm12872_vm7, %v1351_v26, %v1355_v11  ;;  %4722 = vmatmul.mubr.bf16.gmra.mrb[44].mxu1 %v10479_v38  ;;  %v1365_v46 = vrot.slane %v1364_v39, 4  ;;  %v12260_v47 = vld [vmem:[#allocation2 + $0x9c] sm:$0xff]   ;;  %v1719_v53 = vsel %vm12912_vm13, %v10464_v32, %v1718_v44  ;;  %v1720_v61 = vrot.slane %v1718_v44, 4  ;;  %v426_v11 = vld [vmem:[%s12868_s17 + $0x68] sm:$0xf] }
  0xe7   : > { %v10447_v2 = vcombine.low %v1346_v21, %v1356_v35  ;;  %v1374_v49 = vor.u32 %v1373_v42, %v1369_v40  ;;  %v1058_v54 = vld [vmem:[#allocation2 + $0xa0] sm:$0xf]  ;;  %4729 = vmatprep.mubr.bf16.mxu1 %v12260_v47  ;;  %v1382_v6 = vshrl.u32 %v1057_v18, 16  ;;  %v1385_v36 = vshll.u32 %v1057_v18, 16  ;;  %v427_v15 = vld [vmem:[%s12868_s17 + $0x6c] sm:$0xf] }
  0xe8   : > { %v1370_v55 = vsel %vm12872_vm7, %v1365_v46, %v1369_v40  ;;  %v1059_v56 = vld [vmem:[#allocation2 + $0xa4] sm:$0x1]  ;;  %v1391_v57 = vshll.u32 %v1058_v54, 16  ;;  %v1722_v62 = vsel %vm12912_vm13, %v1720_v61, %v1721_v48  ;;  %v1395_v63 = vshrl.u32 %v1058_v54, 16  ;;  %v853_v22 = vld [vmem:[#allocation2 + $0xa8] sm:$0xf] }
  0xe9   : > { %4560 = vmatprep.mubr.bf16.mxu0 %v10447_v2  ;;  %v1375_v58 = vrot.slane %v1374_v49, 4  ;;  %v1401_v0 = vshll.u32 %v1059_v56, 16  ;;  %v10480_v3 = vcombine.low %v1719_v53, %v1722_v62  ;;  %v1384_v4 = vrot.slane %v1382_v6, 4  ;;  %v1572_v23 = vld [vmem:[#allocation2 + $0x9c] sm:$0xe] }
  0xea   : > { %4561 = vmatmul.mubr.bf16.gmra.mrb[44].mxu0 %v12256_v37  ;;  %v1387_v5 = vrot.slane %v1385_v36, 5  ;;  %v1393_v7 = vrot.slane %v1391_v57, 5  ;;  %v1397_v9 = vrot.slane %v1395_v63, 4  ;;  %v657_v17 = vshrl.u32 %v426_v11, 16  ;;  %v1573_v24 = vld [vmem:[#allocation2 + $0xa0] sm:$0xf] }
  0xeb   : > { %v1380_v8 = vsel %vm12872_vm7, %v1375_v58, %v1379_v51  ;;  %v1403_v10 = vrot.slane %v1401_v0, 5  ;;  %v660_v59 = vshll.u32 %v426_v11, 16  ;;  %v665_v20 = vshrl.u32 %v427_v15, 16  ;;  %v1574_v27 = vld [vmem:[#allocation2 + $0xa4] sm:$0x1]  ;;  %v12266_v46 = vld [vmem:[#allocation2 + $0x9c] sm:$0xff]  }
  0xec   : > { %v10448_v12 = vcombine.low %v1370_v55, %v1380_v8  ;;  %v1388_v14 = vor.u32 %v1387_v5, %v1384_v4  ;;  %v1398_v19 = vor.u32 %v1397_v9, %v1393_v7  ;;  %v668_v21 = vshll.u32 %v427_v15, 16  ;;  %v857_v42 = vld [vmem:[#allocation2 + $0xb0] sm:$0x1]  ;;  %v429_v48 = vld [vmem:[%s12868_s17 + $0x74] sm:$0xf] }
  0xed   : > { %v659_v26 = vrot.slane %v657_v17, 7  ;;  %v1725_v28 = vrot.slane %v1573_v24, 5  ;;  %v667_v30 = vrot.slane %v665_v20, 7  ;;  %v10465_v31 = vrot.slane %v1572_v23, 9  ;;  %v428_v47 = vld [vmem:[%s12868_s17 + $0x70] sm:$0xf] }
  0xee   : > { %4568 = vmatprep.mubr.bf16.mxu0 %v10448_v12  ;;  %4730 = vmatmul.mubr.bf16.gmra.mrb[48].mxu1 %v10480_v3  ;;  %v1389_v25 = vrot.slane %v1388_v14, 4  ;;  %v1399_v29 = vrot.slane %v1398_v19, 4  ;;  %v1728_v35 = vrot.slane %v1574_v27, 5  ;;  %v674_v49 = vshrl.u32 %v428_v47, 16  ;;  %v860_v18 = vld [vmem:[#allocation2 + $0xb4] sm:$0xf] }
  0xef   : > { %v662_v34 = vor.u32 %v660_v59, %v659_v26  ;;  %v663_v32 = vrot.slane %v659_v26, 4  ;;  %v670_v38 = vor.u32 %v668_v21, %v667_v30  ;;  %v672_v39 = vrot.slane %v667_v30, 4  ;;  %v864_v36 = vld [vmem:[#allocation2 + $0xbc] sm:$0x1]  ;;  %v430_v27 = vld [vmem:[%s12868_s17 + $0x78] sm:$0xf] }
  0xf0   : > { %v1394_v33 = vsel %vm12872_vm7, %v1389_v25, %v1393_v7  ;;  %v1404_v37 = vsel %vm12872_vm7, %v1399_v29, %v1403_v10  ;;  %v1727_v40 = vrot.slane %v1725_v28, 4  ;;  %v677_v51 = vshll.u32 %v428_v47, 16 }
  0xf1   : > { %v10449_v41 = vcombine.low %v1394_v33, %v1404_v37  ;;  %v854_v2 = vsel %vm12889_vm11, %v662_v34, %v853_v22  ;;  %v671_v43 = vsel %vm12883_vm10, %v663_v32, %v670_v38  ;;  %v858_v44 = vsel %vm12895_vm12, %v672_v39, %v857_v42 }
  0xf2   : > { %4569 = vmatmul.mubr.bf16.gmra.mrb[48].mxu0 %v12258_v13  ;;  %855 = vst [vmem:[#allocation2 + $0xa8] sm:$0xf] %v854_v2  ;;  %856 = vst.msk [vmem:[#allocation2 + $0xac] sm:$0xf] %vm756_vm5, %v671_v43  ;;  %v682_v53 = vshrl.u32 %v429_v48, 16  ;;  %v685_v61 = vshll.u32 %v429_v48, 16  ;;  %v1726_v54 = vsel %vm12912_vm13, %v10465_v31, %v1725_v28  ;;  %v1729_v55 = vsel %vm12912_vm13, %v1727_v40, %v1728_v35 }
  0xf3   : > { %4576 = vmatprep.mubr.bf16.mxu0 %v10449_v41  ;;  %859 = vst [vmem:[#allocation2 + $0xb0] sm:$0x1] %v858_v44  ;;  %v676_v56 = vrot.slane %v674_v49, 7  ;;  %v10481_v0 = vcombine.low %v1726_v54, %v1729_v55  ;;  %v431_v31 = vld [vmem:[%s12868_s17 + $0x7c] sm:$0xf]  ;;  %v691_v33 = vshrl.u32 %v430_v27, 16 }
  0xf4   : > { %v684_v6 = vrot.slane %v682_v53, 7  ;;  %v694_v35 = vshll.u32 %v430_v27, 16  ;;  %v699_v37 = vshrl.u32 %v431_v31, 16  ;;  %v702_v2 = vshll.u32 %v431_v31, 16  ;;  %s285_s17 = scalar_lea.vmem [#allocation8], %s284_s29 }
  0xf5   : > { %v679_v57 = vor.u32 %v677_v51, %v676_v56  ;;  %v680_v58 = vrot.slane %v676_v56, 4  ;;  %v693_v41 = vrot.slane %v691_v33, 7  ;;  %s10345_s13 = sshll.u32 %s285_s17, 4  ;;  %s15764_s13 = int_to_ptr.vmem [resolvable:$true] %s10345_s13 }
  0xf6   : > { %v687_v62 = vor.u32 %v685_v61, %v684_v6  ;;  %v689_v63 = vrot.slane %v684_v6, 4  ;;  %v13312_v44 = vrot.slane %v699_v37, 7  ;;  %s12460_s20 = scalar_lea.vmem %s15764_s13, 16  ;;  %p12467_p2 = scmp.lt.s32.totalorder %s15764_s13, %s12465_s21 }
  0xf7   : > { %v861_v9 = vsel %vm12889_vm11, %v679_v57, %v860_v18  ;;  %v696_v18 = vor.u32 %v694_v35, %v693_v41  ;;  %v1969_v35 = vld [vmem:[#allocation2 + $0x10] sm:$0xf]  ;;  %p12461_p6 = scmp.ne.s32.totalorder %s15764_s13, %s12460_s20  ;;  %p12468_p3 = scmp.lt.s32.totalorder %s12466_s22, %s12460_s20 }
  0xf8   : > { %v688_v8 = vsel %vm12883_vm10, %v680_v58, %v687_v62  ;;  %v865_v10 = vsel %vm12895_vm12, %v689_v63, %v864_v36  ;;  %862 = vst [vmem:[#allocation2 + $0xb4] sm:$0xf] %v861_v9  ;;  %v697_v58 = vrot.slane %v693_v41, 4  ;;  %v704_v62 = vor.u32 %v702_v2, %v13312_v44 }
  0xf9   : > { %v1060_v3 = vld [vmem:[#allocation2 + $0xa8] sm:$0xf]  ;;  %v1061_v5 = vld [vmem:[#allocation2 + $0xac] sm:$0xf]  ;;  %863 = vst.msk [vmem:[#allocation2 + $0xb8] sm:$0xf] %vm756_vm5, %v688_v8  ;;  %p12462_p10 = pnand %p12461_p6, %p15971_p9  ;;  %p12469_p4 = por %p12468_p3, %p12467_p2 }
  0xfa   : > { %4577 = vmatmul.mubr.bf16.gmra.mrb[52].mxu0 %v12266_v46  ;;  %v12267_v4 = vld [vmem:[#allocation2 + $0xa8] sm:$0xff]   ;;  %v1406_v7 = vshrl.u32 %v1060_v3, 16  ;;  %v1062_v11 = vld [vmem:[#allocation2 + $0xb0] sm:$0x1]  ;;  %v1409_v12 = vshll.u32 %v1060_v3, 16  ;;  %v1415_v13 = vshll.u32 %v1061_v5, 16  ;;  %v705_v8 = vsel %vm12883_vm10, %v697_v58, %v704_v62 }
  0xfb   : > { %v1419_v14 = vshrl.u32 %v1061_v5, 16  ;;  %866 = vst [vmem:[#allocation2 + $0xbc] sm:$0x1] %v865_v10  ;;  %4737 = vmatprep.mubr.bf16.mxu1 %v12267_v4  ;;  %v1425_v17 = vshll.u32 %v1062_v11, 16  ;;  %v1575_v59 = vld [vmem:[#allocation2 + $0xa8] sm:$0xe]  ;;  %p12463_p12 = pneg %p12462_p10 }
  0xfc   : > { %v1408_v15 = vrot.slane %v1406_v7, 4  ;;  %4738 = vmatmul.mubr.bf16.gmra.mrb[52].mxu1 %v10481_v0  ;;  %v1411_v19 = vrot.slane %v1409_v12, 5  ;;  %v1417_v20 = vrot.slane %v1415_v13, 5  ;;  %v1576_v22 = vld [vmem:[#allocation2 + $0xac] sm:$0xf]  ;;  %v10466_v23 = vrot.slane %v1575_v59, 9 }
  0xfd   : > { %v1421_v21 = vrot.slane %v1419_v14, 4  ;;  %v1427_v24 = vrot.slane %v1425_v17, 5  ;;  %v1577_v25 = vld [vmem:[#allocation2 + $0xb0] sm:$0x1]  ;;  %v1732_v26 = vrot.slane %v1576_v22, 5  ;;  %v12272_v40 = vld [vmem:[#allocation2 + $0xa8] sm:$0xff]   ;;  %p12470_p7 = pnand %p12469_p4, %p12463_p12 }
  0xfe   : > { %v1412_v28 = vor.u32 %v1411_v19, %v1408_v15  ;;  %v1735_v30 = vrot.slane %v1577_v25, 5  ;;  %v867_v46 = vld [vmem:[#allocation2 + $0xc0] sm:$0xf]  ;;  %870 = vst.msk [vmem:[#allocation2 + $0xc4] sm:$0xf] %vm756_vm5, %v705_v8  ;;  %v2026_v41 = vshll.u32 %v1969_v35, 16 }
  0xff   : > { %v1422_v29 = vor.u32 %v1421_v21, %v1417_v20  ;;  %v1733_v34 = vsel %vm12912_vm13, %v10466_v23, %v1732_v26  ;;  %v1734_v32 = vrot.slane %v1732_v26, 4  ;;  %v1063_v51 = vld [vmem:[#allocation2 + $0xb4] sm:$0xf]  ;;  %v868_v9 = vsel %vm12889_vm11, %v696_v18, %v867_v46  ;;  %v2480_v21 = vld [vmem:[#allocation2 + $0xc] sm:$0xe] }
 0x100   : > { %v1413_v38 = vrot.slane %v1412_v28, 4  ;;  %v12274_v42 = vld [vmem:[#allocation2 + $0xb4] sm:$0xff]   ;;  %v1430_v55 = vshrl.u32 %v1063_v51, 16  ;;  %v1433_v56 = vshll.u32 %v1063_v51, 16  ;;  %869 = vst [vmem:[#allocation2 + $0xc0] sm:$0xf] %v868_v9 }
 0x101   : > { %v1423_v39 = vrot.slane %v1422_v29, 4  ;;  %v1736_v43 = vsel %vm12912_vm13, %v1734_v32, %v1735_v30  ;;  %v1064_v53 = vld [vmem:[#allocation2 + $0xb8] sm:$0xf]  ;;  %4745 = vmatprep.mubr.bf16.mxu1 %v12274_v42  ;;  %v1578_v4 = vld [vmem:[#allocation2 + $0xb4] sm:$0xe]  ;;  %v2581_v28 = vrot.slane %v2482_v60, 5 }
 0x102   : > { %v1418_v47 = vsel %vm12872_vm7, %v1413_v38, %v1417_v20  ;;  %v10482_v49 = vcombine.low %v1733_v34, %v1736_v43  ;;  %v1065_v61 = vld [vmem:[#allocation2 + $0xbc] sm:$0x1]  ;;  %v1439_v6 = vshll.u32 %v1064_v53, 16  ;;  %v1443_v36 = vshrl.u32 %v1064_v53, 16  ;;  %v1579_v10 = vld [vmem:[#allocation2 + $0xb8] sm:$0xf] }
 0x103   : > { %v1428_v48 = vsel %vm12872_vm7, %v1423_v39, %v1427_v24  ;;  %v1449_v57 = vshll.u32 %v1065_v61, 16  ;;  %v1432_v63 = vrot.slane %v1430_v55, 4  ;;  %v1435_v0 = vrot.slane %v1433_v56, 5  ;;  %v1580_v11 = vld [vmem:[#allocation2 + $0xbc] sm:$0x1]  ;;  %v12280_v30 = vld [vmem:[#allocation2 + $0xb4] sm:$0xff]  }
 0x104   : > { %v10450_v54 = vcombine.low %v1418_v47, %v1428_v48  ;;  %4746 = vmatmul.mubr.bf16.gmra.mrb[56].mxu1 %v10482_v49  ;;  %v1441_v3 = vrot.slane %v1439_v6, 5  ;;  %v1445_v5 = vrot.slane %v1443_v36, 4  ;;  %v10467_v13 = vrot.slane %v1578_v4, 9  ;;  %v2481_v22 = vld [vmem:[#allocation2 + $0x10] sm:$0xf] }
 0x105   : > { %v1451_v7 = vrot.slane %v1449_v57, 5  ;;  %v1436_v12 = vor.u32 %v1435_v0, %v1432_v63  ;;  %v1739_v14 = vrot.slane %v1579_v10, 5  ;;  %v1742_v15 = vrot.slane %v1580_v11, 5  ;;  %v1968_v32 = vld [vmem:[#allocation2 + $0xc] sm:$0xf] }
 0x106   : > { %4584 = vmatprep.mubr.bf16.mxu0 %v10450_v54  ;;  %v1446_v17 = vor.u32 %v1445_v5, %v1441_v3  ;;  %v10516_v24 = vrot.slane %v2480_v21, 9  ;;  %v2578_v25 = vrot.slane %v2481_v22, 5  ;;  %v1970_v38 = vld [vmem:[#allocation2 + $0x14] sm:$0x1]  ;;  %v2017_v39 = vshrl.u32 %v1968_v32, 16 }
 0x107   : > { %4585 = vmatmul.mubr.bf16.gmra.mrb[56].mxu0 %v12272_v40  ;;  %v1437_v59 = vrot.slane %v1436_v12, 4  ;;  %v1740_v19 = vsel %vm12912_vm13, %v10467_v13, %v1739_v14  ;;  %v1741_v20 = vrot.slane %v1739_v14, 4  ;;  %v2020_v40 = vshll.u32 %v1968_v32, 16  ;;  %v12281_v2 = vld [vmem:[#allocation2 + $0xc0] sm:$0xff]   ;;  %v2913_v61 = vld [vmem:[#allocation2 + $0x18] sm:$0xf] }
 0x108   : > { %v1447_v23 = vrot.slane %v1446_v17, 4  ;;  %v2579_v33 = vsel %vm12912_vm13, %v10516_v24, %v2578_v25  ;;  %v2580_v34 = vrot.slane %v2578_v25, 4  ;;  %v2030_v43 = vshrl.u32 %v1969_v35, 16  ;;  %4753 = vmatprep.mubr.bf16.mxu1 %v12281_v2  ;;  %v2914_v54 = vld [vmem:[#allocation2 + $0x1c] sm:$0xf] }
 0x109   : > { %v1442_v26 = vsel %vm12872_vm7, %v1437_v59, %v1441_v3  ;;  %v1743_v27 = vsel %vm12912_vm13, %v1741_v20, %v1742_v15  ;;  %v2019_v47 = vrot.slane %v2017_v39, 4  ;;  %v2022_v48 = vrot.slane %v2020_v40, 5  ;;  %v2915_v55 = vld [vmem:[#allocation2 + $0x20] sm:$0x1]  ;;  %v2483_v9 = vld [vmem:[#allocation2 + $0x18] sm:$0xe] }
 0x10a   : > { %v1452_v29 = vsel %vm12872_vm7, %v1447_v23, %v1451_v7  ;;  %v10483_v31 = vcombine.low %v1740_v19, %v1743_v27  ;;  %v2582_v42 = vsel %vm12912_vm13, %v2580_v34, %v2581_v28  ;;  %v2028_v49 = vrot.slane %v2026_v41, 5  ;;  %v2484_v13 = vld [vmem:[#allocation2 + $0x1c] sm:$0xf]  ;;  %v2485_v14 = vld [vmem:[#allocation2 + $0x20] sm:$0x1]  ;;  %v12289_v27 = vld [vmem:[%s15805_s1 + $0x208] sm:$0xff]  }
 0x10b   : > { %v10451_v37 = vcombine.low %v1442_v26, %v1452_v29  ;;  %v10532_v46 = vcombine.low %v2579_v33, %v2582_v42  ;;  %v2032_v51 = vrot.slane %v2030_v43, 4  ;;  %v2036_v53 = vshll.u32 %v1970_v38, 16  ;;  %v1971_v21 = vld [vmem:[#allocation2 + $0x18] sm:$0xf]  ;;  %v1972_v22 = vld [vmem:[#allocation2 + $0x1c] sm:$0xf] }
 0x10c   : > { %4754 = vmatmul.mubr.bf16.gmra.mrb[60].mxu1 %v10483_v31  ;;  %v2023_v18 = vor.u32 %v2022_v48, %v2019_v47  ;;  %v2962_v56 = vshrl.u32 %v2913_v61, 16  ;;  %v2965_v6 = vshll.u32 %v2913_v61, 16  ;;  %v2971_v58 = vshll.u32 %v2914_v54, 16  ;;  %v1973_v24 = vld [vmem:[#allocation2 + $0x20] sm:$0x1]  ;;  %v12287_v32 = vld [vmem:[#allocation2 + $0x18] sm:$0xff]  }
 0x10d   : > { %4592 = vmatprep.mubr.bf16.mxu0 %v10451_v37  ;;  %v2033_v36 = vor.u32 %v2032_v51, %v2028_v49  ;;  %v2038_v57 = vrot.slane %v2036_v53, 5  ;;  %v2975_v62 = vshrl.u32 %v2914_v54, 16  ;;  %v2981_v4 = vshll.u32 %v2915_v55, 16  ;;  %v2916_v33 = vld [vmem:[#allocation2 + $0x24] sm:$0xf]  ;;  %v12292_v53 = vld [vmem:[%s15805_s1 + $0x210] sm:$0xff]  }
 0x10e   : > { %v2024_v63 = vrot.slane %v2023_v18, 4  ;;  %v2964_v0 = vrot.slane %v2962_v56, 4  ;;  %v2967_v3 = vrot.slane %v2965_v6, 5  ;;  %v2973_v7 = vrot.slane %v2971_v58, 5  ;;  %v2917_v39 = vld [vmem:[#allocation2 + $0x28] sm:$0xf] }
 0x10f   : > { %4593 = vmatmul.mubr.bf16.gmra.mrb[60].mxu0 %v12280_v30  ;;  %v2034_v5 = vrot.slane %v2033_v36, 4  ;;  %v2977_v8 = vrot.slane %v2975_v62, 4  ;;  %v2983_v12 = vrot.slane %v2981_v4, 5  ;;  %v10517_v15 = vrot.slane %v2483_v9, 9  ;;  %v2918_v43 = vld [vmem:[#allocation2 + $0x2c] sm:$0x1] }
 0x110   : > { %4794 = vmatprep.mubr.bf16.mxu0 %v10532_v46  ;;  %v2029_v10 = vsel %vm12872_vm7, %v2024_v63, %v2028_v49  ;;  %v2968_v11 = vor.u32 %v2967_v3, %v2964_v0  ;;  %v2585_v19 = vrot.slane %v2484_v13, 5  ;;  %v2588_v20 = vrot.slane %v2485_v14, 5  ;;  %v2486_v51 = vld [vmem:[#allocation2 + $0x24] sm:$0xe]  ;;  %v2487_v55 = vld [vmem:[#allocation2 + $0x28] sm:$0xf] }
 0x111   : > { %v2039_v17 = vsel %vm12872_vm7, %v2034_v5, %v2038_v57  ;;  %v2978_v59 = vor.u32 %v2977_v8, %v2973_v7  ;;  %v2041_v25 = vshrl.u32 %v1971_v21, 16  ;;  %v2044_v26 = vshll.u32 %v1971_v21, 16  ;;  %v2488_v58 = vld [vmem:[#allocation2 + $0x2c] sm:$0x1]  ;;  %v1974_v4 = vld [vmem:[#allocation2 + $0x24] sm:$0xf] }
 0x112   : > { %v10500_v23 = vcombine.low %v2029_v10, %v2039_v17  ;;  %v2969_v60 = vrot.slane %v2968_v11, 4  ;;  %v2586_v29 = vsel %vm12912_vm13, %v10517_v15, %v2585_v19  ;;  %v2587_v30 = vrot.slane %v2585_v19, 4  ;;  %v1975_v10 = vld [vmem:[#allocation2 + $0x28] sm:$0xf]  ;;  %v12295_v11 = vld [vmem:[%s15805_s1 + $0x218] sm:$0xff]  }
 0x113   : > { %v2979_v28 = vrot.slane %v2978_v59, 4  ;;  %v2050_v31 = vshll.u32 %v1972_v22, 16  ;;  %v2043_v35 = vrot.slane %v2041_v25, 4  ;;  %v2046_v37 = vrot.slane %v2044_v26, 5  ;;  %v1976_v15 = vld [vmem:[#allocation2 + $0x2c] sm:$0x1] }
 0x114   : > { %v2974_v34 = vsel %vm12872_vm7, %v2969_v60, %v2973_v7  ;;  %v2054_v38 = vshrl.u32 %v1972_v22, 16  ;;  %v2589_v41 = vsel %vm12912_vm13, %v2587_v30, %v2588_v20  ;;  %v2060_v42 = vshll.u32 %v1973_v24, 16  ;;  %v2919_v25 = vld [vmem:[#allocation2 + $0x30] sm:$0xf]  ;;  %v12298_v26 = vld [vmem:[%s15805_s1 + $0x220] sm:$0xff]  }
 0x115   : > { %v2984_v40 = vsel %vm12872_vm7, %v2979_v28, %v2983_v12  ;;  %v2052_v2 = vrot.slane %v2050_v31, 5  ;;  %v10533_v47 = vcombine.low %v2586_v29, %v2589_v41  ;;  %v2047_v48 = vor.u32 %v2046_v37, %v2043_v35  ;;  %v2920_v31 = vld [vmem:[#allocation2 + $0x34] sm:$0xf]  ;;  %v2921_v41 = vld [vmem:[#allocation2 + $0x38] sm:$0x1] }
 0x116   : > { %v10564_v46 = vcombine.low %v2974_v34, %v2984_v40  ;;  %v2056_v49 = vrot.slane %v2054_v38, 4  ;;  %v2062_v61 = vrot.slane %v2060_v42, 5  ;;  %v2986_v18 = vshrl.u32 %v2916_v33, 16  ;;  %v12288_v38 = vld [vmem:[#allocation2 + $0x24] sm:$0xff]   ;;  %v2489_v42 = vld [vmem:[#allocation2 + $0x30] sm:$0xe] }
 0x117   : > { %4795 = vmatmul.mubr.bf16.vlgmr.msra.gmra.mrb[64].mxu0 %v10500_v23  ;;  %v2989_v54 = vshll.u32 %v2916_v33, 16  ;;  %v2048_v56 = vrot.slane %v2047_v48, 4  ;;  %v2999_v36 = vshrl.u32 %v2917_v39, 16  ;;  %v3005_v57 = vshll.u32 %v2918_v43, 16 }
 0x118   : > { %11980 = vmatpush3.bf16.msra.mxu0 %v13228_v50  ;;  %v2995_v50 = vshll.u32 %v2917_v39, 16  ;;  %4955 = vmatprep.mubr.bf16.mxu1 %v10564_v46  ;;  %v2057_v6 = vor.u32 %v2056_v49, %v2052_v2  ;;  %v2988_v62 = vrot.slane %v2986_v18, 4  ;;  %v10518_v3 = vrot.slane %v2486_v51, 9  ;;  %v2490_v49 = vld [vmem:[#allocation2 + $0x34] sm:$0xf]  ;;  %v12301_v51 = vld [vmem:[%s15805_s1 + $0x228] sm:$0xff]  }
 0x119   : > { %11981 = vmatprep.subr.bf16.mxu0 %v12289_v27  ;;  %4802 = vmatprep.mubr.bf16.mxu0 %v10533_v47  ;;  %v2991_v63 = vrot.slane %v2989_v54, 5  ;;  %v2053_v5 = vsel %vm12872_vm7, %v2048_v56, %v2052_v2  ;;  %v3001_v8 = vrot.slane %v2999_v36, 4  ;;  %v3007_v9 = vrot.slane %v3005_v57, 5  ;;  %v1977_v57 = vld [vmem:[#allocation2 + $0x30] sm:$0xf] }
 0x11a   : > { %4956 = vmatmul.mubr.bf16.vlgmr.msra.gmra.mrb[64].mxu1 %v12287_v32  ;;  %v2997_v0 = vrot.slane %v2995_v50, 5  ;;  %v2058_v7 = vrot.slane %v2057_v6, 4  ;;  %v2592_v13 = vrot.slane %v2487_v55, 5  ;;  %v2595_v14 = vrot.slane %v2488_v58, 5  ;;  %v2491_v50 = vld [vmem:[#allocation2 + $0x38] sm:$0x1] }
 0x11b   : > { %v2992_v12 = vor.u32 %v2991_v63, %v2988_v62  ;;  %v2065_v17 = vshrl.u32 %v1974_v4, 16  ;;  %v2068_v20 = vshll.u32 %v1974_v4, 16  ;;  %v2074_v21 = vshll.u32 %v1975_v10, 16 }
 0x11c   : > { %11982 = vmatpush3.bf16.msra.mxu0 %v12289_v27  ;;  %v2063_v59 = vsel %vm12872_vm7, %v2058_v7, %v2062_v61  ;;  %v3002_v19 = vor.u32 %v3001_v8, %v2997_v0  ;;  %v2593_v60 = vsel %vm12912_vm13, %v10518_v3, %v2592_v13  ;;  %v2594_v24 = vrot.slane %v2592_v13, 4  ;;  %v1978_v3 = vld [vmem:[#allocation2 + $0x34] sm:$0xf]  ;;  %v1979_v13 = vld [vmem:[#allocation2 + $0x38] sm:$0x1] }
 0x11d   : > { %11983 = vmatprep.subr.bf16.mxu0 %v12292_v53  ;;  %v10501_v22 = vcombine.low %v2053_v5, %v2063_v59  ;;  %v2993_v23 = vrot.slane %v2992_v12, 4  ;;  %v2067_v28 = vrot.slane %v2065_v17, 4  ;;  %v2070_v29 = vrot.slane %v2068_v20, 5 }
 0x11e   : > { %v3003_v27 = vrot.slane %v3002_v19, 4  ;;  %v2076_v30 = vrot.slane %v2074_v21, 5  ;;  %v2596_v34 = vsel %vm12912_vm13, %v2594_v24, %v2595_v14  ;;  %v2078_v32 = vshrl.u32 %v1975_v10, 16  ;;  %v2923_v24 = vld [vmem:[#allocation2 + $0x40] sm:$0xf] }
 0x11f   : > { %4803 = vmatmul.mubr.bf16.gmra.mrb[68].mxu0 %v10501_v22  ;;  %v2998_v33 = vsel %vm12872_vm7, %v2993_v23, %v2997_v0  ;;  %v2084_v35 = vshll.u32 %v1976_v15, 16  ;;  %v10534_v39 = vcombine.low %v2593_v60, %v2596_v34  ;;  %v2071_v40 = vor.u32 %v2070_v29, %v2067_v28  ;;  %v2922_v15 = vld [vmem:[#allocation2 + $0x3c] sm:$0xf] }
 0x120   : > { %11984 = vmatpush3.bf16.msra.mxu0 %v12292_v53  ;;  %v3008_v37 = vsel %vm12872_vm7, %v3003_v27, %v3007_v9  ;;  %v3010_v2 = vshrl.u32 %v2919_v25, 16  ;;  %v2080_v46 = vrot.slane %v2078_v32, 4  ;;  %v3013_v48 = vshll.u32 %v2919_v25, 16  ;;  %v12304_v9 = vld [vmem:[%s15805_s1 + $0x230] sm:$0xff]  }
 0x121   : > { %11985 = vmatprep.subr.bf16.mxu0 %v12295_v11  ;;  %v10565_v43 = vcombine.low %v2998_v33, %v3008_v37  ;;  %v2086_v47 = vrot.slane %v2084_v35, 5  ;;  %4810 = vmatprep.mubr.bf16.mxu0 %v10534_v39  ;;  %v2072_v53 = vrot.slane %v2071_v40, 4  ;;  %v3019_v18 = vshll.u32 %v2920_v31, 16  ;;  %v2492_v35 = vld [vmem:[#allocation2 + $0x3c] sm:$0xe] }
 0x122   : > { %v3012_v61 = vrot.slane %v3010_v2, 4  ;;  %v3023_v54 = vshrl.u32 %v2920_v31, 16  ;;  %v2081_v55 = vor.u32 %v2080_v46, %v2076_v30  ;;  %v3015_v56 = vrot.slane %v3013_v48, 5  ;;  %v12307_v37 = vld [vmem:[%s15805_s1 + $0x238] sm:$0xff]   ;;  %v2493_v2 = vld [vmem:[#allocation2 + $0x40] sm:$0xf] }
 0x123   : > { %4963 = vmatprep.mubr.bf16.mxu1 %v10565_v43  ;;  %v3029_v6 = vshll.u32 %v2921_v41, 16  ;;  %v10519_v36 = vrot.slane %v2489_v42, 9  ;;  %v2077_v58 = vsel %vm12872_vm7, %v2072_v53, %v2076_v30  ;;  %v3021_v62 = vrot.slane %v3019_v18, 5  ;;  %v2924_v30 = vld [vmem:[#allocation2 + $0x44] sm:$0x1] }
 0x124   : > { %11986 = vmatpush3.bf16.msra.mxu0 %v12295_v11  ;;  %4964 = vmatmul.mubr.bf16.gmra.mrb[68].mxu1 %v12288_v38  ;;  %v3025_v63 = vrot.slane %v3023_v54, 4  ;;  %v2599_v0 = vrot.slane %v2490_v49, 5  ;;  %v2082_v4 = vrot.slane %v2081_v55, 4  ;;  %v3016_v5 = vor.u32 %v3015_v56, %v3012_v61  ;;  %v2494_v42 = vld [vmem:[#allocation2 + $0x44] sm:$0x1] }
 0x125   : > { %11987 = vmatprep.subr.bf16.mxu0 %v12298_v26  ;;  %v3031_v7 = vrot.slane %v3029_v6, 5  ;;  %v2602_v8 = vrot.slane %v2491_v50, 5  ;;  %v2089_v14 = vshrl.u32 %v1977_v57, 16  ;;  %v2092_v19 = vshll.u32 %v1977_v57, 16  ;;  %v1980_v49 = vld [vmem:[#allocation2 + $0x3c] sm:$0xf] }
 0x126   : > { %v3026_v10 = vor.u32 %v3025_v63, %v3021_v62  ;;  %v2600_v11 = vsel %vm12912_vm13, %v10519_v36, %v2599_v0  ;;  %v2601_v12 = vrot.slane %v2599_v0, 4  ;;  %v2087_v17 = vsel %vm12872_vm7, %v2082_v4, %v2086_v47  ;;  %v1981_v6 = vld [vmem:[#allocation2 + $0x40] sm:$0xf] }
 0x127   : > { %v3017_v59 = vrot.slane %v3016_v5, 4  ;;  %v2098_v20 = vshll.u32 %v1978_v3, 16  ;;  %v10502_v21 = vcombine.low %v2077_v58, %v2087_v17  ;;  %v2091_v60 = vrot.slane %v2089_v14, 4 }
 0x128   : > { %11988 = vmatpush3.bf16.msra.mxu0 %v12298_v26  ;;  %v3027_v22 = vrot.slane %v3026_v10, 4  ;;  %v2603_v23 = vsel %vm12912_vm13, %v2601_v12, %v2602_v8  ;;  %v12290_v26 = vld [vmem:[#allocation2 + $0x30] sm:$0xff]   ;;  %v2094_v28 = vrot.slane %v2092_v19, 5  ;;  %v2102_v33 = vshrl.u32 %v1978_v3, 16 }
 0x129   : > { %11989 = vmatprep.subr.bf16.mxu0 %v12301_v51  ;;  %v3022_v25 = vsel %vm12872_vm7, %v3017_v59, %v3021_v62  ;;  %v10535_v27 = vcombine.low %v2600_v11, %v2603_v23  ;;  %v2100_v29 = vrot.slane %v2098_v20, 5  ;;  %4811 = vmatmul.mubr.bf16.gmra.mrb[72].mxu0 %v10502_v21  ;;  %v2108_v34 = vshll.u32 %v1979_v13, 16  ;;  %v1982_v13 = vld [vmem:[#allocation2 + $0x44] sm:$0x1]  ;;  %v2926_v21 = vld [vmem:[#allocation2 + $0x4c] sm:$0xf] }
 0x12a   : > { %v3032_v31 = vsel %vm12872_vm7, %v3027_v22, %v3031_v7  ;;  %v3034_v32 = vshrl.u32 %v2922_v15, 16  ;;  %v2095_v39 = vor.u32 %v2094_v28, %v2091_v60  ;;  %v3037_v40 = vshll.u32 %v2922_v15, 16  ;;  %v2925_v15 = vld [vmem:[#allocation2 + $0x48] sm:$0xf]  ;;  %v12291_v23 = vld [vmem:[#allocation2 + $0x3c] sm:$0xff]  }
 0x12b   : > { %v10566_v38 = vcombine.low %v3022_v25, %v3032_v31  ;;  %4818 = vmatprep.mubr.bf16.mxu0 %v10535_v27  ;;  %v3043_v41 = vshll.u32 %v2923_v24, 16  ;;  %v2104_v43 = vrot.slane %v2102_v33, 4  ;;  %v2110_v46 = vrot.slane %v2108_v34, 5  ;;  %v2495_v31 = vld [vmem:[#allocation2 + $0x48] sm:$0xe] }
 0x12c   : > { %11990 = vmatpush3.bf16.msra.mxu0 %v12301_v51  ;;  %v3036_v47 = vrot.slane %v3034_v32, 4  ;;  %v3047_v48 = vshrl.u32 %v2923_v24, 16  ;;  %v2096_v51 = vrot.slane %v2095_v39, 4  ;;  %v3039_v53 = vrot.slane %v3037_v40, 5 }
 0x12d   : > { %11991 = vmatprep.subr.bf16.mxu0 %v12304_v9  ;;  %4971 = vmatprep.mubr.bf16.mxu1 %v10566_v38  ;;  %v3045_v61 = vrot.slane %v3043_v41, 5  ;;  %v3053_v18 = vshll.u32 %v2924_v30, 16  ;;  %v2105_v54 = vor.u32 %v2104_v43, %v2100_v29  ;;  %v10520_v55 = vrot.slane %v2492_v35, 9  ;;  %v2497_v38 = vld [vmem:[#allocation2 + $0x50] sm:$0x1] }
 0x12e   : > { %4972 = vmatmul.mubr.bf16.gmra.mrb[72].mxu1 %v12290_v26  ;;  %v3049_v50 = vrot.slane %v3047_v48, 4  ;;  %v2606_v56 = vrot.slane %v2493_v2, 5  ;;  %v2101_v36 = vsel %vm12872_vm7, %v2096_v51, %v2100_v29  ;;  %v3040_v57 = vor.u32 %v3039_v53, %v3036_v47  ;;  %v2927_v26 = vld [vmem:[#allocation2 + $0x50] sm:$0x1] }
 0x12f   : > { %v3055_v58 = vrot.slane %v3053_v18, 5  ;;  %v2609_v62 = vrot.slane %v2494_v42, 5  ;;  %v2106_v63 = vrot.slane %v2105_v54, 4  ;;  %v2113_v7 = vshrl.u32 %v1980_v49, 16  ;;  %v1983_v42 = vld [vmem:[#allocation2 + $0x48] sm:$0xf] }
 0x130   : > { %11992 = vmatpush3.bf16.msra.mxu0 %v12304_v9  ;;  %v3050_v0 = vor.u32 %v3049_v50, %v3045_v61  ;;  %v2607_v3 = vsel %vm12912_vm13, %v10520_v55, %v2606_v56  ;;  %v2608_v4 = vrot.slane %v2606_v56, 4  ;;  %v3041_v5 = vrot.slane %v3040_v57, 4  ;;  %v1984_v18 = vld [vmem:[#allocation2 + $0x4c] sm:$0xf] }
 0x131   : > { %11993 = vmatprep.subr.bf16.mxu0 %v12307_v37  ;;  %v2116_v8 = vshll.u32 %v1980_v49, 16  ;;  %v2122_v9 = vshll.u32 %v1981_v6, 16  ;;  %v2111_v10 = vsel %vm12872_vm7, %v2106_v63, %v2110_v46  ;;  %v2126_v14 = vshrl.u32 %v1981_v6, 16 }
 0x132   : > { %v3051_v11 = vrot.slane %v3050_v0, 4  ;;  %v2610_v12 = vsel %vm12912_vm13, %v2608_v4, %v2609_v62  ;;  %v10503_v17 = vcombine.low %v2101_v36, %v2111_v10  ;;  %v3046_v59 = vsel %vm12872_vm7, %v3041_v5, %v3045_v61  ;;  %v1985_v36 = vld [vmem:[#allocation2 + $0x50] sm:$0x1]  ;;  %v2929_v4 = vld [vmem:[#allocation2 + $0x58] sm:$0xf] }
 0x133   : > { %v10536_v19 = vcombine.low %v2607_v3, %v2610_v12  ;;  %v2115_v20 = vrot.slane %v2113_v7, 4  ;;  %v2118_v60 = vrot.slane %v2116_v8, 5  ;;  %v2124_v24 = vrot.slane %v2122_v9, 5  ;;  %v2928_v3 = vld [vmem:[#allocation2 + $0x54] sm:$0xf]  ;;  %v12293_v7 = vld [vmem:[#allocation2 + $0x48] sm:$0xff]  }
 0x134   : > { %11994 = vmatpush3.bf16.msra.mxu0 %v12307_v37  ;;  %v3056_v22 = vsel %vm12872_vm7, %v3051_v11, %v3055_v58  ;;  %v2128_v25 = vrot.slane %v2126_v14, 4  ;;  %v2132_v28 = vshll.u32 %v1982_v13, 16  ;;  %v3058_v29 = vshrl.u32 %v2925_v15, 16  ;;  %v2496_v37 = vld [vmem:[#allocation2 + $0x4c] sm:$0xf] }
 0x135   : > { %4819 = vmatmul.mubr.bf16.gmra.mrb[76].mxu0 %v10503_v17  ;;  %v10567_v27 = vcombine.low %v3046_v59, %v3056_v22  ;;  %v3061_v30 = vshll.u32 %v2925_v15, 16  ;;  %v2119_v33 = vor.u32 %v2118_v60, %v2115_v20  ;;  %v3067_v32 = vshll.u32 %v2926_v21, 16  ;;  %v2930_v11 = vld [vmem:[#allocation2 + $0x5c] sm:$0x1]  ;;  %v2499_v22 = vld [vmem:[#allocation2 + $0x58] sm:$0xf] }
 0x136   : > { %4826 = vmatprep.mubr.bf16.mxu0 %v10536_v19  ;;  %v2129_v34 = vor.u32 %v2128_v25, %v2124_v24  ;;  %v3071_v35 = vshrl.u32 %v2926_v21, 16  ;;  %v2134_v39 = vrot.slane %v2132_v28, 5  ;;  %v3060_v40 = vrot.slane %v3058_v29, 4  ;;  %v2498_v21 = vld [vmem:[#allocation2 + $0x54] sm:$0xe] }
 0x137   : > { %4979 = vmatprep.mubr.bf16.mxu1 %v10567_v27  ;;  %v3063_v41 = vrot.slane %v3061_v30, 5  ;;  %v3077_v2 = vshll.u32 %v2927_v26, 16  ;;  %v2120_v43 = vrot.slane %v2119_v33, 4  ;;  %v3069_v47 = vrot.slane %v3067_v32, 5  ;;  %v2500_v26 = vld [vmem:[#allocation2 + $0x5c] sm:$0x1] }
 0x138   : > { %4980 = vmatmul.mubr.bf16.gmra.mrb[76].mxu1 %v12291_v23  ;;  %v2130_v46 = vrot.slane %v2129_v34, 4  ;;  %v3073_v48 = vrot.slane %v3071_v35, 4  ;;  %v10521_v53 = vrot.slane %v2495_v31, 9  ;;  %v2613_v61 = vrot.slane %v2496_v37, 5  ;;  %v1986_v27 = vld [vmem:[#allocation2 + $0x54] sm:$0xf] }
 0x139   : > { %v3064_v49 = vor.u32 %v3063_v41, %v3060_v40  ;;  %v3079_v51 = vrot.slane %v3077_v2, 5  ;;  %v2125_v50 = vsel %vm12872_vm7, %v2120_v43, %v2124_v24  ;;  %v2616_v6 = vrot.slane %v2497_v38, 5 }
 0x13a   : > { %v2135_v55 = vsel %vm12872_vm7, %v2130_v46, %v2134_v39  ;;  %v3074_v56 = vor.u32 %v3073_v48, %v3069_v47  ;;  %v2614_v63 = vsel %vm12912_vm13, %v10521_v53, %v2613_v61  ;;  %v2615_v0 = vrot.slane %v2613_v61, 4  ;;  %v1987_v61 = vld [vmem:[#allocation2 + $0x58] sm:$0xf] }
 0x13b   : > { %v10504_v58 = vcombine.low %v2125_v50, %v2135_v55  ;;  %v3065_v62 = vrot.slane %v3064_v49, 4  ;;  %v2137_v8 = vshrl.u32 %v1983_v42, 16  ;;  %v2140_v9 = vshll.u32 %v1983_v42, 16 }
 0x13c   : > { %v3075_v5 = vrot.slane %v3074_v56, 4  ;;  %v2146_v10 = vshll.u32 %v1984_v18, 16  ;;  %v2617_v13 = vsel %vm12912_vm13, %v2615_v0, %v2616_v6  ;;  %v2150_v14 = vshrl.u32 %v1984_v18, 16 }
 0x13d   : > { %4827 = vmatmul.mubr.bf16.gmra.mrb[80].mxu0 %v10504_v58  ;;  %v3070_v12 = vsel %vm12872_vm7, %v3065_v62, %v3069_v47  ;;  %v2156_v15 = vshll.u32 %v1985_v36, 16  ;;  %v10537_v59 = vcombine.low %v2614_v63, %v2617_v13  ;;  %v2139_v19 = vrot.slane %v2137_v8, 4  ;;  %v1988_v36 = vld [vmem:[#allocation2 + $0x5c] sm:$0x1]  ;;  %v2931_v58 = vld [vmem:[#allocation2 + $0x60] sm:$0xf] }
 0x13e   : > { %v3080_v17 = vsel %vm12872_vm7, %v3075_v5, %v3079_v51  ;;  %v2142_v20 = vrot.slane %v2140_v9, 5  ;;  %v2148_v60 = vrot.slane %v2146_v10, 5  ;;  %v2152_v24 = vrot.slane %v2150_v14, 4  ;;  %v2932_v5 = vld [vmem:[#allocation2 + $0x64] sm:$0xf] }
 0x13f   : > { %v10568_v23 = vcombine.low %v3070_v12, %v3080_v17  ;;  %v2158_v25 = vrot.slane %v2156_v15, 5  ;;  %4834 = vmatprep.mubr.bf16.mxu0 %v10537_v59  ;;  %v3082_v30 = vshrl.u32 %v2928_v3, 16  ;;  %v3085_v31 = vshll.u32 %v2928_v3, 16  ;;  %v2933_v12 = vld [vmem:[#allocation2 + $0x68] sm:$0x1] }
 0x140   : > { %v2143_v29 = vor.u32 %v2142_v20, %v2139_v19  ;;  %v3091_v33 = vshll.u32 %v2929_v4, 16  ;;  %v2153_v32 = vor.u32 %v2152_v24, %v2148_v60  ;;  %v3095_v35 = vshrl.u32 %v2929_v4, 16  ;;  %v2501_v19 = vld [vmem:[#allocation2 + $0x60] sm:$0xe] }
 0x141   : > { %4987 = vmatprep.mubr.bf16.mxu1 %v10568_v23  ;;  %v3101_v37 = vshll.u32 %v2930_v11, 16  ;;  %v10522_v38 = vrot.slane %v2498_v21, 9  ;;  %v3084_v41 = vrot.slane %v3082_v30, 4  ;;  %v3087_v2 = vrot.slane %v3085_v31, 5  ;;  %v12294_v21 = vld [vmem:[#allocation2 + $0x54] sm:$0xff]  }
 0x142   : > { %4988 = vmatmul.mubr.bf16.gmra.mrb[80].mxu1 %v12293_v7  ;;  %v2144_v40 = vrot.slane %v2143_v29, 4  ;;  %v3093_v42 = vrot.slane %v3091_v33, 5  ;;  %v2154_v43 = vrot.slane %v2153_v32, 4  ;;  %v3097_v46 = vrot.slane %v3095_v35, 4  ;;  %v2502_v29 = vld [vmem:[#allocation2 + $0x64] sm:$0xf] }
 0x143   : > { %v3103_v47 = vrot.slane %v3101_v37, 5  ;;  %v2620_v48 = vrot.slane %v2499_v22, 5  ;;  %v3088_v51 = vor.u32 %v3087_v2, %v3084_v41  ;;  %v2623_v53 = vrot.slane %v2500_v26, 5  ;;  %v2503_v35 = vld [vmem:[#allocation2 + $0x68] sm:$0x1] }
 0x144   : > { %v2149_v49 = vsel %vm12872_vm7, %v2144_v40, %v2148_v60  ;;  %v2161_v18 = vshrl.u32 %v1986_v27, 16  ;;  %v2159_v50 = vsel %vm12872_vm7, %v2154_v43, %v2158_v25  ;;  %v3098_v55 = vor.u32 %v3097_v46, %v3093_v42 }
 0x145   : > { %v13406_v54 = vpop.f32.mrb[0].mxu0  ;;  %v2621_v56 = vsel %vm12912_vm13, %v10522_v38, %v2620_v48  ;;  %v2622_v6 = vrot.slane %v2620_v48, 4  ;;  %v10505_v63 = vcombine.low %v2149_v49, %v2159_v50  ;;  %v3089_v0 = vrot.slane %v3088_v51, 4  ;;  %v1989_v48 = vld [vmem:[#allocation2 + $0x60] sm:$0xf] }
 0x146   : > { %v13412_v57 = vpop.f32.mrb[1].mxu0  ;;  %v2163_v3 = vrot.slane %v2161_v18, 4  ;;  %v2164_v4 = vshll.u32 %v1986_v27, 16  ;;  %v3099_v8 = vrot.slane %v3098_v55, 4  ;;  %v2170_v10 = vshll.u32 %v1987_v61, 16 }
 0x147   : > { %v13422_v28 = vpop.f32.mrb[2].mxu0  ;;  %v2624_v9 = vsel %vm12912_vm13, %v2622_v6, %v2623_v53  ;;  %v2174_v11 = vshrl.u32 %v1987_v61, 16  ;;  %4835 = vmatmul.mubr.bf16.gmra.mrb[84].mxu0 %v10505_v63  ;;  %v3094_v14 = vsel %vm12872_vm7, %v3089_v0, %v3093_v42  ;;  %v2180_v59 = vshll.u32 %v1988_v36, 16  ;;  %v1990_v18 = vld [vmem:[#allocation2 + $0x64] sm:$0xf] }
 0x148   : > { %v13424_v34 = vpop.f32.mrb[3].mxu0  ;;  %v10538_v15 = vcombine.low %v2621_v56, %v2624_v9  ;;  %v2166_v17 = vrot.slane %v2164_v4, 5  ;;  %v3104_v20 = vsel %vm12872_vm7, %v3099_v8, %v3103_v47  ;;  %v2172_v22 = vrot.slane %v2170_v10, 5  ;;  %v1991_v36 = vld [vmem:[#allocation2 + $0x68] sm:$0x1]  ;;  %v12296_v10 = vld [vmem:[#allocation2 + $0x60] sm:$0xff]  }
 0x149   : > { %v2176_v23 = vrot.slane %v2174_v11, 4  ;;  %v3106_v60 = vshrl.u32 %v2931_v58, 16  ;;  %v10569_v24 = vcombine.low %v3094_v14, %v3104_v20  ;;  %v2182_v26 = vrot.slane %v2180_v59, 5 }
 0x14a   : > { %4842 = vmatprep.mubr.bf16.mxu0 %v10538_v15  ;;  %v2167_v25 = vor.u32 %v2166_v17, %v2163_v3  ;;  %v3109_v27 = vshll.u32 %v2931_v58, 16  ;;  %v3115_v33 = vshll.u32 %v2932_v5, 16  ;;  %v3119_v32 = vshrl.u32 %v2932_v5, 16  ;;  %v2934_v5 = vld [vmem:[#allocation2 + $0x6c] sm:$0xf] }
 0x14b   : > { %v2177_v30 = vor.u32 %v2176_v23, %v2172_v22  ;;  %v3108_v31 = vrot.slane %v3106_v60, 4  ;;  %4995 = vmatprep.mubr.bf16.mxu1 %v10569_v24  ;;  %v3125_v41 = vshll.u32 %v2933_v12, 16  ;;  %v10523_v2 = vrot.slane %v2501_v19, 9  ;;  %v2935_v15 = vld [vmem:[#allocation2 + $0x70] sm:$0xf] }
 0x14c   : > { %v2168_v38 = vrot.slane %v2167_v25, 4  ;;  %v3111_v40 = vrot.slane %v3109_v27, 5  ;;  %4996 = vmatmul.mubr.bf16.gmra.mrb[84].mxu1 %v12294_v21  ;;  %v3117_v43 = vrot.slane %v3115_v33, 5  ;;  %v3121_v46 = vrot.slane %v3119_v32, 4  ;;  %v2936_v25 = vld [vmem:[#allocation2 + $0x74] sm:$0x1] }
 0x14d   : > { %v2178_v42 = vrot.slane %v2177_v30, 4  ;;  %v2627_v47 = vrot.slane %v2502_v29, 5  ;;  %v3127_v53 = vrot.slane %v3125_v41, 5  ;;  %v2630_v61 = vrot.slane %v2503_v35, 5  ;;  %v2504_v33 = vld [vmem:[#allocation2 + $0x6c] sm:$0xe] }
 0x14e   : > { %v13426_v39 = vpop.f32.mrb[0].mxu1  ;;  %v2173_v49 = vsel %vm12872_vm7, %v2168_v38, %v2172_v22  ;;  %v3112_v51 = vor.u32 %v3111_v40, %v3108_v31  ;;  %v3122_v55 = vor.u32 %v3121_v46, %v3117_v43  ;;  %v2185_v3 = vshrl.u32 %v1989_v48, 16  ;;  %v2505_v32 = vld [vmem:[#allocation2 + $0x70] sm:$0xf] }
 0x14f   : > { %v13434_v62 = vpop.f32.mrb[1].mxu1  ;;  %v2183_v50 = vsel %vm12872_vm7, %v2178_v42, %v2182_v26  ;;  %v2628_v56 = vsel %vm12912_vm13, %v10523_v2, %v2627_v47  ;;  %v2629_v6 = vrot.slane %v2627_v47, 4  ;;  %v2188_v4 = vshll.u32 %v1989_v48, 16  ;;  %v2506_v2 = vld [vmem:[#allocation2 + $0x74] sm:$0x1] }
 0x150   : > { %v13436_v7 = vpop.f32.mrb[2].mxu1  ;;  %v10506_v63 = vcombine.low %v2173_v49, %v2183_v50  ;;  %v3113_v0 = vrot.slane %v3112_v51, 4  ;;  %v3123_v9 = vrot.slane %v3122_v55, 4  ;;  %v2194_v12 = vshll.u32 %v1990_v18, 16  ;;  %v1992_v49 = vld [vmem:[#allocation2 + $0x6c] sm:$0xf] }
 0x151   : > { %v13440_v13 = vpop.f32.mrb[3].mxu1  ;;  %v2631_v11 = vsel %vm12912_vm13, %v2629_v6, %v2630_v61  ;;  %v2198_v14 = vshrl.u32 %v1990_v18, 16  ;;  %v2187_v20 = vrot.slane %v2185_v3, 4  ;;  %v2190_v21 = vrot.slane %v2188_v4, 5  ;;  %v1994_v4 = vld [vmem:[#allocation2 + $0x74] sm:$0x1] }
 0x152   : > { %4843 = vmatmul.mubr.bf16.gmra.mrb[88].mxu0 %v10506_v63  ;;  %v3118_v59 = vsel %vm12872_vm7, %v3113_v0, %v3117_v43  ;;  %v10539_v19 = vcombine.low %v2628_v56, %v2631_v11  ;;  %v3128_v22 = vsel %vm12872_vm7, %v3123_v9, %v3127_v53  ;;  %v2196_v23 = vrot.slane %v2194_v12, 5 }
 0x153   : > { %v2200_v60 = vrot.slane %v2198_v14, 4  ;;  %v2204_v24 = vshll.u32 %v1991_v36, 16  ;;  %v10570_v27 = vcombine.low %v3118_v59, %v3128_v22  ;;  %v2191_v29 = vor.u32 %v2190_v21, %v2187_v20  ;;  %v1993_v36 = vld [vmem:[#allocation2 + $0x70] sm:$0xf]  ;;  %v2937_v14 = vld [vmem:[#allocation2 + $0x78] sm:$0xf] }
 0x154   : > { %4850 = vmatprep.mubr.bf16.mxu0 %v10539_v19  ;;  %v3130_v30 = vshrl.u32 %v2934_v5, 16  ;;  %v3133_v31 = vshll.u32 %v2934_v5, 16  ;;  %v3139_v40 = vshll.u32 %v2935_v15, 16  ;;  %v3143_v41 = vshrl.u32 %v2935_v15, 16  ;;  %v12297_v59 = vld [vmem:[#allocation2 + $0x6c] sm:$0xff]  }
 0x155   : > { %v2201_v35 = vor.u32 %v2200_v60, %v2196_v23  ;;  %v2206_v38 = vrot.slane %v2204_v24, 5  ;;  %5003 = vmatprep.mubr.bf16.mxu1 %v10570_v27  ;;  %v2192_v43 = vrot.slane %v2191_v29, 4  ;;  %v3149_v48 = vshll.u32 %v2936_v25, 16  ;;  %v2938_v22 = vld [vmem:[#allocation2 + $0x7c] sm:$0xf] }
 0x156   : > { %v3132_v46 = vrot.slane %v3130_v30, 4  ;;  %v3135_v47 = vrot.slane %v3133_v31, 5  ;;  %5004 = vmatmul.mubr.bf16.gmra.mrb[88].mxu1 %v12296_v10  ;;  %v3141_v53 = vrot.slane %v3139_v40, 5  ;;  %v3145_v61 = vrot.slane %v3143_v41, 4  ;;  %v2939_v27 = vld [vmem:[#allocation2 + $0x80] sm:$0x1] }
 0x157   : > { %v13446_v37 = vpop.f32.mrb[4].mxu1  ;;  %v2202_v51 = vrot.slane %v2201_v35, 4  ;;  %v10524_v18 = vrot.slane %v2504_v33, 9  ;;  %v2197_v50 = vsel %vm12872_vm7, %v2192_v43, %v2196_v23  ;;  %v3151_v56 = vrot.slane %v3149_v48, 5  ;;  %v2507_v29 = vld [vmem:[#allocation2 + $0x78] sm:$0xe] }
 0x158   : > { %v13468_v42 = vpop.f32.mrb[5].mxu1  ;;  %v3136_v55 = vor.u32 %v3135_v47, %v3132_v46  ;;  %v2634_v6 = vrot.slane %v2505_v32, 5  ;;  %v3146_v0 = vor.u32 %v3145_v61, %v3141_v53  ;;  %v2637_v3 = vrot.slane %v2506_v2, 5  ;;  %v2508_v35 = vld [vmem:[#allocation2 + $0x7c] sm:$0xf] }
 0x159   : > { %v2207_v63 = vsel %vm12872_vm7, %v2202_v51, %v2206_v38  ;;  %v2209_v5 = vshrl.u32 %v1992_v49, 16  ;;  %v2212_v20 = vshll.u32 %v1992_v49, 16  ;;  %v2218_v21 = vshll.u32 %v1993_v36, 16  ;;  %v2509_v38 = vld [vmem:[#allocation2 + $0x80] sm:$0x1]  ;;  %v13482_v46 = vpop.f32.mrb[6].mxu1 }
 0x15a   : > { %v13454_v58 = vpop.f32.mrb[4].mxu0  ;;  %v10507_v9 = vcombine.low %v2197_v50, %v2207_v63  ;;  %v3137_v10 = vrot.slane %v3136_v55, 4  ;;  %v2635_v11 = vsel %vm12912_vm13, %v10524_v18, %v2634_v6  ;;  %v2636_v12 = vrot.slane %v2634_v6, 4 }
 0x15b   : > { %v13456_v8 = vpop.f32.mrb[5].mxu0  ;;  %v3147_v15 = vrot.slane %v3146_v0, 4  ;;  %v2211_v19 = vrot.slane %v2209_v5, 4  ;;  %v2222_v24 = vshrl.u32 %v1993_v36, 16  ;;  %v2228_v25 = vshll.u32 %v1994_v4, 16 }
 0x15c   : > { %v13460_v17 = vpop.f32.mrb[6].mxu0  ;;  %4851 = vmatmul.mubr.bf16.gmra.mrb[92].mxu0 %v10507_v9  ;;  %v3142_v23 = vsel %vm12872_vm7, %v3137_v10, %v3141_v53  ;;  %v2638_v60 = vsel %vm12912_vm13, %v2636_v12, %v2637_v3  ;;  %v2214_v33 = vrot.slane %v2212_v20, 5  ;;  %v2220_v32 = vrot.slane %v2218_v21, 5  ;;  %v13484_v53 = vpop.f32.mrb[7].mxu1 }
 0x15d   : > { %v13466_v26 = vpop.f32.mrb[7].mxu0  ;;  %v3152_v30 = vsel %vm12872_vm7, %v3147_v15, %v3151_v56  ;;  %v10540_v31 = vcombine.low %v2635_v11, %v2638_v60  ;;  %v2224_v41 = vrot.slane %v2222_v24, 4  ;;  %v2230_v2 = vrot.slane %v2228_v25, 5  ;;  %v1995_v56 = vld [vmem:[#allocation2 + $0x78] sm:$0xf] }
 0x15e   : > { %v10571_v40 = vcombine.low %v3142_v23, %v3152_v30  ;;  %v3154_v43 = vshrl.u32 %v2937_v14, 16  ;;  %v2215_v47 = vor.u32 %v2214_v33, %v2211_v19  ;;  %v3157_v48 = vshll.u32 %v2937_v14, 16  ;;  %v1996_v11 = vld [vmem:[#allocation2 + $0x7c] sm:$0xf]  ;;  %v1997_v23 = vld [vmem:[#allocation2 + $0x80] sm:$0x1] }
 0x15f   : > { %4858 = vmatprep.mubr.bf16.mxu0 %v10540_v31  ;;  %v3163_v49 = vshll.u32 %v2938_v22, 16  ;;  %v3167_v51 = vshrl.u32 %v2938_v22, 16  ;;  %v2225_v61 = vor.u32 %v2224_v41, %v2220_v32  ;;  %v3173_v50 = vshll.u32 %v2939_v27, 16  ;;  %v2940_v31 = vld [vmem:[#allocation2 + $0x84] sm:$0xf] }
 0x160   : > { %5011 = vmatprep.mubr.bf16.mxu1 %v10571_v40  ;;  %v3156_v18 = vrot.slane %v3154_v43, 4  ;;  %v10525_v55 = vrot.slane %v2507_v29, 9  ;;  %v2216_v36 = vrot.slane %v2215_v47, 4  ;;  %v3159_v63 = vrot.slane %v3157_v48, 5  ;;  %v12299_v29 = vld [vmem:[#allocation2 + $0x78] sm:$0xff]  }
 0x161   : > { %5012 = vmatmul.mubr.bf16.gmra.mrb[92].mxu1 %v12297_v59  ;;  %v3165_v0 = vrot.slane %v3163_v49, 5  ;;  %v3169_v3 = vrot.slane %v3167_v51, 4  ;;  %v2226_v4 = vrot.slane %v2225_v61, 4  ;;  %v3175_v5 = vrot.slane %v3173_v50, 5  ;;  %v2941_v41 = vld [vmem:[#allocation2 + $0x88] sm:$0xf] }
 0x162   : > { %v13486_v6 = vpop.f32.mrb[8].mxu0  ;;  %v2641_v9 = vrot.slane %v2508_v35, 5  ;;  %v2644_v10 = vrot.slane %v2509_v38, 5  ;;  %v2221_v12 = vsel %vm12872_vm7, %v2216_v36, %v2220_v32  ;;  %v3160_v14 = vor.u32 %v3159_v63, %v3156_v18  ;;  %v2942_v51 = vld [vmem:[#allocation2 + $0x8c] sm:$0x1] }
 0x163   : > { %v3170_v15 = vor.u32 %v3169_v3, %v3165_v0  ;;  %v2233_v19 = vshrl.u32 %v1995_v56, 16  ;;  %v13490_v20 = vpop.f32.mrb[9].mxu0  ;;  %v2231_v59 = vsel %vm12872_vm7, %v2226_v4, %v2230_v2  ;;  %v2236_v60 = vshll.u32 %v1995_v56, 16  ;;  %v13500_v2 = vpop.f32.mrb[8].mxu1  ;;  %v2510_v61 = vld [vmem:[#allocation2 + $0x84] sm:$0xe] }
 0x164   : > { %v2642_v21 = vsel %vm12912_vm13, %v10525_v55, %v2641_v9  ;;  %v2643_v22 = vrot.slane %v2641_v9, 4  ;;  %v10508_v24 = vcombine.low %v2221_v12, %v2231_v59  ;;  %v3161_v25 = vrot.slane %v3160_v14, 4  ;;  %v13496_v33 = vpop.f32.mrb[10].mxu0  ;;  %v2511_v63 = vld [vmem:[#allocation2 + $0x88] sm:$0xf]  ;;  %v13508_v59 = vpop.f32.mrb[9].mxu1 }
 0x165   : > { %v3171_v27 = vrot.slane %v3170_v15, 4  ;;  %v2235_v30 = vrot.slane %v2233_v19, 4  ;;  %v2238_v35 = vrot.slane %v2236_v60, 5  ;;  %v2242_v38 = vshll.u32 %v1996_v11, 16  ;;  %v13506_v18 = vpop.f32.mrb[11].mxu0 }
 0x166   : > { %v2645_v32 = vsel %vm12912_vm13, %v2643_v22, %v2644_v10  ;;  %v2246_v40 = vshrl.u32 %v1996_v11, 16  ;;  %4859 = vmatmul.mubr.bf16.gmra.mrb[96].mxu0 %v10508_v24  ;;  %v3166_v43 = vsel %vm12872_vm7, %v3161_v25, %v3165_v0  ;;  %v2252_v49 = vshll.u32 %v1997_v23, 16  ;;  %v2512_v3 = vld [vmem:[#allocation2 + $0x8c] sm:$0x1]  ;;  %v1998_v11 = vld [vmem:[#allocation2 + $0x84] sm:$0xf] }
 0x167   : > { %v3176_v47 = vsel %vm12872_vm7, %v3171_v27, %v3175_v5  ;;  %v10541_v48 = vcombine.low %v2642_v21, %v2645_v32  ;;  %v2239_v55 = vor.u32 %v2238_v35, %v2235_v30  ;;  %v2244_v56 = vrot.slane %v2242_v38, 5  ;;  %v1999_v19 = vld [vmem:[#allocation2 + $0x88] sm:$0xf] }
 0x168   : > { %v10572_v50 = vcombine.low %v3166_v43, %v3176_v47  ;;  %v2248_v36 = vrot.slane %v2246_v40, 4  ;;  %v2254_v4 = vrot.slane %v2252_v49, 5  ;;  %v3178_v9 = vshrl.u32 %v2940_v31, 16  ;;  %v2000_v47 = vld [vmem:[#allocation2 + $0x8c] sm:$0x1] }
 0x169   : > { %4866 = vmatprep.mubr.bf16.mxu0 %v10541_v48  ;;  %v3181_v10 = vshll.u32 %v2940_v31, 16  ;;  %v3187_v0 = vshll.u32 %v2941_v41, 16  ;;  %v2240_v5 = vrot.slane %v2239_v55, 4  ;;  %v3191_v14 = vshrl.u32 %v2941_v41, 16  ;;  %v13512_v31 = vpop.f32.mrb[10].mxu1 }
 0x16a   : > { %5019 = vmatprep.mubr.bf16.mxu1 %v10572_v50  ;;  %v2249_v12 = vor.u32 %v2248_v36, %v2244_v56  ;;  %v3197_v15 = vshll.u32 %v2942_v51, 16  ;;  %v3180_v21 = vrot.slane %v3178_v9, 4  ;;  %v10526_v60 = vrot.slane %v2510_v61, 9  ;;  %v13514_v41 = vpop.f32.mrb[11].mxu1 }
 0x16b   : > { %5020 = vmatmul.mubr.bf16.gmra.mrb[96].mxu1 %v12299_v29  ;;  %v3183_v22 = vrot.slane %v3181_v10, 5  ;;  %v3189_v23 = vrot.slane %v3187_v0, 5  ;;  %v2245_v24 = vsel %vm12872_vm7, %v2240_v5, %v2244_v56  ;;  %v3193_v27 = vrot.slane %v3191_v14, 4  ;;  %v2943_v56 = vld [vmem:[#allocation2 + $0x90] sm:$0xf]  ;;  %v12300_v14 = vld [vmem:[#allocation2 + $0x84] sm:$0xff]  }
 0x16c   : > { %v2250_v25 = vrot.slane %v2249_v12, 4  ;;  %v3199_v30 = vrot.slane %v3197_v15, 5  ;;  %v2648_v35 = vrot.slane %v2511_v63, 5  ;;  %v2651_v38 = vrot.slane %v2512_v3, 5  ;;  %v2944_v10 = vld [vmem:[#allocation2 + $0x94] sm:$0xf] }
 0x16d   : > { %v3184_v32 = vor.u32 %v3183_v22, %v3180_v21  ;;  %v2257_v40 = vshrl.u32 %v1998_v11, 16  ;;  %v3194_v43 = vor.u32 %v3193_v27, %v3189_v23  ;;  %v2260_v48 = vshll.u32 %v1998_v11, 16  ;;  %v2945_v22 = vld [vmem:[#allocation2 + $0x98] sm:$0x1] }
 0x16e   : > { %v2255_v29 = vsel %vm12872_vm7, %v2250_v25, %v2254_v4  ;;  %v2266_v49 = vshll.u32 %v1999_v19, 16  ;;  %v2649_v50 = vsel %vm12912_vm13, %v10526_v60, %v2648_v35  ;;  %v2650_v55 = vrot.slane %v2648_v35, 4 }
 0x16f   : > { %v10509_v51 = vcombine.low %v2245_v24, %v2255_v29  ;;  %v3185_v61 = vrot.slane %v3184_v32, 4  ;;  %v3195_v36 = vrot.slane %v3194_v43, 4  ;;  %v2259_v63 = vrot.slane %v2257_v40, 4  ;;  %v13526_v24 = vpop.f32.mrb[12].mxu0 }
 0x170   : > { %v2262_v3 = vrot.slane %v2260_v48, 5  ;;  %v2268_v9 = vrot.slane %v2266_v49, 5  ;;  %v2652_v0 = vsel %vm12912_vm13, %v2650_v55, %v2651_v38  ;;  %v2270_v11 = vshrl.u32 %v1999_v19, 16  ;;  %v2513_v49 = vld [vmem:[#allocation2 + $0x90] sm:$0xe] }
 0x171   : > { %4867 = vmatmul.mubr.bf16.gmra.mrb[100].mxu0 %v10509_v51  ;;  %v3190_v4 = vsel %vm12872_vm7, %v3185_v61, %v3189_v23  ;;  %v2276_v5 = vshll.u32 %v2000_v47, 16  ;;  %v3200_v12 = vsel %vm12872_vm7, %v3195_v36, %v3199_v30  ;;  %v10542_v15 = vcombine.low %v2649_v50, %v2652_v0  ;;  %v13528_v23 = vpop.f32.mrb[13].mxu0  ;;  %v2514_v55 = vld [vmem:[#allocation2 + $0x94] sm:$0xf] }
 0x172   : > { %v2263_v21 = vor.u32 %v2262_v3, %v2259_v63  ;;  %v3202_v60 = vshrl.u32 %v2943_v56, 16  ;;  %v10573_v25 = vcombine.low %v3190_v4, %v3200_v12  ;;  %v2272_v27 = vrot.slane %v2270_v11, 4  ;;  %v2002_v11 = vld [vmem:[#allocation2 + $0x94] sm:$0xf] }
 0x173   : > { %v2278_v32 = vrot.slane %v2276_v5, 5  ;;  %v3205_v35 = vshll.u32 %v2943_v56, 16  ;;  %4874 = vmatprep.mubr.bf16.mxu0 %v10542_v15  ;;  %v3211_v40 = vshll.u32 %v2944_v10, 16  ;;  %v3215_v29 = vshrl.u32 %v2944_v10, 16  ;;  %v2515_v56 = vld [vmem:[#allocation2 + $0x98] sm:$0x1] }
 0x174   : > { %v2264_v38 = vrot.slane %v2263_v21, 4  ;;  %v3204_v19 = vrot.slane %v3202_v60, 4  ;;  %5027 = vmatprep.mubr.bf16.mxu1 %v10573_v25  ;;  %v2273_v30 = vor.u32 %v2272_v27, %v2268_v9  ;;  %v3221_v47 = vshll.u32 %v2945_v22, 16  ;;  %v2001_v10 = vld [vmem:[#allocation2 + $0x90] sm:$0xf]  ;;  %v13544_v5 = vpop.f32.mrb[14].mxu0 }
 0x175   : > { %v3207_v43 = vrot.slane %v3205_v35, 5  ;;  %v13532_v48 = vadd.f32 %v13412_v57, %v13406_v54  ;;  %5028 = vmatmul.mubr.bf16.gmra.mrb[100].mxu1 %v12300_v14  ;;  %v3213_v51 = vrot.slane %v3211_v40, 5  ;;  %v3217_v61 = vrot.slane %v3215_v29, 4  ;;  %v13548_v15 = vpop.f32.mrb[12].mxu1  ;;  %v12302_v60 = vld [vmem:[#allocation2 + $0x90] sm:$0xff]  }
 0x176   : > { %v13536_v50 = vadd.f32 %v13424_v34, %v13422_v28  ;;  %v2269_v36 = vsel %vm12872_vm7, %v2264_v38, %v2268_v9  ;;  %v2274_v63 = vrot.slane %v2273_v30, 4  ;;  %v3223_v0 = vrot.slane %v3221_v47, 5  ;;  %v2003_v9 = vld [vmem:[#allocation2 + $0x98] sm:$0x1]  ;;  %v2946_v25 = vld [vmem:[#allocation2 + $0x9c] sm:$0xf] }
 0x177   : > { %v3208_v3 = vor.u32 %v3207_v43, %v3204_v19  ;;  %v3218_v4 = vor.u32 %v3217_v61, %v3213_v51  ;;  %v13542_v54 = vadd.f32 %v13434_v62, %v13426_v39  ;;  %v10527_v57 = vrot.slane %v2513_v49, 9  ;;  %v13558_v19 = vpop.f32.mrb[15].mxu0  ;;  %v13560_v40 = vpop.f32.mrb[13].mxu1  ;;  %v2947_v43 = vld [vmem:[#allocation2 + $0xa0] sm:$0xf] }
 0x178   : > { %v2279_v28 = vsel %vm12872_vm7, %v2274_v63, %v2278_v32  ;;  %v2655_v12 = vrot.slane %v2514_v55, 5  ;;  %v2658_v14 = vrot.slane %v2515_v56, 5  ;;  %v13552_v39 = vadd.f32 %v13440_v13, %v13436_v7  ;;  %v13564_v47 = vpop.f32.mrb[14].mxu1  ;;  %v2948_v56 = vld [vmem:[#allocation2 + $0xa4] sm:$0x1] }
 0x179   : > { %15838 = vst [vmem:[#allocation13_spill] sm:$0xff] %v13542_v54  ;;  %v3209_v34 = vrot.slane %v3208_v3, 4  ;;  %v10510_v21 = vcombine.low %v2269_v36, %v2279_v28  ;;  %v3219_v22 = vrot.slane %v3218_v4, 4  ;;  %v2281_v62 = vshrl.u32 %v2001_v10, 16  ;;  %v13568_v4 = vpop.f32.mrb[15].mxu1 }
 0x17a   : > { %15839 = vst [vmem:[#allocation14_spill] sm:$0xff] %v13552_v39  ;;  %v2656_v32 = vsel %vm12912_vm13, %v10527_v57, %v2655_v12  ;;  %v2657_v35 = vrot.slane %v2655_v12, 4  ;;  %v2284_v38 = vshll.u32 %v2001_v10, 16  ;;  %v2290_v13 = vshll.u32 %v2002_v11, 16  ;;  %v13570_v12 = vpop.f32.mrb[16].mxu0 }
 0x17b   : > { %v3214_v27 = vsel %vm12872_vm7, %v3209_v34, %v3213_v51  ;;  %4875 = vmatmul.mubr.bf16.gmra.mrb[104].mxu0 %v10510_v21  ;;  %v3224_v29 = vsel %vm12872_vm7, %v3219_v22, %v3223_v0  ;;  %v2283_v7 = vrot.slane %v2281_v62, 4  ;;  %v2294_v30 = vshrl.u32 %v2002_v11, 16  ;;  %v2516_v34 = vld [vmem:[#allocation2 + $0x9c] sm:$0xe]  ;;  %v2517_v62 = vld [vmem:[#allocation2 + $0xa0] sm:$0xf] }
 0x17c   : > { %v10574_v49 = vcombine.low %v3214_v27, %v3224_v29  ;;  %v2659_v51 = vsel %vm12912_vm13, %v2657_v35, %v2658_v14  ;;  %v2286_v61 = vrot.slane %v2284_v38, 5  ;;  %v2300_v55 = vshll.u32 %v2003_v9, 16  ;;  %v2518_v27 = vld [vmem:[#allocation2 + $0xa4] sm:$0x1] }
 0x17d   : > { %v10543_v36 = vcombine.low %v2656_v32, %v2659_v51  ;;  %v2292_v63 = vrot.slane %v2290_v13, 5  ;;  %v2296_v3 = vrot.slane %v2294_v30, 4  ;;  %v3226_v10 = vshrl.u32 %v2946_v25, 16  ;;  %v13572_v32 = vpop.f32.mrb[17].mxu0 }
 0x17e   : > { %5035 = vmatprep.mubr.bf16.mxu1 %v10574_v49  ;;  %v2287_v0 = vor.u32 %v2286_v61, %v2283_v7  ;;  %v2302_v57 = vrot.slane %v2300_v55, 5  ;;  %v3229_v11 = vshll.u32 %v2946_v25, 16  ;;  %v3235_v28 = vshll.u32 %v2947_v43, 16  ;;  %v13578_v7 = vpop.f32.mrb[18].mxu0 }
 0x17f   : > { %5036 = vmatmul.mubr.bf16.gmra.mrb[104].mxu1 %v12302_v60  ;;  %4882 = vmatprep.mubr.bf16.mxu0 %v10543_v36  ;;  %v2297_v14 = vor.u32 %v2296_v3, %v2292_v63  ;;  %v3228_v21 = vrot.slane %v3226_v10, 4  ;;  %v3239_v9 = vshrl.u32 %v2947_v43, 16  ;;  %v3245_v22 = vshll.u32 %v2948_v56, 16  ;;  %v13584_v43 = vpop.f32.mrb[16].mxu1 }
 0x180   : > { %v2288_v35 = vrot.slane %v2287_v0, 4  ;;  %v3231_v38 = vrot.slane %v3229_v11, 5  ;;  %v3237_v29 = vrot.slane %v3235_v28, 5  ;;  %v13576_v25 = vadd.f32 %v13456_v8, %v13454_v58  ;;  %v2004_v58 = vld [vmem:[#allocation2 + $0x9c] sm:$0xf] }
 0x181   : > { %v2298_v13 = vrot.slane %v2297_v14, 4  ;;  %v3241_v60 = vrot.slane %v3239_v9, 4  ;;  %v13582_v30 = vadd.f32 %v13466_v26, %v13460_v17  ;;  %v3247_v61 = vrot.slane %v3245_v22, 5  ;;  %v2005_v8 = vld [vmem:[#allocation2 + $0xa0] sm:$0xf]  ;;  %v13594_v17 = vpop.f32.mrb[19].mxu0 }
 0x182   : > { %v2293_v49 = vsel %vm12872_vm7, %v2288_v35, %v2292_v63  ;;  %v3232_v51 = vor.u32 %v3231_v38, %v3228_v21  ;;  %v13590_v55 = vadd.f32 %v13468_v42, %v13446_v37  ;;  %v10528_v3 = vrot.slane %v2516_v34, 9  ;;  %v13596_v63 = vpop.f32.mrb[17].mxu1  ;;  %v12303_v14 = vld [vmem:[#allocation2 + $0x9c] sm:$0xff]   ;;  %v2006_v42 = vld [vmem:[#allocation2 + $0xa4] sm:$0x1] }
 0x183   : > { %v2303_v56 = vsel %vm12872_vm7, %v2298_v13, %v2302_v57  ;;  %v3242_v36 = vor.u32 %v3241_v60, %v3237_v29  ;;  %v2662_v0 = vrot.slane %v2517_v62, 5  ;;  %v2665_v11 = vrot.slane %v2518_v27, 5  ;;  %v13602_v57 = vpop.f32.mrb[18].mxu1  ;;  %v2949_v35 = vld [vmem:[#allocation2 + $0xa8] sm:$0xf]  ;;  %v13610_v13 = vpop.f32.mrb[20].mxu0 }
 0x184   : > { %15840 = vst [vmem:[#allocation15_spill] sm:$0xff] %v13590_v55  ;;  %v10511_v26 = vcombine.low %v2293_v49, %v2303_v56  ;;  %v3233_v10 = vrot.slane %v3232_v51, 4  ;;  %v13600_v37 = vadd.f32 %v13484_v53, %v13482_v46  ;;  %v2305_v21 = vshrl.u32 %v2004_v58, 16  ;;  %v13608_v38 = vpop.f32.mrb[19].mxu1  ;;  %v2950_v51 = vld [vmem:[#allocation2 + $0xac] sm:$0xf] }
 0x185   : > { %v3243_v28 = vrot.slane %v3242_v36, 4  ;;  %v2308_v9 = vshll.u32 %v2004_v58, 16  ;;  %v2663_v22 = vsel %vm12912_vm13, %v10528_v3, %v2662_v0  ;;  %v2664_v62 = vrot.slane %v2662_v0, 4  ;;  %v13614_v58 = vpop.f32.mrb[21].mxu0 }
 0x186   : > { %15841 = vst [vmem:[#allocation16_spill] sm:$0xff] %v13600_v37  ;;  %4883 = vmatmul.mubr.bf16.gmra.mrb[108].mxu0 %v10511_v26  ;;  %v3238_v34 = vsel %vm12872_vm7, %v3233_v10, %v3237_v29  ;;  %v2314_v27 = vshll.u32 %v2005_v8, 16  ;;  %v2307_v53 = vrot.slane %v2305_v21, 4  ;;  %v2318_v49 = vshrl.u32 %v2005_v8, 16  ;;  %v2951_v26 = vld [vmem:[#allocation2 + $0xb0] sm:$0x1] }
 0x187   : > { %v3248_v46 = vsel %vm12872_vm7, %v3243_v28, %v3247_v61  ;;  %v2310_v60 = vrot.slane %v2308_v9, 5  ;;  %v2666_v56 = vsel %vm12912_vm13, %v2664_v62, %v2665_v11  ;;  %v2324_v3 = vshll.u32 %v2006_v42, 16  ;;  %v2519_v8 = vld [vmem:[#allocation2 + $0xa8] sm:$0xe]  ;;  %v2520_v9 = vld [vmem:[#allocation2 + $0xac] sm:$0xf] }
 0x188   : > { %v10575_v29 = vcombine.low %v3238_v34, %v3248_v46  ;;  %v2316_v36 = vrot.slane %v2314_v27, 5  ;;  %v10544_v10 = vcombine.low %v2663_v22, %v2666_v56  ;;  %v2320_v52 = vrot.slane %v2318_v49, 4  ;;  %v13618_v62 = vpop.f32.mrb[22].mxu0  ;;  %v13620_v42 = vpop.f32.mrb[20].mxu1 }
 0x189   : > { %v2311_v0 = vor.u32 %v2310_v60, %v2307_v53  ;;  %v3250_v37 = vshrl.u32 %v2949_v35, 16  ;;  %v2326_v55 = vrot.slane %v2324_v3, 5  ;;  %v3253_v61 = vshll.u32 %v2949_v35, 16  ;;  %v13626_v60 = vpop.f32.mrb[23].mxu0  ;;  %v13628_v49 = vpop.f32.mrb[21].mxu1 }
 0x18a   : > { %5043 = vmatprep.mubr.bf16.mxu1 %v10575_v29  ;;  %v3259_v28 = vshll.u32 %v2950_v51, 16  ;;  %v3263_v21 = vshrl.u32 %v2950_v51, 16  ;;  %4890 = vmatprep.mubr.bf16.mxu0 %v10544_v10  ;;  %v2321_v46 = vor.u32 %v2320_v52, %v2316_v36  ;;  %v3269_v11 = vshll.u32 %v2951_v26, 16  ;;  %v2521_v51 = vld [vmem:[#allocation2 + $0xb0] sm:$0x1]  ;;  %v13636_v29 = vpop.f32.mrb[22].mxu1 }
 0x18b   : > { %5044 = vmatmul.mubr.bf16.gmra.mrb[108].mxu1 %v12303_v14  ;;  %v2312_v34 = vrot.slane %v2311_v0, 4  ;;  %v3252_v39 = vrot.slane %v3250_v37, 4  ;;  %v3255_v22 = vrot.slane %v3253_v61, 5  ;;  %v13624_v35 = vadd.f32 %v13490_v20, %v13486_v6  ;;  %v13638_v56 = vpop.f32.mrb[24].mxu0  ;;  %v2007_v10 = vld [vmem:[#allocation2 + $0xa8] sm:$0xf] }
 0x18c   : > { %v3261_v27 = vrot.slane %v3259_v28, 5  ;;  %v3265_v53 = vrot.slane %v3263_v21, 4  ;;  %v2322_v14 = vrot.slane %v2321_v46, 4  ;;  %v13634_v37 = vadd.f32 %v13506_v18, %v13496_v33  ;;  %v13644_v0 = vpop.f32.mrb[23].mxu1  ;;  %v2008_v28 = vld [vmem:[#allocation2 + $0xac] sm:$0xf] }
 0x18d   : > { %15842 = vst [vmem:[#allocation17_spill] sm:$0xff] %v13624_v35  ;;  %v2317_v52 = vsel %vm12872_vm7, %v2312_v34, %v2316_v36  ;;  %v3256_v3 = vor.u32 %v3255_v22, %v3252_v39  ;;  %v3271_v20 = vrot.slane %v3269_v11, 5  ;;  %v13642_v26 = vadd.f32 %v13508_v59, %v13500_v2  ;;  %v13646_v36 = vpop.f32.mrb[25].mxu0  ;;  %v12305_v46 = vld [vmem:[#allocation2 + $0xa8] sm:$0xff]   ;;  %v2009_v22 = vld [vmem:[#allocation2 + $0xb0] sm:$0x1] }
 0x18e   : > { %15843 = vst [vmem:[#allocation18_spill] sm:$0xff] %v13634_v37  ;;  %v3266_v6 = vor.u32 %v3265_v53, %v3261_v27  ;;  %v2327_v33 = vsel %vm12872_vm7, %v2322_v14, %v2326_v55  ;;  %v10529_v18 = vrot.slane %v2519_v8, 9  ;;  %v2669_v61 = vrot.slane %v2520_v9, 5  ;;  %v13650_v53 = vpop.f32.mrb[26].mxu0  ;;  %v2952_v8 = vld [vmem:[#allocation2 + $0xb4] sm:$0xf] }
 0x18f   : > { %15844 = vst [vmem:[#allocation19_spill] sm:$0xff] %v13642_v26  ;;  %v10512_v21 = vcombine.low %v2317_v52, %v2327_v33  ;;  %v3257_v34 = vrot.slane %v3256_v3, 4  ;;  %v2672_v11 = vrot.slane %v2521_v51, 5  ;;  %v13656_v26 = vadd.f32 %v13514_v41, %v13512_v31  ;;  %v13658_v9 = vpop.f32.mrb[24].mxu1  ;;  %v13660_v52 = vpop.f32.mrb[27].mxu0 }
 0x190   : > { %v3267_v39 = vrot.slane %v3266_v6, 4  ;;  %v2670_v2 = vsel %vm12912_vm13, %v10529_v18, %v2669_v61  ;;  %v2671_v59 = vrot.slane %v2669_v61, 4  ;;  %v2329_v55 = vshrl.u32 %v2007_v10, 16  ;;  %15846 = vst [vmem:[#allocation21_spill] sm:$0xff] %v13658_v9  ;;  %v2953_v33 = vld [vmem:[#allocation2 + $0xb8] sm:$0xf] }
 0x191   : > { %15845 = vst [vmem:[#allocation20_spill] sm:$0xff] %v13656_v26  ;;  %4891 = vmatmul.mubr.bf16.gmra.mrb[112].mxu0 %v10512_v21  ;;  %v3262_v14 = vsel %vm12872_vm7, %v3257_v34, %v3261_v27  ;;  %v2332_v3 = vshll.u32 %v2007_v10, 16  ;;  %v2338_v6 = vshll.u32 %v2008_v28, 16  ;;  %v13666_v18 = vpop.f32.mrb[25].mxu1  ;;  %v13668_v31 = vpop.f32.mrb[28].mxu0  ;;  %v2342_v54 = vshrl.u32 %v2008_v28, 16 }
 0x192   : > { %v3272_v51 = vsel %vm12872_vm7, %v3267_v39, %v3271_v20  ;;  %15847 = vst [vmem:[#allocation22_spill] sm:$0xff] %v13666_v18  ;;  %15848 = vst [vmem:[#allocation23_spill] sm:$0xff] %v13668_v31  ;;  %v2673_v61 = vsel %vm12912_vm13, %v2671_v59, %v2672_v11  ;;  %v2331_v26 = vrot.slane %v2329_v55, 4  ;;  %v2954_v21 = vld [vmem:[#allocation2 + $0xbc] sm:$0x1]  ;;  %v13672_v37 = vpop.f32.mrb[26].mxu1  ;;  %v13756_v1 = vadd.f32 %v13572_v32, %v13570_v12 }
 0x193   : > { %v10576_v41 = vcombine.low %v3262_v14, %v3272_v51  ;;  %15849 = vst [vmem:[#allocation24_spill] sm:$0xff] %v13672_v37  ;;  %v13674_v27 = vpop.f32.mrb[29].mxu0  ;;  %v10545_v34 = vcombine.low %v2670_v2, %v2673_v61  ;;  %v2334_v20 = vrot.slane %v2332_v3, 5  ;;  %v2340_v10 = vrot.slane %v2338_v6, 5  ;;  %v13676_v35 = vpop.f32.mrb[27].mxu1 }
 0x194   : > { %v2348_v39 = vshll.u32 %v2009_v22, 16  ;;  %v2344_v18 = vrot.slane %v2342_v54, 4  ;;  %v3274_v31 = vshrl.u32 %v2952_v8, 16  ;;  %v3277_v14 = vshll.u32 %v2952_v8, 16  ;;  %v2522_v37 = vld [vmem:[#allocation2 + $0xb4] sm:$0xe] }
 0x195   : > { %5051 = vmatprep.mubr.bf16.mxu1 %v10576_v41  ;;  %v3283_v51 = vshll.u32 %v2953_v33, 16  ;;  %4898 = vmatprep.mubr.bf16.mxu0 %v10545_v34  ;;  %v2335_v11 = vor.u32 %v2334_v20, %v2331_v26  ;;  %v3287_v59 = vshrl.u32 %v2953_v33, 16  ;;  %v3293_v55 = vshll.u32 %v2954_v21, 16  ;;  %v13678_v9 = vpop.f32.mrb[30].mxu0  ;;  %v13680_v61 = vpop.f32.mrb[28].mxu1  ;;  %v12310_v54 = vld [vmem:[#allocation5 + $0x40] sm:$0xff]  }
 0x196   : > { %5052 = vmatmul.mubr.bf16.gmra.mrb[112].mxu1 %v12305_v46  ;;  %v2350_v28 = vrot.slane %v2348_v39, 5  ;;  %v2345_v2 = vor.u32 %v2344_v18, %v2340_v10  ;;  %v3276_v3 = vrot.slane %v3274_v31, 4  ;;  %v3279_v6 = vrot.slane %v3277_v14, 5  ;;  %v13682_v41 = vpop.f32.mrb[31].mxu0  ;;  %v2523_v33 = vld [vmem:[#allocation2 + $0xb8] sm:$0xf]  ;;  %11490 = vmatprep.subr.bf16.mxu1 %v12310_v54 }
 0x197   : > { %v3285_v22 = vrot.slane %v3283_v51, 5  ;;  %v2336_v46 = vrot.slane %v2335_v11, 4  ;;  %v3289_v34 = vrot.slane %v3287_v59, 4  ;;  %v13687_v26 = vadd.f32 %v13528_v23, %v13526_v24  ;;  %v13689_v21 = vpop.f32.mrb[29].mxu1  ;;  %v2524_v14 = vld [vmem:[#allocation2 + $0xbc] sm:$0x1] }
 0x198   : > { %v2346_v18 = vrot.slane %v2345_v2, 4  ;;  %v3280_v31 = vor.u32 %v3279_v6, %v3276_v3  ;;  %v13693_v20 = vadd.f32 %v13558_v19, %v13544_v5  ;;  %v13697_v39 = vadd.f32 %v13560_v40, %v13548_v15  ;;  %v13699_v51 = vpop.f32.mrb[30].mxu1  ;;  %v2010_v2 = vld [vmem:[#allocation2 + $0xb4] sm:$0xf]  ;;  %v2011_v15 = vld [vmem:[#allocation2 + $0xb8] sm:$0xf] }
 0x199   : > { %15851 = vst [vmem:[#allocation26_spill] sm:$0xff] %v13699_v51  ;;  %v2341_v24 = vsel %vm12872_vm7, %v2336_v46, %v2340_v10  ;;  %v3290_v23 = vor.u32 %v3289_v34, %v3285_v22  ;;  %v3295_v11 = vrot.slane %v3293_v55, 5  ;;  %v10530_v59 = vrot.slane %v2522_v37, 9  ;;  %v13703_v3 = vpop.f32.mrb[31].mxu1  ;;  %v12306_v51 = vld [vmem:[#allocation2 + $0xb4] sm:$0xff]  }
 0x19a   : > { %15850 = vst [vmem:[#allocation25_spill] sm:$0xff] %v13697_v39  ;;  %v2351_v5 = vsel %vm12872_vm7, %v2346_v18, %v2350_v28  ;;  %v3281_v19 = vrot.slane %v3280_v31, 4  ;;  %v2676_v6 = vrot.slane %v2523_v33, 5  ;;  %v2679_v10 = vrot.slane %v2524_v14, 5  ;;  %v2012_v55 = vld [vmem:[#allocation2 + $0xbc] sm:$0x1] }
 0x19b   : > { %v13709_v8 = vpop.f32.mrb[32].mxu1  ;;  %v10513_v54 = vcombine.low %v2341_v24, %v2351_v5  ;;  %v3291_v39 = vrot.slane %v3290_v23, 4  ;;  %v13713_v37 = vadd.f32 %v13568_v4, %v13564_v47  ;;  %v2353_v31 = vshrl.u32 %v2010_v2, 16  ;;  %v871_v24 = vld [vmem:[#allocation2 + $0xc8] sm:$0x1] }
 0x19c   : > { %15853 = vst [vmem:[#allocation28_spill] sm:$0xff] %v13709_v8  ;;  %v13717_v34 = vpop.f32.mrb[33].mxu1  ;;  %v3286_v28 = vsel %vm12872_vm7, %v3281_v19, %v3285_v22  ;;  %v2677_v33 = vsel %vm12912_vm13, %v10530_v59, %v2676_v6  ;;  %v2678_v18 = vrot.slane %v2676_v6, 4  ;;  %v2356_v4 = vshll.u32 %v2010_v2, 16 }
 0x19d   : > { %v13707_v40 = vpop.f32.mrb[32].mxu0  ;;  %15854 = vst [vmem:[#allocation29_spill] sm:$0xff] %v13713_v37  ;;  %15856 = vst [vmem:[#allocation31_spill] sm:$0xff] %v13717_v34  ;;  %v13725_v14 = vpop.f32.mrb[34].mxu1  ;;  %4899 = vmatmul.mubr.bf16.gmra.mrb[116].mxu0 %v10513_v54  ;;  %v3296_v47 = vsel %vm12872_vm7, %v3291_v39, %v3295_v11  ;;  %v2362_v5 = vshll.u32 %v2011_v15, 16  ;;  %v2366_v37 = vshrl.u32 %v2011_v15, 16 }
 0x19e   : > { %15852 = vst [vmem:[#allocation27_spill] sm:$0xff] %v13707_v40  ;;  %v13715_v46 = vpop.f32.mrb[33].mxu0  ;;  %15858 = vst [vmem:[#allocation33_spill] sm:$0xff] %v13725_v14  ;;  %v2955_v34 = vld [vmem:[#allocation2 + $0xc0] sm:$0xf]  ;;  %v10577_v22 = vcombine.low %v3286_v28, %v3296_v47  ;;  %v2680_v59 = vsel %vm12912_vm13, %v2678_v18, %v2679_v10  ;;  %v2355_v19 = vrot.slane %v2353_v31, 4 }
 0x19f   : > { %15855 = vst [vmem:[#allocation30_spill] sm:$0xff] %v13715_v46  ;;  %v13723_v23 = vpop.f32.mrb[34].mxu0  ;;  %v2372_v6 = vshll.u32 %v2012_v55, 16  ;;  %v2956_v46 = vld [vmem:[#allocation2 + $0xc4] sm:$0xf]  ;;  %v10546_v54 = vcombine.low %v2677_v33, %v2680_v59  ;;  %v2358_v40 = vrot.slane %v2356_v4, 5 }
 0x1a0   : > { %15857 = vst [vmem:[#allocation32_spill] sm:$0xff] %v13723_v23  ;;  %v13729_v8 = vpop.f32.mrb[35].mxu0  ;;  %v13733_v23 = vpop.f32.mrb[35].mxu1  ;;  %v2364_v39 = vrot.slane %v2362_v5, 5  ;;  %v2368_v11 = vrot.slane %v2366_v37, 4  ;;  %5059 = vmatprep.mubr.bf16.mxu1 %v10577_v22  ;;  %v15860_v55 = vrot.slane %v13312_v44, 4 }
 0x1a1   : > { %v13742_v15 = vld [vmem:[%s15806_s2] ss:$0 sm:$0xff]  ;;  %v2374_v10 = vrot.slane %v2372_v6, 5  ;;  %v3298_v18 = vshrl.u32 %v2955_v34, 16  ;;  %v3301_v31 = vshll.u32 %v2955_v34, 16  ;;  %5060 = vmatmul.mubr.bf16.gmra.mrb[116].mxu1 %v12306_v51  ;;  %4906 = vmatprep.mubr.bf16.mxu0 %v10546_v54  ;;  %v2359_v37 = vor.u32 %v2358_v40, %v2355_v19 }
 0x1a2   : > { %v872_v28 = vsel %vm12895_vm12, %v15860_v55, %v871_v24  ;;  %v2369_v47 = vor.u32 %v2368_v11, %v2364_v39  ;;  %v3307_v4 = vshll.u32 %v2956_v46, 16  ;;  %v3311_v5 = vshrl.u32 %v2956_v46, 16  ;;  %v2525_v59 = vld [vmem:[#allocation2 + $0xc0] sm:$0xe]  ;;  %v2526_v40 = vld [vmem:[#allocation2 + $0xc4] sm:$0xf] }
 0x1a3   : > { %873 = vst [vmem:[#allocation2 + $0xc8] sm:$0x1] %v872_v28  ;;  %v3300_v44 = vrot.slane %v3298_v18, 4  ;;  %v3303_v6 = vrot.slane %v3301_v31, 5  ;;  %v13760_v51 = vadd.f32 %v13594_v17, %v13578_v7  ;;  %v2360_v46 = vrot.slane %v2359_v37, 4 }
 0x1a4   : > { %v2370_v19 = vrot.slane %v2369_v47, 4  ;;  %v13766_v54 = vrot.slane %v3307_v4, 5  ;;  %v3313_v11 = vrot.slane %v3311_v5, 4  ;;  %v13774_v12 = vadd.f32 %v13532_v48, %v13742_v15  ;;  %v2013_v18 = vld [vmem:[#allocation2 + $0xc0] sm:$0xf] }
 0x1a5   : > { %v13735_v14 = vpop.f32.mrb[36].mxu0  ;;  %v13778_v32 = vadd.f32 %v13536_v50, %v13742_v15  ;;  %v3304_v7 = vor.u32 %v3303_v6, %v3300_v44  ;;  %v13782_v17 = vadd.f32 %v13596_v63, %v13584_v43  ;;  %v2014_v31 = vld [vmem:[#allocation2 + $0xc4] sm:$0xf]  ;;  %v2365_v4 = vsel %vm12872_vm7, %v2360_v46, %v2364_v39  ;;  %v2958_v39 = vld [vmem:[#allocation2 + $0xcc] sm:$0xf] }
 0x1a6   : > { %v13737_v2 = vpop.f32.mrb[37].mxu0  ;;  %15865 = vst [vmem:[#allocation39_spill] sm:$0xff] %v13774_v12  ;;  %v2375_v48 = vsel %vm12872_vm7, %v2370_v19, %v2374_v10  ;;  %v3314_v50 = vor.u32 %v3313_v11, %v13766_v54  ;;  %v10531_v5 = vrot.slane %v2525_v59, 9  ;;  %v2683_v63 = vrot.slane %v2526_v40, 5 }
 0x1a7   : > { %15859 = vst [vmem:[#allocation34_spill] sm:$0xff] %v13737_v2  ;;  %v13748_v33 = vpop.f32.mrb[38].mxu0  ;;  %v13750_v2 = vpop.f32.mrb[36].mxu1  ;;  %15866 = vst [vmem:[#allocation40_spill] sm:$0xff] %v13778_v32  ;;  %v10514_v6 = vcombine.low %v2365_v4, %v2375_v48  ;;  %v3305_v43 = vrot.slane %v3304_v7, 4  ;;  %v2377_v12 = vshrl.u32 %v2013_v18, 16 }
 0x1a8   : > { %v13752_v22 = vpop.f32.mrb[39].mxu0  ;;  %v13762_v34 = vpop.f32.mrb[37].mxu1  ;;  %15867 = vst [vmem:[#allocation41_spill] sm:$0xff] %v13782_v17  ;;  %v13797_v17 = vadd.f32 %v13608_v38, %v13602_v57  ;;  %v3315_v32 = vrot.slane %v3314_v50, 4  ;;  %v2684_v19 = vsel %vm12912_vm13, %v10531_v5, %v2683_v63  ;;  %v2685_v40 = vrot.slane %v2683_v63, 4 }
 0x1a9   : > { %15861 = vst [vmem:[#allocation35_spill] sm:$0xff] %v13762_v34  ;;  %v13768_v55 = vpop.f32.mrb[38].mxu1  ;;  %4907 = vmatmul.mubr.bf16.gmra.mrb[120].mxu0 %v10514_v6  ;;  %v3310_v10 = vsel %vm12872_vm7, %v3305_v43, %v13766_v54  ;;  %v2390_v11 = vshrl.u32 %v2014_v31, 16  ;;  %v2959_v7 = vld [vmem:[#allocation2 + $0xd0] sm:$0xf]  ;;  %v2379_v48 = vrot.slane %v2377_v12, 4 }
 0x1aa   : > { %15863 = vst [vmem:[#allocation37_spill] sm:$0xff] %v13768_v55  ;;  %v13784_v37 = vpop.f32.mrb[39].mxu1  ;;  %15871 = vst [vmem:[#allocation45_spill] sm:$0xff] %v13797_v17  ;;  %v2957_v46 = vld [vmem:[#allocation2 + $0xc8] sm:$0x1] }
 0x1ab   : > { %15868 = vst [vmem:[#allocation42_spill] sm:$0xff] %v13784_v37  ;;  %v2527_v59 = vld [vmem:[#allocation2 + $0xc8] sm:$0x1]  ;;  %v3317_v57 = vshll.u32 %v2957_v46, 16  ;;  %v2392_v17 = vrot.slane %v2390_v11, 4  ;;  %v12311_v37 = vld [vmem:[#allocation5] sm:$0xff]  }
 0x1ac   : > { %v2686_v38 = vrot.slane %v2527_v59, 5  ;;  %v2015_v4 = vld [vmem:[#allocation2 + $0xc8] sm:$0x1]  ;;  %v2960_v63 = vld [vmem:[#allocation2 + $0xd4] sm:$0x1]  ;;  %v12312_v46 = vld [vmem:[#allocation5 + $0x48] sm:$0xff]   ;;  %11491 = vmatpush3.bf16.msra.mxu1 %v12311_v37 }
 0x1ad   : > { %v13764_v24 = vpop.f32.mrb[40].mxu0  ;;  %v2396_v6 = vshll.u32 %v2015_v4, 16  ;;  %v3319_v54 = vrot.slane %v3317_v57, 5  ;;  %v12313_v4 = vld [vmem:[#allocation5 + $0x8] sm:$0xff]   ;;  %11492 = vmatprep.subr.bf16.mxu1 %v12312_v46  ;;  %v13840_v46 = vadd.f32 %v13628_v49, %v13620_v42  ;;  %v13852_v42 = vadd.f32 %v13644_v0, %v13636_v29 }
 0x1ae   : > { %15862 = vst [vmem:[#allocation36_spill] sm:$0xff] %v13764_v24  ;;  %v13770_v28 = vpop.f32.mrb[41].mxu0  ;;  %v2687_v43 = vsel %vm12912_vm13, %v2685_v40, %v2686_v38  ;;  %v3331_v38 = vshll.u32 %v2959_v7, 16  ;;  %v13864_v29 = vadd.f32 %v13646_v36, %v13638_v56  ;;  %v13868_v0 = vadd.f32 %v13660_v52, %v13650_v53  ;;  %v3436_v53 = vld [vmem:[#allocation2 + $0x44] sm:$0x1] }
 0x1af   : > { %15864 = vst [vmem:[#allocation38_spill] sm:$0xff] %v13770_v28  ;;  %v13786_v47 = vpop.f32.mrb[42].mxu0  ;;  %v2386_v28 = vshll.u32 %v2014_v31, 16  ;;  %v3325_v31 = vshll.u32 %v2958_v39, 16  ;;  %v10547_v59 = vcombine.low %v2684_v19, %v2687_v43  ;;  %v3320_v57 = vsel %vm12872_vm7, %v3315_v32, %v3319_v54  ;;  %v3425_v54 = vld [vmem:[#allocation2 + $0x18] sm:$0xe] }
 0x1b0   : > { %15869 = vst [vmem:[#allocation43_spill] sm:$0xff] %v13786_v47  ;;  %v13793_v44 = vpop.f32.mrb[43].mxu0  ;;  %v2380_v47 = vshll.u32 %v2013_v18, 16  ;;  %v13820_v32 = vadd.f32 %v13614_v58, %v13610_v13  ;;  %v3426_v43 = vld [vmem:[#allocation2 + $0x1c] sm:$0xf]  ;;  %11493 = vmatpush3.bf16.msra.mxu1 %v12313_v4  ;;  %v13836_v13 = vadd.f32 %v13582_v30, %v13742_v15  ;;  %15874 = vst [vmem:[#allocation48_spill] sm:$0xff] %v13840_v46 }
 0x1b1   : > { %15870 = vst [vmem:[#allocation44_spill] sm:$0xff] %v13793_v44  ;;  %v2388_v50 = vrot.slane %v2386_v28, 5  ;;  %v3322_v44 = vshrl.u32 %v2958_v39, 16  ;;  %v13804_v24 = vpop.f32.mrb[40].mxu1  ;;  %v3327_v40 = vrot.slane %v3325_v31, 5  ;;  %v10578_v39 = vcombine.low %v3310_v10, %v3320_v57  ;;  %4914 = vmatprep.mubr.bf16.mxu0 %v10547_v59  ;;  %15875 = vst [vmem:[#allocation49_spill] sm:$0xff] %v13852_v42 }
 0x1b2   : > { %v2382_v18 = vrot.slane %v2380_v47, 5  ;;  %15872 = vst [vmem:[#allocation46_spill] sm:$0xff] %v13804_v24  ;;  %v13808_v55 = vpop.f32.mrb[41].mxu1  ;;  %v2398_v47 = vrot.slane %v2396_v6, 5  ;;  %v12308_v24 = vld [vmem:[#allocation2 + $0xc0] sm:$0xff]   ;;  %v3333_v6 = vrot.slane %v3331_v38, 5 }
 0x1b3   : > { %v2393_v12 = vor.u32 %v2392_v17, %v2388_v50  ;;  %v3324_v28 = vrot.slane %v3322_v44, 4  ;;  %v13810_v11 = vpop.f32.mrb[42].mxu1  ;;  %v3335_v17 = vshrl.u32 %v2959_v7, 16  ;;  %5067 = vmatprep.mubr.bf16.mxu1 %v10578_v39  ;;  %15873 = vst [vmem:[#allocation47_spill] sm:$0xff] %v13836_v13  ;;  %v3429_v59 = vld [vmem:[#allocation2 + $0x28] sm:$0xf] }
 0x1b4   : > { %v2383_v5 = vor.u32 %v2382_v18, %v2379_v48  ;;  %v13814_v48 = vpop.f32.mrb[43].mxu1  ;;  %v3341_v18 = vshll.u32 %v2960_v63, 16  ;;  %v3428_v63 = vld [vmem:[#allocation2 + $0x24] sm:$0xe]  ;;  %5068 = vmatmul.mubr.bf16.gmra.mrb[120].mxu1 %v12308_v24  ;;  %v3523_v57 = vrot.slane %v3426_v43, 5  ;;  %v3530_v43 = vrot.slane %v3429_v59, 5 }
 0x1b5   : > { %v2394_v19 = vrot.slane %v2393_v12, 4  ;;  %v3328_v37 = vor.u32 %v3327_v40, %v3324_v28  ;;  %v3337_v7 = vrot.slane %v3335_v17, 4  ;;  %v3430_v12 = vld [vmem:[#allocation2 + $0x2c] sm:$0x1]  ;;  %v10580_v28 = vrot.slane %v3425_v54, 9  ;;  %v12314_v52 = vld [vmem:[#allocation5 + $0x50] sm:$0xff]  }
 0x1b6   : > { %v2384_v34 = vrot.slane %v2383_v5, 4  ;;  %v13824_v5 = vadd.f32 %v13576_v25, %v13742_v15  ;;  %v10581_v49 = vrot.slane %v3428_v63, 9  ;;  %v3431_v38 = vld [vmem:[#allocation2 + $0x30] sm:$0xe]  ;;  %v3432_v39 = vld [vmem:[#allocation2 + $0x34] sm:$0xf]  ;;  %11494 = vmatprep.subr.bf16.mxu1 %v12314_v52 }
 0x1b7   : > { %v2399_v10 = vsel %vm12872_vm7, %v2394_v19, %v2398_v47  ;;  %v3329_v58 = vrot.slane %v3328_v37, 4  ;;  %v3343_v47 = vrot.slane %v3341_v18, 5  ;;  %v3524_v37 = vsel %vm12912_vm13, %v10580_v28, %v3523_v57  ;;  %v15877_v63 = vld [vmem:[#allocation22_spill] sm:$0xff] }
 0x1b8   : > { %v2389_v44 = vsel %vm12872_vm7, %v2384_v34, %v2388_v50  ;;  %v13830_v34 = vadd.f32 %v13626_v60, %v13618_v62  ;;  %v3427_v50 = vld [vmem:[#allocation2 + $0x20] sm:$0x1]  ;;  %v3338_v60 = vor.u32 %v3337_v7, %v3333_v6  ;;  %v3525_v54 = vrot.slane %v3523_v57, 4  ;;  %v15879_v57 = vld [vmem:[#allocation17_spill] sm:$0xff]  ;;  %v3439_v46 = vld [vmem:[#allocation2 + $0x50] sm:$0x1] }
 0x1b9   : > { %v13832_v31 = vpop.f32.mrb[44].mxu1  ;;  %v10515_v25 = vcombine.low %v2389_v44, %v2399_v10  ;;  %v3334_v30 = vsel %vm12872_vm7, %v3329_v58, %v3333_v6  ;;  %v3526_v24 = vrot.slane %v3427_v50, 5  ;;  %v12309_v44 = vld [vmem:[#allocation2 + $0xcc] sm:$0xff]   ;;  %v3433_v6 = vld [vmem:[#allocation2 + $0x38] sm:$0x1]  ;;  %v3533_v7 = vrot.slane %v3430_v12, 5 }
 0x1ba   : > { %v13842_v62 = vpop.f32.mrb[45].mxu1  ;;  %v3339_v18 = vrot.slane %v3338_v60, 4  ;;  %v15876_v50 = vld [vmem:[#allocation21_spill] sm:$0xff]  ;;  %v3434_v58 = vld [vmem:[#allocation2 + $0x3c] sm:$0xe]  ;;  %v3531_v56 = vsel %vm12912_vm13, %v10581_v49, %v3530_v43  ;;  %v3532_v36 = vrot.slane %v3530_v43, 4 }
 0x1bb   : > { %v13846_v40 = vpop.f32.mrb[46].mxu1  ;;  %4915 = vmatmul.mubr.bf16.gmra.mrb[124].mxu0 %v10515_v25  ;;  %v13872_v25 = vadd.f32 %v15877_v63, %v15876_v50  ;;  %v3435_v60 = vld [vmem:[#allocation2 + $0x40] sm:$0xf]  ;;  %v3527_v12 = vsel %vm12912_vm13, %v3525_v54, %v3526_v24  ;;  %v13884_v50 = vadd.f32 %v15879_v57, %v13742_v15  ;;  %v15881_v63 = vld [vmem:[#allocation18_spill] sm:$0xff]  ;;  %v10582_v54 = vrot.slane %v3431_v38, 9 }
 0x1bc   : > { %v13856_v17 = vpop.f32.mrb[47].mxu1  ;;  %v3344_v59 = vsel %vm12872_vm7, %v3339_v18, %v3343_v47  ;;  %v10596_v45 = vcombine.low %v3524_v37, %v3527_v12  ;;  %v3437_v47 = vld [vmem:[#allocation2 + $0x48] sm:$0xe]  ;;  %v3438_v18 = vld [vmem:[#allocation2 + $0x4c] sm:$0xf]  ;;  %v3534_v24 = vsel %vm12912_vm13, %v3532_v36, %v3533_v7  ;;  %v3537_v49 = vrot.slane %v3432_v39, 5 }
 0x1bd   : > { %v13844_v4 = vpop.f32.mrb[44].mxu0  ;;  %15878 = vst [vmem:[#allocation21_spill] sm:$0xff] %v13872_v25  ;;  %15880 = vst [vmem:[#allocation22_spill] sm:$0xff] %v13884_v50  ;;  %v13888_v25 = vadd.f32 %v15881_v63, %v13742_v15  ;;  %v10579_v42 = vcombine.low %v3334_v30, %v3344_v59  ;;  %v3540_v43 = vrot.slane %v3433_v6, 5  ;;  %v10597_v57 = vcombine.low %v3531_v56, %v3534_v24  ;;  %v15883_v50 = vld [vmem:[#allocation24_spill] sm:$0xff]  ;;  %v15885_v7 = vld [vmem:[#allocation23_spill] sm:$0xff] }
 0x1be   : > { %v13854_v19 = vpop.f32.mrb[45].mxu0  ;;  %11995 = vmatprep.mubr.bf16.mxu0 %v10596_v45  ;;  %v13896_v63 = vadd.f32 %v13676_v35, %v15883_v50  ;;  %v10583_v30 = vrot.slane %v3434_v58, 9  ;;  %v3544_v37 = vrot.slane %v3435_v60, 5  ;;  %v12315_v12 = vld [vmem:[#allocation5 + $0x10] sm:$0xff]   ;;  %v3538_v38 = vsel %vm12912_vm13, %v10582_v54, %v3537_v49  ;;  %v13906_v45 = vld [vmem:[#allocation2 + $0x54] sm:$0xe] }
 0x1bf   : > { %v13860_v10 = vpop.f32.mrb[46].mxu0  ;;  %15882 = vst [vmem:[#allocation17_spill] sm:$0xff] %v13888_v25  ;;  %5075 = vmatprep.mubr.bf16.mxu1 %v10579_v42  ;;  %v3539_v39 = vrot.slane %v3537_v49, 4  ;;  %v3547_v6 = vrot.slane %v3436_v53, 5  ;;  %v13904_v42 = vadd.f32 %v13674_v27, %v15885_v7  ;;  %v3441_v56 = vld [vmem:[#allocation2 + $0x58] sm:$0xf]  ;;  %v13914_v60 = vadd.f32 %v13687_v26, %v13742_v15  ;;  %11495 = vmatpush3.bf16.msra.mxu1 %v12315_v12 }
 0x1c0   : > { %v13874_v28 = vpop.f32.mrb[47].mxu0  ;;  %15884 = vst [vmem:[#allocation18_spill] sm:$0xff] %v13896_v63  ;;  %5076 = vmatmul.mubr.bf16.gmra.mrb[124].mxu1 %v12309_v44  ;;  %v3546_v44 = vrot.slane %v3544_v37, 4  ;;  %v13918_v36 = vadd.f32 %v13682_v41, %v13678_v9  ;;  %v13922_v27 = vadd.f32 %v13689_v21, %v13680_v61  ;;  %v3442_v53 = vld [vmem:[#allocation2 + $0x5c] sm:$0x1]  ;;  %v3545_v24 = vsel %vm12912_vm13, %v10583_v30, %v3544_v37  ;;  %v15890_v37 = vld [vmem:[#allocation26_spill] sm:$0xff] }
 0x1c1   : > { %v13892_v13 = vpop.f32.mrb[48].mxu1  ;;  %15886 = vst [vmem:[#allocation24_spill] sm:$0xff] %v13914_v60  ;;  %v3541_v26 = vsel %vm12912_vm13, %v3539_v39, %v3540_v43  ;;  %v10584_v54 = vrot.slane %v3437_v47, 9  ;;  %v3551_v49 = vrot.slane %v3438_v18, 5  ;;  %v3443_v9 = vld [vmem:[#allocation2 + $0x60] sm:$0xe]  ;;  %v13936_v61 = vadd.f32 %v13693_v20, %v13742_v15 }
 0x1c2   : > { %v13898_v59 = vpop.f32.mrb[49].mxu1  ;;  %15887 = vst [vmem:[#allocation23_spill] sm:$0xff] %v13922_v27  ;;  %v10598_v21 = vcombine.low %v3538_v38, %v3541_v26  ;;  %v3554_v12 = vrot.slane %v3439_v46, 5  ;;  %v3444_v7 = vld [vmem:[#allocation2 + $0x64] sm:$0xf]  ;;  %v13944_v47 = vadd.f32 %v13756_v1, %v13742_v15  ;;  %v13950_v20 = vadd.f32 %v13703_v3, %v15890_v37  ;;  %v15896_v60 = vld [vmem:[#allocation31_spill] sm:$0xff] }
 0x1c3   : > { %v13910_v58 = vpop.f32.mrb[50].mxu1  ;;  %11996 = vmatmul.mubr.bf16.vlgmr.msra.gmra.mrb[128].mxu0 %v10597_v57  ;;  %15888 = vst [vmem:[#allocation50_spill] sm:$0xff] %v13936_v61  ;;  %v3548_v57 = vsel %vm12912_vm13, %v3546_v44, %v3547_v6  ;;  %v3445_v27 = vld [vmem:[#allocation2 + $0x68] sm:$0x1]  ;;  %v3552_v18 = vsel %vm12912_vm13, %v10584_v54, %v3551_v49  ;;  %v3553_v30 = vrot.slane %v3551_v49, 4  ;;  %v10585_v46 = vrot.slane %v13906_v45, 9 }
 0x1c4   : > { %v13926_v50 = vpop.f32.mrb[51].mxu1  ;;  %15889 = vst [vmem:[#allocation51_spill] sm:$0xff] %v13944_v47  ;;  %15891 = vst [vmem:[#allocation26_spill] sm:$0xff] %v13950_v20  ;;  %11999 = vmatprep.mubr.bf16.mxu0 %v10598_v21  ;;  %v10599_v38 = vcombine.low %v3545_v24, %v3548_v57  ;;  %v3558_v39 = vrot.slane %v3441_v56, 5  ;;  %v15892_v6 = vld [vmem:[#allocation27_spill] sm:$0xff]  ;;  %v15893_v44 = vld [vmem:[#allocation30_spill] sm:$0xff] }
 0x1c5   : > { %v13908_v35 = vpop.f32.mrb[48].mxu0  ;;  %v11084_v26 = vadd.f32 %v15893_v44, %v15892_v6  ;;  %v3447_v63 = vld [vmem:[#allocation2 + $0x70] sm:$0xf]  ;;  %v3555_v1 = vsel %vm12912_vm13, %v3553_v30, %v3554_v12  ;;  %v3561_v47 = vrot.slane %v3442_v53, 5  ;;  %v15894_v61 = vld [vmem:[#allocation32_spill] sm:$0xff]  ;;  %v10586_v56 = vrot.slane %v3443_v9, 9 }
 0x1c6   : > { %v13924_v52 = vpop.f32.mrb[49].mxu0  ;;  %v11087_v54 = vadd.f32 %v13729_v8, %v15894_v61  ;;  %v15895_v49 = vld [vmem:[#allocation28_spill] sm:$0xff]  ;;  %v3446_v37 = vld [vmem:[#allocation2 + $0x6c] sm:$0xe]  ;;  %v10600_v21 = vcombine.low %v3552_v18, %v3555_v1  ;;  %v3560_v24 = vrot.slane %v3558_v39, 4  ;;  %v3565_v44 = vrot.slane %v3444_v7, 5 }
 0x1c7   : > { %v13932_v41 = vpop.f32.mrb[50].mxu0  ;;  %v11196_v3 = vadd.f32 %v15896_v60, %v15895_v49  ;;  %v4539_v45 = vadd.f32 %v11084_v26, %v13742_v15  ;;  %v3448_v57 = vld [vmem:[#allocation2 + $0x74] sm:$0x1]  ;;  %v3568_v20 = vrot.slane %v3445_v27, 5  ;;  %v15897_v25 = vld [vmem:[#allocation33_spill] sm:$0xff]  ;;  %v13969_v60 = vadd.f32 %v13760_v51, %v13742_v15 }
 0x1c8   : > { %v13940_v43 = vpop.f32.mrb[51].mxu0  ;;  %v4542_v6 = vadd.f32 %v11087_v54, %v13742_v15  ;;  %v11199_v53 = vadd.f32 %v13733_v23, %v15897_v25  ;;  %v3449_v12 = vld [vmem:[#allocation2 + $0x78] sm:$0xe]  ;;  %v3450_v30 = vld [vmem:[#allocation2 + $0x7c] sm:$0xf]  ;;  %v13973_v61 = vadd.f32 %v13820_v32, %v13742_v15  ;;  %v3572_v7 = vrot.slane %v3447_v63, 5 }
 0x1c9   : > { %v13975_v9 = vadd.f32 %v11196_v3, %v4539_v45  ;;  %v3451_v27 = vld [vmem:[#allocation2 + $0x80] sm:$0x1]  ;;  %v3559_v23 = vsel %vm12912_vm13, %v10585_v46, %v3558_v39  ;;  %v3562_v25 = vsel %vm12912_vm13, %v3560_v24, %v3561_v47  ;;  %v3567_v51 = vrot.slane %v3565_v44, 4  ;;  %v15901_v54 = vld [vmem:[#allocation34_spill] sm:$0xff]  ;;  %v15902_v24 = vld [vmem:[#allocation35_spill] sm:$0xff] }
 0x1ca   : > { %15898 = vst [vmem:[#allocation27_spill] sm:$0xff] %v13973_v61  ;;  %v13983_v26 = vadd.f32 %v11199_v53, %v4542_v6  ;;  %v3566_v32 = vsel %vm12912_vm13, %v10586_v56, %v3565_v44  ;;  %v3574_v63 = vrot.slane %v3572_v7, 4  ;;  %v11090_v49 = vadd.f32 %v15901_v54, %v13735_v14  ;;  %v13991_v3 = vld [vmem:[#allocation2 + $0x88] sm:$0xf]  ;;  %v3452_v14 = vld [vmem:[#allocation2 + $0x84] sm:$0xe] }
 0x1cb   : > { %12000 = vmatmul.mubr.bf16.gmra.mrb[132].mxu0 %v10599_v38  ;;  %15899 = vst [vmem:[#allocation30_spill] sm:$0xff] %v13975_v9  ;;  %v10587_v38 = vrot.slane %v3446_v37, 9  ;;  %v3569_v47 = vsel %vm12912_vm13, %v3567_v51, %v3568_v20  ;;  %v3575_v46 = vrot.slane %v3448_v57, 5  ;;  %v11093_v39 = vadd.f32 %v13752_v22, %v13748_v33  ;;  %v3454_v53 = vld [vmem:[#allocation2 + $0x8c] sm:$0x1]  ;;  %v15903_v61 = vld [vmem:[#allocation37_spill] sm:$0xff] }
 0x1cc   : > { %12003 = vmatprep.mubr.bf16.mxu0 %v10600_v21  ;;  %15900 = vst [vmem:[#allocation32_spill] sm:$0xff] %v13983_v26  ;;  %v11202_v45 = vadd.f32 %v15902_v24, %v13750_v2  ;;  %v10601_v56 = vcombine.low %v3559_v23, %v3562_v25  ;;  %v4547_v37 = vadd.f32 %v11090_v49, %v13742_v15  ;;  %v10588_v6 = vrot.slane %v3449_v12, 9  ;;  %v15904_v20 = vld [vmem:[#allocation42_spill] sm:$0xff]  ;;  %v3456_v23 = vld [vmem:[#allocation2 + $0x94] sm:$0xf] }
 0x1cd   : > { %v13965_v8 = vpop.f32.mrb[52].mxu0  ;;  %v3579_v44 = vrot.slane %v3450_v30, 5  ;;  %v10602_v54 = vcombine.low %v3566_v32, %v3569_v47  ;;  %v4550_v26 = vadd.f32 %v11093_v39, %v13742_v15  ;;  %v3582_v9 = vrot.slane %v3451_v27, 5  ;;  %v3455_v30 = vld [vmem:[#allocation2 + $0x90] sm:$0xe] }
 0x1ce   : > { %v13977_v18 = vpop.f32.mrb[53].mxu0  ;;  %v11205_v57 = vadd.f32 %v15904_v20, %v15903_v61  ;;  %v14009_v33 = vadd.f32 %v13830_v34, %v13742_v15  ;;  %v14013_v2 = vadd.f32 %v13864_v29, %v13742_v15  ;;  %v14015_v22 = vadd.f32 %v11202_v45, %v4547_v37  ;;  %v15909_v34 = vld [vmem:[#allocation36_spill] sm:$0xff]  ;;  %v15910_v49 = vld [vmem:[#allocation38_spill] sm:$0xff]  ;;  %v3457_v39 = vld [vmem:[#allocation2 + $0x98] sm:$0x1] }
 0x1cf   : > { %v13985_v1 = vpop.f32.mrb[54].mxu0  ;;  %v14005_v51 = vpop.f32.mrb[52].mxu1  ;;  %v3581_v12 = vrot.slane %v3579_v44, 4  ;;  %v3573_v61 = vsel %vm12912_vm13, %v10587_v38, %v3572_v7  ;;  %v3586_v32 = vrot.slane %v13991_v3, 5  ;;  %v11096_v47 = vadd.f32 %v15910_v49, %v15909_v34  ;;  %v14026_v29 = vld [vmem:[#allocation2 + $0xa0] sm:$0xf] }
 0x1d0   : > { %v13993_v21 = vpop.f32.mrb[55].mxu0  ;;  %15905 = vst [vmem:[#allocation28_spill] sm:$0xff] %v14009_v33  ;;  %15906 = vst [vmem:[#allocation31_spill] sm:$0xff] %v14013_v2  ;;  %v14017_v25 = vpop.f32.mrb[53].mxu1  ;;  %v14021_v27 = vadd.f32 %v11205_v57, %v4550_v26  ;;  %v3576_v45 = vsel %vm12912_vm13, %v3574_v63, %v3575_v46  ;;  %v3580_v37 = vsel %vm12912_vm13, %v10588_v6, %v3579_v44  ;;  %v15911_v7 = vld [vmem:[#allocation43_spill] sm:$0xff]  ;;  %v15912_v26 = vld [vmem:[#allocation44_spill] sm:$0xff] }
 0x1d1   : > { %15907 = vst [vmem:[#allocation33_spill] sm:$0xff] %v14015_v22  ;;  %v14028_v24 = vpop.f32.mrb[54].mxu1  ;;  %v11099_v38 = vadd.f32 %v15912_v26, %v15911_v7  ;;  %v15913_v20 = vld [vmem:[#allocation46_spill] sm:$0xff]  ;;  %v3458_v57 = vld [vmem:[#allocation2 + $0x9c] sm:$0xe]  ;;  %v10589_v22 = vrot.slane %v3452_v14, 9  ;;  %v4555_v46 = vadd.f32 %v11096_v47, %v13742_v15 }
 0x1d2   : > { %15908 = vst [vmem:[#allocation34_spill] sm:$0xff] %v14021_v27  ;;  %v11208_v3 = vadd.f32 %v13808_v55, %v15913_v20  ;;  %v14038_v34 = vpop.f32.mrb[55].mxu1  ;;  %v12316_v49 = vld [vmem:[#allocation5 + $0x58] sm:$0xff]   ;;  %v3589_v63 = vrot.slane %v3454_v53, 5  ;;  %v3588_v6 = vrot.slane %v3586_v32, 4  ;;  %v3593_v7 = vrot.slane %v3456_v23, 5 }
 0x1d3   : > { %12004 = vmatmul.mubr.bf16.gmra.mrb[136].mxu0 %v10601_v56  ;;  %v12317_v27 = vld [vmem:[#allocation5 + $0x18] sm:$0xff]   ;;  %v3583_v56 = vsel %vm12912_vm13, %v3581_v12, %v3582_v9  ;;  %v4558_v44 = vadd.f32 %v11099_v38, %v13742_v15  ;;  %v11211_v55 = vadd.f32 %v13814_v48, %v13810_v11  ;;  %v3460_v26 = vld [vmem:[#allocation2 + $0xa4] sm:$0x1]  ;;  %11496 = vmatprep.subr.bf16.mxu1 %v12316_v49  ;;  %v10590_v9 = vrot.slane %v3455_v30, 9  ;;  %v3463_v11 = vld [vmem:[#allocation2 + $0xb0] sm:$0x1] }
 0x1d4   : > { %12007 = vmatprep.mubr.bf16.mxu0 %v10602_v54  ;;  %v3462_v20 = vld [vmem:[#allocation2 + $0xac] sm:$0xf]  ;;  %v14048_v54 = vadd.f32 %v13868_v0, %v13742_v15  ;;  %v14050_v2 = vadd.f32 %v11208_v3, %v4555_v46  ;;  %v3600_v14 = vrot.slane %v14026_v29, 5  ;;  %v3461_v53 = vld [vmem:[#allocation2 + $0xa8] sm:$0xe]  ;;  %11497 = vmatpush3.bf16.msra.mxu1 %v12317_v27  ;;  %v10603_v12 = vcombine.low %v3573_v61, %v3576_v45 }
 0x1d5   : > { %v3595_v47 = vrot.slane %v3593_v7, 4  ;;  %v3596_v23 = vrot.slane %v3457_v39, 5  ;;  %v14053_v38 = vadd.f32 %v11211_v55, %v4558_v44  ;;  %v10604_v48 = vcombine.low %v3580_v37, %v3583_v56  ;;  %v3465_v3 = vld [vmem:[#allocation2 + $0xb8] sm:$0xf]  ;;  %v3464_v37 = vld [vmem:[#allocation2 + $0xb4] sm:$0xe] }
 0x1d6   : > { %v3587_v49 = vsel %vm12912_vm13, %v10589_v22, %v3586_v32  ;;  %v10591_v33 = vrot.slane %v3458_v57, 9  ;;  %v11102_v0 = vadd.f32 %v13854_v19, %v13844_v4  ;;  %v3590_v27 = vsel %vm12912_vm13, %v3588_v6, %v3589_v63  ;;  %v3466_v57 = vld [vmem:[#allocation2 + $0xbc] sm:$0x1] }
 0x1d7   : > { %v14059_v30 = vpop.f32.mrb[56].mxu1  ;;  %v3602_v61 = vrot.slane %v3600_v14, 4  ;;  %v11105_v39 = vadd.f32 %v13874_v28, %v13860_v10  ;;  %v11214_v29 = vadd.f32 %v13842_v62, %v13832_v31  ;;  %v3594_v22 = vsel %vm12912_vm13, %v10590_v9, %v3593_v7 }
 0x1d8   : > { %v14067_v45 = vpop.f32.mrb[57].mxu1  ;;  %v3603_v32 = vrot.slane %v3460_v26, 5  ;;  %v4563_v4 = vadd.f32 %v11102_v0, %v13742_v15  ;;  %v3607_v19 = vrot.slane %v3462_v20, 5  ;;  %v3597_v10 = vsel %vm12912_vm13, %v3595_v47, %v3596_v23  ;;  %v3467_v20 = vld [vmem:[#allocation2 + $0xc0] sm:$0xe] }
 0x1d9   : > { %v14072_v63 = vpop.f32.mrb[58].mxu1  ;;  %v4566_v31 = vadd.f32 %v11105_v39, %v13742_v15  ;;  %v10592_v62 = vrot.slane %v3461_v53, 9  ;;  %v11217_v28 = vadd.f32 %v13856_v17, %v13846_v40  ;;  %v10605_v44 = vcombine.low %v3587_v49, %v3590_v27  ;;  %v3468_v17 = vld [vmem:[#allocation2 + $0xc4] sm:$0xf]  ;;  %v14102_v27 = vld [vmem:[#allocation2 + $0xd0] sm:$0xf] }
 0x1da   : > { %v11118_v56 = vpop.f32.mrb[56].mxu0  ;;  %v11234_v6 = vpop.f32.mrb[59].mxu1  ;;  %v14079_v7 = vadd.f32 %v11214_v29, %v4563_v4  ;;  %v3609_v55 = vrot.slane %v3607_v19, 4  ;;  %v3610_v26 = vrot.slane %v3463_v11, 5  ;;  %v3614_v53 = vrot.slane %v3465_v3, 5 }
 0x1db   : > { %12008 = vmatmul.mubr.bf16.gmra.mrb[140].mxu0 %v10603_v12  ;;  %v11119_v46 = vpop.f32.mrb[57].mxu0  ;;  %v14083_v12 = vsel %vm12912_vm13, %v10591_v33, %v3600_v14  ;;  %v14085_v47 = vadd.f32 %v11217_v28, %v4566_v31  ;;  %v11108_v40 = vadd.f32 %v13924_v52, %v13908_v35  ;;  %v14091_v49 = vsel %vm12912_vm13, %v3602_v61, %v3603_v32  ;;  %v3469_v14 = vld [vmem:[#allocation2 + $0xc8] sm:$0x1] }
 0x1dc   : > { %12011 = vmatprep.mubr.bf16.mxu0 %v10604_v48  ;;  %v11121_v9 = vpop.f32.mrb[58].mxu0  ;;  %v10606_v48 = vcombine.low %v3594_v22, %v3597_v10  ;;  %v11111_v11 = vadd.f32 %v13940_v43, %v13932_v41  ;;  %v11220_v33 = vadd.f32 %v13898_v59, %v13892_v13  ;;  %v14099_v0 = vsel %vm12912_vm13, %v10592_v62, %v3607_v19 }
 0x1dd   : > { %v11122_v23 = vpop.f32.mrb[59].mxu0  ;;  %v10593_v3 = vrot.slane %v3464_v37, 9  ;;  %v3617_v35 = vrot.slane %v3466_v57, 5  ;;  %v4571_v52 = vadd.f32 %v11108_v40, %v13742_v15  ;;  %v14106_v61 = vsel %vm12912_vm13, %v3609_v55, %v3610_v26 }
 0x1de   : > { %v4574_v41 = vadd.f32 %v11111_v11, %v13742_v15  ;;  %v3621_v43 = vrot.slane %v3468_v17, 5  ;;  %v11223_v13 = vadd.f32 %v13926_v50, %v13910_v58  ;;  %v14113_v59 = vadd.f32 %v13904_v42, %v13742_v15 }
 0x1df   : > { %v3616_v39 = vrot.slane %v3614_v53, 4  ;;  %v14115_v29 = vadd.f32 %v11220_v33, %v4571_v52  ;;  %v10594_v22 = vrot.slane %v3467_v20, 9  ;;  %v14119_v32 = vadd.f32 %v13918_v36, %v13742_v15  ;;  %v3470_v33 = vld [vmem:[#allocation2 + $0xcc] sm:$0xe] }
 0x1e0   : > { %v3623_v4 = vrot.slane %v3621_v43, 4  ;;  %v3624_v19 = vrot.slane %v3469_v14, 5  ;;  %v14121_v37 = vadd.f32 %v11223_v13, %v4574_v41  ;;  %v10607_v58 = vcombine.low %v14083_v12, %v14091_v49  ;;  %v15916_v41 = vld [vmem:[#allocation40_spill] sm:$0xff] }
 0x1e1   : > { %v10608_v42 = vcombine.low %v14099_v0, %v14106_v61  ;;  %v14129_v50 = vsel %vm12912_vm13, %v10593_v3, %v3614_v53  ;;  %v11114_v57 = vadd.f32 %v13977_v18, %v13965_v8  ;;  %v3628_v36 = vrot.slane %v14102_v27, 5  ;;  %v15914_v0 = vld [vmem:[#allocation39_spill] sm:$0xff]  ;;  %v15915_v3 = vld [vmem:[#allocation13_spill] sm:$0xff] }
 0x1e2   : > { %v11117_v10 = vadd.f32 %v13993_v21, %v13985_v1  ;;  %v11226_v31 = vadd.f32 %v14017_v25, %v14005_v51  ;;  %v11229_v62 = vadd.f32 %v14038_v34, %v14028_v24  ;;  %v11124_v28 = vpop.f32.mrb[60].mxu0  ;;  %v14146_v8 = vsel %vm12912_vm13, %v10594_v22, %v3621_v43  ;;  %v11236_v1 = vpop.f32.mrb[60].mxu1  ;;  %v15917_v43 = vld [vmem:[#allocation14_spill] sm:$0xff] }
 0x1e3   : > { %12012 = vmatmul.mubr.bf16.gmra.mrb[144].mxu0 %v10605_v44  ;;  %v14142_v44 = vsel %vm12912_vm13, %v3616_v39, %v3617_v35  ;;  %v4579_v18 = vadd.f32 %v11114_v57, %v13742_v15  ;;  %v11120_v55 = vadd.f32 %v11119_v46, %v11118_v56  ;;  %v11125_v26 = vpop.f32.mrb[61].mxu0  ;;  %v14151_v21 = vsel %vm12912_vm13, %v3623_v4, %v3624_v19  ;;  %v11237_v20 = vpop.f32.mrb[61].mxu1  ;;  %v15918_v39 = vld [vmem:[#allocation15_spill] sm:$0xff] }
 0x1e4   : > { %12015 = vmatprep.mubr.bf16.mxu0 %v10606_v48  ;;  %v4582_v51 = vadd.f32 %v11117_v10, %v13742_v15  ;;  %v11123_v25 = vadd.f32 %v11122_v23, %v11121_v9  ;;  %v11232_v24 = vadd.f32 %v14067_v45, %v14059_v30  ;;  %v11127_v34 = vpop.f32.mrb[62].mxu0  ;;  %v11235_v56 = vadd.f32 %v11234_v6, %v14072_v63  ;;  %v11239_v17 = vpop.f32.mrb[62].mxu1  ;;  %v12318_v63 = vld [vmem:[#allocation5 + $0x60] sm:$0xff]   ;;  %v15920_v10 = vld [vmem:[#allocation16_spill] sm:$0xff] }
 0x1e5   : > { %v14156_v12 = vadd.f32 %v11226_v31, %v4579_v18  ;;  %v4587_v53 = vadd.f32 %v11120_v55, %v13742_v15  ;;  %v11126_v46 = vadd.f32 %v11125_v26, %v11124_v28  ;;  %v11128_v40 = vpop.f32.mrb[63].mxu0  ;;  %v11238_v9 = vadd.f32 %v11237_v20, %v11236_v1  ;;  %v11240_v23 = vpop.f32.mrb[63].mxu1  ;;  %v12319_v6 = vld [vmem:[#allocation5 + $0x20] sm:$0xff]   ;;  %v15923_v55 = vld [vmem:[#allocation17_spill] sm:$0xff]  ;;  %v15924_v26 = vld [vmem:[#allocation20_spill] sm:$0xff]  ;;  %11498 = vmatprep.subr.bf16.mxu1 %v12318_v63 }
 0x1e6   : > { %v14160_v48 = vadd.f32 %v11229_v62, %v4582_v51  ;;  %v4590_v49 = vadd.f32 %v11123_v25, %v13742_v15  ;;  %v11129_v11 = vadd.f32 %v11128_v40, %v11127_v34  ;;  %v11241_v14 = vadd.f32 %v11240_v23, %v11239_v17  ;;  %v3472_v4 = vld [vmem:[#allocation2 + $0xd4] sm:$0x1]  ;;  %v15921_v62 = vld [vmem:[#allocation22_spill] sm:$0xff]  ;;  %v15925_v51 = vld [vmem:[#allocation24_spill] sm:$0xff]  ;;  %11499 = vmatpush3.bf16.msra.mxu1 %v12319_v6 }
 0x1e7   : > { %v14163_v30 = vadd.f32 %v11232_v24, %v4587_v53  ;;  %v4595_v45 = vadd.f32 %v11126_v46, %v13742_v15  ;;  %v4636_v35 = vadd.f32 %v15915_v3, %v15914_v0  ;;  %v4639_v13 = vadd.f32 %v15917_v43, %v15916_v41  ;;  %v15919_v57 = vld [vmem:[#allocation47_spill] sm:$0xff]  ;;  %v15927_v25 = vld [vmem:[#allocation50_spill] sm:$0xff]  ;;  %v15928_v24 = vld [vmem:[#allocation29_spill] sm:$0xff] }
 0x1e8   : > { %v14168_v52 = vadd.f32 %v11235_v56, %v4590_v49  ;;  %v4598_v61 = vadd.f32 %v11129_v11, %v13742_v15  ;;  %v4644_v22 = vadd.f32 %v15918_v39, %v13824_v5  ;;  %v4647_v31 = vadd.f32 %v15920_v10, %v15919_v57  ;;  %v15922_v28 = vld [vmem:[#allocation19_spill] sm:$0xff]  ;;  %v15926_v5 = vld [vmem:[#allocation25_spill] sm:$0xff]  ;;  %v15933_v49 = vld [vmem:[#allocation48_spill] sm:$0xff] }
 0x1e9   : > { %v14175_v19 = vadd.f32 %v11238_v9, %v4595_v45  ;;  %v14181_v18 = vadd.f32 %v15922_v28, %v15921_v62  ;;  %v14185_v15 = vadd.f32 %v15924_v26, %v15923_v55  ;;  %v14195_v34 = vadd.f32 %v15928_v24, %v15927_v25  ;;  %v15929_v20 = vld [vmem:[#allocation51_spill] sm:$0xff]  ;;  %v15930_v53 = vld [vmem:[#allocation41_spill] sm:$0xff]  ;;  %v15934_v9 = vld [vmem:[#allocation28_spill] sm:$0xff] }
 0x1ea   : > { %v14187_v1 = vadd.f32 %v11241_v14, %v4598_v61  ;;  %v14199_v56 = vadd.f32 %v15930_v53, %v15929_v20  ;;  %v11258_v46 = vpop.f32.mrb[64].mxu0  ;;  %v15931_v40 = vld [vmem:[#allocation45_spill] sm:$0xff]  ;;  %v15936_v14 = vld [vmem:[#allocation31_spill] sm:$0xff]  ;;  %v10595_v61 = vrot.slane %v3470_v33, 9  ;;  %v15938_v43 = vld [vmem:[#allocation18_spill] sm:$0xff]  ;;  %v10609_v28 = vcombine.low %v14129_v50, %v14142_v44 }
 0x1eb   : > { %12016 = vmatmul.mubr.bf16.gmra.mrb[148].mxu0 %v10607_v58  ;;  %v14191_v58 = vadd.f32 %v15926_v5, %v15925_v51  ;;  %v14203_v17 = vadd.f32 %v15931_v40, %v13969_v60  ;;  %v15935_v23 = vld [vmem:[#allocation49_spill] sm:$0xff]  ;;  %v11259_v41 = vpop.f32.mrb[65].mxu0  ;;  %v14219_v39 = vadd.f32 %v15938_v43, %v14048_v54  ;;  %v15939_v60 = vld [vmem:[#allocation23_spill] sm:$0xff]  ;;  %v15940_v10 = vld [vmem:[#allocation26_spill] sm:$0xff]  ;;  %v3630_v33 = vrot.slane %v3628_v36, 4 }
 0x1ec   : > { %12019 = vmatprep.mubr.bf16.mxu0 %v10608_v42  ;;  %v15932_v42 = vld [vmem:[#allocation27_spill] sm:$0xff]  ;;  %v14211_v45 = vadd.f32 %v15935_v23, %v15934_v9  ;;  %v15937_v0 = vld [vmem:[#allocation21_spill] sm:$0xff]  ;;  %v14223_v57 = vadd.f32 %v15939_v60, %v14113_v59  ;;  %v14227_v62 = vadd.f32 %v15940_v10, %v14119_v32  ;;  %v11260_v63 = vadd.f32 %v11259_v41, %v11258_v46  ;;  %v11261_v55 = vpop.f32.mrb[66].mxu0 }
 0x1ed   : > { %v14207_v11 = vadd.f32 %v15933_v49, %v15932_v42  ;;  %v14215_v3 = vadd.f32 %v15937_v0, %v15936_v14  ;;  %v10610_v54 = vcombine.low %v14146_v8, %v14151_v21  ;;  %v3631_v26 = vrot.slane %v3472_v4, 5  ;;  %v11262_v51 = vpop.f32.mrb[67].mxu0  ;;  %v11370_v25 = vpop.f32.mrb[64].mxu1  ;;  %v12320_v43 = vld [vmem:[#allocation5 + $0x68] sm:$0xff]  }
 0x1ee   : > { %v4797_v59 = vadd.f32 %v11260_v63, %v4636_v35  ;;  %v11263_v5 = vadd.f32 %v11262_v51, %v11261_v55  ;;  %v11371_v24 = vpop.f32.mrb[65].mxu1  ;;  %v3629_v50 = vsel %vm12912_vm13, %v10595_v61, %v3628_v36  ;;  %v12321_v60 = vld [vmem:[#allocation5 + $0x28] sm:$0xff]   ;;  %11500 = vmatprep.subr.bf16.mxu1 %v12320_v43 }
 0x1ef   : > { %v3632_v44 = vsel %vm12912_vm13, %v3630_v33, %v3631_v26  ;;  %v11372_v6 = vadd.f32 %v11371_v24, %v11370_v25  ;;  %v11373_v20 = vpop.f32.mrb[66].mxu1  ;;  %11501 = vmatpush3.bf16.msra.mxu1 %v12321_v60 }
 0x1f0   : > { %v4800_v32 = vadd.f32 %v11263_v5, %v4639_v13  ;;  %v11374_v8 = vpop.f32.mrb[67].mxu1  ;;  %v10611_v35 = vcombine.low %v3629_v50, %v3632_v44 }
 0x1f1   : > { %v11375_v21 = vadd.f32 %v11374_v8, %v11373_v20  ;;  %v14241_v4 = vadd.f32 %v11372_v6, %v4797_v59 }
 0x1f2   : > { %v11264_v53 = vpop.f32.mrb[68].mxu0 }
 0x1f3   : > { %12020 = vmatmul.mubr.bf16.gmra.mrb[152].mxu0 %v10609_v28  ;;  %v14243_v46 = vadd.f32 %v11375_v21, %v4800_v32  ;;  %v11265_v13 = vpop.f32.mrb[69].mxu0 }
 0x1f4   : > { %12023 = vmatprep.mubr.bf16.mxu0 %v10610_v54  ;;  %v11266_v40 = vadd.f32 %v11265_v13, %v11264_v53  ;;  %v11267_v42 = vpop.f32.mrb[70].mxu0 }
 0x1f5   : > { %v11268_v27 = vpop.f32.mrb[71].mxu0 }
 0x1f6   : > { %v4805_v49 = vadd.f32 %v11266_v40, %v4644_v22  ;;  %v11269_v36 = vadd.f32 %v11268_v27, %v11267_v42 }
 0x1f7   : > { %v11376_v9 = vpop.f32.mrb[68].mxu1 }
 0x1f8   : > { %v4808_v23 = vadd.f32 %v11269_v36, %v4647_v31  ;;  %v11377_v14 = vpop.f32.mrb[69].mxu1 }
 0x1f9   : > { %v11378_v0 = vadd.f32 %v11377_v14, %v11376_v9  ;;  %v11379_v61 = vpop.f32.mrb[70].mxu1 }
 0x1fa   : > { %v11380_v41 = vpop.f32.mrb[71].mxu1 }
 0x1fb   : > { %12024 = vmatmul.mubr.bf16.gmra.mrb[156].mxu0 %v10611_v35  ;;  %v11381_v10 = vadd.f32 %v11380_v41, %v11379_v61  ;;  %v14245_v28 = vadd.f32 %v11378_v0, %v4805_v49  ;;  %v12322_v41 = vld [vmem:[#allocation5 + $0xc0] sm:$0xff]  }
 0x1fc   : > { %v11270_v33 = vpop.f32.mrb[72].mxu0  ;;  %11602 = vmatprep.subr.bf16.mxu0 %v12322_v41 }
 0x1fd   : > { %v14247_v63 = vadd.f32 %v11381_v10, %v4808_v23  ;;  %v11271_v55 = vpop.f32.mrb[73].mxu0 }
 0x1fe   : > { %v11272_v54 = vadd.f32 %v11271_v55, %v11270_v33  ;;  %v11273_v22 = vpop.f32.mrb[74].mxu0  ;;  %v12324_v55 = vld [vmem:[#allocation5 + $0x80] sm:$0xff]  }
 0x1ff   : > { %v11274_v26 = vpop.f32.mrb[75].mxu0  ;;  %11603 = vmatpush3.bf16.msra.mxu0 %v12324_v55 }
 0x200   : > { %v4813_v31 = vadd.f32 %v11272_v54, %v14181_v18  ;;  %v11275_v59 = vadd.f32 %v11274_v26, %v11273_v22  ;;  %v12325_v54 = vld [vmem:[#allocation5 + $0x30] sm:$0xff]  }
 0x201   : > { %v11382_v51 = vpop.f32.mrb[72].mxu1 }
 0x202   : > { %v11383_v5 = vpop.f32.mrb[73].mxu1  ;;  %v4816_v25 = vadd.f32 %v11275_v59, %v14185_v15 }
 0x203   : > { %v11384_v32 = vadd.f32 %v11383_v5, %v11382_v51  ;;  %v11385_v24 = vpop.f32.mrb[74].mxu1 }
 0x204   : > { %v11386_v50 = vpop.f32.mrb[75].mxu1 }
 0x205   : > { %v11387_v44 = vadd.f32 %v11386_v50, %v11385_v24  ;;  %v14251_v6 = vadd.f32 %v11384_v32, %v4813_v31 }
 0x207   : > { %v14253_v20 = vadd.f32 %v11387_v44, %v4816_v25 }
 0x208   : > { %v11276_v8 = vpop.f32.mrb[76].mxu0 }
 0x209   : > { %v11277_v21 = vpop.f32.mrb[77].mxu0 }
 0x20a   : > { %v11278_v35 = vadd.f32 %v11277_v21, %v11276_v8  ;;  %v11279_v53 = vpop.f32.mrb[78].mxu0 }
 0x20b   : > { %v11388_v13 = vpop.f32.mrb[76].mxu1  ;;  %v11280_v40 = vpop.f32.mrb[79].mxu0 }
 0x20c   : > { %v4821_v18 = vadd.f32 %v11278_v35, %v14191_v58  ;;  %v11281_v42 = vadd.f32 %v11280_v40, %v11279_v53  ;;  %v11389_v27 = vpop.f32.mrb[77].mxu1  ;;  %v12323_v58 = vld [vmem:[#allocation5 + $0x70] sm:$0xff]   ;;  %v12326_v53 = vld [vmem:[#allocation5 + $0xc8] sm:$0xff]  }
 0x20d   : > { %v11390_v49 = vadd.f32 %v11389_v27, %v11388_v13  ;;  %v11391_v15 = vpop.f32.mrb[78].mxu1  ;;  %11502 = vmatprep.subr.bf16.mxu1 %v12323_v58  ;;  %11604 = vmatprep.subr.bf16.mxu0 %v12326_v53 }
 0x20e   : > { %v4824_v36 = vadd.f32 %v11281_v42, %v14195_v34  ;;  %v11392_v9 = vpop.f32.mrb[79].mxu1  ;;  %11503 = vmatpush3.bf16.msra.mxu1 %v12325_v54 }
 0x20f   : > { %v11393_v23 = vadd.f32 %v11392_v9, %v11391_v15  ;;  %v14257_v14 = vadd.f32 %v11390_v49, %v4821_v18  ;;  %v12328_v49 = vld [vmem:[#allocation5 + $0xd0] sm:$0xff]  }
 0x210   : > { %v11282_v0 = vpop.f32.mrb[80].mxu0  ;;  %v12329_v15 = vld [vmem:[#allocation5 + $0x90] sm:$0xff]  }
 0x211   : > { %v11283_v61 = vpop.f32.mrb[81].mxu0  ;;  %v14259_v43 = vadd.f32 %v11393_v23, %v4824_v36 }
 0x212   : > { %v11284_v60 = vadd.f32 %v11283_v61, %v11282_v0  ;;  %v11285_v10 = vpop.f32.mrb[82].mxu0 }
 0x213   : > { %v11286_v33 = vpop.f32.mrb[83].mxu0 }
 0x214   : > { %v4829_v22 = vadd.f32 %v11284_v60, %v14199_v56  ;;  %v11287_v26 = vadd.f32 %v11286_v33, %v11285_v10  ;;  %v12330_v60 = vld [vmem:[#allocation5 + $0xd8] sm:$0xff]  }
 0x215   : > { %v11394_v34 = vpop.f32.mrb[80].mxu1 }
 0x216   : > { %v4832_v31 = vadd.f32 %v11287_v26, %v14203_v17  ;;  %v11395_v51 = vpop.f32.mrb[81].mxu1  ;;  %v12327_v17 = vld [vmem:[#allocation5 + $0x88] sm:$0xff]  }
 0x217   : > { %v11396_v59 = vadd.f32 %v11395_v51, %v11394_v34  ;;  %v11397_v5 = vpop.f32.mrb[82].mxu1  ;;  %11605 = vmatpush3.bf16.msra.mxu0 %v12327_v17 }
 0x218   : > { %v11398_v25 = vpop.f32.mrb[83].mxu1  ;;  %11606 = vmatprep.subr.bf16.mxu0 %v12328_v49  ;;  %v12333_v49 = vld [vmem:[#allocation5 + $0x78] sm:$0xff]  }
 0x219   : > { %v11399_v32 = vadd.f32 %v11398_v25, %v11397_v5  ;;  %v14263_v24 = vadd.f32 %v11396_v59, %v4829_v22  ;;  %11504 = vmatprep.subr.bf16.mxu1 %v12333_v49 }
 0x21a   : > { %v11288_v50 = vpop.f32.mrb[84].mxu0 }
 0x21b   : > { %v14265_v44 = vadd.f32 %v11399_v32, %v4832_v31  ;;  %v11289_v8 = vpop.f32.mrb[85].mxu0  ;;  %11607 = vmatpush3.bf16.msra.mxu0 %v12329_v15  ;;  %v12334_v15 = vld [vmem:[#allocation5 + $0xa0] sm:$0xff]  }
 0x21c   : > { %v11290_v21 = vadd.f32 %v11289_v8, %v11288_v50  ;;  %v11291_v56 = vpop.f32.mrb[86].mxu0  ;;  %11608 = vmatprep.subr.bf16.mxu0 %v12330_v60 }
 0x21d   : > { %v11292_v35 = vpop.f32.mrb[87].mxu0 }
 0x21e   : > { %v4837_v13 = vadd.f32 %v11290_v21, %v14207_v11  ;;  %v11293_v40 = vadd.f32 %v11292_v35, %v11291_v56 }
 0x21f   : > { %v11400_v18 = vpop.f32.mrb[84].mxu1 }
 0x220   : > { %v4840_v42 = vadd.f32 %v11293_v40, %v14211_v45  ;;  %v11401_v27 = vpop.f32.mrb[85].mxu1  ;;  %v12331_v45 = vld [vmem:[#allocation5 + $0x98] sm:$0xff]  }
 0x221   : > { %v11402_v36 = vadd.f32 %v11401_v27, %v11400_v18  ;;  %v11403_v9 = vpop.f32.mrb[86].mxu1  ;;  %11609 = vmatpush3.bf16.msra.mxu0 %v12331_v45  ;;  %v12332_v27 = vld [vmem:[#allocation5 + $0xe0] sm:$0xff]  }
 0x222   : > { %v11404_v23 = vpop.f32.mrb[87].mxu1  ;;  %11610 = vmatprep.subr.bf16.mxu0 %v12332_v27  ;;  %v12345_v27 = vld [vmem:[#allocation5 + $0x140] sm:$0xff]  }
 0x223   : > { %v11405_v0 = vadd.f32 %v11404_v23, %v11403_v9  ;;  %v14269_v61 = vadd.f32 %v11402_v36, %v4837_v13  ;;  %v12335_v9 = vld [vmem:[#allocation5 + $0x38] sm:$0xff]   ;;  %v12336_v23 = vld [vmem:[#allocation5 + $0xe8] sm:$0xff]  }
 0x224   : > { %11505 = vmatpush3.bf16.msra.mxu1 %v12335_v9 }
 0x225   : > { %v11294_v41 = vpop.f32.mrb[88].mxu0  ;;  %v14271_v10 = vadd.f32 %v11405_v0, %v4840_v42  ;;  %11611 = vmatpush3.bf16.msra.mxu0 %v12334_v15  ;;  %11714 = vmatprep.subr.bf16.mxu1 %v12345_v27 }
 0x226   : > { %v11295_v11 = vpop.f32.mrb[89].mxu0  ;;  %11612 = vmatprep.subr.bf16.mxu0 %v12336_v23 }
 0x227   : > { %v11296_v33 = vadd.f32 %v11295_v11, %v11294_v41  ;;  %v11297_v58 = vpop.f32.mrb[90].mxu0 }
 0x228   : > { %v11298_v55 = vpop.f32.mrb[91].mxu0 }
 0x229   : > { %v4845_v54 = vadd.f32 %v11296_v33, %v14215_v3  ;;  %v11299_v22 = vadd.f32 %v11298_v55, %v11297_v58  ;;  %v11406_v26 = vpop.f32.mrb[88].mxu1 }
 0x22a   : > { %v11407_v31 = vpop.f32.mrb[89].mxu1 }
 0x22b   : > { %v4848_v34 = vadd.f32 %v11299_v22, %v14219_v39  ;;  %v11408_v51 = vadd.f32 %v11407_v31, %v11406_v26  ;;  %v11409_v59 = vpop.f32.mrb[90].mxu1  ;;  %v15941_v22 = vld [vmem:[#allocation30_spill] sm:$0xff] }
 0x22c   : > { %v11410_v5 = vpop.f32.mrb[91].mxu1 }
 0x22d   : > { %v11411_v25 = vadd.f32 %v11410_v5, %v11409_v59  ;;  %v14275_v32 = vadd.f32 %v11408_v51, %v4845_v54  ;;  %v12339_v54 = vld [vmem:[#allocation5 + $0xb0] sm:$0xff]   ;;  %v12340_v51 = vld [vmem:[#allocation5 + $0xf8] sm:$0xff]  }
 0x22e   : > { %v12341_v5 = vld [vmem:[#allocation5 + $0xb8] sm:$0xff]  }
 0x22f   : > { %v11300_v50 = vpop.f32.mrb[92].mxu0  ;;  %v14277_v21 = vadd.f32 %v11411_v25, %v4848_v34  ;;  %v5954_v25 = vld [vmem:[#allocation3] sm:$0xf] }
 0x230   : > { %v11301_v8 = vpop.f32.mrb[93].mxu0 }
 0x231   : > { %v11302_v56 = vadd.f32 %v11301_v8, %v11300_v50  ;;  %v11303_v35 = vpop.f32.mrb[94].mxu0  ;;  %v15942_v50 = vld [vmem:[#allocation32_spill] sm:$0xff] }
 0x232   : > { %v11304_v53 = vpop.f32.mrb[95].mxu0 }
 0x233   : > { %v4853_v3 = vadd.f32 %v11302_v56, %v14223_v57  ;;  %v11305_v13 = vadd.f32 %v11304_v53, %v11303_v35  ;;  %v12337_v57 = vld [vmem:[#allocation5 + $0xa8] sm:$0xff]  }
 0x234   : > { %v11412_v40 = vpop.f32.mrb[92].mxu1  ;;  %11613 = vmatpush3.bf16.msra.mxu0 %v12337_v57  ;;  %v5955_v53 = vld [vmem:[#allocation3 + $0x4] sm:$0xf] }
 0x235   : > { %v4856_v39 = vadd.f32 %v11305_v13, %v14227_v62  ;;  %v11413_v17 = vpop.f32.mrb[93].mxu1  ;;  %v12338_v62 = vld [vmem:[#allocation5 + $0xf0] sm:$0xff]   ;;  %v6003_v13 = vshrl.u32 %v5954_v25, 16 }
 0x236   : > { %v11414_v18 = vadd.f32 %v11413_v17, %v11412_v40  ;;  %v11415_v42 = vpop.f32.mrb[94].mxu1  ;;  %11614 = vmatprep.subr.bf16.mxu0 %v12338_v62  ;;  %v6012_v17 = vshll.u32 %v5955_v53, 16 }
 0x237   : > { %v11416_v36 = vpop.f32.mrb[95].mxu1  ;;  %v6005_v15 = vrot.slane %v6003_v13, 4 }
 0x238   : > { %v11417_v0 = vadd.f32 %v11416_v36, %v11415_v42  ;;  %v14281_v41 = vadd.f32 %v11414_v18, %v4853_v3  ;;  %v5956_v3 = vld [vmem:[#allocation3 + $0x8] sm:$0x1]  ;;  %11615 = vmatpush3.bf16.msra.mxu0 %v12339_v54  ;;  %v6016_v18 = vshrl.u32 %v5955_v53, 16  ;;  %v6014_v23 = vrot.slane %v6012_v17, 5 }
 0x239   : > { %v11306_v11 = vpop.f32.mrb[96].mxu0  ;;  %v6022_v42 = vshll.u32 %v5956_v3, 16  ;;  %11616 = vmatprep.subr.bf16.mxu0 %v12340_v51  ;;  %v15943_v51 = vld [vmem:[#allocation33_spill] sm:$0xff] }
 0x23a   : > { %v14283_v60 = vadd.f32 %v11417_v0, %v4856_v39  ;;  %v11307_v33 = vpop.f32.mrb[97].mxu0  ;;  %v6006_v39 = vshll.u32 %v5954_v25, 16  ;;  %v6018_v0 = vrot.slane %v6016_v18, 4 }
 0x23b   : > { %v11308_v58 = vadd.f32 %v11307_v33, %v11306_v11  ;;  %v11309_v45 = vpop.f32.mrb[98].mxu0 }
 0x23c   : > { %v11310_v55 = vpop.f32.mrb[99].mxu0  ;;  %v6008_v9 = vrot.slane %v6006_v39, 5  ;;  %11617 = vmatpush3.bf16.msra.mxu0 %v12341_v5  ;;  %v15945_v5 = vld [vmem:[#allocation34_spill] sm:$0xff] }
 0x23d   : > { %v4861_v26 = vadd.f32 %v11308_v58, %v15941_v22  ;;  %v11311_v31 = vadd.f32 %v11310_v55, %v11309_v45  ;;  %v6019_v58 = vor.u32 %v6018_v0, %v6014_v23  ;;  %v6024_v45 = vrot.slane %v6022_v42, 5 }
 0x23e   : > { %v11418_v34 = vpop.f32.mrb[96].mxu1  ;;  %v6009_v33 = vor.u32 %v6008_v9, %v6005_v15 }
 0x23f   : > { %v11419_v59 = vpop.f32.mrb[97].mxu1  ;;  %v4864_v8 = vadd.f32 %v11311_v31, %v15942_v50  ;;  %v6020_v31 = vrot.slane %v6019_v58, 4 }
 0x240   : > { %v11420_v56 = vadd.f32 %v11419_v59, %v11418_v34  ;;  %v11421_v35 = vpop.f32.mrb[98].mxu1  ;;  %v6010_v34 = vrot.slane %v6009_v33, 4 }
 0x241   : > { %v11422_v40 = vpop.f32.mrb[99].mxu1 }
 0x242   : > { %v11423_v49 = vadd.f32 %v11422_v40, %v11421_v35  ;;  %v14287_v36 = vadd.f32 %v11420_v56, %v4861_v26  ;;  %v6015_v56 = vsel %vm12872_vm7, %v6010_v34, %v6014_v23  ;;  %v12342_v35 = vld [vmem:[#allocation3] sm:$0xff]   ;;  %v12346_v40 = vld [vmem:[#allocation5 + $0x100] sm:$0xff]  }
 0x244   : > { %v11312_v57 = vpop.f32.mrb[100].mxu0  ;;  %v14289_v11 = vadd.f32 %v11423_v49, %v4864_v8  ;;  %v6025_v8 = vsel %vm12872_vm7, %v6020_v31, %v6024_v45 }
 0x245   : > { %v11313_v62 = vpop.f32.mrb[101].mxu0  ;;  %v10733_v13 = vcombine.low %v6015_v56, %v6025_v8 }
 0x246   : > { %v11314_v55 = vadd.f32 %v11313_v62, %v11312_v57  ;;  %v11315_v54 = vpop.f32.mrb[102].mxu0 }
 0x247   : > { %v11316_v22 = vpop.f32.mrb[103].mxu0  ;;  %9402 = vmatprep.mubr.bf16.mxu1 %v10733_v13 }
 0x248   : > { %v4869_v26 = vadd.f32 %v11314_v55, %v15943_v51  ;;  %v11317_v59 = vadd.f32 %v11316_v22, %v11315_v54  ;;  %v11424_v25 = vpop.f32.mrb[100].mxu1  ;;  %9403 = vmatmul.mubr.bf16.vlgmr.msra.gmra.mrb[128].mxu1 %v12342_v35  ;;  %v12351_v35 = vld [vmem:[#allocation5 + $0x148] sm:$0xff]  }
 0x249   : > { %v11425_v3 = vpop.f32.mrb[101].mxu1  ;;  %11715 = vmatpush3.bf16.msra.mxu1 %v12346_v40 }
 0x24a   : > { %v4872_v53 = vadd.f32 %v11317_v59, %v15945_v5  ;;  %v11426_v39 = vadd.f32 %v11425_v3, %v11424_v25  ;;  %v11427_v17 = vpop.f32.mrb[102].mxu1  ;;  %11716 = vmatprep.subr.bf16.mxu1 %v12351_v35 }
 0x24b   : > { %v11428_v18 = vpop.f32.mrb[103].mxu1 }
 0x24c   : > { %v11429_v42 = vadd.f32 %v11428_v18, %v11427_v17  ;;  %v14297_v27 = vadd.f32 %v11426_v39, %v4869_v26 }
 0x24e   : > { %v11318_v49 = vpop.f32.mrb[104].mxu0  ;;  %v14299_v15 = vadd.f32 %v11429_v42, %v4872_v53 }
 0x24f   : > { %v11319_v9 = vpop.f32.mrb[105].mxu0 }
 0x250   : > { %v11320_v23 = vadd.f32 %v11319_v9, %v11318_v49  ;;  %v11321_v0 = vpop.f32.mrb[106].mxu0 }
 0x251   : > { %v11322_v57 = vpop.f32.mrb[107].mxu0 }
 0x252   : > { %v4877_v62 = vadd.f32 %v11320_v23, %v14050_v2  ;;  %v11430_v33 = vpop.f32.mrb[104].mxu1  ;;  %v11323_v58 = vadd.f32 %v11322_v57, %v11321_v0  ;;  %v12352_v23 = vld [vmem:[#allocation5 + $0x108] sm:$0xff]  }
 0x253   : > { %v11431_v45 = vpop.f32.mrb[105].mxu1  ;;  %11717 = vmatpush3.bf16.msra.mxu1 %v12352_v23 }
 0x254   : > { %v4880_v55 = vadd.f32 %v11323_v58, %v14053_v38  ;;  %v11432_v54 = vadd.f32 %v11431_v45, %v11430_v33  ;;  %v11433_v22 = vpop.f32.mrb[106].mxu1 }
 0x255   : > { %v11434_v34 = vpop.f32.mrb[107].mxu1 }
 0x256   : > { %v11435_v31 = vadd.f32 %v11434_v34, %v11433_v22  ;;  %v14303_v51 = vadd.f32 %v11432_v54, %v4877_v62 }
 0x258   : > { %v14305_v26 = vadd.f32 %v11435_v31, %v4880_v55 }
 0x259   : > { %v11324_v59 = vpop.f32.mrb[108].mxu0 }
 0x25a   : > { %v11325_v25 = vpop.f32.mrb[109].mxu0 }
 0x25b   : > { %v11326_v56 = vadd.f32 %v11325_v25, %v11324_v59  ;;  %v11327_v8 = vpop.f32.mrb[110].mxu0 }
 0x25c   : > { %v11328_v5 = vpop.f32.mrb[111].mxu0 }
 0x25d   : > { %v4885_v2 = vadd.f32 %v11326_v56, %v14079_v7  ;;  %v11329_v53 = vadd.f32 %v11328_v5, %v11327_v8 }
 0x25e   : > { %v11436_v3 = vpop.f32.mrb[108].mxu1 }
 0x25f   : > { %v4888_v38 = vadd.f32 %v11329_v53, %v14085_v47  ;;  %v11437_v13 = vpop.f32.mrb[109].mxu1 }
 0x260   : > { %v11438_v40 = vadd.f32 %v11437_v13, %v11436_v3  ;;  %v11439_v39 = vpop.f32.mrb[110].mxu1 }
 0x261   : > { %v11440_v17 = vpop.f32.mrb[111].mxu1 }
 0x262   : > { %v11441_v18 = vadd.f32 %v11440_v17, %v11439_v39  ;;  %v14309_v42 = vadd.f32 %v11438_v40, %v4885_v2 }
 0x264   : > { %v14311_v49 = vadd.f32 %v11441_v18, %v4888_v38  ;;  %v11330_v9 = vpop.f32.mrb[112].mxu0 }
 0x265   : > { %v11331_v0 = vpop.f32.mrb[113].mxu0 }
 0x266   : > { %v11332_v57 = vadd.f32 %v11331_v0, %v11330_v9  ;;  %v11333_v62 = vpop.f32.mrb[114].mxu0  ;;  %v12357_v9 = vld [vmem:[#allocation5 + $0x150] sm:$0xff]  }
 0x267   : > { %v11334_v7 = vpop.f32.mrb[115].mxu0  ;;  %11718 = vmatprep.subr.bf16.mxu1 %v12357_v9  ;;  %v12364_v9 = vld [vmem:[#allocation5 + $0x118] sm:$0xff]  }
 0x268   : > { %v4893_v33 = vadd.f32 %v11332_v57, %v14115_v29  ;;  %v11335_v47 = vadd.f32 %v11334_v7, %v11333_v62 }
 0x269   : > { %v11442_v58 = vpop.f32.mrb[112].mxu1 }
 0x26a   : > { %v11443_v45 = vpop.f32.mrb[113].mxu1  ;;  %v4896_v55 = vadd.f32 %v11335_v47, %v14121_v37  ;;  %v12358_v47 = vld [vmem:[#allocation5 + $0x110] sm:$0xff]  }
 0x26b   : > { %v11444_v54 = vadd.f32 %v11443_v45, %v11442_v58  ;;  %v11445_v22 = vpop.f32.mrb[114].mxu1  ;;  %11719 = vmatpush3.bf16.msra.mxu1 %v12358_v47 }
 0x26c   : > { %v11446_v34 = vpop.f32.mrb[115].mxu1 }
 0x26d   : > { %v11447_v31 = vadd.f32 %v11446_v34, %v11445_v22  ;;  %v14315_v59 = vadd.f32 %v11444_v54, %v4893_v33 }
 0x26f   : > { %v14317_v25 = vadd.f32 %v11447_v31, %v4896_v55 }
 0x270   : > { %v11336_v56 = vpop.f32.mrb[116].mxu0 }
 0x271   : > { %v11337_v8 = vpop.f32.mrb[117].mxu0 }
 0x272   : > { %v11338_v35 = vadd.f32 %v11337_v8, %v11336_v56  ;;  %v11339_v5 = vpop.f32.mrb[118].mxu0 }
 0x273   : > { %v11340_v2 = vpop.f32.mrb[119].mxu0 }
 0x274   : > { %v4901_v29 = vadd.f32 %v11338_v35, %v14156_v12  ;;  %v11448_v53 = vpop.f32.mrb[116].mxu1  ;;  %v11341_v3 = vadd.f32 %v11340_v2, %v11339_v5 }
 0x275   : > { %v11449_v38 = vpop.f32.mrb[117].mxu1 }
 0x276   : > { %v4904_v37 = vadd.f32 %v11341_v3, %v14160_v48  ;;  %v11450_v13 = vadd.f32 %v11449_v38, %v11448_v53  ;;  %v11451_v40 = vpop.f32.mrb[118].mxu1  ;;  %v12363_v38 = vld [vmem:[#allocation5 + $0x158] sm:$0xff]  }
 0x277   : > { %v11452_v39 = vpop.f32.mrb[119].mxu1  ;;  %11720 = vmatprep.subr.bf16.mxu1 %v12363_v38 }
 0x278   : > { %v11453_v17 = vadd.f32 %v11452_v39, %v11451_v40  ;;  %v14321_v18 = vadd.f32 %v11450_v13, %v4901_v29  ;;  %v6466_v13 = vld [vmem:[#allocation3] sm:$0xe]  ;;  %v6467_v40 = vld [vmem:[#allocation3 + $0x4] sm:$0xf]  ;;  %11721 = vmatpush3.bf16.msra.mxu1 %v12364_v9 }
 0x27a   : > { %v14323_v23 = vadd.f32 %v11453_v17, %v4904_v37 }
 0x27c   : > { %v11342_v0 = vpop.f32.mrb[120].mxu0 }
 0x27d   : > { %v11343_v57 = vpop.f32.mrb[121].mxu0 }
 0x27e   : > { %v11344_v62 = vadd.f32 %v11343_v57, %v11342_v0  ;;  %v11345_v7 = vpop.f32.mrb[122].mxu0 }
 0x27f   : > { %v11346_v12 = vpop.f32.mrb[123].mxu0 }
 0x280   : > { %v4909_v33 = vadd.f32 %v11344_v62, %v14163_v30  ;;  %v11347_v58 = vadd.f32 %v11346_v12, %v11345_v7 }
 0x282   : > { %v4912_v48 = vadd.f32 %v11347_v58, %v14168_v52  ;;  %v10749_v58 = vrot.slane %v6466_v13, 9 }
 0x287   : > { %v11454_v45 = vpop.f32.mrb[120].mxu1 }
 0x288   : > { %v11455_v55 = vpop.f32.mrb[121].mxu1 }
 0x289   : > { %v11456_v54 = vadd.f32 %v11455_v55, %v11454_v45  ;;  %v11457_v22 = vpop.f32.mrb[122].mxu1 }
 0x28a   : > { %v11458_v31 = vpop.f32.mrb[123].mxu1 }
 0x28b   : > { %v11459_v8 = vadd.f32 %v11458_v31, %v11457_v22  ;;  %v14327_v2 = vadd.f32 %v11456_v54, %v4909_v33  ;;  %v14336_v54 = vld [vmem:[#allocation3 + $0x8] sm:$0x1] }
 0x28d   : > { %v14330_v3 = vadd.f32 %v11459_v8, %v4912_v48  ;;  %v6564_v48 = vrot.slane %v6467_v40, 5 }
 0x28e   : > { %v11348_v34 = vpop.f32.mrb[124].mxu0 }
 0x28f   : > { %v11349_v56 = vpop.f32.mrb[125].mxu0 }
 0x290   : > { %v11350_v35 = vadd.f32 %v11349_v56, %v11348_v34  ;;  %v11351_v5 = vpop.f32.mrb[126].mxu0 }
 0x291   : > { %v11352_v29 = vpop.f32.mrb[127].mxu0 }
 0x292   : > { %v4917_v30 = vadd.f32 %v11350_v35, %v14175_v19  ;;  %v11353_v53 = vadd.f32 %v11352_v29, %v11351_v5  ;;  %v6567_v5 = vrot.slane %v14336_v54, 5 }
 0x293   : > { %v11460_v37 = vpop.f32.mrb[124].mxu1 }
 0x294   : > { %v4920_v52 = vadd.f32 %v11353_v53, %v14187_v1  ;;  %v11461_v39 = vpop.f32.mrb[125].mxu1  ;;  %v14346_v53 = vsel %vm12912_vm13, %v10749_v58, %v6564_v48 }
 0x295   : > { %v11462_v0 = vadd.f32 %v11461_v39, %v11460_v37  ;;  %v11463_v57 = vpop.f32.mrb[126].mxu1 }
 0x296   : > { %v11997_v17 = vpop.f32.mrb[128].mxu0  ;;  %v11464_v12 = vpop.f32.mrb[127].mxu1 }
 0x297   : > { %v5127_v62 = vadd.f32 %v11997_v17, %v14245_v28  ;;  %v5118_v7 = vpop.f32.mrb[129].mxu0  ;;  %v11465_v1 = vadd.f32 %v11464_v12, %v11463_v57  ;;  %v14338_v22 = vadd.f32 %v11462_v0, %v4917_v30  ;;  %v6566_v30 = vrot.slane %v6564_v48, 4 }
 0x298   : > { %v5119_v19 = vadd.f32 %v5118_v7, %v14241_v4  ;;  %v11998_v33 = vpop.f32.mrb[130].mxu0 }
 0x299   : > { %v5247_v47 = vmax.f32 %v5127_v62, 0.0  ;;  %v5130_v45 = vadd.f32 %v11998_v33, %v14247_v63  ;;  %v5121_v55 = vpop.f32.mrb[131].mxu0  ;;  %v14341_v4 = vadd.f32 %v11465_v1, %v4920_v52  ;;  %v5705_v62 = vld [vmem:[#allocation3 + $0x18] sm:$0xf] }
 0x29a   : > { %v5245_v34 = vmax.f32 %v5119_v19, 0.0  ;;  %v5122_v28 = vadd.f32 %v5121_v55, %v14243_v46 }
 0x29b   : > { %v10988_v31 = vpack.c.bf16 %v5247_v47, %v5247_v47  ;;  %v5248_v56 = vmax.f32 %v5130_v45, 0.0  ;;  %v5696_v47 = vld [vmem:[#allocation3 + $0xc] sm:$0xf] }
 0x29c   : > { %v10986_v8 = vpack.c.bf16 %v5245_v34, %v5245_v34  ;;  %v5246_v35 = vmax.f32 %v5122_v28, 0.0 }
 0x29d   : > { %v5391_v29 = vshrl.u32 %v10988_v31, 16  ;;  %v10989_v63 = vpack.c.bf16 %v5248_v56, %v5248_v56  ;;  %v5394_v38 = vshll.u32 %v10988_v31, 16  ;;  %v5709_v31 = vld [vmem:[#allocation3 + $0x20] sm:$0x1] }
 0x29e   : > { %v5374_v37 = vshrl.u32 %v10986_v8, 16  ;;  %v5377_v46 = vshll.u32 %v10986_v8, 16  ;;  %v10987_v13 = vpack.c.bf16 %v5246_v35, %v5246_v35  ;;  %v12001_v40 = vpop.f32.mrb[132].mxu0 }
 0x29f   : > { %v5393_v39 = vrot.slane %v5391_v29, 7  ;;  %v5399_v52 = vshrl.u32 %v10989_v63, 16  ;;  %v5402_v17 = vshll.u32 %v10989_v63, 16  ;;  %v5143_v9 = vadd.f32 %v12001_v40, %v14257_v14  ;;  %v5134_v0 = vpop.f32.mrb[133].mxu0  ;;  %v5702_v63 = vld [vmem:[#allocation3 + $0x14] sm:$0x1] }
 0x2a0   : > { %v5376_v7 = vrot.slane %v5374_v37, 7  ;;  %v5382_v12 = vshrl.u32 %v10987_v13, 16  ;;  %v5385_v19 = vshll.u32 %v10987_v13, 16  ;;  %v5135_v33 = vadd.f32 %v5134_v0, %v14251_v6  ;;  %v12002_v58 = vpop.f32.mrb[134].mxu0 }
 0x2a1   : > { %v5396_v48 = vor.u32 %v5394_v38, %v5393_v39  ;;  %v5397_v1 = vrot.slane %v5393_v39, 4  ;;  %v5401_v45 = vrot.slane %v5399_v52, 7  ;;  %v5251_v55 = vmax.f32 %v5143_v9, 0.0  ;;  %v5137_v14 = vpop.f32.mrb[135].mxu0  ;;  %v12369_v39 = vld [vmem:[#allocation5 + $0x160] sm:$0xff]  }
 0x2a2   : > { %v5379_v54 = vor.u32 %v5377_v46, %v5376_v7  ;;  %v5380_v34 = vrot.slane %v5376_v7, 4  ;;  %v5384_v56 = vrot.slane %v5382_v12, 7  ;;  %v5249_v8 = vmax.f32 %v5135_v33, 0.0  ;;  %v12370_v52 = vld [vmem:[#allocation5 + $0x1c0] sm:$0xff]   ;;  %11722 = vmatprep.subr.bf16.mxu1 %v12369_v39 }
 0x2a3   : > { %v5706_v6 = vsel %vm14351_vm0, %v5396_v48, %v5705_v62  ;;  %v5404_v35 = vor.u32 %v5402_v17, %v5401_v45  ;;  %v5406_v29 = vrot.slane %v5401_v45, 4  ;;  %v10992_v38 = vpack.c.bf16 %v5251_v55, %v5251_v55  ;;  %v12371_v12 = vld [vmem:[#allocation5 + $0x120] sm:$0xff]   ;;  %11826 = vmatprep.subr.bf16.mxu0 %v12370_v52 }
 0x2a4   : > { %5707 = vst [vmem:[#allocation3 + $0x18] sm:$0xf] %v5706_v6  ;;  %v5697_v37 = vsel %vm14351_vm0, %v5379_v54, %v5696_v47  ;;  %v5387_v46 = vor.u32 %v5385_v19, %v5384_v56  ;;  %v5389_v13 = vrot.slane %v5384_v56, 4  ;;  %v10990_v40 = vpack.c.bf16 %v5249_v8, %v5249_v8  ;;  %11723 = vmatpush3.bf16.msra.mxu1 %v12371_v12 }
 0x2a5   : > { %5698 = vst [vmem:[#allocation3 + $0xc] sm:$0xf] %v5697_v37  ;;  %v5405_v0 = vsel %vm12883_vm10, %v5397_v1, %v5404_v35  ;;  %v5710_v62 = vsel %vm14358_vm1, %v5406_v29, %v5709_v31  ;;  %v5425_v17 = vshrl.u32 %v10992_v38, 16  ;;  %v14372_v7 = vsel %vm12912_vm13, %v6566_v30, %v6567_v5 }
 0x2a6   : > { %5708 = vst [vmem:[#allocation3 + $0x1c] sm:$0xf] %v5405_v0  ;;  %5711 = vst [vmem:[#allocation3 + $0x20] sm:$0x1] %v5710_v62  ;;  %v5388_v19 = vsel %vm12883_vm10, %v5380_v34, %v5387_v46  ;;  %v5703_v33 = vsel %vm14358_vm1, %v5389_v13, %v5702_v63  ;;  %v5428_v48 = vshll.u32 %v10992_v38, 16  ;;  %v5408_v47 = vshrl.u32 %v10990_v40, 16 }
 0x2a7   : > { %v12005_v1 = vpop.f32.mrb[136].mxu0  ;;  %5699 = vst [vmem:[#allocation3 + $0x10] sm:$0xf] %v5388_v19  ;;  %5704 = vst [vmem:[#allocation3 + $0x14] sm:$0x1] %v5703_v33  ;;  %v14378_v45 = vrot.slane %v5425_v17, 7  ;;  %v5146_v5 = vadd.f32 %v12002_v58, %v14259_v43  ;;  %v5138_v30 = vadd.f32 %v5137_v14, %v14253_v20  ;;  %v10765_v35 = vcombine.low %v14346_v53, %v14372_v7 }
 0x2a8   : > { %v5159_v55 = vadd.f32 %v12005_v1, %v14269_v61  ;;  %v5150_v54 = vpop.f32.mrb[137].mxu0  ;;  %v5719_v34 = vld [vmem:[#allocation3 + $0x30] sm:$0xf]  ;;  %v14383_v31 = vrot.slane %v5408_v47, 7  ;;  %v5411_v56 = vshll.u32 %v10990_v40, 16  ;;  %v12372_v17 = vld [vmem:[#allocation5 + $0x180] sm:$0xff]  }
 0x2a9   : > { %v5151_v8 = vadd.f32 %v5150_v54, %v14263_v24  ;;  %v12006_v6 = vpop.f32.mrb[138].mxu0  ;;  %v5430_v29 = vor.u32 %v5428_v48, %v14378_v45  ;;  %v5431_v43 = vrot.slane %v14378_v45, 4  ;;  %v5712_v58 = vld [vmem:[#allocation3 + $0x24] sm:$0xf]  ;;  %v5252_v20 = vmax.f32 %v5146_v5, 0.0 }
 0x2aa   : > { %v5250_v14 = vmax.f32 %v5138_v30, 0.0  ;;  %v5153_v61 = vpop.f32.mrb[139].mxu0  ;;  %v5413_v63 = vor.u32 %v5411_v56, %v14383_v31  ;;  %v5414_v38 = vrot.slane %v14383_v31, 4  ;;  %v5255_v37 = vmax.f32 %v5159_v55, 0.0  ;;  %v5723_v48 = vld [vmem:[#allocation3 + $0x38] sm:$0x1] }
 0x2ab   : > { %v5253_v46 = vmax.f32 %v5151_v8, 0.0  ;;  %v5720_v24 = vsel %vm14351_vm0, %v5430_v29, %v5719_v34  ;;  %v10993_v13 = vpack.c.bf16 %v5252_v20, %v5252_v20  ;;  %v5162_v53 = vadd.f32 %v12006_v6, %v14271_v10  ;;  %v5716_v47 = vld [vmem:[#allocation3 + $0x2c] sm:$0x1]  ;;  %v5733_v31 = vld [vmem:[#allocation3 + $0x48] sm:$0xf] }
 0x2ac   : > { %v10991_v40 = vpack.c.bf16 %v5250_v14, %v5250_v14  ;;  %5721 = vst [vmem:[#allocation3 + $0x30] sm:$0xf] %v5720_v24  ;;  %v5713_v39 = vsel %vm14351_vm0, %v5413_v63, %v5712_v58  ;;  %v10996_v52 = vpack.c.bf16 %v5255_v37, %v5255_v37  ;;  %v5154_v62 = vadd.f32 %v5153_v61, %v14265_v44 }
 0x2ad   : > { %v10994_v0 = vpack.c.bf16 %v5253_v46, %v5253_v46  ;;  %5714 = vst [vmem:[#allocation3 + $0x24] sm:$0xf] %v5713_v39  ;;  %v5433_v7 = vshrl.u32 %v10993_v13, 16  ;;  %v5436_v12 = vshll.u32 %v10993_v13, 16  ;;  %v5256_v56 = vmax.f32 %v5162_v53, 0.0  ;;  %v12344_v61 = vld [vmem:[#allocation3 + $0x18] sm:$0xff]  }
 0x2ae   : > { %v5416_v19 = vshrl.u32 %v10991_v40, 16  ;;  %v5419_v33 = vshll.u32 %v10991_v40, 16  ;;  %v5459_v1 = vshrl.u32 %v10996_v52, 16  ;;  %v5462_v45 = vshll.u32 %v10996_v52, 16  ;;  %v12009_v30 = vpop.f32.mrb[140].mxu0  ;;  %v12343_v55 = vld [vmem:[#allocation3 + $0xc] sm:$0xff]  }
 0x2af   : > { %v5442_v5 = vshrl.u32 %v10994_v0, 16  ;;  %v5445_v10 = vshll.u32 %v10994_v0, 16  ;;  %v5435_v54 = vrot.slane %v5433_v7, 7  ;;  %v5254_v8 = vmax.f32 %v5154_v62, 0.0  ;;  %v5166_v44 = vpop.f32.mrb[141].mxu0  ;;  %9563 = vmatprep.mubr.bf16.mxu0 %v12343_v55 }
 0x2b0   : > { %v5418_v34 = vrot.slane %v5416_v19, 7  ;;  %v14398_v6 = vrot.slane %v5459_v1, 7  ;;  %v5175_v58 = vadd.f32 %v12009_v30, %v14281_v41  ;;  %v5167_v20 = vadd.f32 %v5166_v44, %v14275_v32  ;;  %v12010_v14 = vpop.f32.mrb[142].mxu0  ;;  %v5726_v13 = vld [vmem:[#allocation3 + $0x3c] sm:$0xf]  ;;  %9564 = vmatmul.mubr.bf16.vlgmr.msra.gmra.mrb[160].mxu0 %v10765_v35  ;;  %v12377_v30 = vld [vmem:[#allocation5 + $0x168] sm:$0xff]  }
 0x2b1   : > { %v14400_v29 = vrot.slane %v5442_v5, 7  ;;  %v5438_v63 = vor.u32 %v5436_v12, %v5435_v54  ;;  %v5440_v37 = vrot.slane %v5435_v54, 4  ;;  %v5169_v40 = vpop.f32.mrb[143].mxu0  ;;  %9571 = vmatprep.mubr.bf16.mxu0 %v12344_v61  ;;  %11827 = vmatpush3.bf16.msra.mxu0 %v12372_v17  ;;  %v10995_v12 = vpack.c.bf16 %v5254_v8, %v5254_v8  ;;  %v5737_v55 = vld [vmem:[#allocation3 + $0x50] sm:$0x1]  ;;  %v12378_v44 = vld [vmem:[#allocation5 + $0x1c8] sm:$0xff]  }
 0x2b2   : > { %v5421_v46 = vor.u32 %v5419_v33, %v5418_v34  ;;  %v5423_v24 = vrot.slane %v5418_v34, 4  ;;  %v5464_v53 = vor.u32 %v5462_v45, %v14398_v6  ;;  %v5465_v39 = vrot.slane %v14398_v6, 4  ;;  %11724 = vmatprep.subr.bf16.mxu1 %v12377_v30  ;;  %11828 = vmatprep.subr.bf16.mxu0 %v12378_v44  ;;  %v5744_v44 = vld [vmem:[#allocation3 + $0x5c] sm:$0x1] }
 0x2b3   : > { %v5447_v52 = vor.u32 %v5445_v10, %v14400_v29  ;;  %v5448_v41 = vrot.slane %v14400_v29, 4  ;;  %v5439_v32 = vsel %vm12883_vm10, %v5431_v43, %v5438_v63  ;;  %v5724_v0 = vsel %vm14358_vm1, %v5440_v37, %v5723_v48 }
 0x2b4   : > { %v5422_v62 = vsel %vm12883_vm10, %v5414_v38, %v5421_v46  ;;  %v5717_v35 = vsel %vm14358_vm1, %v5423_v24, %v5716_v47  ;;  %5722 = vst [vmem:[#allocation3 + $0x34] sm:$0xf] %v5439_v32  ;;  %5725 = vst [vmem:[#allocation3 + $0x38] sm:$0x1] %v5724_v0  ;;  %v5734_v7 = vsel %vm14351_vm0, %v5464_v53, %v5733_v31  ;;  %v5259_v19 = vmax.f32 %v5175_v58, 0.0  ;;  %v12380_v24 = vld [vmem:[#allocation5 + $0x188] sm:$0xff]  }
 0x2b5   : > { %5715 = vst [vmem:[#allocation3 + $0x28] sm:$0xf] %v5422_v62  ;;  %5718 = vst [vmem:[#allocation3 + $0x2c] sm:$0x1] %v5717_v35  ;;  %v5727_v17 = vsel %vm14351_vm0, %v5447_v52, %v5726_v13  ;;  %v10997_v43 = vpack.c.bf16 %v5256_v56, %v5256_v56  ;;  %v5257_v33 = vmax.f32 %v5167_v20, 0.0  ;;  %v5178_v38 = vadd.f32 %v12010_v14, %v14283_v60  ;;  %v12379_v20 = vld [vmem:[#allocation5 + $0x128] sm:$0xff]  }
 0x2b6   : > { %5735 = vst [vmem:[#allocation3 + $0x48] sm:$0xf] %v5734_v7  ;;  %5728 = vst [vmem:[#allocation3 + $0x3c] sm:$0xf] %v5727_v17  ;;  %v5170_v48 = vadd.f32 %v5169_v40, %v14277_v21  ;;  %v5450_v45 = vshrl.u32 %v10995_v12, 16  ;;  %v5453_v5 = vshll.u32 %v10995_v12, 16  ;;  %v11000_v54 = vpack.c.bf16 %v5259_v19, %v5259_v19  ;;  %11725 = vmatpush3.bf16.msra.mxu1 %v12379_v20 }
 0x2b7   : > { %v5467_v47 = vshrl.u32 %v10997_v43, 16  ;;  %v5470_v1 = vshll.u32 %v10997_v43, 16  ;;  %v12013_v10 = vpop.f32.mrb[144].mxu0  ;;  %v10998_v34 = vpack.c.bf16 %v5257_v33, %v5257_v33  ;;  %v5260_v31 = vmax.f32 %v5178_v38, 0.0  ;;  %v5730_v32 = vld [vmem:[#allocation3 + $0x44] sm:$0x1]  ;;  %11829 = vmatpush3.bf16.msra.mxu0 %v12380_v24 }
 0x2b8   : > { %v5258_v56 = vmax.f32 %v5170_v48, 0.0  ;;  %v5182_v8 = vpop.f32.mrb[145].mxu0  ;;  %v5452_v29 = vrot.slane %v5450_v45, 7  ;;  %v5191_v58 = vadd.f32 %v12013_v10, %v14297_v27  ;;  %v5493_v14 = vshrl.u32 %v11000_v54, 16  ;;  %v5747_v43 = vld [vmem:[#allocation3 + $0x60] sm:$0xf] }
 0x2b9   : > { %v5469_v6 = vrot.slane %v5467_v47, 7  ;;  %v14424_v60 = vadd.f32 %v5182_v8, %v14287_v36  ;;  %v12014_v21 = vpop.f32.mrb[146].mxu0  ;;  %v5496_v61 = vshll.u32 %v11000_v54, 16  ;;  %v5476_v63 = vshrl.u32 %v10998_v34, 16  ;;  %v5740_v12 = vld [vmem:[#allocation3 + $0x54] sm:$0xf] }
 0x2ba   : > { %v5479_v37 = vshll.u32 %v10998_v34, 16  ;;  %v5185_v46 = vpop.f32.mrb[147].mxu0  ;;  %v5455_v53 = vor.u32 %v5453_v5, %v5452_v29  ;;  %v5457_v52 = vrot.slane %v5452_v29, 4  ;;  %v5495_v27 = vrot.slane %v5493_v14, 7  ;;  %v5957_v47 = vld [vmem:[#allocation3 + $0xc] sm:$0xf] }
 0x2bb   : > { %v5472_v13 = vor.u32 %v5470_v1, %v5469_v6  ;;  %v5474_v40 = vrot.slane %v5469_v6, 4  ;;  %v5478_v0 = vrot.slane %v5476_v63, 7  ;;  %v11001_v36 = vpack.c.bf16 %v5260_v31, %v5260_v31  ;;  %v14447_v63 = vld [vmem:[#allocation3 + $0x10] sm:$0xf] }
 0x2bc   : > { %v10999_v62 = vpack.c.bf16 %v5258_v56, %v5258_v56  ;;  %v5456_v17 = vsel %vm12883_vm10, %v5448_v41, %v5455_v53  ;;  %v5731_v19 = vsel %vm14358_vm1, %v5457_v52, %v5730_v32  ;;  %v5498_v33 = vor.u32 %v5496_v61, %v5495_v27 }
 0x2bd   : > { %v5473_v35 = vsel %vm12883_vm10, %v5465_v39, %v5472_v13  ;;  %v5738_v7 = vsel %vm14358_vm1, %v5474_v40, %v5737_v55  ;;  %5729 = vst [vmem:[#allocation3 + $0x40] sm:$0xf] %v5456_v17  ;;  %v5499_v38 = vrot.slane %v5495_v27, 4  ;;  %v5481_v48 = vor.u32 %v5479_v37, %v5478_v0  ;;  %5732 = vst [vmem:[#allocation3 + $0x44] sm:$0x1] %v5731_v19 }
 0x2be   : > { %5736 = vst [vmem:[#allocation3 + $0x4c] sm:$0xf] %v5473_v35  ;;  %5739 = vst [vmem:[#allocation3 + $0x50] sm:$0x1] %v5738_v7  ;;  %v5482_v39 = vrot.slane %v5478_v0, 4  ;;  %v5501_v1 = vshrl.u32 %v11001_v36, 16  ;;  %v5748_v41 = vsel %vm14351_vm0, %v5498_v33, %v5747_v43  ;;  %v5194_v29 = vadd.f32 %v12014_v21, %v14299_v15 }
 0x2bf   : > { %v5504_v45 = vshll.u32 %v11001_v36, 16  ;;  %v5484_v5 = vshrl.u32 %v10999_v62, 16  ;;  %v14434_v10 = vpop.f32.mrb[148].mxu0  ;;  %v5741_v30 = vsel %vm14351_vm0, %v5481_v48, %v5740_v12  ;;  %v5751_v55 = vld [vmem:[#allocation3 + $0x68] sm:$0x1]  ;;  %v5487_v54 = vshll.u32 %v10999_v62, 16 }
 0x2c0   : > { %v5263_v34 = vmax.f32 %v5191_v58, 0.0  ;;  %v14440_v31 = vpop.f32.mrb[149].mxu0  ;;  %5749 = vst [vmem:[#allocation3 + $0x60] sm:$0xf] %v5748_v41  ;;  %5742 = vst [vmem:[#allocation3 + $0x54] sm:$0xf] %v5741_v30  ;;  %v5186_v61 = vadd.f32 %v5185_v46, %v14289_v11 }
 0x2c1   : > { %v5503_v56 = vrot.slane %v5501_v1, 7  ;;  %v5486_v8 = vrot.slane %v5484_v5, 7  ;;  %v5261_v6 = vmax.f32 %v14424_v60, 0.0  ;;  %v14444_v20 = vpop.f32.mrb[150].mxu0  ;;  %v6027_v37 = vshrl.u32 %v5957_v47, 16 }
 0x2c2   : > { %v11004_v14 = vpack.c.bf16 %v5263_v34, %v5263_v34  ;;  %v6030_v58 = vshll.u32 %v5957_v47, 16  ;;  %v14449_v24 = vpop.f32.mrb[151].mxu0  ;;  %v5264_v0 = vmax.f32 %v5194_v29, 0.0  ;;  %v5761_v62 = vld [vmem:[#allocation3 + $0x78] sm:$0xf]  ;;  %v5262_v12 = vmax.f32 %v5186_v61, 0.0 }
 0x2c3   : > { %v5506_v13 = vor.u32 %v5504_v45, %v5503_v56  ;;  %v5508_v40 = vrot.slane %v5503_v56, 4  ;;  %v5489_v53 = vor.u32 %v5487_v54, %v5486_v8  ;;  %v5491_v52 = vrot.slane %v5486_v8, 4  ;;  %v5754_v43 = vld [vmem:[#allocation3 + $0x6c] sm:$0xf]  ;;  %v5959_v34 = vld [vmem:[#allocation3 + $0x14] sm:$0x1] }
 0x2c4   : > { %v5527_v32 = vshrl.u32 %v11004_v14, 16  ;;  %v5530_v27 = vshll.u32 %v11004_v14, 16  ;;  %v11002_v60 = vpack.c.bf16 %v5261_v6, %v5261_v6  ;;  %v11005_v17 = vpack.c.bf16 %v5264_v0, %v5264_v0  ;;  %v6469_v5 = vld [vmem:[#allocation3 + $0xc] sm:$0xe]  ;;  %v8365_v50 = vld [vmem:[#allocation3 + $0x40] sm:$0xf] }
 0x2c5   : > { %v5507_v15 = vsel %vm12883_vm10, %v5499_v38, %v5506_v13  ;;  %v5752_v11 = vsel %vm14358_vm1, %v5508_v40, %v5751_v55  ;;  %v5490_v21 = vsel %vm12883_vm10, %v5482_v39, %v5489_v53  ;;  %v5745_v46 = vsel %vm14358_vm1, %v5491_v52, %v5744_v44  ;;  %v5765_v55 = vld [vmem:[#allocation3 + $0x80] sm:$0x1]  ;;  %v12385_v13 = vld [vmem:[#allocation5 + $0x170] sm:$0xff]  }
 0x2c6   : > { %5750 = vst [vmem:[#allocation3 + $0x64] sm:$0xf] %v5507_v15  ;;  %5753 = vst [vmem:[#allocation3 + $0x68] sm:$0x1] %v5752_v11  ;;  %v5529_v36 = vrot.slane %v5527_v32, 7  ;;  %v5510_v35 = vshrl.u32 %v11002_v60, 16  ;;  %v11003_v54 = vpack.c.bf16 %v5262_v12, %v5262_v12  ;;  %11726 = vmatprep.subr.bf16.mxu1 %v12385_v13 }
 0x2c7   : > { %5743 = vst [vmem:[#allocation3 + $0x58] sm:$0xf] %v5490_v21  ;;  %5746 = vst [vmem:[#allocation3 + $0x5c] sm:$0x1] %v5745_v46  ;;  %v5513_v7 = vshll.u32 %v11002_v60, 16  ;;  %v6029_v19 = vrot.slane %v6027_v37, 4 }
 0x2c8   : > { %v6032_v33 = vrot.slane %v6030_v58, 5  ;;  %v6036_v38 = vshll.u32 %v14447_v63, 16  ;;  %v14460_v48 = vpop.f32.mrb[152].mxu0  ;;  %v5532_v47 = vor.u32 %v5530_v27, %v5529_v36  ;;  %v5533_v39 = vrot.slane %v5529_v36, 4  ;;  %v6470_v37 = vld [vmem:[#allocation3 + $0x10] sm:$0xf] }
 0x2c9   : > { %v5512_v1 = vrot.slane %v5510_v35, 7  ;;  %v5535_v45 = vshrl.u32 %v11005_v17, 16  ;;  %v14462_v41 = vpop.f32.mrb[153].mxu0  ;;  %v5538_v30 = vshll.u32 %v11005_v17, 16  ;;  %v5518_v40 = vshrl.u32 %v11003_v54, 16 }
 0x2ca   : > { %v6033_v56 = vor.u32 %v6032_v33, %v6029_v19  ;;  %v14464_v8 = vrot.slane %v6036_v38, 5  ;;  %v14466_v44 = vpop.f32.mrb[154].mxu0  ;;  %v5762_v6 = vsel %vm14351_vm0, %v5532_v47, %v5761_v62  ;;  %v5521_v53 = vshll.u32 %v11003_v54, 16  ;;  %v6471_v27 = vld [vmem:[#allocation3 + $0x14] sm:$0x1] }
 0x2cb   : > { %v5515_v29 = vor.u32 %v5513_v7, %v5512_v1  ;;  %v5516_v14 = vrot.slane %v5512_v1, 4  ;;  %v5537_v61 = vrot.slane %v5535_v45, 7  ;;  %v14470_v58 = vpop.f32.mrb[155].mxu0  ;;  %5763 = vst [vmem:[#allocation3 + $0x78] sm:$0xf] %v5762_v6  ;;  %v6040_v32 = vshrl.u32 %v14447_v63, 16 }
 0x2cc   : > { %v6034_v52 = vrot.slane %v6033_v56, 4  ;;  %v5960_v60 = vld [vmem:[#allocation3 + $0x18] sm:$0xf]  ;;  %v5758_v21 = vld [vmem:[#allocation3 + $0x74] sm:$0x1]  ;;  %v6046_v46 = vshll.u32 %v5959_v34, 16 }
 0x2cd   : > { %v5755_v0 = vsel %vm14351_vm0, %v5515_v29, %v5754_v43  ;;  %v5540_v15 = vor.u32 %v5538_v30, %v5537_v61  ;;  %v5542_v11 = vrot.slane %v5537_v61, 4  ;;  %v5520_v36 = vrot.slane %v5518_v40, 7  ;;  %v5961_v19 = vld [vmem:[#allocation3 + $0x1c] sm:$0xf] }
 0x2ce   : > { %5756 = vst [vmem:[#allocation3 + $0x6c] sm:$0xf] %v5755_v0  ;;  %v6039_v62 = vsel %vm12872_vm7, %v6034_v52, %v14464_v8  ;;  %v6042_v35 = vrot.slane %v6040_v32, 4  ;;  %v10750_v7 = vrot.slane %v6469_v5, 9  ;;  %v6048_v43 = vrot.slane %v6046_v46, 5  ;;  %v14483_v45 = vpop.f32.mrb[156].mxu0 }
 0x2cf   : > { %v5541_v63 = vsel %vm12883_vm10, %v5533_v39, %v5540_v15  ;;  %v5766_v17 = vsel %vm14358_vm1, %v5542_v11, %v5765_v55  ;;  %v6571_v12 = vrot.slane %v6470_v37, 5  ;;  %v5523_v33 = vor.u32 %v5521_v53, %v5520_v36  ;;  %v5962_v39 = vld [vmem:[#allocation3 + $0x20] sm:$0x1]  ;;  %v14487_v55 = vpop.f32.mrb[157].mxu0  ;;  %v6472_v52 = vld [vmem:[#allocation3 + $0x18] sm:$0xe] }
 0x2d0   : > { %5764 = vst [vmem:[#allocation3 + $0x7c] sm:$0xf] %v5541_v63  ;;  %5767 = vst [vmem:[#allocation3 + $0x80] sm:$0x1] %v5766_v17  ;;  %v5525_v38 = vrot.slane %v5520_v36, 4  ;;  %v6043_v47 = vor.u32 %v6042_v35, %v14464_v8  ;;  %v6574_v1 = vrot.slane %v6471_v27, 5  ;;  %v5199_v17 = vadd.f32 %v14440_v31, %v14303_v51 }
 0x2d1   : > { %v6572_v5 = vsel %vm12912_vm13, %v10750_v7, %v6571_v12  ;;  %v6573_v30 = vrot.slane %v6571_v12, 4  ;;  %v6051_v54 = vshrl.u32 %v5960_v60, 16  ;;  %v6054_v34 = vshll.u32 %v5960_v60, 16  ;;  %v14493_v61 = vpop.f32.mrb[158].mxu0  ;;  %v12347_v60 = vld [vmem:[#allocation3 + $0xc] sm:$0xff]   ;;  %v12348_v46 = vld [vmem:[#allocation3 + $0x24] sm:$0xff]  }
 0x2d2   : > { %v5524_v56 = vsel %vm12883_vm10, %v5516_v14, %v5523_v33  ;;  %v5759_v6 = vsel %vm14358_vm1, %v5525_v38, %v5758_v21  ;;  %v6044_v29 = vrot.slane %v6043_v47, 4  ;;  %v6060_v8 = vshll.u32 %v5961_v19, 16  ;;  %v14497_v32 = vpop.f32.mrb[159].mxu0  ;;  %v6473_v11 = vld [vmem:[#allocation3 + $0x1c] sm:$0xf]  ;;  %v12386_v33 = vld [vmem:[#allocation5 + $0x1d0] sm:$0xff]  }
 0x2d3   : > { %5757 = vst [vmem:[#allocation3 + $0x70] sm:$0xf] %v5524_v56  ;;  %5760 = vst [vmem:[#allocation3 + $0x74] sm:$0x1] %v5759_v6  ;;  %v6575_v37 = vsel %vm12912_vm13, %v6573_v30, %v6574_v1  ;;  %v6053_v13 = vrot.slane %v6051_v54, 4  ;;  %v6056_v40 = vrot.slane %v6054_v34, 5  ;;  %v5207_v7 = vadd.f32 %v14434_v10, %v14309_v42  ;;  %11830 = vmatprep.subr.bf16.mxu0 %v12386_v33 }
 0x2d4   : > { %v6064_v53 = vshrl.u32 %v5961_v19, 16  ;;  %v6049_v14 = vsel %vm12872_vm7, %v6044_v29, %v6048_v43  ;;  %v10766_v27 = vcombine.low %v6572_v5, %v6575_v37  ;;  %v6062_v0 = vrot.slane %v6060_v8, 5  ;;  %v6474_v19 = vld [vmem:[#allocation3 + $0x20] sm:$0x1]  ;;  %v5963_v34 = vld [vmem:[#allocation3 + $0x24] sm:$0xf] }
 0x2d5   : > { %v6070_v15 = vshll.u32 %v5962_v39, 16  ;;  %v10734_v21 = vcombine.low %v6039_v62, %v6049_v14  ;;  %v6057_v36 = vor.u32 %v6056_v40, %v6053_v13  ;;  %v5210_v43 = vadd.f32 %v14444_v20, %v14311_v49  ;;  %v5775_v13 = vld [vmem:[#allocation3 + $0x90] sm:$0xf] }
 0x2d6   : > { %v6066_v35 = vrot.slane %v6064_v53, 4  ;;  %9572 = vmatmul.mubr.bf16.gmra.mrb[164].mxu0 %v10766_v27  ;;  %v5202_v12 = vadd.f32 %v14449_v24, %v14305_v26  ;;  %v5267_v47 = vmax.f32 %v5207_v7, 0.0  ;;  %v10751_v1 = vrot.slane %v6472_v52, 9  ;;  %v5768_v27 = vld [vmem:[#allocation3 + $0x84] sm:$0xf]  ;;  %v12350_v33 = vld [vmem:[#allocation3 + $0x30] sm:$0xff]  }
 0x2d7   : > { %v6072_v63 = vrot.slane %v6070_v15, 5  ;;  %9410 = vmatprep.mubr.bf16.mxu1 %v10734_v21  ;;  %9579 = vmatprep.mubr.bf16.mxu0 %v12348_v46  ;;  %v6058_v62 = vrot.slane %v6057_v36, 4  ;;  %v5265_v42 = vmax.f32 %v5199_v17, 0.0  ;;  %v5268_v10 = vmax.f32 %v5210_v43, 0.0  ;;  %v5779_v46 = vld [vmem:[#allocation3 + $0x98] sm:$0x1] }
 0x2d8   : > { %v6067_v38 = vor.u32 %v6066_v35, %v6062_v0  ;;  %9411 = vmatmul.mubr.bf16.gmra.mrb[132].mxu1 %v12347_v60  ;;  %v5266_v5 = vmax.f32 %v5202_v12, 0.0  ;;  %v6578_v30 = vrot.slane %v6473_v11, 5  ;;  %v11008_v31 = vpack.c.bf16 %v5267_v47, %v5267_v47  ;;  %v12349_v35 = vld [vmem:[#allocation3 + $0x18] sm:$0xff]   ;;  %v5772_v12 = vld [vmem:[#allocation3 + $0x8c] sm:$0x1] }
 0x2d9   : > { %v6063_v51 = vsel %vm12872_vm7, %v6058_v62, %v6062_v0  ;;  %v6581_v26 = vrot.slane %v6474_v19, 5  ;;  %v11006_v20 = vpack.c.bf16 %v5265_v42, %v5265_v42  ;;  %v11009_v24 = vpack.c.bf16 %v5268_v10, %v5268_v10  ;;  %v5964_v42 = vld [vmem:[#allocation3 + $0x28] sm:$0xf]  ;;  %v5965_v10 = vld [vmem:[#allocation3 + $0x2c] sm:$0x1] }
 0x2da   : > { %v6068_v49 = vrot.slane %v6067_v38, 4  ;;  %v11007_v39 = vpack.c.bf16 %v5266_v5, %v5266_v5  ;;  %v6579_v54 = vsel %vm12912_vm13, %v10751_v1, %v6578_v30  ;;  %v5561_v6 = vshrl.u32 %v11008_v31, 16 }
 0x2db   : > { %v5564_v29 = vshll.u32 %v11008_v31, 16  ;;  %v6580_v8 = vrot.slane %v6578_v30, 4  ;;  %v5544_v40 = vshrl.u32 %v11006_v20, 16  ;;  %v5547_v53 = vshll.u32 %v11006_v20, 16 }
 0x2dc   : > { %v6073_v56 = vsel %vm12872_vm7, %v6068_v49, %v6072_v63  ;;  %v5569_v52 = vshrl.u32 %v11009_v24, 16  ;;  %v5563_v14 = vrot.slane %v5561_v6, 7  ;;  %v5572_v60 = vshll.u32 %v11009_v24, 16 }
 0x2dd   : > { %v10735_v37 = vcombine.low %v6063_v51, %v6073_v56  ;;  %v5552_v0 = vshrl.u32 %v11007_v39, 16  ;;  %v5555_v15 = vshll.u32 %v11007_v39, 16  ;;  %v5546_v11 = vrot.slane %v5544_v40, 7  ;;  %v12387_v39 = vld [vmem:[#allocation5 + $0x130] sm:$0xff]   ;;  %v6475_v40 = vld [vmem:[#allocation3 + $0x24] sm:$0xe] }
 0x2de   : > { %v5571_v21 = vrot.slane %v5569_v52, 7  ;;  %v6582_v36 = vsel %vm12912_vm13, %v6580_v8, %v6581_v26  ;;  %v6075_v7 = vshrl.u32 %v5963_v34, 16  ;;  %v5566_v63 = vor.u32 %v5564_v29, %v5563_v14  ;;  %11727 = vmatpush3.bf16.msra.mxu1 %v12387_v39 }
 0x2df   : > { %9418 = vmatprep.mubr.bf16.mxu1 %v10735_v37  ;;  %v5567_v17 = vrot.slane %v5563_v14, 4  ;;  %v5554_v43 = vrot.slane %v5552_v0, 7  ;;  %v10767_v19 = vcombine.low %v6579_v54, %v6582_v36  ;;  %v5549_v62 = vor.u32 %v5547_v53, %v5546_v11  ;;  %v6477_v0 = vld [vmem:[#allocation3 + $0x2c] sm:$0x1] }
 0x2e0   : > { %v5550_v38 = vrot.slane %v5546_v11, 4  ;;  %v5574_v47 = vor.u32 %v5572_v60, %v5571_v21  ;;  %v5576_v1 = vrot.slane %v5571_v21, 4  ;;  %9419 = vmatmul.mubr.bf16.gmra.mrb[136].mxu1 %v12349_v35  ;;  %v5776_v5 = vsel %vm14351_vm0, %v5566_v63, %v5775_v13  ;;  %v6476_v60 = vld [vmem:[#allocation3 + $0x28] sm:$0xf]  ;;  %v12391_v35 = vld [vmem:[#allocation5 + $0x1d8] sm:$0xff]  }
 0x2e1   : > { %v5557_v30 = vor.u32 %v5555_v15, %v5554_v43  ;;  %v5559_v51 = vrot.slane %v5554_v43, 4  ;;  %9580 = vmatmul.mubr.bf16.gmra.mrb[168].mxu0 %v10767_v19  ;;  %v6077_v49 = vrot.slane %v6075_v7, 4  ;;  %5777 = vst [vmem:[#allocation3 + $0x90] sm:$0xf] %v5776_v5  ;;  %v5769_v31 = vsel %vm14351_vm0, %v5549_v62, %v5768_v27 }
 0x2e2   : > { %v5575_v26 = vsel %vm12883_vm10, %v5567_v17, %v5574_v47  ;;  %v5780_v20 = vsel %vm14358_vm1, %v5576_v1, %v5779_v46  ;;  %9587 = vmatprep.mubr.bf16.mxu0 %v12350_v33  ;;  %v6078_v24 = vshll.u32 %v5963_v34, 16  ;;  %5770 = vst [vmem:[#allocation3 + $0x84] sm:$0xf] %v5769_v31  ;;  %v6084_v6 = vshll.u32 %v5964_v42, 16  ;;  %v5789_v47 = vld [vmem:[#allocation3 + $0xa8] sm:$0xf] }
 0x2e3   : > { %5778 = vst [vmem:[#allocation3 + $0x94] sm:$0xf] %v5575_v26  ;;  %5781 = vst [vmem:[#allocation3 + $0x98] sm:$0x1] %v5780_v20  ;;  %v5558_v54 = vsel %vm12883_vm10, %v5550_v38, %v5557_v30  ;;  %v5773_v56 = vsel %vm14358_vm1, %v5559_v51, %v5772_v12  ;;  %v6088_v29 = vshrl.u32 %v5964_v42, 16  ;;  %v6094_v37 = vshll.u32 %v5965_v10, 16 }
 0x2e4   : > { %5771 = vst [vmem:[#allocation3 + $0x88] sm:$0xf] %v5558_v54  ;;  %5774 = vst [vmem:[#allocation3 + $0x8c] sm:$0x1] %v5773_v56  ;;  %v6080_v8 = vrot.slane %v6078_v24, 5  ;;  %v5223_v13 = vadd.f32 %v14460_v48, %v14321_v18  ;;  %v5215_v34 = vadd.f32 %v14462_v41, %v14315_v59  ;;  %v6086_v53 = vrot.slane %v6084_v6, 5 }
 0x2e5   : > { %v6090_v52 = vrot.slane %v6088_v29, 4  ;;  %v5226_v14 = vadd.f32 %v14466_v44, %v14323_v23  ;;  %v5218_v27 = vadd.f32 %v14470_v58, %v14317_v25  ;;  %v6096_v11 = vrot.slane %v6094_v37, 5  ;;  %v12388_v18 = vld [vmem:[#allocation5 + $0x190] sm:$0xff]   ;;  %v5782_v42 = vld [vmem:[#allocation3 + $0x9c] sm:$0xf] }
 0x2e6   : > { %v6081_v15 = vor.u32 %v6080_v8, %v6077_v49  ;;  %v5271_v21 = vmax.f32 %v5223_v13, 0.0  ;;  %v5269_v46 = vmax.f32 %v5215_v34, 0.0  ;;  %v10752_v41 = vrot.slane %v6475_v40, 9  ;;  %11831 = vmatpush3.bf16.msra.mxu0 %v12388_v18  ;;  %v5793_v31 = vld [vmem:[#allocation3 + $0xb0] sm:$0x1]  ;;  %v12353_v6 = vld [vmem:[#allocation3 + $0x24] sm:$0xff]  }
 0x2e7   : > { %v6091_v48 = vor.u32 %v6090_v52, %v6086_v53  ;;  %v5272_v36 = vmax.f32 %v5226_v14, 0.0  ;;  %v5270_v59 = vmax.f32 %v5218_v27, 0.0  ;;  %v6585_v43 = vrot.slane %v6476_v60, 5  ;;  %11832 = vmatprep.subr.bf16.mxu0 %v12391_v35  ;;  %v5966_v20 = vld [vmem:[#allocation3 + $0x30] sm:$0xf] }
 0x2e8   : > { %v6082_v7 = vrot.slane %v6081_v15, 4  ;;  %v11012_v63 = vpack.c.bf16 %v5271_v21, %v5271_v21  ;;  %v11010_v17 = vpack.c.bf16 %v5269_v46, %v5269_v46  ;;  %v6588_v58 = vrot.slane %v6477_v0, 5  ;;  %v5967_v29 = vld [vmem:[#allocation3 + $0x34] sm:$0xf]  ;;  %v5786_v0 = vld [vmem:[#allocation3 + $0xa4] sm:$0x1] }
 0x2e9   : > { %v6092_v23 = vrot.slane %v6091_v48, 4  ;;  %v11013_v44 = vpack.c.bf16 %v5272_v36, %v5272_v36  ;;  %v11011_v25 = vpack.c.bf16 %v5270_v59, %v5270_v59  ;;  %v6586_v54 = vsel %vm12912_vm13, %v10752_v41, %v6585_v43  ;;  %v12392_v46 = vld [vmem:[#allocation5 + $0x198] sm:$0xff]   ;;  %v12354_v41 = vld [vmem:[#allocation3 + $0x3c] sm:$0xff]  }
 0x2ea   : > { %v6087_v12 = vsel %vm12872_vm7, %v6082_v7, %v6086_v53  ;;  %v5595_v19 = vshrl.u32 %v11012_v63, 16  ;;  %v5598_v33 = vshll.u32 %v11012_v63, 16  ;;  %v5578_v62 = vshrl.u32 %v11010_v17, 16  ;;  %v14553_v35 = vld [vmem:[#allocation3 + $0x30] sm:$0xe]  ;;  %v12393_v7 = vld [vmem:[#allocation5 + $0x1e0] sm:$0xff]   ;;  %11833 = vmatpush3.bf16.msra.mxu0 %v12392_v46 }
 0x2eb   : > { %v6097_v38 = vsel %vm12872_vm7, %v6092_v23, %v6096_v11  ;;  %v5581_v1 = vshll.u32 %v11010_v17, 16  ;;  %v5603_v10 = vshrl.u32 %v11013_v44, 16  ;;  %v5606_v5 = vshll.u32 %v11013_v44, 16  ;;  %v5968_v11 = vld [vmem:[#allocation3 + $0x38] sm:$0x1]  ;;  %11834 = vmatprep.subr.bf16.mxu0 %v12393_v7 }
 0x2ec   : > { %v10736_v30 = vcombine.low %v6087_v12, %v6097_v38  ;;  %v5597_v51 = vrot.slane %v5595_v19, 7  ;;  %v5580_v49 = vrot.slane %v5578_v62, 7  ;;  %v5586_v26 = vshrl.u32 %v11011_v25, 16  ;;  %v14555_v44 = vld [vmem:[#allocation3 + $0x34] sm:$0xf] }
 0x2ed   : > { %v5605_v24 = vrot.slane %v5603_v10, 7  ;;  %v5589_v39 = vshll.u32 %v11011_v25, 16  ;;  %v6587_v56 = vrot.slane %v6585_v43, 4  ;;  %v6099_v21 = vshrl.u32 %v5966_v20, 16  ;;  %v12396_v62 = vld [vmem:[#allocation5 + $0x178] sm:$0xff]   ;;  %v12397_v10 = vld [vmem:[#allocation5 + $0x1a0] sm:$0xff]  }
 0x2ee   : > { %9426 = vmatprep.mubr.bf16.mxu1 %v10736_v30  ;;  %v5600_v8 = vor.u32 %v5598_v33, %v5597_v51  ;;  %v5601_v37 = vrot.slane %v5597_v51, 4  ;;  %v5583_v13 = vor.u32 %v5581_v1, %v5580_v49  ;;  %v5584_v34 = vrot.slane %v5580_v49, 4  ;;  %v14563_v33 = vld [vmem:[#allocation3 + $0x38] sm:$0x1]  ;;  %11728 = vmatprep.subr.bf16.mxu1 %v12396_v62  ;;  %v5800_v7 = vld [vmem:[#allocation3 + $0xbc] sm:$0x1] }
 0x2ef   : > { %v5608_v40 = vor.u32 %v5606_v5, %v5605_v24  ;;  %v5610_v53 = vrot.slane %v5605_v24, 4  ;;  %v5588_v52 = vrot.slane %v5586_v26, 7  ;;  %v6589_v14 = vsel %vm12912_vm13, %v6587_v56, %v6588_v58  ;;  %9427 = vmatmul.mubr.bf16.gmra.mrb[140].mxu1 %v12353_v6  ;;  %11835 = vmatpush3.bf16.msra.mxu0 %v12397_v10 }
 0x2f0   : > { %v5790_v27 = vsel %vm14351_vm0, %v5600_v8, %v5789_v47  ;;  %v5783_v60 = vsel %vm14351_vm0, %v5583_v13, %v5782_v42  ;;  %v10768_v15 = vcombine.low %v6586_v54, %v6589_v14  ;;  %v6101_v63 = vrot.slane %v6099_v21, 4  ;;  %v5807_v21 = vld [vmem:[#allocation3 + $0xc8] sm:$0x1] }
 0x2f1   : > { %5791 = vst [vmem:[#allocation3 + $0xa8] sm:$0xf] %v5790_v27  ;;  %5784 = vst [vmem:[#allocation3 + $0x9c] sm:$0xf] %v5783_v60  ;;  %v5609_v18 = vsel %vm12883_vm10, %v5601_v37, %v5608_v40  ;;  %v5794_v48 = vsel %vm14358_vm1, %v5610_v53, %v5793_v31  ;;  %v5591_v36 = vor.u32 %v5589_v39, %v5588_v52  ;;  %v5593_v59 = vrot.slane %v5588_v52, 4 }
 0x2f2   : > { %5792 = vst [vmem:[#allocation3 + $0xac] sm:$0xf] %v5609_v18  ;;  %5795 = vst [vmem:[#allocation3 + $0xb0] sm:$0x1] %v5794_v48  ;;  %9588 = vmatmul.mubr.bf16.gmra.mrb[172].mxu0 %v10768_v15  ;;  %v6102_v17 = vshll.u32 %v5966_v20, 16  ;;  %v6108_v43 = vshll.u32 %v5967_v29, 16  ;;  %v5239_v19 = vadd.f32 %v14483_v45, %v14338_v22  ;;  %v5231_v42 = vadd.f32 %v14487_v55, %v14327_v2 }
 0x2f3   : > { %v6112_v23 = vshrl.u32 %v5967_v29, 16  ;;  %v5592_v25 = vsel %vm12883_vm10, %v5584_v34, %v5591_v36  ;;  %v5787_v58 = vsel %vm14358_vm1, %v5593_v59, %v5786_v0  ;;  %9595 = vmatprep.mubr.bf16.mxu0 %v12354_v41  ;;  %v6118_v12 = vshll.u32 %v5968_v11, 16  ;;  %v12398_v55 = vld [vmem:[#allocation5 + $0x138] sm:$0xff]   ;;  %v14574_v37 = vld [vmem:[#allocation3 + $0x3c] sm:$0xf] }
 0x2f4   : > { %5785 = vst [vmem:[#allocation3 + $0xa0] sm:$0xf] %v5592_v25  ;;  %5788 = vst [vmem:[#allocation3 + $0xa4] sm:$0x1] %v5787_v58  ;;  %v6104_v38 = vrot.slane %v6102_v17, 5  ;;  %v6110_v47 = vrot.slane %v6108_v43, 5  ;;  %v5242_v51 = vadd.f32 %v14493_v61, %v14341_v4  ;;  %v5234_v22 = vadd.f32 %v14497_v32, %v14330_v3  ;;  %11729 = vmatpush3.bf16.msra.mxu1 %v12398_v55 }
 0x2f5   : > { %v6114_v1 = vrot.slane %v6112_v23, 4  ;;  %v6120_v5 = vrot.slane %v6118_v12, 5  ;;  %v5275_v30 = vmax.f32 %v5239_v19, 0.0  ;;  %v5273_v31 = vmax.f32 %v5231_v42, 0.0  ;;  %v12399_v61 = vld [vmem:[#allocation5 + $0x1e8] sm:$0xff]   ;;  %v12355_v36 = vld [vmem:[#allocation3 + $0x30] sm:$0xff]  }
 0x2f6   : > { %v6105_v45 = vor.u32 %v6104_v38, %v6101_v63  ;;  %v10753_v26 = vrot.slane %v14553_v35, 9  ;;  %v5276_v24 = vmax.f32 %v5242_v51, 0.0  ;;  %v5274_v39 = vmax.f32 %v5234_v22, 0.0  ;;  %v5803_v40 = vld [vmem:[#allocation3 + $0xc0] sm:$0xf]  ;;  %11836 = vmatprep.subr.bf16.mxu0 %v12399_v61  ;;  %v12356_v38 = vld [vmem:[#allocation3 + $0x48] sm:$0xff]  }
 0x2f7   : > { %v6115_v49 = vor.u32 %v6114_v1, %v6110_v47  ;;  %v11016_v20 = vpack.c.bf16 %v5275_v30, %v5275_v30  ;;  %v6592_v2 = vrot.slane %v14555_v44, 5  ;;  %v11014_v6 = vpack.c.bf16 %v5273_v31, %v5273_v31  ;;  %v5796_v60 = vld [vmem:[#allocation3 + $0xb4] sm:$0xf]  ;;  %v5970_v17 = vld [vmem:[#allocation3 + $0x40] sm:$0xf] }
 0x2f8   : > { %v6106_v54 = vrot.slane %v6105_v45, 4  ;;  %v6595_v4 = vrot.slane %v14563_v33, 5  ;;  %v11017_v29 = vpack.c.bf16 %v5276_v24, %v5276_v24  ;;  %v11015_v8 = vpack.c.bf16 %v5274_v39, %v5274_v39  ;;  %v5971_v25 = vld [vmem:[#allocation3 + $0x44] sm:$0x1]  ;;  %v6482_v1 = vld [vmem:[#allocation3 + $0x40] sm:$0xf] }
 0x2f9   : > { %v6116_v56 = vrot.slane %v6115_v49, 4  ;;  %v5629_v3 = vshrl.u32 %v11016_v20, 16  ;;  %v5632_v32 = vshll.u32 %v11016_v20, 16  ;;  %v5612_v53 = vshrl.u32 %v11014_v6, 16  ;;  %v12400_v42 = vld [vmem:[#allocation5 + $0x1a8] sm:$0xff]   ;;  %v12401_v49 = vld [vmem:[#allocation5 + $0x1f0] sm:$0xff]  }
 0x2fa   : > { %v6111_v13 = vsel %vm12872_vm7, %v6106_v54, %v6110_v47  ;;  %v5615_v52 = vshll.u32 %v11014_v6, 16  ;;  %v5637_v0 = vshrl.u32 %v11017_v29, 16  ;;  %v5640_v15 = vshll.u32 %v11017_v29, 16  ;;  %v6481_v47 = vld [vmem:[#allocation3 + $0x3c] sm:$0xe]  ;;  %11837 = vmatpush3.bf16.msra.mxu0 %v12400_v42 }
 0x2fb   : > { %v6121_v34 = vsel %vm12872_vm7, %v6116_v56, %v6120_v5  ;;  %v5631_v27 = vrot.slane %v5629_v3, 7  ;;  %v5614_v11 = vrot.slane %v5612_v53, 7  ;;  %v5620_v46 = vshrl.u32 %v11015_v8, 16  ;;  %v6483_v22 = vld [vmem:[#allocation3 + $0x44] sm:$0x1]  ;;  %11838 = vmatprep.subr.bf16.mxu0 %v12401_v49 }
 0x2fc   : > { %v10737_v14 = vcombine.low %v6111_v13, %v6121_v34  ;;  %v5623_v18 = vshll.u32 %v11015_v8, 16  ;;  %v6593_v48 = vsel %vm12912_vm13, %v10753_v26, %v6592_v2  ;;  %v5639_v35 = vrot.slane %v5637_v0, 7  ;;  %v5972_v45 = vld [vmem:[#allocation3 + $0x48] sm:$0xf]  ;;  %v5973_v39 = vld [vmem:[#allocation3 + $0x4c] sm:$0xf] }
 0x2fd   : > { %v5634_v59 = vor.u32 %v5632_v32, %v5631_v27  ;;  %v5635_v41 = vrot.slane %v5631_v27, 4  ;;  %v6594_v63 = vrot.slane %v6592_v2, 4  ;;  %v5617_v43 = vor.u32 %v5615_v52, %v5614_v11  ;;  %v5974_v3 = vld [vmem:[#allocation3 + $0x50] sm:$0x1]  ;;  %v6485_v53 = vld [vmem:[#allocation3 + $0x4c] sm:$0xf] }
 0x2fe   : > { %9434 = vmatprep.mubr.bf16.mxu1 %v10737_v14  ;;  %v5618_v23 = vrot.slane %v5614_v11, 4  ;;  %v5622_v44 = vrot.slane %v5620_v46, 7  ;;  %v6123_v58 = vshrl.u32 %v14574_v37, 16  ;;  %v5642_v19 = vor.u32 %v5640_v15, %v5639_v35  ;;  %v6486_v52 = vld [vmem:[#allocation3 + $0x50] sm:$0x1]  ;;  %v12403_v11 = vld [vmem:[#allocation5 + $0x1b0] sm:$0xff]  }
 0x2ff   : > { %9435 = vmatmul.mubr.bf16.gmra.mrb[144].mxu1 %v12355_v36  ;;  %v5804_v12 = vsel %vm14351_vm0, %v5634_v59, %v5803_v40  ;;  %v5644_v33 = vrot.slane %v5639_v35, 4  ;;  %v6596_v62 = vsel %vm12912_vm13, %v6594_v63, %v6595_v4  ;;  %v5797_v10 = vsel %vm14351_vm0, %v5617_v43, %v5796_v60  ;;  %v5975_v15 = vld [vmem:[#allocation3 + $0x54] sm:$0xf]  ;;  %v5976_v36 = vld [vmem:[#allocation3 + $0x58] sm:$0xf]  ;;  %11839 = vmatpush3.bf16.msra.mxu0 %v12403_v11 }
 0x300   : > { %5805 = vst [vmem:[#allocation3 + $0xc0] sm:$0xf] %v5804_v12  ;;  %v5625_v5 = vor.u32 %v5623_v18, %v5622_v44  ;;  %v5627_v30 = vrot.slane %v5622_v44, 4  ;;  %v10769_v51 = vcombine.low %v6593_v48, %v6596_v62  ;;  %5798 = vst [vmem:[#allocation3 + $0xb4] sm:$0xf] %v5797_v10  ;;  %v5643_v31 = vsel %vm12883_vm10, %v5635_v41, %v5642_v19  ;;  %v12404_v59 = vld [vmem:[#allocation5 + $0x1f8] sm:$0xff]  }
 0x301   : > { %v5808_v26 = vsel %vm14358_vm1, %v5644_v33, %v5807_v21  ;;  %v6125_v20 = vrot.slane %v6123_v58, 4  ;;  %v6126_v24 = vshll.u32 %v14574_v37, 16  ;;  %5806 = vst [vmem:[#allocation3 + $0xc4] sm:$0xf] %v5643_v31  ;;  %v6132_v55 = vshll.u32 %v5970_v17, 16  ;;  %11840 = vmatprep.subr.bf16.mxu0 %v12404_v59  ;;  %v12359_v19 = vld [vmem:[#allocation3 + $0x3c] sm:$0xff]  }
 0x302   : > { %5809 = vst [vmem:[#allocation3 + $0xc8] sm:$0x1] %v5808_v26  ;;  %v5626_v57 = vsel %vm12883_vm10, %v5618_v23, %v5625_v5  ;;  %v5801_v2 = vsel %vm14358_vm1, %v5627_v30, %v5800_v7  ;;  %9596 = vmatmul.mubr.bf16.gmra.mrb[176].mxu0 %v10769_v51  ;;  %v6136_v54 = vshrl.u32 %v5970_v17, 16  ;;  %v6142_v6 = vshll.u32 %v5971_v25, 16  ;;  %v6484_v37 = vld [vmem:[#allocation3 + $0x48] sm:$0xe] }
 0x303   : > { %5799 = vst [vmem:[#allocation3 + $0xb8] sm:$0xf] %v5626_v57  ;;  %5802 = vst [vmem:[#allocation3 + $0xbc] sm:$0x1] %v5801_v2  ;;  %9603 = vmatprep.mubr.bf16.mxu0 %v12356_v38  ;;  %v6128_v56 = vrot.slane %v6126_v24, 5  ;;  %v10754_v4 = vrot.slane %v6481_v47, 9 }
 0x304   : > { %v6599_v61 = vrot.slane %v6482_v1, 5  ;;  %v6134_v32 = vrot.slane %v6132_v55, 5  ;;  %v6138_v29 = vrot.slane %v6136_v54, 4  ;;  %v6602_v8 = vrot.slane %v6483_v22, 5  ;;  %v12405_v17 = vld [vmem:[#allocation5 + $0x1b8] sm:$0xff]   ;;  %v12407_v26 = vld [vmem:[#allocation5 + $0x200] sm:$0xff]  }
 0x305   : > { %v6147_v9 = vshrl.u32 %v5972_v45, 16  ;;  %v6129_v13 = vor.u32 %v6128_v56, %v6125_v20  ;;  %v6144_v28 = vrot.slane %v6142_v6, 5  ;;  %v6150_v60 = vshll.u32 %v5972_v45, 16  ;;  %v12360_v23 = vld [vmem:[#allocation3 + $0x54] sm:$0xff]   ;;  %v5977_v42 = vld [vmem:[#allocation3 + $0x5c] sm:$0x1]  ;;  %11841 = vmatpush3.bf16.msra.mxu0 %v12405_v17  ;;  %12027 = vmatprep.subr.bf16.mxu1 %v12407_v26 }
 0x306   : > { %v6600_v34 = vsel %vm12912_vm13, %v10754_v4, %v6599_v61  ;;  %v6601_v40 = vrot.slane %v6599_v61, 4  ;;  %v6139_v14 = vor.u32 %v6138_v29, %v6134_v32  ;;  %v6156_v0 = vshll.u32 %v5973_v39, 16  ;;  %v6487_v30 = vld [vmem:[#allocation3 + $0x54] sm:$0xe]  ;;  %v6488_v31 = vld [vmem:[#allocation3 + $0x58] sm:$0xf] }
 0x307   : > { %v6149_v27 = vrot.slane %v6147_v9, 4  ;;  %v6130_v21 = vrot.slane %v6129_v13, 4  ;;  %v6160_v18 = vshrl.u32 %v5973_v39, 16  ;;  %v6166_v48 = vshll.u32 %v5974_v3, 16  ;;  %v6489_v2 = vld [vmem:[#allocation3 + $0x5c] sm:$0x1] }
 0x308   : > { %v6603_v46 = vsel %vm12912_vm13, %v6601_v40, %v6602_v8  ;;  %v6140_v41 = vrot.slane %v6139_v14, 4  ;;  %v6152_v7 = vrot.slane %v6150_v60, 5  ;;  %v6158_v63 = vrot.slane %v6156_v0, 5  ;;  %v5978_v4 = vld [vmem:[#allocation3 + $0x60] sm:$0xf] }
 0x309   : > { %v10770_v35 = vcombine.low %v6600_v34, %v6603_v46  ;;  %v6135_v43 = vsel %vm12872_vm7, %v6130_v21, %v6134_v32  ;;  %v6162_v44 = vrot.slane %v6160_v18, 4  ;;  %v6168_v25 = vrot.slane %v6166_v48, 5  ;;  %v5979_v61 = vld [vmem:[#allocation3 + $0x64] sm:$0xf]  ;;  %v5980_v9 = vld [vmem:[#allocation3 + $0x68] sm:$0x1] }
 0x30a   : > { %v10755_v58 = vrot.slane %v6484_v37, 9  ;;  %v6145_v12 = vsel %vm12872_vm7, %v6140_v41, %v6144_v28  ;;  %v6153_v33 = vor.u32 %v6152_v7, %v6149_v27  ;;  %v6606_v62 = vrot.slane %v6485_v53, 5  ;;  %v6490_v40 = vld [vmem:[#allocation3 + $0x60] sm:$0xe]  ;;  %v6491_v0 = vld [vmem:[#allocation3 + $0x64] sm:$0xf] }
 0x30b   : > { %9604 = vmatmul.mubr.bf16.gmra.mrb[180].mxu0 %v10770_v35  ;;  %v6609_v38 = vrot.slane %v6486_v52, 5  ;;  %v10738_v47 = vcombine.low %v6135_v43, %v6145_v12  ;;  %v6163_v1 = vor.u32 %v6162_v44, %v6158_v63  ;;  %v6171_v10 = vshrl.u32 %v5975_v15, 16  ;;  %v12362_v53 = vld [vmem:[#allocation3 + $0x60] sm:$0xff]   ;;  %v6492_v41 = vld [vmem:[#allocation3 + $0x68] sm:$0x1] }
 0x30c   : > { %9611 = vmatprep.mubr.bf16.mxu0 %v12360_v23  ;;  %v6174_v5 = vshll.u32 %v5975_v15, 16  ;;  %v6154_v51 = vrot.slane %v6153_v33, 4  ;;  %v6607_v22 = vsel %vm12912_vm13, %v10755_v58, %v6606_v62  ;;  %v6608_v45 = vrot.slane %v6606_v62, 4  ;;  %v12361_v35 = vld [vmem:[#allocation3 + $0x48] sm:$0xff]  }
 0x30d   : > { %v6180_v49 = vshll.u32 %v5976_v36, 16  ;;  %9442 = vmatprep.mubr.bf16.mxu1 %v10738_v47  ;;  %v6164_v20 = vrot.slane %v6163_v1, 4  ;;  %v6173_v24 = vrot.slane %v6171_v10, 4  ;;  %v6184_v57 = vshrl.u32 %v5976_v36, 16  ;;  %v5981_v23 = vld [vmem:[#allocation3 + $0x6c] sm:$0xf] }
 0x30e   : > { %v6176_v39 = vrot.slane %v6174_v5, 5  ;;  %9443 = vmatmul.mubr.bf16.gmra.mrb[148].mxu1 %v12359_v19  ;;  %v6159_v55 = vsel %vm12872_vm7, %v6154_v51, %v6158_v63  ;;  %v6610_v54 = vsel %vm12912_vm13, %v6608_v45, %v6609_v38  ;;  %v6190_v6 = vshll.u32 %v5977_v42, 16  ;;  %v5982_v19 = vld [vmem:[#allocation3 + $0x70] sm:$0xf]  ;;  %v5983_v1 = vld [vmem:[#allocation3 + $0x74] sm:$0x1] }
 0x30f   : > { %v6182_v56 = vrot.slane %v6180_v49, 5  ;;  %v6169_v3 = vsel %vm12872_vm7, %v6164_v20, %v6168_v25  ;;  %v10771_v32 = vcombine.low %v6607_v22, %v6610_v54  ;;  %v6186_v8 = vrot.slane %v6184_v57, 4  ;;  %v6493_v51 = vld [vmem:[#allocation3 + $0x6c] sm:$0xe] }
 0x310   : > { %v6177_v29 = vor.u32 %v6176_v39, %v6173_v24  ;;  %v10739_v37 = vcombine.low %v6159_v55, %v6169_v3  ;;  %v6192_v13 = vrot.slane %v6190_v6, 5  ;;  %v10756_v28 = vrot.slane %v6487_v30, 9  ;;  %v12366_v22 = vld [vmem:[#allocation3 + $0x6c] sm:$0xff]  }
 0x311   : > { %v6613_v34 = vrot.slane %v6488_v31, 5  ;;  %v6187_v14 = vor.u32 %v6186_v8, %v6182_v56  ;;  %v6616_v27 = vrot.slane %v6489_v2, 5  ;;  %v6195_v60 = vshrl.u32 %v5978_v4, 16  ;;  %v6494_v2 = vld [vmem:[#allocation3 + $0x70] sm:$0xf] }
 0x312   : > { %v6178_v52 = vrot.slane %v6177_v29, 4  ;;  %9450 = vmatprep.mubr.bf16.mxu1 %v10739_v37  ;;  %v6198_v21 = vshll.u32 %v5978_v4, 16  ;;  %v6204_v46 = vshll.u32 %v5979_v61, 16  ;;  %v6208_v59 = vshrl.u32 %v5979_v61, 16  ;;  %v6495_v4 = vld [vmem:[#allocation3 + $0x74] sm:$0x1] }
 0x313   : > { %9612 = vmatmul.mubr.bf16.gmra.mrb[184].mxu0 %v10771_v32  ;;  %v6614_v15 = vsel %vm12912_vm13, %v10756_v28, %v6613_v34  ;;  %v6615_v11 = vrot.slane %v6613_v34, 4  ;;  %v6188_v48 = vrot.slane %v6187_v14, 4  ;;  %v6197_v36 = vrot.slane %v6195_v60, 4  ;;  %v5984_v61 = vld [vmem:[#allocation3 + $0x78] sm:$0xf] }
 0x314   : > { %9619 = vmatprep.mubr.bf16.mxu0 %v12362_v53  ;;  %v6183_v18 = vsel %vm12872_vm7, %v6178_v52, %v6182_v56  ;;  %v6200_v63 = vrot.slane %v6198_v21, 5  ;;  %v6206_v17 = vrot.slane %v6204_v46, 5  ;;  %v6214_v43 = vshll.u32 %v5980_v9, 16  ;;  %v5985_v9 = vld [vmem:[#allocation3 + $0x7c] sm:$0xf] }
 0x315   : > { %v6617_v7 = vsel %vm12912_vm13, %v6615_v11, %v6616_v27  ;;  %v6193_v44 = vsel %vm12872_vm7, %v6188_v48, %v6192_v13  ;;  %v6210_v58 = vrot.slane %v6208_v59, 4  ;;  %v10757_v12 = vrot.slane %v6490_v40, 9  ;;  %v5986_v37 = vld [vmem:[#allocation3 + $0x80] sm:$0x1]  ;;  %v12365_v13 = vld [vmem:[#allocation3 + $0x54] sm:$0xff]  }
 0x316   : > { %v10772_v25 = vcombine.low %v6614_v15, %v6617_v7  ;;  %9451 = vmatmul.mubr.bf16.gmra.mrb[152].mxu1 %v12361_v35  ;;  %v10740_v33 = vcombine.low %v6183_v18, %v6193_v44  ;;  %v6201_v62 = vor.u32 %v6200_v63, %v6197_v36  ;;  %v6216_v38 = vrot.slane %v6214_v43, 5  ;;  %v6496_v52 = vld [vmem:[#allocation3 + $0x78] sm:$0xe]  ;;  %v6497_v15 = vld [vmem:[#allocation3 + $0x7c] sm:$0xf] }
 0x317   : > { %v6620_v47 = vrot.slane %v6491_v0, 5  ;;  %v6211_v42 = vor.u32 %v6210_v58, %v6206_v17  ;;  %v6623_v10 = vrot.slane %v6492_v41, 5  ;;  %v6219_v5 = vshrl.u32 %v5981_v23, 16  ;;  %v6498_v35 = vld [vmem:[#allocation3 + $0x80] sm:$0x1]  ;;  %v12368_v44 = vld [vmem:[#allocation3 + $0x78] sm:$0xff]  }
 0x318   : > { %v6222_v30 = vshll.u32 %v5981_v23, 16  ;;  %9458 = vmatprep.mubr.bf16.mxu1 %v10740_v33  ;;  %v6202_v45 = vrot.slane %v6201_v62, 4  ;;  %v6228_v26 = vshll.u32 %v5982_v19, 16  ;;  %v6232_v57 = vshrl.u32 %v5982_v19, 16  ;;  %v5987_v23 = vld [vmem:[#allocation3 + $0x84] sm:$0xf] }
 0x319   : > { %v6621_v49 = vsel %vm12912_vm13, %v10757_v12, %v6620_v47  ;;  %v6622_v31 = vrot.slane %v6620_v47, 4  ;;  %v6212_v20 = vrot.slane %v6211_v42, 4  ;;  %v6221_v24 = vrot.slane %v6219_v5, 4  ;;  %v5988_v33 = vld [vmem:[#allocation3 + $0x88] sm:$0xf] }
 0x31a   : > { %v6224_v39 = vrot.slane %v6222_v30, 5  ;;  %v6207_v55 = vsel %vm12872_vm7, %v6202_v45, %v6206_v17  ;;  %v6230_v56 = vrot.slane %v6228_v26, 5  ;;  %v6238_v6 = vshll.u32 %v5983_v1, 16  ;;  %v5989_v42 = vld [vmem:[#allocation3 + $0x8c] sm:$0x1] }
 0x31b   : > { %9620 = vmatmul.mubr.bf16.gmra.mrb[188].mxu0 %v10772_v25  ;;  %v6624_v54 = vsel %vm12912_vm13, %v6622_v31, %v6623_v10  ;;  %v6217_v3 = vsel %vm12872_vm7, %v6212_v20, %v6216_v38  ;;  %v6234_v8 = vrot.slane %v6232_v57, 4  ;;  %v10758_v40 = vrot.slane %v6493_v51, 9  ;;  %v6500_v45 = vld [vmem:[#allocation3 + $0x88] sm:$0xf] }
 0x31c   : > { %9627 = vmatprep.mubr.bf16.mxu0 %v12366_v22  ;;  %v10773_v32 = vcombine.low %v6621_v49, %v6624_v54  ;;  %v6225_v29 = vor.u32 %v6224_v39, %v6221_v24  ;;  %v10741_v28 = vcombine.low %v6207_v55, %v6217_v3  ;;  %v6240_v34 = vrot.slane %v6238_v6, 5  ;;  %v6499_v22 = vld [vmem:[#allocation3 + $0x84] sm:$0xe]  ;;  %v6501_v39 = vld [vmem:[#allocation3 + $0x8c] sm:$0x1] }
 0x31d   : > { %v6627_v53 = vrot.slane %v6494_v2, 5  ;;  %v6235_v27 = vor.u32 %v6234_v8, %v6230_v56  ;;  %v6630_v60 = vrot.slane %v6495_v4, 5  ;;  %v6243_v0 = vshrl.u32 %v5984_v61, 16  ;;  %v12367_v49 = vld [vmem:[#allocation3 + $0x60] sm:$0xff]  }
 0x31e   : > { %v6226_v14 = vrot.slane %v6225_v29, 4  ;;  %9459 = vmatmul.mubr.bf16.gmra.mrb[156].mxu1 %v12365_v13  ;;  %v6246_v46 = vshll.u32 %v5984_v61, 16  ;;  %v6252_v18 = vshll.u32 %v5985_v9, 16  ;;  %v6256_v41 = vshrl.u32 %v5985_v9, 16 }
 0x31f   : > { %v14632_v11 = vsel %vm12912_vm13, %v10758_v40, %v6627_v53  ;;  %v6629_v21 = vrot.slane %v6627_v53, 4  ;;  %9466 = vmatprep.mubr.bf16.mxu1 %v10741_v28  ;;  %v6236_v36 = vrot.slane %v6235_v27, 4  ;;  %v6245_v59 = vrot.slane %v6243_v0, 4  ;;  %v5992_v53 = vld [vmem:[#allocation3 + $0x98] sm:$0x1] }
 0x320   : > { %v6231_v48 = vsel %vm12872_vm7, %v6226_v14, %v6230_v56  ;;  %v6248_v63 = vrot.slane %v6246_v46, 5  ;;  %v6254_v17 = vrot.slane %v6252_v18, 5  ;;  %v6262_v43 = vshll.u32 %v5986_v37, 16  ;;  %v5990_v56 = vld [vmem:[#allocation3 + $0x90] sm:$0xf] }
 0x321   : > { %v6631_v7 = vsel %vm12912_vm13, %v6629_v21, %v6630_v60  ;;  %v6241_v25 = vsel %vm12872_vm7, %v6236_v36, %v6240_v34  ;;  %v6258_v12 = vrot.slane %v6256_v41, 4  ;;  %v10759_v19 = vrot.slane %v6496_v52, 9  ;;  %v5991_v37 = vld [vmem:[#allocation3 + $0x94] sm:$0xf]  ;;  %v12374_v52 = vld [vmem:[#allocation3 + $0x84] sm:$0xff]  }
 0x322   : > { %v10774_v58 = vcombine.low %v14632_v11, %v6631_v7  ;;  %v10742_v62 = vcombine.low %v6231_v48, %v6241_v25  ;;  %v6249_v38 = vor.u32 %v6248_v63, %v6245_v59  ;;  %v6264_v47 = vrot.slane %v6262_v43, 5  ;;  %v6503_v48 = vld [vmem:[#allocation3 + $0x94] sm:$0xf]  ;;  %v6504_v7 = vld [vmem:[#allocation3 + $0x98] sm:$0x1]  ;;  %v12373_v63 = vld [vmem:[#allocation3 + $0x6c] sm:$0xff]  }
 0x323   : > { %9628 = vmatmul.mubr.bf16.gmra.mrb[192].mxu0 %v10773_v32  ;;  %v6634_v1 = vrot.slane %v6497_v15, 5  ;;  %v6259_v10 = vor.u32 %v6258_v12, %v6254_v17  ;;  %v6637_v5 = vrot.slane %v6498_v35, 5  ;;  %v6267_v30 = vshrl.u32 %v5987_v23, 16  ;;  %v6502_v15 = vld [vmem:[#allocation3 + $0x90] sm:$0xe] }
 0x324   : > { %9635 = vmatprep.mubr.bf16.mxu0 %v12368_v44  ;;  %v6270_v51 = vshll.u32 %v5987_v23, 16  ;;  %v6250_v31 = vrot.slane %v6249_v38, 4  ;;  %v6276_v24 = vshll.u32 %v5988_v33, 16  ;;  %v6280_v54 = vshrl.u32 %v5988_v33, 16  ;;  %v5993_v25 = vld [vmem:[#allocation3 + $0x9c] sm:$0xf] }
 0x325   : > { %v14643_v26 = vsel %vm12912_vm13, %v10759_v19, %v6634_v1  ;;  %v6636_v20 = vrot.slane %v6634_v1, 4  ;;  %v6260_v57 = vrot.slane %v6259_v10, 4  ;;  %v6269_v2 = vrot.slane %v6267_v30, 4  ;;  %v5995_v30 = vld [vmem:[#allocation3 + $0xa4] sm:$0x1] }
 0x326   : > { %v6272_v55 = vrot.slane %v6270_v51, 5  ;;  %9467 = vmatmul.mubr.bf16.gmra.mrb[160].mxu1 %v12367_v49  ;;  %v6255_v6 = vsel %vm12872_vm7, %v6250_v31, %v6254_v17  ;;  %v6278_v61 = vrot.slane %v6276_v24, 5  ;;  %v6286_v3 = vshll.u32 %v5989_v42, 16  ;;  %v6505_v24 = vld [vmem:[#allocation3 + $0x9c] sm:$0xe] }
 0x327   : > { %v14649_v4 = vsel %vm12912_vm13, %v6636_v20, %v6637_v5  ;;  %9474 = vmatprep.mubr.bf16.mxu1 %v10742_v62  ;;  %v6265_v32 = vsel %vm12872_vm7, %v6260_v57, %v6264_v47  ;;  %v6282_v9 = vrot.slane %v6280_v54, 4  ;;  %v10760_v34 = vrot.slane %v6499_v22, 9  ;;  %v5994_v62 = vld [vmem:[#allocation3 + $0xa0] sm:$0xf] }
 0x328   : > { %v10775_v29 = vcombine.low %v14643_v26, %v14649_v4  ;;  %v6273_v8 = vor.u32 %v6272_v55, %v6269_v2  ;;  %v10743_v13 = vcombine.low %v6255_v6, %v6265_v32  ;;  %v6288_v28 = vrot.slane %v6286_v3, 5  ;;  %v6506_v54 = vld [vmem:[#allocation3 + $0xa0] sm:$0xf]  ;;  %v6507_v3 = vld [vmem:[#allocation3 + $0xa4] sm:$0x1] }
 0x329   : > { %v6641_v40 = vrot.slane %v6500_v45, 5  ;;  %v6283_v27 = vor.u32 %v6282_v9, %v6278_v61  ;;  %v6644_v60 = vrot.slane %v6501_v39, 5  ;;  %v6291_v0 = vshrl.u32 %v5990_v56, 16  ;;  %v12376_v45 = vld [vmem:[#allocation3 + $0x90] sm:$0xff]   ;;  %v5996_v32 = vld [vmem:[#allocation3 + $0xa8] sm:$0xf] }
 0x32a   : > { %v6274_v14 = vrot.slane %v6273_v8, 4  ;;  %v6294_v46 = vshll.u32 %v5990_v56, 16  ;;  %v6300_v18 = vshll.u32 %v5991_v37, 16  ;;  %v6304_v35 = vshrl.u32 %v5991_v37, 16 }
 0x32b   : > { %9636 = vmatmul.mubr.bf16.gmra.mrb[196].mxu0 %v10774_v58  ;;  %v14657_v11 = vsel %vm12912_vm13, %v10760_v34, %v6641_v40  ;;  %v6643_v21 = vrot.slane %v6641_v40, 4  ;;  %v6284_v59 = vrot.slane %v6283_v27, 4  ;;  %v6293_v41 = vrot.slane %v6291_v0, 4  ;;  %v12375_v34 = vld [vmem:[#allocation3 + $0x78] sm:$0xff]   ;;  %v6508_v27 = vld [vmem:[#allocation3 + $0xa8] sm:$0xe] }
 0x32c   : > { %9643 = vmatprep.mubr.bf16.mxu0 %v12374_v52  ;;  %v6279_v36 = vsel %vm12872_vm7, %v6274_v14, %v6278_v61  ;;  %v6296_v43 = vrot.slane %v6294_v46, 5  ;;  %v6302_v23 = vrot.slane %v6300_v18, 5  ;;  %v6310_v44 = vshll.u32 %v5992_v53, 16  ;;  %v6509_v46 = vld [vmem:[#allocation3 + $0xac] sm:$0xf] }
 0x32d   : > { %v14663_v17 = vsel %vm12912_vm13, %v6643_v21, %v6644_v60  ;;  %v6289_v58 = vsel %vm12872_vm7, %v6284_v59, %v6288_v28  ;;  %v6306_v19 = vrot.slane %v6304_v35, 4  ;;  %v10761_v33 = vrot.slane %v6502_v15, 9  ;;  %v5998_v28 = vld [vmem:[#allocation3 + $0xb0] sm:$0x1] }
 0x32e   : > { %v10776_v12 = vcombine.low %v14657_v11, %v14663_v17  ;;  %9475 = vmatmul.mubr.bf16.gmra.mrb[164].mxu1 %v12373_v63  ;;  %v10744_v38 = vcombine.low %v6279_v36, %v6289_v58  ;;  %v6297_v47 = vor.u32 %v6296_v43, %v6293_v41  ;;  %v6312_v1 = vrot.slane %v6310_v44, 5  ;;  %v6510_v41 = vld [vmem:[#allocation3 + $0xb0] sm:$0x1] }
 0x32f   : > { %v6648_v42 = vrot.slane %v6503_v48, 5  ;;  %9482 = vmatprep.mubr.bf16.mxu1 %v10743_v13  ;;  %v6307_v10 = vor.u32 %v6306_v19, %v6302_v23  ;;  %v6651_v5 = vrot.slane %v6504_v7, 5  ;;  %v6315_v51 = vshrl.u32 %v5993_v25, 16  ;;  %v5997_v13 = vld [vmem:[#allocation3 + $0xac] sm:$0xf] }
 0x330   : > { %v6318_v22 = vshll.u32 %v5993_v25, 16  ;;  %v6298_v49 = vrot.slane %v6297_v47, 4  ;;  %v6324_v20 = vshll.u32 %v5994_v62, 16  ;;  %v6328_v55 = vshrl.u32 %v5994_v62, 16  ;;  %v5999_v19 = vld [vmem:[#allocation3 + $0xb4] sm:$0xf] }
 0x331   : > { %v14671_v31 = vsel %vm12912_vm13, %v10761_v33, %v6648_v42  ;;  %v6650_v26 = vrot.slane %v6648_v42, 4  ;;  %v6308_v39 = vrot.slane %v6307_v10, 4  ;;  %v6317_v57 = vrot.slane %v6315_v51, 4  ;;  %v12382_v33 = vld [vmem:[#allocation3 + $0x9c] sm:$0xff]   ;;  %v6000_v42 = vld [vmem:[#allocation3 + $0xb8] sm:$0xf] }
 0x332   : > { %v6320_v2 = vrot.slane %v6318_v22, 5  ;;  %v6303_v56 = vsel %vm12872_vm7, %v6298_v49, %v6302_v23  ;;  %v6326_v4 = vrot.slane %v6324_v20, 5  ;;  %v6334_v61 = vshll.u32 %v5995_v30, 16  ;;  %v6001_v22 = vld [vmem:[#allocation3 + $0xbc] sm:$0x1] }
 0x333   : > { %9644 = vmatmul.mubr.bf16.gmra.mrb[200].mxu0 %v10775_v29  ;;  %v14677_v6 = vsel %vm12912_vm13, %v6650_v26, %v6651_v5  ;;  %v6313_v8 = vsel %vm12872_vm7, %v6308_v39, %v6312_v1  ;;  %v6330_v29 = vrot.slane %v6328_v55, 4  ;;  %v10762_v52 = vrot.slane %v6505_v24, 9  ;;  %v6511_v24 = vld [vmem:[#allocation3 + $0xb4] sm:$0xe]  ;;  %v12381_v39 = vld [vmem:[#allocation3 + $0x84] sm:$0xff]  }
 0x334   : > { %9651 = vmatprep.mubr.bf16.mxu0 %v12376_v45  ;;  %v10777_v9 = vcombine.low %v14671_v31, %v14677_v6  ;;  %v6321_v37 = vor.u32 %v6320_v2, %v6317_v57  ;;  %v10745_v40 = vcombine.low %v6303_v56, %v6313_v8  ;;  %v6336_v53 = vrot.slane %v6334_v61, 5  ;;  %v6513_v61 = vld [vmem:[#allocation3 + $0xbc] sm:$0x1]  ;;  %v12383_v6 = vld [vmem:[#allocation3 + $0x90] sm:$0xff]  }
 0x335   : > { %v6655_v14 = vrot.slane %v6506_v54, 5  ;;  %v6331_v0 = vor.u32 %v6330_v29, %v6326_v4  ;;  %v6658_v15 = vrot.slane %v6507_v3, 5  ;;  %v6339_v21 = vshrl.u32 %v5996_v32, 16  ;;  %v7843_v29 = vld [vmem:[#allocation3 + $0x18] sm:$0xf] }
 0x336   : > { %v6322_v60 = vrot.slane %v6321_v37, 4  ;;  %9483 = vmatmul.mubr.bf16.gmra.mrb[168].mxu1 %v12375_v34  ;;  %v6342_v36 = vshll.u32 %v5996_v32, 16  ;;  %v6348_v59 = vshll.u32 %v5997_v13, 16  ;;  %v6352_v43 = vshrl.u32 %v5997_v13, 16  ;;  %v12384_v13 = vld [vmem:[#allocation3 + $0xa8] sm:$0xff]  }
 0x337   : > { %v14685_v18 = vsel %vm12912_vm13, %v10762_v52, %v6655_v14  ;;  %v6657_v48 = vrot.slane %v6655_v14, 4  ;;  %9490 = vmatprep.mubr.bf16.mxu1 %v10744_v38  ;;  %v6332_v7 = vrot.slane %v6331_v0, 4  ;;  %v6341_v63 = vrot.slane %v6339_v21, 4  ;;  %v7844_v14 = vld [vmem:[#allocation3 + $0x1c] sm:$0xf] }
 0x338   : > { %v6327_v35 = vsel %vm12872_vm7, %v6322_v60, %v6326_v4  ;;  %v6344_v44 = vrot.slane %v6342_v36, 5  ;;  %v6350_v25 = vrot.slane %v6348_v59, 5  ;;  %v6358_v58 = vshll.u32 %v5998_v28, 16  ;;  %v7845_v21 = vld [vmem:[#allocation3 + $0x20] sm:$0x1] }
 0x339   : > { %v14691_v23 = vsel %vm12912_vm13, %v6657_v48, %v6658_v15  ;;  %v6337_v62 = vsel %vm12872_vm7, %v6332_v7, %v6336_v53  ;;  %v6354_v47 = vrot.slane %v6352_v43, 4  ;;  %v10763_v1 = vrot.slane %v6508_v27, 9 }
 0x33a   : > { %v10778_v38 = vcombine.low %v14685_v18, %v14691_v23  ;;  %v14700_v10 = vcombine.low %v6327_v35, %v6337_v62  ;;  %v6345_v5 = vor.u32 %v6344_v44, %v6341_v63  ;;  %v6360_v30 = vrot.slane %v6358_v58, 5 }
 0x33b   : > { %9652 = vmatmul.mubr.bf16.gmra.mrb[204].mxu0 %v10776_v12  ;;  %v6662_v51 = vrot.slane %v6509_v46, 5  ;;  %v6355_v45 = vor.u32 %v6354_v47, %v6350_v25  ;;  %v6665_v49 = vrot.slane %v6510_v41, 5  ;;  %v6363_v26 = vshrl.u32 %v5999_v19, 16  ;;  %v6512_v12 = vld [vmem:[#allocation3 + $0xb8] sm:$0xf]  ;;  %v14718_v46 = vpop.f32.mrb[128].mxu1 }
 0x33c   : > { %9659 = vmatprep.mubr.bf16.mxu0 %v12382_v33  ;;  %v6366_v20 = vshll.u32 %v5999_v19, 16  ;;  %v6346_v57 = vrot.slane %v6345_v5, 4  ;;  %v6372_v17 = vshll.u32 %v6000_v42, 16  ;;  %v6376_v4 = vshrl.u32 %v6000_v42, 16  ;;  %v7410_v41 = vld [vmem:[#allocation3 + $0xc] sm:$0xe] }
 0x33d   : > { %v14704_v2 = vsel %vm12912_vm13, %v10763_v1, %v6662_v51  ;;  %v6664_v11 = vrot.slane %v6662_v51, 4  ;;  %v6356_v55 = vrot.slane %v6355_v45, 4  ;;  %v6365_v54 = vrot.slane %v6363_v26, 4  ;;  %v14720_v35 = vpop.f32.mrb[129].mxu1  ;;  %v7412_v1 = vld [vmem:[#allocation3 + $0x14] sm:$0x1] }
 0x33e   : > { %v6368_v56 = vrot.slane %v6366_v20, 5  ;;  %9491 = vmatmul.mubr.bf16.gmra.mrb[172].mxu1 %v12381_v39  ;;  %v6351_v3 = vsel %vm12872_vm7, %v6346_v57, %v6350_v25  ;;  %v6374_v8 = vrot.slane %v6372_v17, 5  ;;  %v6382_v37 = vshll.u32 %v6001_v22, 16  ;;  %v7411_v25 = vld [vmem:[#allocation3 + $0x10] sm:$0xf]  ;;  %v14729_v58 = vpop.f32.mrb[130].mxu1 }
 0x33f   : > { %v14710_v32 = vsel %vm12912_vm13, %v6664_v11, %v6665_v49  ;;  %9498 = vmatprep.mubr.bf16.mxu1 %v10745_v40  ;;  %v6361_v28 = vsel %vm12872_vm7, %v6356_v55, %v6360_v30  ;;  %v6378_v52 = vrot.slane %v6376_v4, 4  ;;  %v10764_v0 = vrot.slane %v6511_v24, 9  ;;  %v14733_v31 = vpop.f32.mrb[131].mxu1  ;;  %v6898_v51 = vld [vmem:[#allocation3 + $0xc] sm:$0xf]  ;;  %v12390_v4 = vld [vmem:[#allocation3 + $0xb4] sm:$0xff]  }
 0x340   : > { %v10779_v34 = vcombine.low %v14704_v2, %v14710_v32  ;;  %v6369_v53 = vor.u32 %v6368_v56, %v6365_v54  ;;  %v14716_v27 = vcombine.low %v6351_v3, %v6361_v28  ;;  %v6384_v60 = vrot.slane %v6382_v37, 5  ;;  %v6899_v20 = vld [vmem:[#allocation3 + $0x10] sm:$0xf]  ;;  %v6900_v17 = vld [vmem:[#allocation3 + $0x14] sm:$0x1] }
 0x341   : > { %v6669_v15 = vrot.slane %v6512_v12, 5  ;;  %v6379_v40 = vor.u32 %v6378_v52, %v6374_v8  ;;  %v6672_v36 = vrot.slane %v6513_v61, 5  ;;  %v7892_v59 = vshrl.u32 %v7843_v29, 16  ;;  %v7846_v52 = vld [vmem:[#allocation3 + $0x24] sm:$0xf] }
 0x342   : > { %v6370_v48 = vrot.slane %v6369_v53, 4  ;;  %v7895_v43 = vshll.u32 %v7843_v29, 16  ;;  %v7901_v44 = vshll.u32 %v7844_v14, 16  ;;  %v7905_v47 = vshrl.u32 %v7844_v14, 16 }
 0x343   : > { %9660 = vmatmul.mubr.bf16.gmra.mrb[208].mxu0 %v10777_v9  ;;  %v14727_v7 = vsel %vm12912_vm13, %v10764_v0, %v6669_v15  ;;  %v6671_v63 = vrot.slane %v6669_v15, 4  ;;  %v6380_v33 = vrot.slane %v6379_v40, 4  ;;  %v7894_v62 = vrot.slane %v7892_v59, 4  ;;  %v7847_v15 = vld [vmem:[#allocation3 + $0x28] sm:$0xf]  ;;  %v12389_v59 = vld [vmem:[#allocation3 + $0x9c] sm:$0xff]  }
 0x344   : > { %9667 = vmatprep.mubr.bf16.mxu0 %v12384_v13  ;;  %v6375_v19 = vsel %vm12872_vm7, %v6370_v48, %v6374_v8  ;;  %v7897_v42 = vrot.slane %v7895_v43, 5  ;;  %v7903_v5 = vrot.slane %v7901_v44, 5  ;;  %v7911_v30 = vshll.u32 %v7845_v21, 16  ;;  %v7848_v21 = vld [vmem:[#allocation3 + $0x2c] sm:$0x1] }
 0x345   : > { %v14737_v9 = vsel %vm12912_vm13, %v6671_v63, %v6672_v36  ;;  %v6385_v22 = vsel %vm12872_vm7, %v6380_v33, %v6384_v60  ;;  %v7907_v49 = vrot.slane %v7905_v47, 4  ;;  %v10813_v26 = vrot.slane %v7410_v41, 9  ;;  %v7414_v36 = vld [vmem:[#allocation3 + $0x1c] sm:$0xf] }
 0x346   : > { %v10780_v45 = vcombine.low %v14727_v7, %v14737_v9  ;;  %9499 = vmatmul.mubr.bf16.gmra.mrb[176].mxu1 %v12383_v6  ;;  %v14743_v24 = vcombine.low %v6375_v19, %v6385_v22  ;;  %v7898_v39 = vor.u32 %v7897_v42, %v7894_v62  ;;  %v7913_v57 = vrot.slane %v7911_v30, 5  ;;  %v6906_v9 = vld [vmem:[#allocation3 + $0x2c] sm:$0x1] }
 0x347   : > { %v7508_v11 = vrot.slane %v7411_v25, 5  ;;  %9506 = vmatprep.mubr.bf16.mxu1 %v14700_v10  ;;  %v7908_v12 = vor.u32 %v7907_v49, %v7903_v5  ;;  %v7511_v55 = vrot.slane %v7412_v1, 5  ;;  %v6947_v54 = vshrl.u32 %v6898_v51, 16  ;;  %v7415_v25 = vld [vmem:[#allocation3 + $0x20] sm:$0x1] }
 0x348   : > { %v6950_v56 = vshll.u32 %v6898_v51, 16  ;;  %v7899_v61 = vrot.slane %v7898_v39, 4  ;;  %v6956_v37 = vshll.u32 %v6899_v20, 16  ;;  %v6960_v53 = vshrl.u32 %v6899_v20, 16  ;;  %v6901_v1 = vld [vmem:[#allocation3 + $0x18] sm:$0xf] }
 0x349   : > { %v14748_v3 = vsel %vm12912_vm13, %v10813_v26, %v7508_v11  ;;  %v7510_v8 = vrot.slane %v7508_v11, 4  ;;  %v7909_v29 = vrot.slane %v7908_v12, 4  ;;  %v6949_v13 = vrot.slane %v6947_v54, 4  ;;  %v6902_v51 = vld [vmem:[#allocation3 + $0x1c] sm:$0xf]  ;;  %v12395_v12 = vld [vmem:[#allocation3 + $0xc0] sm:$0xff]  }
 0x34a   : > { %v6952_v28 = vrot.slane %v6950_v56, 5  ;;  %v7904_v10 = vsel %vm12872_vm7, %v7899_v61, %v7903_v5  ;;  %v6958_v60 = vrot.slane %v6956_v37, 5  ;;  %v6966_v0 = vshll.u32 %v6900_v17, 16  ;;  %v6903_v56 = vld [vmem:[#allocation3 + $0x20] sm:$0x1] }
 0x34b   : > { %9668 = vmatmul.mubr.bf16.gmra.mrb[212].mxu0 %v10778_v38  ;;  %v14757_v14 = vsel %vm12912_vm13, %v7510_v8, %v7511_v55  ;;  %v7914_v48 = vsel %vm12872_vm7, %v7909_v29, %v7913_v57  ;;  %v6962_v23 = vrot.slane %v6960_v53, 4  ;;  %v7413_v38 = vld [vmem:[#allocation3 + $0x18] sm:$0xe]  ;;  %v7916_v43 = vshrl.u32 %v7846_v52, 16 }
 0x34c   : > { %9675 = vmatprep.mubr.bf16.mxu0 %v12390_v4  ;;  %v10829_v40 = vcombine.low %v14748_v3, %v14757_v14  ;;  %v6953_v18 = vor.u32 %v6952_v28, %v6949_v13  ;;  %v14763_v41 = vcombine.low %v7904_v10, %v7914_v48  ;;  %v6968_v63 = vrot.slane %v6966_v0, 5  ;;  %v7849_v28 = vld [vmem:[#allocation3 + $0x30] sm:$0xf]  ;;  %v7850_v0 = vld [vmem:[#allocation3 + $0x34] sm:$0xf] }
 0x34d   : > { %v7919_v44 = vshll.u32 %v7846_v52, 16  ;;  %v6963_v33 = vor.u32 %v6962_v23, %v6958_v60  ;;  %v7925_v62 = vshll.u32 %v7847_v15, 16  ;;  %v7929_v47 = vshrl.u32 %v7847_v15, 16  ;;  %v7416_v48 = vld [vmem:[#allocation3 + $0x24] sm:$0xe] }
 0x34e   : > { %v6954_v19 = vrot.slane %v6953_v18, 4  ;;  %9507 = vmatmul.mubr.bf16.gmra.mrb[180].mxu1 %v12389_v59  ;;  %v7918_v6 = vrot.slane %v7916_v43, 4  ;;  %v7935_v5 = vshll.u32 %v7848_v21, 16  ;;  %v10814_v30 = vrot.slane %v7413_v38, 9  ;;  %v7851_v21 = vld [vmem:[#allocation3 + $0x38] sm:$0x1] }
 0x34f   : > { %v7921_v42 = vrot.slane %v7919_v44, 5  ;;  %9514 = vmatprep.mubr.bf16.mxu1 %v14716_v27  ;;  %v6964_v49 = vrot.slane %v6963_v33, 4  ;;  %v7927_v26 = vrot.slane %v7925_v62, 5  ;;  %v7931_v20 = vrot.slane %v7929_v47, 4  ;;  %v12394_v27 = vld [vmem:[#allocation3 + $0xa8] sm:$0xff]  }
 0x350   : > { %v6959_v22 = vsel %vm12872_vm7, %v6954_v19, %v6958_v60  ;;  %v7937_v57 = vrot.slane %v7935_v5, 5  ;;  %v7515_v11 = vrot.slane %v7414_v36, 5  ;;  %v7518_v17 = vrot.slane %v7415_v25, 5  ;;  %v7417_v59 = vld [vmem:[#allocation3 + $0x28] sm:$0xf] }
 0x351   : > { %v7922_v39 = vor.u32 %v7921_v42, %v7918_v6  ;;  %v6969_v55 = vsel %vm12872_vm7, %v6964_v49, %v6968_v63  ;;  %v7932_v54 = vor.u32 %v7931_v20, %v7927_v26  ;;  %v6971_v4 = vshrl.u32 %v6901_v1, 16  ;;  %v7418_v63 = vld [vmem:[#allocation3 + $0x2c] sm:$0x1] }
 0x352   : > { %v6974_v61 = vshll.u32 %v6901_v1, 16  ;;  %v14773_v8 = vcombine.low %v6959_v22, %v6969_v55  ;;  %v14777_v29 = vsel %vm12912_vm13, %v10814_v30, %v7515_v11  ;;  %v7517_v13 = vrot.slane %v7515_v11, 4 }
 0x353   : > { %9676 = vmatmul.mubr.bf16.gmra.mrb[216].mxu0 %v10779_v34  ;;  %v7923_v37 = vrot.slane %v7922_v39, 4  ;;  %v7933_v53 = vrot.slane %v7932_v54, 4  ;;  %v6973_v52 = vrot.slane %v6971_v4, 4  ;;  %v6980_v60 = vshll.u32 %v6902_v51, 16  ;;  %v6905_v39 = vld [vmem:[#allocation3 + $0x28] sm:$0xf] }
 0x354   : > { %9683 = vmatprep.mubr.bf16.mxu0 %v12395_v12  ;;  %v6976_v10 = vrot.slane %v6974_v61, 5  ;;  %v14783_v32 = vsel %vm12912_vm13, %v7517_v13, %v7518_v17  ;;  %v6984_v34 = vshrl.u32 %v6902_v51, 16  ;;  %v6990_v15 = vshll.u32 %v6903_v56, 16  ;;  %v6904_v51 = vld [vmem:[#allocation3 + $0x24] sm:$0xf]  ;;  %v12402_v12 = vld [vmem:[#allocation3 + $0xb4] sm:$0xff]  }
 0x355   : > { %v7928_v2 = vsel %vm12872_vm7, %v7923_v37, %v7927_v26  ;;  %v7938_v18 = vsel %vm12872_vm7, %v7933_v53, %v7937_v57  ;;  %v10830_v23 = vcombine.low %v14777_v29, %v14783_v32  ;;  %v6982_v36 = vrot.slane %v6980_v60, 5  ;;  %v7852_v37 = vld [vmem:[#allocation3 + $0x3c] sm:$0xf] }
 0x356   : > { %v6977_v38 = vor.u32 %v6976_v10, %v6973_v52  ;;  %9515 = vmatmul.mubr.bf16.gmra.mrb[184].mxu1 %v12394_v27  ;;  %v14789_v43 = vcombine.low %v7928_v2, %v7938_v18  ;;  %v6986_v44 = vrot.slane %v6984_v34, 4  ;;  %v6992_v25 = vrot.slane %v6990_v15, 5  ;;  %v7853_v52 = vld [vmem:[#allocation3 + $0x40] sm:$0xf]  ;;  %v7854_v34 = vld [vmem:[#allocation3 + $0x44] sm:$0x1] }
 0x357   : > { %v7940_v19 = vshrl.u32 %v7849_v28, 16  ;;  %9522 = vmatprep.mubr.bf16.mxu1 %v14743_v24  ;;  %v7943_v62 = vshll.u32 %v7849_v28, 16  ;;  %v7949_v47 = vshll.u32 %v7850_v0, 16  ;;  %v7953_v1 = vshrl.u32 %v7850_v0, 16  ;;  %v12406_v15 = vld [vmem:[#allocation3 + $0x18] sm:$0xff]  }
 0x358   : > { %v6978_v33 = vrot.slane %v6977_v38, 4  ;;  %v6987_v6 = vor.u32 %v6986_v44, %v6982_v36  ;;  %v7959_v5 = vshll.u32 %v7851_v21, 16  ;;  %v10815_v30 = vrot.slane %v7416_v48, 9 }
 0x359   : > { %v7942_v42 = vrot.slane %v7940_v19, 4  ;;  %v7945_v49 = vrot.slane %v7943_v62, 5  ;;  %v7951_v26 = vrot.slane %v7949_v47, 5  ;;  %v7955_v20 = vrot.slane %v7953_v1, 4  ;;  %v7420_v19 = vld [vmem:[#allocation3 + $0x34] sm:$0xf] }
 0x35a   : > { %v6983_v22 = vsel %vm12872_vm7, %v6978_v33, %v6982_v36  ;;  %v6988_v24 = vrot.slane %v6987_v6, 4  ;;  %v7961_v57 = vrot.slane %v7959_v5, 5  ;;  %v7522_v11 = vrot.slane %v7417_v59, 5  ;;  %v7421_v62 = vld [vmem:[#allocation3 + $0x38] sm:$0x1] }
 0x35b   : > { %9684 = vmatmul.mubr.bf16.gmra.mrb[220].mxu0 %v10780_v45  ;;  %v7525_v17 = vrot.slane %v7418_v63, 5  ;;  %v7946_v55 = vor.u32 %v7945_v49, %v7942_v42  ;;  %v7956_v54 = vor.u32 %v7955_v20, %v7951_v26  ;;  %v6995_v56 = vshrl.u32 %v6904_v51, 16  ;;  %v6907_v5 = vld [vmem:[#allocation3 + $0x30] sm:$0xf] }
 0x35c   : > { %9885 = vmatprep.mubr.bf16.mxu0 %v14763_v41  ;;  %v6998_v4 = vshll.u32 %v6904_v51, 16  ;;  %v6993_v61 = vsel %vm12872_vm7, %v6988_v24, %v6992_v25  ;;  %v14802_v27 = vsel %vm12912_vm13, %v10815_v30, %v7522_v11  ;;  %v7524_v7 = vrot.slane %v7522_v11, 4  ;;  %v7419_v25 = vld [vmem:[#allocation3 + $0x30] sm:$0xe]  ;;  %v12410_v24 = vld [vmem:[#allocation5 + $0x208] sm:$0xff]  }
 0x35d   : > { %v7004_v45 = vshll.u32 %v6905_v39, 16  ;;  %v14804_v13 = vcombine.low %v6983_v22, %v6993_v61  ;;  %v7947_v28 = vrot.slane %v7946_v55, 4  ;;  %v7957_v53 = vrot.slane %v7956_v54, 4  ;;  %v6908_v55 = vld [vmem:[#allocation3 + $0x34] sm:$0xf] }
 0x35e   : > { %v6997_v41 = vrot.slane %v6995_v56, 4  ;;  %9523 = vmatmul.mubr.bf16.gmra.mrb[188].mxu1 %v12402_v12  ;;  %v14808_v10 = vsel %vm12912_vm13, %v7524_v7, %v7525_v17  ;;  %v7000_v60 = vrot.slane %v6998_v4, 5  ;;  %v7008_v2 = vshrl.u32 %v6905_v39, 16  ;;  %v6909_v54 = vld [vmem:[#allocation3 + $0x38] sm:$0x1] }
 0x35f   : > { %v7006_v0 = vrot.slane %v7004_v45, 5  ;;  %9724 = vmatprep.mubr.bf16.mxu1 %v10829_v40  ;;  %v7952_v21 = vsel %vm12872_vm7, %v7947_v28, %v7951_v26  ;;  %v7962_v48 = vsel %vm12872_vm7, %v7957_v53, %v7961_v57  ;;  %v10831_v18 = vcombine.low %v14802_v27, %v14808_v10  ;;  %v12430_v45 = vld [vmem:[#allocation5 + $0x200] sm:$0xff]  }
 0x360   : > { %v7014_v38 = vshll.u32 %v6906_v9, 16  ;;  %v14819_v36 = vcombine.low %v7952_v21, %v7962_v48  ;;  %v7001_v59 = vor.u32 %v7000_v60, %v6997_v41  ;;  %v7010_v63 = vrot.slane %v7008_v2, 4  ;;  %v7855_v9 = vld [vmem:[#allocation3 + $0x48] sm:$0xf]  ;;  %v7857_v48 = vld [vmem:[#allocation3 + $0x50] sm:$0x1] }
 0x361   : > { %v7964_v44 = vshrl.u32 %v7852_v37, 16  ;;  %v7967_v14 = vshll.u32 %v7852_v37, 16  ;;  %v7973_v40 = vshll.u32 %v7853_v52, 16  ;;  %v7977_v33 = vshrl.u32 %v7853_v52, 16  ;;  %v12408_v37 = vld [vmem:[#allocation3 + $0x24] sm:$0xff]  }
 0x362   : > { %v7016_v3 = vrot.slane %v7014_v38, 5  ;;  %v7002_v47 = vrot.slane %v7001_v59, 4  ;;  %v7011_v1 = vor.u32 %v7010_v63, %v7006_v0  ;;  %v7983_v42 = vshll.u32 %v7854_v34, 16  ;;  %v7856_v34 = vld [vmem:[#allocation3 + $0x4c] sm:$0xf] }
 0x363   : > { %9886 = vmatmul.mubr.bf16.vlgmr.msra.gmra.mrb[224].mxu0 %v12406_v15  ;;  %v7966_v6 = vrot.slane %v7964_v44, 4  ;;  %v7969_v30 = vrot.slane %v7967_v14, 5  ;;  %v7975_v51 = vrot.slane %v7973_v40, 5  ;;  %v7979_v22 = vrot.slane %v7977_v33, 4  ;;  %v12413_v15 = vld [vmem:[#allocation5 + $0x210] sm:$0xff]  }
 0x364   : > { %9893 = vmatprep.mubr.bf16.mxu0 %v14789_v43  ;;  %v10816_v49 = vrot.slane %v7419_v25, 9  ;;  %v7007_v26 = vsel %vm12872_vm7, %v7002_v47, %v7006_v0  ;;  %v7012_v20 = vrot.slane %v7011_v1, 4  ;;  %v7985_v39 = vrot.slane %v7983_v42, 5  ;;  %v7422_v25 = vld [vmem:[#allocation3 + $0x3c] sm:$0xe] }
 0x365   : > { %v7529_v57 = vrot.slane %v7420_v19, 5  ;;  %v7970_v11 = vor.u32 %v7969_v30, %v7966_v6  ;;  %v7980_v17 = vor.u32 %v7979_v22, %v7975_v51  ;;  %v7532_v12 = vrot.slane %v7421_v62, 5  ;;  %v7423_v19 = vld [vmem:[#allocation3 + $0x40] sm:$0xf]  ;;  %v7424_v62 = vld [vmem:[#allocation3 + $0x44] sm:$0x1] }
 0x366   : > { %v7019_v56 = vshrl.u32 %v6907_v5, 16  ;;  %9725 = vmatmul.mubr.bf16.vlgmr.msra.gmra.mrb[192].mxu1 %v14773_v8  ;;  %v7017_v43 = vsel %vm12872_vm7, %v7012_v20, %v7016_v3  ;;  %v7022_v7 = vshll.u32 %v6907_v5, 16  ;;  %v7028_v0 = vshll.u32 %v6908_v55, 16  ;;  %v6910_v5 = vld [vmem:[#allocation3 + $0x3c] sm:$0xf]  ;;  %v12416_v30 = vld [vmem:[#allocation5 + $0x218] sm:$0xff]  }
 0x367   : > { %v14829_v4 = vsel %vm12912_vm13, %v10816_v49, %v7529_v57  ;;  %v7531_v61 = vrot.slane %v7529_v57, 4  ;;  %9732 = vmatprep.mubr.bf16.mxu1 %v10830_v23  ;;  %12028 = vmatpush3.bf16.msra.mxu1 %v12430_v45  ;;  %v14834_v28 = vcombine.low %v7007_v26, %v7017_v43  ;;  %v7971_v8 = vrot.slane %v7970_v11, 4  ;;  %v6911_v20 = vld [vmem:[#allocation3 + $0x40] sm:$0xf] }
 0x368   : > { %v7981_v53 = vrot.slane %v7980_v17, 4  ;;  %v7021_v41 = vrot.slane %v7019_v56, 4  ;;  %12029 = vmatprep.subr.bf16.mxu1 %v12410_v24  ;;  %v7024_v60 = vrot.slane %v7022_v7, 5  ;;  %v7032_v2 = vshrl.u32 %v6908_v55, 16  ;;  %v12419_v56 = vld [vmem:[#allocation5 + $0x220] sm:$0xff]  }
 0x369   : > { %v14838_v52 = vsel %vm12912_vm13, %v7531_v61, %v7532_v12  ;;  %v7976_v29 = vsel %vm12872_vm7, %v7971_v8, %v7975_v51  ;;  %v7038_v21 = vshll.u32 %v6909_v54, 16  ;;  %v7030_v63 = vrot.slane %v7028_v0, 5  ;;  %v6912_v61 = vld [vmem:[#allocation3 + $0x44] sm:$0x1]  ;;  %v7859_v0 = vld [vmem:[#allocation3 + $0x58] sm:$0xf] }
 0x36a   : > { %v7986_v32 = vsel %vm12872_vm7, %v7981_v53, %v7985_v39  ;;  %v10832_v23 = vcombine.low %v14829_v4, %v14838_v52  ;;  %v7025_v59 = vor.u32 %v7024_v60, %v7021_v41  ;;  %v7034_v44 = vrot.slane %v7032_v2, 4 }
 0x36b   : > { %9894 = vmatmul.mubr.bf16.gmra.mrb[228].mxu0 %v12408_v37  ;;  %v10864_v38 = vcombine.low %v7976_v29, %v7986_v32  ;;  %12030 = vmatpush3.bf16.msra.mxu1 %v12410_v24  ;;  %v7040_v3 = vrot.slane %v7038_v21, 5  ;;  %v7988_v14 = vshrl.u32 %v7855_v9, 16  ;;  %v7991_v40 = vshll.u32 %v7855_v9, 16  ;;  %v7860_v32 = vld [vmem:[#allocation3 + $0x5c] sm:$0x1] }
 0x36c   : > { %9901 = vmatprep.mubr.bf16.mxu0 %v14819_v36  ;;  %v7997_v33 = vshll.u32 %v7856_v34, 16  ;;  %v7026_v47 = vrot.slane %v7025_v59, 4  ;;  %v7035_v1 = vor.u32 %v7034_v44, %v7030_v63  ;;  %v8001_v6 = vshrl.u32 %v7856_v34, 16  ;;  %12031 = vmatprep.subr.bf16.mxu1 %v12413_v15  ;;  %v12409_v36 = vld [vmem:[#allocation3 + $0x30] sm:$0xff]   ;;  %v7425_v21 = vld [vmem:[#allocation3 + $0x48] sm:$0xe] }
 0x36d   : > { %v8007_v42 = vshll.u32 %v7857_v48, 16  ;;  %v7990_v51 = vrot.slane %v7988_v14, 4  ;;  %v7993_v22 = vrot.slane %v7991_v40, 5  ;;  %v10817_v26 = vrot.slane %v7422_v25, 9  ;;  %v7426_v44 = vld [vmem:[#allocation3 + $0x4c] sm:$0xf] }
 0x36e   : > { %v7999_v49 = vrot.slane %v7997_v33, 5  ;;  %9733 = vmatmul.mubr.bf16.gmra.mrb[196].mxu1 %v14804_v13  ;;  %v7031_v39 = vsel %vm12872_vm7, %v7026_v47, %v7030_v63  ;;  %v7036_v24 = vrot.slane %v7035_v1, 4  ;;  %v8003_v57 = vrot.slane %v8001_v6, 4  ;;  %v7427_v25 = vld [vmem:[#allocation3 + $0x50] sm:$0x1] }
 0x36f   : > { %v8009_v11 = vrot.slane %v8007_v42, 5  ;;  %9740 = vmatprep.mubr.bf16.mxu1 %v10831_v18  ;;  %v7994_v17 = vor.u32 %v7993_v22, %v7990_v51  ;;  %v7536_v12 = vrot.slane %v7423_v19, 5  ;;  %v7539_v55 = vrot.slane %v7424_v62, 5  ;;  %12032 = vmatpush3.bf16.msra.mxu1 %v12413_v15  ;;  %v7858_v18 = vld [vmem:[#allocation3 + $0x54] sm:$0xf]  ;;  %v12422_v19 = vld [vmem:[#allocation5 + $0x228] sm:$0xff]  }
 0x370   : > { %v7043_v54 = vshrl.u32 %v6910_v5, 16  ;;  %v7041_v13 = vsel %vm12872_vm7, %v7036_v24, %v7040_v3  ;;  %v8004_v43 = vor.u32 %v8003_v57, %v7999_v49  ;;  %v7046_v7 = vshll.u32 %v6910_v5, 16  ;;  %12033 = vmatprep.subr.bf16.mxu1 %v12416_v30  ;;  %v6913_v62 = vld [vmem:[#allocation3 + $0x48] sm:$0xf]  ;;  %v6914_v5 = vld [vmem:[#allocation3 + $0x4c] sm:$0xf] }
 0x371   : > { %v7052_v9 = vshll.u32 %v6911_v20, 16  ;;  %v14855_v45 = vcombine.low %v7031_v39, %v7041_v13  ;;  %v7995_v37 = vrot.slane %v7994_v17, 4  ;;  %v14859_v27 = vsel %vm12912_vm13, %v10817_v26, %v7536_v12  ;;  %v12425_v24 = vld [vmem:[#allocation5 + $0x230] sm:$0xff]  }
 0x372   : > { %v7538_v10 = vrot.slane %v7536_v12, 4  ;;  %v8005_v8 = vrot.slane %v8004_v43, 4  ;;  %v7045_v53 = vrot.slane %v7043_v54, 4  ;;  %v7048_v41 = vrot.slane %v7046_v7, 5  ;;  %v7861_v7 = vld [vmem:[#allocation3 + $0x60] sm:$0xf] }
 0x373   : > { %9902 = vmatmul.mubr.bf16.gmra.mrb[232].mxu0 %v12409_v36  ;;  %v7054_v60 = vrot.slane %v7052_v9, 5  ;;  %v8000_v2 = vsel %vm12872_vm7, %v7995_v37, %v7999_v49  ;;  %v7056_v15 = vshrl.u32 %v6911_v20, 16  ;;  %v7062_v29 = vshll.u32 %v6912_v61, 16  ;;  %12034 = vmatpush3.bf16.msra.mxu1 %v12416_v30  ;;  %v12411_v30 = vld [vmem:[#allocation3 + $0x3c] sm:$0xff]  }
 0x374   : > { %9909 = vmatprep.mubr.bf16.mxu0 %v10864_v38  ;;  %v14865_v34 = vsel %vm12912_vm13, %v7538_v10, %v7539_v55  ;;  %v8010_v48 = vsel %vm12872_vm7, %v8005_v8, %v8009_v11  ;;  %v7049_v63 = vor.u32 %v7048_v41, %v7045_v53  ;;  %v8012_v38 = vshrl.u32 %v7858_v18, 16  ;;  %12035 = vmatprep.subr.bf16.mxu1 %v12419_v56  ;;  %v6915_v55 = vld [vmem:[#allocation3 + $0x50] sm:$0x1]  ;;  %v7862_v8 = vld [vmem:[#allocation3 + $0x64] sm:$0xf] }
 0x375   : > { %v10833_v59 = vcombine.low %v14859_v27, %v14865_v34  ;;  %v10865_v3 = vcombine.low %v8000_v2, %v8010_v48  ;;  %v7058_v14 = vrot.slane %v7056_v15, 4  ;;  %v7064_v40 = vrot.slane %v7062_v29, 5  ;;  %v12428_v53 = vld [vmem:[#allocation5 + $0x238] sm:$0xff]   ;;  %v7863_v15 = vld [vmem:[#allocation3 + $0x68] sm:$0x1] }
 0x376   : > { %v8015_v33 = vshll.u32 %v7858_v18, 16  ;;  %9741 = vmatmul.mubr.bf16.gmra.mrb[200].mxu1 %v14834_v28  ;;  %v7050_v47 = vrot.slane %v7049_v63, 4  ;;  %v8014_v1 = vrot.slane %v8012_v38, 4  ;;  %v8021_v6 = vshll.u32 %v7859_v0, 16  ;;  %v7428_v29 = vld [vmem:[#allocation3 + $0x54] sm:$0xe] }
 0x377   : > { %v8025_v42 = vshrl.u32 %v7859_v0, 16  ;;  %9748 = vmatprep.mubr.bf16.mxu1 %v10832_v23  ;;  %v7059_v51 = vor.u32 %v7058_v14, %v7054_v60  ;;  %v8031_v49 = vshll.u32 %v7860_v32, 16  ;;  %v10818_v26 = vrot.slane %v7425_v21, 9  ;;  %12036 = vmatpush3.bf16.msra.mxu1 %v12419_v56  ;;  %v12412_v32 = vld [vmem:[#allocation3 + $0x48] sm:$0xff]  }
 0x378   : > { %v8017_v22 = vrot.slane %v8015_v33, 5  ;;  %v7055_v20 = vsel %vm12872_vm7, %v7050_v47, %v7054_v60  ;;  %v8023_v36 = vrot.slane %v8021_v6, 5  ;;  %v7543_v39 = vrot.slane %v7426_v44, 5  ;;  %12037 = vmatprep.subr.bf16.mxu1 %v12422_v19  ;;  %v7429_v44 = vld [vmem:[#allocation3 + $0x58] sm:$0xf] }
 0x379   : > { %v8027_v28 = vrot.slane %v8025_v42, 4  ;;  %v7060_v57 = vrot.slane %v7059_v51, 4  ;;  %v8033_v17 = vrot.slane %v8031_v49, 5  ;;  %v7546_v12 = vrot.slane %v7427_v25, 5  ;;  %v7430_v47 = vld [vmem:[#allocation3 + $0x5c] sm:$0x1] }
 0x37a   : > { %v8018_v11 = vor.u32 %v8017_v22, %v8014_v1  ;;  %v14879_v52 = vsel %vm12912_vm13, %v10818_v26, %v7543_v39  ;;  %v7545_v23 = vrot.slane %v7543_v39, 4  ;;  %v7067_v54 = vshrl.u32 %v6913_v62, 16  ;;  %v6917_v22 = vld [vmem:[#allocation3 + $0x58] sm:$0xf] }
 0x37b   : > { %9910 = vmatmul.mubr.bf16.gmra.mrb[236].mxu0 %v12411_v30  ;;  %v8028_v4 = vor.u32 %v8027_v28, %v8023_v36  ;;  %v7065_v56 = vsel %vm12872_vm7, %v7060_v57, %v7064_v40  ;;  %v7070_v43 = vshll.u32 %v6913_v62, 16  ;;  %v7076_v61 = vshll.u32 %v6914_v5, 16  ;;  %12038 = vmatpush3.bf16.msra.mxu1 %v12422_v19  ;;  %v6916_v30 = vld [vmem:[#allocation3 + $0x54] sm:$0xf] }
 0x37c   : > { %9917 = vmatprep.mubr.bf16.mxu0 %v10865_v3  ;;  %v8019_v13 = vrot.slane %v8018_v11, 4  ;;  %v10801_v9 = vcombine.low %v7055_v20, %v7065_v56  ;;  %v14885_v10 = vsel %vm12912_vm13, %v7545_v23, %v7546_v12  ;;  %v7069_v18 = vrot.slane %v7067_v54, 4  ;;  %12039 = vmatprep.subr.bf16.mxu1 %v12425_v24  ;;  %v6918_v11 = vld [vmem:[#allocation3 + $0x5c] sm:$0x1]  ;;  %v7864_v23 = vld [vmem:[#allocation3 + $0x6c] sm:$0xf] }
 0x37d   : > { %v8029_v37 = vrot.slane %v8028_v4, 4  ;;  %v10834_v60 = vcombine.low %v14879_v52, %v14885_v10  ;;  %v7072_v0 = vrot.slane %v7070_v43, 5  ;;  %v7078_v2 = vrot.slane %v7076_v61, 5  ;;  %v7865_v61 = vld [vmem:[#allocation3 + $0x70] sm:$0xf] }
 0x37e   : > { %v8024_v41 = vsel %vm12872_vm7, %v8019_v13, %v8023_v36  ;;  %9749 = vmatmul.mubr.bf16.gmra.mrb[204].mxu1 %v14855_v45  ;;  %v7080_v48 = vshrl.u32 %v6914_v5, 16  ;;  %v7086_v63 = vshll.u32 %v6915_v55, 16  ;;  %v8036_v38 = vshrl.u32 %v7861_v7, 16  ;;  %v12414_v55 = vld [vmem:[#allocation3 + $0x54] sm:$0xff]  }
 0x37f   : > { %v8034_v21 = vsel %vm12872_vm7, %v8029_v37, %v8033_v17  ;;  %9756 = vmatprep.mubr.bf16.mxu1 %v10833_v59  ;;  %v7073_v19 = vor.u32 %v7072_v0, %v7069_v18  ;;  %v8039_v3 = vshll.u32 %v7861_v7, 16  ;;  %v8045_v14 = vshll.u32 %v7862_v8, 16  ;;  %12040 = vmatpush3.bf16.msra.mxu1 %v12425_v24 }
 0x380   : > { %v10866_v25 = vcombine.low %v8024_v41, %v8034_v21  ;;  %v7082_v40 = vrot.slane %v7080_v48, 4  ;;  %v7088_v33 = vrot.slane %v7086_v63, 5  ;;  %v8038_v45 = vrot.slane %v8036_v38, 4  ;;  %12041 = vmatprep.subr.bf16.mxu1 %v12428_v53 }
 0x381   : > { %v8049_v62 = vshrl.u32 %v7862_v8, 16  ;;  %v7074_v1 = vrot.slane %v7073_v19, 4  ;;  %v8041_v6 = vrot.slane %v8039_v3, 5  ;;  %v8047_v42 = vrot.slane %v8045_v14, 5  ;;  %v7431_v3 = vld [vmem:[#allocation3 + $0x60] sm:$0xe] }
 0x382   : > { %v8055_v5 = vshll.u32 %v7863_v15, 16  ;;  %v7083_v51 = vor.u32 %v7082_v40, %v7078_v2  ;;  %v10819_v34 = vrot.slane %v7428_v29, 9  ;;  %v7550_v59 = vrot.slane %v7429_v44, 5  ;;  %v7866_v15 = vld [vmem:[#allocation3 + $0x74] sm:$0x1] }
 0x383   : > { %9918 = vmatmul.mubr.bf16.gmra.mrb[240].mxu0 %v12412_v32  ;;  %v8051_v27 = vrot.slane %v8049_v62, 4  ;;  %v7079_v49 = vsel %vm12872_vm7, %v7074_v1, %v7078_v2  ;;  %v8042_v26 = vor.u32 %v8041_v6, %v8038_v45  ;;  %v7553_v36 = vrot.slane %v7430_v47, 5  ;;  %12042 = vmatpush3.bf16.msra.mxu1 %v12428_v53  ;;  %v14905_v7 = vpop.f32.mrb[160].mxu0  ;;  %v7432_v14 = vld [vmem:[#allocation3 + $0x64] sm:$0xf] }
 0x384   : > { %9925 = vmatprep.mubr.bf16.mxu0 %v10866_v25  ;;  %v8057_v20 = vrot.slane %v8055_v5, 5  ;;  %v7084_v28 = vrot.slane %v7083_v51, 4  ;;  %v7551_v24 = vsel %vm12912_vm13, %v10819_v34, %v7550_v59  ;;  %v7552_v57 = vrot.slane %v7550_v59, 4  ;;  %v7433_v47 = vld [vmem:[#allocation3 + $0x68] sm:$0x1] }
 0x385   : > { %v8052_v39 = vor.u32 %v8051_v27, %v8047_v42  ;;  %v8043_v17 = vrot.slane %v8042_v26, 4  ;;  %v7091_v12 = vshrl.u32 %v6916_v30, 16  ;;  %v7094_v4 = vshll.u32 %v6916_v30, 16  ;;  %v6919_v30 = vld [vmem:[#allocation3 + $0x60] sm:$0xf] }
 0x386   : > { %v7100_v52 = vshll.u32 %v6917_v22, 16  ;;  %9757 = vmatmul.mubr.bf16.gmra.mrb[208].mxu1 %v10801_v9  ;;  %v7089_v54 = vsel %vm12872_vm7, %v7084_v28, %v7088_v33  ;;  %v7554_v13 = vsel %vm12912_vm13, %v7552_v57, %v7553_v36  ;;  %v7104_v43 = vshrl.u32 %v6917_v22, 16  ;;  %v14909_v9 = vpop.f32.mrb[161].mxu0  ;;  %v6920_v22 = vld [vmem:[#allocation3 + $0x64] sm:$0xf] }
 0x387   : > { %v8053_v56 = vrot.slane %v8052_v39, 4  ;;  %9764 = vmatprep.mubr.bf16.mxu1 %v10834_v60  ;;  %v10802_v37 = vcombine.low %v7079_v49, %v7089_v54  ;;  %v8048_v10 = vsel %vm12872_vm7, %v8043_v17, %v8047_v42  ;;  %v10835_v18 = vcombine.low %v7551_v24, %v7554_v13  ;;  %v14913_v29 = vpop.f32.mrb[162].mxu0  ;;  %v6921_v28 = vld [vmem:[#allocation3 + $0x68] sm:$0x1]  ;;  %v12415_v17 = vld [vmem:[#allocation3 + $0x60] sm:$0xff]  }
 0x388   : > { %v7093_v8 = vrot.slane %v7091_v12, 4  ;;  %v7096_v41 = vrot.slane %v7094_v4, 5  ;;  %v7102_v0 = vrot.slane %v7100_v52, 5  ;;  %v7106_v2 = vrot.slane %v7104_v43, 4  ;;  %v14915_v63 = vpop.f32.mrb[163].mxu0 }
 0x389   : > { %v8058_v53 = vsel %vm12872_vm7, %v8053_v56, %v8057_v20  ;;  %v7110_v21 = vshll.u32 %v6918_v11, 16  ;;  %v8060_v60 = vshrl.u32 %v7864_v23, 16  ;;  %v8063_v48 = vshll.u32 %v7864_v23, 16  ;;  %v7867_v43 = vld [vmem:[#allocation3 + $0x78] sm:$0xf] }
 0x38a   : > { %v10867_v32 = vcombine.low %v8048_v10, %v8058_v53  ;;  %v7097_v38 = vor.u32 %v7096_v41, %v7093_v8  ;;  %v7107_v44 = vor.u32 %v7106_v2, %v7102_v0  ;;  %v8069_v25 = vshll.u32 %v7865_v61, 16  ;;  %v7869_v53 = vld [vmem:[#allocation3 + $0x80] sm:$0x1]  ;;  %v7434_v41 = vld [vmem:[#allocation3 + $0x6c] sm:$0xe] }
 0x38b   : > { %9926 = vmatmul.mubr.bf16.gmra.mrb[244].mxu0 %v12414_v55  ;;  %v8073_v19 = vshrl.u32 %v7865_v61, 16  ;;  %v7112_v40 = vrot.slane %v7110_v21, 5  ;;  %v8062_v33 = vrot.slane %v8060_v60, 4  ;;  %v8065_v45 = vrot.slane %v8063_v48, 5  ;;  %v7868_v61 = vld [vmem:[#allocation3 + $0x7c] sm:$0xf] }
 0x38c   : > { %9933 = vmatprep.mubr.bf16.mxu0 %v10867_v32  ;;  %v8079_v62 = vshll.u32 %v7866_v15, 16  ;;  %v7098_v1 = vrot.slane %v7097_v38, 4  ;;  %v7108_v6 = vrot.slane %v7107_v44, 4  ;;  %v8071_v42 = vrot.slane %v8069_v25, 5  ;;  %v7435_v21 = vld [vmem:[#allocation3 + $0x70] sm:$0xf] }
 0x38d   : > { %v8075_v5 = vrot.slane %v8073_v19, 4  ;;  %v8066_v51 = vor.u32 %v8065_v45, %v8062_v33  ;;  %v10820_v34 = vrot.slane %v7431_v3, 9  ;;  %v7557_v59 = vrot.slane %v7432_v14, 5  ;;  %v7436_v25 = vld [vmem:[#allocation3 + $0x74] sm:$0x1] }
 0x38e   : > { %v8081_v27 = vrot.slane %v8079_v62, 5  ;;  %9765 = vmatmul.mubr.bf16.gmra.mrb[212].mxu1 %v10802_v37  ;;  %v7103_v49 = vsel %vm12872_vm7, %v7098_v1, %v7102_v0  ;;  %v7113_v26 = vsel %vm12872_vm7, %v7108_v6, %v7112_v40  ;;  %v7560_v36 = vrot.slane %v7433_v47, 5  ;;  %v6922_v33 = vld [vmem:[#allocation3 + $0x6c] sm:$0xf] }
 0x38f   : > { %v8076_v20 = vor.u32 %v8075_v5, %v8071_v42  ;;  %9772 = vmatprep.mubr.bf16.mxu1 %v10835_v18  ;;  %v10803_v39 = vcombine.low %v7103_v49, %v7113_v26  ;;  %v8067_v24 = vrot.slane %v8066_v51, 4  ;;  %v7558_v57 = vsel %vm12912_vm13, %v10820_v34, %v7557_v59  ;;  %v12417_v51 = vld [vmem:[#allocation3 + $0x6c] sm:$0xff]  }
 0x390   : > { %v7559_v11 = vrot.slane %v7557_v59, 4  ;;  %v7115_v4 = vshrl.u32 %v6919_v30, 16  ;;  %v7118_v52 = vshll.u32 %v6919_v30, 16  ;;  %v7124_v23 = vshll.u32 %v6920_v22, 16 }
 0x391   : > { %v8077_v12 = vrot.slane %v8076_v20, 4  ;;  %v8072_v55 = vsel %vm12872_vm7, %v8067_v24, %v8071_v42  ;;  %v7128_v56 = vshrl.u32 %v6920_v22, 16  ;;  %v7134_v13 = vshll.u32 %v6921_v28, 16  ;;  %v6923_v22 = vld [vmem:[#allocation3 + $0x70] sm:$0xf] }
 0x392   : > { %v7561_v54 = vsel %vm12912_vm13, %v7559_v11, %v7560_v36  ;;  %v7117_v18 = vrot.slane %v7115_v4, 4  ;;  %v7120_v8 = vrot.slane %v7118_v52, 5  ;;  %v7126_v2 = vrot.slane %v7124_v23, 5 }
 0x393   : > { %9934 = vmatmul.mubr.bf16.gmra.mrb[248].mxu0 %v12415_v17  ;;  %v8082_v37 = vsel %vm12872_vm7, %v8077_v12, %v8081_v27  ;;  %v10836_v10 = vcombine.low %v7558_v57, %v7561_v54  ;;  %v7130_v15 = vrot.slane %v7128_v56, 4  ;;  %v7136_v32 = vrot.slane %v7134_v13, 5  ;;  %v7870_v12 = vld [vmem:[#allocation3 + $0x84] sm:$0xf] }
 0x394   : > { %v10868_v0 = vcombine.low %v8072_v55, %v8082_v37  ;;  %v7121_v60 = vor.u32 %v7120_v8, %v7117_v18  ;;  %v8084_v48 = vshrl.u32 %v7867_v43, 16  ;;  %v8087_v38 = vshll.u32 %v7867_v43, 16  ;;  %v7872_v37 = vld [vmem:[#allocation3 + $0x8c] sm:$0x1] }
 0x395   : > { %v8093_v44 = vshll.u32 %v7868_v61, 16  ;;  %v7131_v19 = vor.u32 %v7130_v15, %v7126_v2  ;;  %v8097_v3 = vshrl.u32 %v7868_v61, 16  ;;  %v8103_v14 = vshll.u32 %v7869_v53, 16  ;;  %v7871_v61 = vld [vmem:[#allocation3 + $0x88] sm:$0xf] }
 0x396   : > { %9941 = vmatprep.mubr.bf16.mxu0 %v10868_v0  ;;  %v10821_v40 = vrot.slane %v7434_v41, 9  ;;  %9773 = vmatmul.mubr.bf16.gmra.mrb[216].mxu1 %v10803_v39  ;;  %v7122_v45 = vrot.slane %v7121_v60, 4  ;;  %v8086_v62 = vrot.slane %v8084_v48, 4  ;;  %v8089_v47 = vrot.slane %v8087_v38, 5  ;;  %v6924_v39 = vld [vmem:[#allocation3 + $0x74] sm:$0x1] }
 0x397   : > { %v8095_v1 = vrot.slane %v8093_v44, 5  ;;  %9780 = vmatprep.mubr.bf16.mxu1 %v10836_v10  ;;  %v7132_v6 = vrot.slane %v7131_v19, 4  ;;  %v8099_v42 = vrot.slane %v8097_v3, 4  ;;  %v8105_v5 = vrot.slane %v8103_v14, 5  ;;  %v7437_v41 = vld [vmem:[#allocation3 + $0x78] sm:$0xe] }
 0x398   : > { %v7564_v30 = vrot.slane %v7435_v21, 5  ;;  %v7127_v27 = vsel %vm12872_vm7, %v7122_v45, %v7126_v2  ;;  %v8090_v34 = vor.u32 %v8089_v47, %v8086_v62  ;;  %v7567_v59 = vrot.slane %v7436_v25, 5  ;;  %v7438_v21 = vld [vmem:[#allocation3 + $0x7c] sm:$0xf]  ;;  %v7439_v25 = vld [vmem:[#allocation3 + $0x80] sm:$0x1] }
 0x399   : > { %v7139_v49 = vshrl.u32 %v6922_v33, 16  ;;  %v7137_v26 = vsel %vm12872_vm7, %v7132_v6, %v7136_v32  ;;  %v8100_v20 = vor.u32 %v8099_v42, %v8095_v1  ;;  %v7142_v17 = vshll.u32 %v6922_v33, 16  ;;  %v12418_v19 = vld [vmem:[#allocation3 + $0x78] sm:$0xff]  }
 0x39a   : > { %v7565_v36 = vsel %vm12912_vm13, %v10821_v40, %v7564_v30  ;;  %v7566_v28 = vrot.slane %v7564_v30, 4  ;;  %v10804_v24 = vcombine.low %v7127_v27, %v7137_v26  ;;  %v8091_v57 = vrot.slane %v8090_v34, 4  ;;  %v6925_v6 = vld [vmem:[#allocation3 + $0x78] sm:$0xf]  ;;  %v6926_v27 = vld [vmem:[#allocation3 + $0x7c] sm:$0xf] }
 0x39b   : > { %9942 = vmatmul.mubr.bf16.gmra.mrb[252].mxu0 %v12417_v51  ;;  %v7141_v11 = vrot.slane %v7139_v49, 4  ;;  %v8101_v4 = vrot.slane %v8100_v20, 4  ;;  %v7148_v23 = vshll.u32 %v6923_v22, 16  ;;  %v7152_v55 = vshrl.u32 %v6923_v22, 16 }
 0x39c   : > { %v7568_v52 = vsel %vm12912_vm13, %v7566_v28, %v7567_v59  ;;  %v8096_v54 = vsel %vm12872_vm7, %v8091_v57, %v8095_v1  ;;  %v7144_v13 = vrot.slane %v7142_v17, 5  ;;  %v7158_v43 = vshll.u32 %v6924_v39, 16 }
 0x39d   : > { %v10837_v56 = vcombine.low %v7565_v36, %v7568_v52  ;;  %v8106_v10 = vsel %vm12872_vm7, %v8101_v4, %v8105_v5  ;;  %v7150_v18 = vrot.slane %v7148_v23, 5  ;;  %v7154_v8 = vrot.slane %v7152_v55, 4  ;;  %v6927_v36 = vld [vmem:[#allocation3 + $0x80] sm:$0x1] }
 0x39e   : > { %v8108_v53 = vshrl.u32 %v7870_v12, 16  ;;  %9781 = vmatmul.mubr.bf16.gmra.mrb[220].mxu1 %v10804_v24  ;;  %v10869_v0 = vcombine.low %v8096_v54, %v8106_v10  ;;  %v7145_v2 = vor.u32 %v7144_v13, %v7141_v11  ;;  %v7160_v15 = vrot.slane %v7158_v43, 5  ;;  %v7874_v54 = vld [vmem:[#allocation3 + $0x94] sm:$0xf]  ;;  %v12420_v43 = vld [vmem:[#allocation3 + $0x84] sm:$0xff]  }
 0x39f   : > { %v8111_v32 = vshll.u32 %v7870_v12, 16  ;;  %9788 = vmatprep.mubr.bf16.mxu1 %v10837_v56  ;;  %v7155_v60 = vor.u32 %v7154_v8, %v7150_v18  ;;  %v8117_v38 = vshll.u32 %v7871_v61, 16  ;;  %v8121_v44 = vshrl.u32 %v7871_v61, 16  ;;  %v7873_v12 = vld [vmem:[#allocation3 + $0x90] sm:$0xf] }
 0x3a0   : > { %v8110_v48 = vrot.slane %v8108_v53, 4  ;;  %9949 = vmatprep.mubr.bf16.mxu0 %v10869_v0  ;;  %v7146_v3 = vrot.slane %v7145_v2, 4  ;;  %v8127_v40 = vshll.u32 %v7872_v37, 16  ;;  %v10822_v33 = vrot.slane %v7437_v41, 9  ;;  %v7875_v56 = vld [vmem:[#allocation3 + $0x98] sm:$0x1] }
 0x3a1   : > { %v8113_v14 = vrot.slane %v8111_v32, 5  ;;  %v7156_v45 = vrot.slane %v7155_v60, 4  ;;  %v8119_v62 = vrot.slane %v8117_v38, 5  ;;  %v8123_v47 = vrot.slane %v8121_v44, 4  ;;  %v7441_v2 = vld [vmem:[#allocation3 + $0x88] sm:$0xf] }
 0x3a2   : > { %v7571_v1 = vrot.slane %v7438_v21, 5  ;;  %v7151_v42 = vsel %vm12872_vm7, %v7146_v3, %v7150_v18  ;;  %v8129_v30 = vrot.slane %v8127_v40, 5  ;;  %v7574_v51 = vrot.slane %v7439_v25, 5  ;;  %v7440_v18 = vld [vmem:[#allocation3 + $0x84] sm:$0xe] }
 0x3a3   : > { %9950 = vmatmul.mubr.bf16.gmra.mrb[0].mxu0 %v12418_v19  ;;  %v8114_v5 = vor.u32 %v8113_v14, %v8110_v48  ;;  %v7161_v34 = vsel %vm12872_vm7, %v7156_v45, %v7160_v15  ;;  %v8124_v59 = vor.u32 %v8123_v47, %v8119_v62  ;;  %v7163_v28 = vshrl.u32 %v6925_v6, 16  ;;  %v7442_v15 = vld [vmem:[#allocation3 + $0x8c] sm:$0x1]  ;;  %v6928_v38 = vld [vmem:[#allocation3 + $0x84] sm:$0xf] }
 0x3a4   : > { %v7572_v22 = vsel %vm12912_vm13, %v10822_v33, %v7571_v1  ;;  %v7573_v49 = vrot.slane %v7571_v1, 4  ;;  %v10805_v26 = vcombine.low %v7151_v42, %v7161_v34  ;;  %v7166_v39 = vshll.u32 %v6925_v6, 16 }
 0x3a5   : > { %v8115_v20 = vrot.slane %v8114_v5, 4  ;;  %v8125_v24 = vrot.slane %v8124_v59, 4  ;;  %v7172_v11 = vshll.u32 %v6926_v27, 16  ;;  %v7176_v17 = vshrl.u32 %v6926_v27, 16  ;;  %v6929_v27 = vld [vmem:[#allocation3 + $0x88] sm:$0xf] }
 0x3a6   : > { %v7575_v57 = vsel %vm12912_vm13, %v7573_v49, %v7574_v51  ;;  %9789 = vmatmul.mubr.bf16.gmra.mrb[224].mxu1 %v10805_v26  ;;  %v7165_v23 = vrot.slane %v7163_v28, 4  ;;  %v7168_v55 = vrot.slane %v7166_v39, 5  ;;  %v7182_v10 = vshll.u32 %v6927_v36, 16 }
 0x3a7   : > { %v8120_v4 = vsel %vm12872_vm7, %v8115_v20, %v8119_v62  ;;  %v10838_v52 = vcombine.low %v7572_v22, %v7575_v57  ;;  %v8130_v13 = vsel %vm12872_vm7, %v8125_v24, %v8129_v30  ;;  %v7174_v61 = vrot.slane %v7172_v11, 5  ;;  %v6930_v20 = vld [vmem:[#allocation3 + $0x8c] sm:$0x1] }
 0x3a8   : > { %v7178_v37 = vrot.slane %v7176_v17, 4  ;;  %v10870_v8 = vcombine.low %v8120_v4, %v8130_v13  ;;  %v7169_v53 = vor.u32 %v7168_v55, %v7165_v23  ;;  %v8132_v41 = vshrl.u32 %v7873_v12, 16  ;;  %v7876_v55 = vld [vmem:[#allocation3 + $0x9c] sm:$0xf] }
 0x3a9   : > { %9796 = vmatprep.mubr.bf16.mxu1 %v10838_v52  ;;  %v8135_v0 = vshll.u32 %v7873_v12, 16  ;;  %v7184_v21 = vrot.slane %v7182_v10, 5  ;;  %v8141_v60 = vshll.u32 %v7874_v54, 16  ;;  %v8145_v48 = vshrl.u32 %v7874_v54, 16  ;;  %v14953_v44 = vpop.f32.mrb[164].mxu0 }
 0x3aa   : > { %v7179_v32 = vor.u32 %v7178_v37, %v7174_v61  ;;  %9957 = vmatprep.mubr.bf16.mxu0 %v10870_v8  ;;  %v7170_v25 = vrot.slane %v7169_v53, 4  ;;  %v8134_v19 = vrot.slane %v8132_v41, 4  ;;  %v8151_v14 = vshll.u32 %v7875_v56, 16  ;;  %v14955_v40 = vpop.f32.mrb[165].mxu0  ;;  %v7878_v53 = vld [vmem:[#allocation3 + $0xa4] sm:$0x1] }
 0x3ab   : > { %v8137_v3 = vrot.slane %v8135_v0, 5  ;;  %9958 = vmatmul.mubr.bf16.gmra.mrb[4].mxu0 %v12420_v43  ;;  %v8143_v45 = vrot.slane %v8141_v60, 5  ;;  %v8147_v62 = vrot.slane %v8145_v48, 4  ;;  %v10823_v47 = vrot.slane %v7440_v18, 9  ;;  %v14957_v1 = vpop.f32.mrb[132].mxu1  ;;  %v14959_v6 = vpop.f32.mrb[166].mxu0 }
 0x3ac   : > { %v7180_v33 = vrot.slane %v7179_v32, 4  ;;  %v7175_v42 = vsel %vm12872_vm7, %v7170_v25, %v7174_v61  ;;  %v8153_v30 = vrot.slane %v8151_v14, 5  ;;  %v7578_v51 = vrot.slane %v7441_v2, 5  ;;  %v14963_v34 = vpop.f32.mrb[133].mxu1  ;;  %v14965_v59 = vpop.f32.mrb[167].mxu0  ;;  %v12421_v2 = vld [vmem:[#allocation3 + $0x90] sm:$0xff]  }
 0x3ad   : > { %v8138_v5 = vor.u32 %v8137_v3, %v8134_v19  ;;  %v8148_v49 = vor.u32 %v8147_v62, %v8143_v45  ;;  %v7581_v26 = vrot.slane %v7442_v15, 5  ;;  %v7187_v36 = vshrl.u32 %v6928_v38, 16  ;;  %v14969_v28 = vpop.f32.mrb[134].mxu1  ;;  %v7877_v61 = vld [vmem:[#allocation3 + $0xa0] sm:$0xf] }
 0x3ae   : > { %v7185_v22 = vsel %vm12872_vm7, %v7180_v33, %v7184_v21  ;;  %v7579_v57 = vsel %vm12912_vm13, %v10823_v47, %v7578_v51  ;;  %v7580_v11 = vrot.slane %v7578_v51, 4  ;;  %v14973_v17 = vpop.f32.mrb[135].mxu1  ;;  %v7190_v52 = vshll.u32 %v6928_v38, 16  ;;  %v7443_v41 = vld [vmem:[#allocation3 + $0x90] sm:$0xe] }
 0x3af   : > { %v10806_v39 = vcombine.low %v7175_v42, %v7185_v22  ;;  %v8139_v24 = vrot.slane %v8138_v5, 4  ;;  %v8149_v12 = vrot.slane %v8148_v49, 4  ;;  %v7189_v4 = vrot.slane %v7187_v36, 4  ;;  %v7444_v60 = vld [vmem:[#allocation3 + $0x94] sm:$0xf] }
 0x3b0   : > { %v7196_v23 = vshll.u32 %v6929_v27, 16  ;;  %v7582_v56 = vsel %vm12912_vm13, %v7580_v11, %v7581_v26  ;;  %v7200_v13 = vshrl.u32 %v6929_v27, 16  ;;  %v7206_v43 = vshll.u32 %v6930_v20, 16  ;;  %v7445_v3 = vld [vmem:[#allocation3 + $0x98] sm:$0x1] }
 0x3b1   : > { %9797 = vmatmul.mubr.bf16.gmra.mrb[228].mxu1 %v10806_v39  ;;  %v8144_v54 = vsel %vm12872_vm7, %v8139_v24, %v8143_v45  ;;  %v8154_v37 = vsel %vm12872_vm7, %v8149_v12, %v8153_v30  ;;  %v10839_v10 = vcombine.low %v7579_v57, %v7582_v56  ;;  %v7192_v18 = vrot.slane %v7190_v52, 5  ;;  %v14986_v42 = vld [vmem:[%s15808_s4] ss:$0 sm:$0xff] }
 0x3b2   : > { %v7198_v8 = vrot.slane %v7196_v23, 5  ;;  %v10871_v0 = vcombine.low %v8144_v54, %v8154_v37  ;;  %v7202_v15 = vrot.slane %v7200_v13, 4  ;;  %v7208_v32 = vrot.slane %v7206_v43, 5  ;;  %v6931_v37 = vld [vmem:[#allocation3 + $0x90] sm:$0xf] }
 0x3b3   : > { %v8156_v21 = vshrl.u32 %v7876_v55, 16  ;;  %9804 = vmatprep.mubr.bf16.mxu1 %v10839_v10  ;;  %v7193_v48 = vor.u32 %v7192_v18, %v7189_v4  ;;  %v8159_v38 = vshll.u32 %v7876_v55, 16  ;;  %v8165_v25 = vshll.u32 %v7877_v61, 16  ;;  %v14981_v14 = vpop.f32.mrb[136].mxu1 }
 0x3b4   : > { %v8169_v19 = vshrl.u32 %v7877_v61, 16  ;;  %9965 = vmatprep.mubr.bf16.mxu0 %v10871_v0  ;;  %v7203_v33 = vor.u32 %v7202_v15, %v7198_v8  ;;  %v8175_v62 = vshll.u32 %v7878_v53, 16  ;;  %v10824_v47 = vrot.slane %v7443_v41, 9  ;;  %v14988_v5 = vpop.f32.mrb[168].mxu0  ;;  %v14990_v30 = vpop.f32.mrb[137].mxu1 }
 0x3b5   : > { %v8158_v45 = vrot.slane %v8156_v21, 4  ;;  %9966 = vmatmul.mubr.bf16.gmra.mrb[8].mxu0 %v12421_v2  ;;  %v7194_v51 = vrot.slane %v7193_v48, 4  ;;  %v8161_v27 = vrot.slane %v8159_v38, 5  ;;  %v8167_v22 = vrot.slane %v8165_v25, 5  ;;  %v14992_v26 = vpop.f32.mrb[169].mxu0  ;;  %v14994_v20 = vpop.f32.mrb[138].mxu1 }
 0x3b6   : > { %v8171_v49 = vrot.slane %v8169_v19, 4  ;;  %v7204_v36 = vrot.slane %v7203_v33, 4  ;;  %v8177_v39 = vrot.slane %v8175_v62, 5  ;;  %v7585_v24 = vrot.slane %v7444_v60, 5  ;;  %v14996_v11 = vpop.f32.mrb[170].mxu0  ;;  %v14998_v12 = vpop.f32.mrb[139].mxu1 }
 0x3b7   : > { %v7588_v57 = vrot.slane %v7445_v3, 5  ;;  %v7199_v4 = vsel %vm12872_vm7, %v7194_v51, %v7198_v8  ;;  %v8162_v52 = vor.u32 %v8161_v27, %v8158_v45  ;;  %v11508_v55 = vadd.f32 %v14720_v35, %v14718_v46  ;;  %v15004_v54 = vpop.f32.mrb[171].mxu0  ;;  %v6932_v2 = vld [vmem:[#allocation3 + $0x94] sm:$0xf]  ;;  %v6933_v15 = vld [vmem:[#allocation3 + $0x98] sm:$0x1] }
 0x3b8   : > { %v8172_v23 = vor.u32 %v8171_v49, %v8167_v22  ;;  %v7209_v56 = vsel %vm12872_vm7, %v7204_v36, %v7208_v32  ;;  %v7586_v13 = vsel %vm12912_vm13, %v10824_v47, %v7585_v24  ;;  %v7587_v43 = vrot.slane %v7585_v24, 4  ;;  %v7879_v60 = vld [vmem:[#allocation3 + $0xa8] sm:$0xf]  ;;  %v7880_v48 = vld [vmem:[#allocation3 + $0xac] sm:$0xf] }
 0x3b9   : > { %v11511_v61 = vadd.f32 %v14733_v31, %v14729_v58  ;;  %v10807_v10 = vcombine.low %v7199_v4, %v7209_v56  ;;  %v8163_v18 = vrot.slane %v8162_v52, 4  ;;  %v9405_v53 = vadd.f32 %v11508_v55, %v14986_v42  ;;  %v7881_v45 = vld [vmem:[#allocation3 + $0xb0] sm:$0x1]  ;;  %v7447_v24 = vld [vmem:[#allocation3 + $0xa0] sm:$0xf] }
 0x3ba   : > { %v8173_v8 = vrot.slane %v8172_v23, 4  ;;  %v7589_v46 = vsel %vm12912_vm13, %v7587_v43, %v7588_v57  ;;  %v11620_v41 = vadd.f32 %v14909_v9, %v14905_v7  ;;  %v11623_v0 = vadd.f32 %v14915_v63, %v14913_v29  ;;  %v12423_v9 = vld [vmem:[#allocation3 + $0x9c] sm:$0xff]   ;;  %v7448_v55 = vld [vmem:[#allocation3 + $0xa4] sm:$0x1] }
 0x3bb   : > { %v9408_v35 = vadd.f32 %v11511_v61, %v14986_v42  ;;  %9805 = vmatmul.mubr.bf16.gmra.mrb[232].mxu1 %v10807_v10  ;;  %v8168_v58 = vsel %vm12872_vm7, %v8163_v18, %v8167_v22  ;;  %v10840_v32 = vcombine.low %v7586_v13, %v7589_v46  ;;  %v7211_v21 = vshrl.u32 %v6931_v37, 16  ;;  %v7446_v22 = vld [vmem:[#allocation3 + $0x9c] sm:$0xe] }
 0x3bc   : > { %v8178_v31 = vsel %vm12872_vm7, %v8173_v8, %v8177_v39  ;;  %v15024_v25 = vadd.f32 %v11620_v41, %v9405_v53  ;;  %v7214_v29 = vshll.u32 %v6931_v37, 16  ;;  %v7220_v19 = vshll.u32 %v6932_v2, 16 }
 0x3bd   : > { %v10872_v38 = vcombine.low %v8168_v58, %v8178_v31  ;;  %v15026_v7 = vadd.f32 %v11623_v0, %v9408_v35  ;;  %9812 = vmatprep.mubr.bf16.mxu1 %v10840_v32  ;;  %v7213_v63 = vrot.slane %v7211_v21, 4  ;;  %v7224_v3 = vshrl.u32 %v6932_v2, 16  ;;  %v6934_v21 = vld [vmem:[#allocation3 + $0x9c] sm:$0xf] }
 0x3be   : > { %15951 = vst [vmem:[#allocation35_spill] sm:$0xff] %v15024_v25  ;;  %v7230_v33 = vshll.u32 %v6933_v15, 16  ;;  %v7216_v62 = vrot.slane %v7214_v29, 5  ;;  %v8180_v47 = vshrl.u32 %v7879_v60, 16  ;;  %v8183_v51 = vshll.u32 %v7879_v60, 16 }
 0x3bf   : > { %15952 = vst [vmem:[#allocation37_spill] sm:$0xff] %v15026_v7  ;;  %9973 = vmatprep.mubr.bf16.mxu0 %v10872_v38  ;;  %v8189_v27 = vshll.u32 %v7880_v48, 16  ;;  %v7222_v49 = vrot.slane %v7220_v19, 5  ;;  %v7226_v36 = vrot.slane %v7224_v3, 4  ;;  %v8193_v39 = vshrl.u32 %v7880_v48, 16 }
 0x3c0   : > { %9974 = vmatmul.mubr.bf16.gmra.mrb[12].mxu0 %v12423_v9  ;;  %v7217_v57 = vor.u32 %v7216_v62, %v7213_v63  ;;  %v8182_v4 = vrot.slane %v8180_v47, 4  ;;  %v8185_v52 = vrot.slane %v8183_v51, 5  ;;  %v7232_v13 = vrot.slane %v7230_v33, 5 }
 0x3c1   : > { %v8191_v23 = vrot.slane %v8189_v27, 5  ;;  %v7227_v56 = vor.u32 %v7226_v36, %v7222_v49  ;;  %v8195_v43 = vrot.slane %v8193_v39, 4  ;;  %v8199_v61 = vshll.u32 %v7881_v45, 16  ;;  %v7882_v45 = vld [vmem:[#allocation3 + $0xb4] sm:$0xf]  ;;  %v12424_v36 = vld [vmem:[#allocation3 + $0xa8] sm:$0xff]  }
 0x3c2   : > { %v7218_v37 = vrot.slane %v7217_v57, 4  ;;  %v8186_v10 = vor.u32 %v8185_v52, %v8182_v4  ;;  %v10825_v18 = vrot.slane %v7446_v22, 9  ;;  %v7592_v8 = vrot.slane %v7447_v24, 5  ;;  %v15028_v53 = vpop.f32.mrb[140].mxu1  ;;  %v7883_v27 = vld [vmem:[#allocation3 + $0xb8] sm:$0xf] }
 0x3c3   : > { %v7228_v46 = vrot.slane %v7227_v56, 4  ;;  %v8196_v35 = vor.u32 %v8195_v43, %v8191_v23  ;;  %v7595_v41 = vrot.slane %v7448_v55, 5  ;;  %v15032_v0 = vadd.f32 %v14955_v40, %v14953_v44  ;;  %v15034_v2 = vpop.f32.mrb[141].mxu1  ;;  %v6935_v40 = vld [vmem:[#allocation3 + $0xa0] sm:$0xf] }
 0x3c4   : > { %v7223_v15 = vsel %vm12872_vm7, %v7218_v37, %v7222_v49  ;;  %v8187_v58 = vrot.slane %v8186_v10, 4  ;;  %v8201_v31 = vrot.slane %v8199_v61, 5  ;;  %v7594_v32 = vrot.slane %v7592_v8, 4  ;;  %v15038_v60 = vpop.f32.mrb[142].mxu1  ;;  %v7884_v39 = vld [vmem:[#allocation3 + $0xbc] sm:$0x1] }
 0x3c5   : > { %v7233_v48 = vsel %vm12872_vm7, %v7228_v46, %v7232_v13  ;;  %v8197_v38 = vrot.slane %v8196_v35, 4  ;;  %v15044_v9 = vadd.f32 %v14963_v34, %v14957_v1  ;;  %v15048_v44 = vadd.f32 %v14965_v59, %v14959_v6  ;;  %v15050_v29 = vpop.f32.mrb[172].mxu0  ;;  %v15052_v63 = vpop.f32.mrb[143].mxu1  ;;  %v6936_v34 = vld [vmem:[#allocation3 + $0xa4] sm:$0x1] }
 0x3c6   : > { %v10808_v19 = vcombine.low %v7223_v15, %v7233_v48  ;;  %v7593_v3 = vsel %vm12912_vm13, %v10825_v18, %v7592_v8  ;;  %v7596_v33 = vsel %vm12912_vm13, %v7594_v32, %v7595_v41  ;;  %v15060_v1 = vadd.f32 %v14973_v17, %v14969_v28  ;;  %v15062_v6 = vpop.f32.mrb[173].mxu0  ;;  %v7449_v55 = vld [vmem:[#allocation3 + $0xa8] sm:$0xe]  ;;  %v7450_v37 = vld [vmem:[#allocation3 + $0xac] sm:$0xf] }
 0x3c7   : > { %v8192_v59 = vsel %vm12872_vm7, %v8187_v58, %v8191_v23  ;;  %v8202_v62 = vsel %vm12872_vm7, %v8197_v38, %v8201_v31  ;;  %v10841_v47 = vcombine.low %v7593_v3, %v7596_v33  ;;  %v7235_v51 = vshrl.u32 %v6934_v21, 16  ;;  %v15068_v22 = vpop.f32.mrb[174].mxu0  ;;  %v7451_v35 = vld [vmem:[#allocation3 + $0xb0] sm:$0x1] }
 0x3c8   : > { %9813 = vmatmul.mubr.bf16.gmra.mrb[236].mxu1 %v10808_v19  ;;  %v10873_v49 = vcombine.low %v8192_v59, %v8202_v62  ;;  %v7238_v28 = vshll.u32 %v6934_v21, 16  ;;  %v7244_v17 = vshll.u32 %v6935_v40, 16  ;;  %v15070_v24 = vpop.f32.mrb[175].mxu0  ;;  %v7248_v4 = vshrl.u32 %v6935_v40, 16 }
 0x3c9   : > { %9820 = vmatprep.mubr.bf16.mxu1 %v10841_v47  ;;  %v7237_v57 = vrot.slane %v7235_v51, 4  ;;  %v7254_v52 = vshll.u32 %v6936_v34, 16  ;;  %v8204_v23 = vshrl.u32 %v7882_v45, 16  ;;  %v8207_v43 = vshll.u32 %v7882_v45, 16 }
 0x3ca   : > { %9981 = vmatprep.mubr.bf16.mxu0 %v10873_v49  ;;  %v7240_v56 = vrot.slane %v7238_v28, 5  ;;  %v7246_v13 = vrot.slane %v7244_v17, 5  ;;  %v8213_v61 = vshll.u32 %v7883_v27, 16  ;;  %v7250_v10 = vrot.slane %v7248_v4, 4  ;;  %v6938_v4 = vld [vmem:[#allocation3 + $0xac] sm:$0xf] }
 0x3cb   : > { %9982 = vmatmul.mubr.bf16.gmra.mrb[16].mxu0 %v12424_v36  ;;  %v7256_v18 = vrot.slane %v7254_v52, 5  ;;  %v8206_v8 = vrot.slane %v8204_v23, 4  ;;  %v8217_v46 = vshrl.u32 %v7883_v27, 16  ;;  %v8209_v15 = vrot.slane %v8207_v43, 5  ;;  %v6937_v36 = vld [vmem:[#allocation3 + $0xa8] sm:$0xf] }
 0x3cc   : > { %v7241_v41 = vor.u32 %v7240_v56, %v7237_v57  ;;  %v8215_v58 = vrot.slane %v8213_v61, 5  ;;  %v8223_v31 = vshll.u32 %v7884_v39, 16  ;;  %v7251_v32 = vor.u32 %v7250_v10, %v7246_v13  ;;  %v6939_v52 = vld [vmem:[#allocation3 + $0xb0] sm:$0x1]  ;;  %v7885_v23 = vld [vmem:[#allocation3 + $0xc0] sm:$0xf] }
 0x3cd   : > { %v8219_v21 = vrot.slane %v8217_v46, 4  ;;  %v10826_v48 = vrot.slane %v7449_v55, 9  ;;  %v7599_v38 = vrot.slane %v7450_v37, 5  ;;  %v8210_v19 = vor.u32 %v8209_v15, %v8206_v8  ;;  %v7886_v55 = vld [vmem:[#allocation3 + $0xc4] sm:$0xf] }
 0x3ce   : > { %v7242_v40 = vrot.slane %v7241_v41, 4  ;;  %v8225_v3 = vrot.slane %v8223_v31, 5  ;;  %v7602_v33 = vrot.slane %v7451_v35, 5  ;;  %v7252_v34 = vrot.slane %v7251_v32, 4  ;;  %v7887_v37 = vld [vmem:[#allocation3 + $0xc8] sm:$0x1] }
 0x3cf   : > { %v8220_v45 = vor.u32 %v8219_v21, %v8215_v58  ;;  %v7600_v59 = vsel %vm12912_vm13, %v10826_v48, %v7599_v38  ;;  %v7601_v62 = vrot.slane %v7599_v38, 4  ;;  %v8211_v51 = vrot.slane %v8210_v19, 4  ;;  %v7452_v41 = vld [vmem:[#allocation3 + $0xb4] sm:$0xe] }
 0x3d0   : > { %v7247_v47 = vsel %vm12872_vm7, %v7242_v40, %v7246_v13  ;;  %v15078_v27 = vadd.f32 %v14992_v26, %v14988_v5  ;;  %v15082_v49 = vadd.f32 %v14990_v30, %v14981_v14  ;;  %v7257_v28 = vsel %vm12872_vm7, %v7252_v34, %v7256_v18 }
 0x3d1   : > { %v8221_v17 = vrot.slane %v8220_v45, 4  ;;  %v7603_v39 = vsel %vm12912_vm13, %v7601_v62, %v7602_v33  ;;  %v15090_v57 = vadd.f32 %v15004_v54, %v14996_v11  ;;  %v10809_v26 = vcombine.low %v7247_v47, %v7257_v28  ;;  %v12426_v54 = vld [vmem:[#allocation3 + $0xb4] sm:$0xff]  }
 0x3d2   : > { %v15092_v5 = vpop.f32.mrb[144].mxu1  ;;  %v8216_v14 = vsel %vm12872_vm7, %v8211_v51, %v8215_v58  ;;  %v10842_v30 = vcombine.low %v7600_v59, %v7603_v39  ;;  %v15102_v11 = vadd.f32 %v14998_v12, %v14994_v20  ;;  %v7259_v43 = vshrl.u32 %v6937_v36, 16  ;;  %v7453_v20 = vld [vmem:[#allocation3 + $0xb8] sm:$0xf]  ;;  %v7454_v59 = vld [vmem:[#allocation3 + $0xbc] sm:$0x1] }
 0x3d3   : > { %v15096_v56 = vpop.f32.mrb[145].mxu1  ;;  %v8226_v13 = vsel %vm12872_vm7, %v8221_v17, %v8225_v3  ;;  %v7262_v61 = vshll.u32 %v6937_v36, 16  ;;  %9821 = vmatmul.mubr.bf16.gmra.mrb[240].mxu1 %v10809_v26  ;;  %v7268_v8 = vshll.u32 %v6938_v4, 16  ;;  %v7272_v46 = vshrl.u32 %v6938_v4, 16 }
 0x3d4   : > { %v15104_v10 = vpop.f32.mrb[146].mxu1  ;;  %v10874_v18 = vcombine.low %v8216_v14, %v8226_v13  ;;  %v7278_v35 = vshll.u32 %v6939_v52, 16  ;;  %9828 = vmatprep.mubr.bf16.mxu1 %v10842_v30  ;;  %v7261_v58 = vrot.slane %v7259_v43, 4  ;;  %v8228_v32 = vshrl.u32 %v7885_v23, 16 }
 0x3d5   : > { %v15106_v15 = vpop.f32.mrb[147].mxu1  ;;  %v7264_v31 = vrot.slane %v7262_v61, 5  ;;  %v15108_v12 = vpop.f32.mrb[176].mxu0  ;;  %v7270_v21 = vrot.slane %v7268_v8, 5  ;;  %v7274_v48 = vrot.slane %v7272_v46, 4  ;;  %v8231_v40 = vshll.u32 %v7885_v23, 16 }
 0x3d6   : > { %9989 = vmatprep.mubr.bf16.mxu0 %v10874_v18  ;;  %v7280_v38 = vrot.slane %v7278_v35, 5  ;;  %v15110_v19 = vpop.f32.mrb[177].mxu0  ;;  %v8230_v33 = vrot.slane %v8228_v32, 4  ;;  %v8237_v34 = vshll.u32 %v7886_v55, 16  ;;  %v8241_v45 = vshrl.u32 %v7886_v55, 16 }
 0x3d7   : > { %9990 = vmatmul.mubr.bf16.gmra.mrb[20].mxu0 %v12426_v54  ;;  %v7265_v3 = vor.u32 %v7264_v31, %v7261_v58  ;;  %v15112_v62 = vpop.f32.mrb[178].mxu0  ;;  %v7275_v47 = vor.u32 %v7274_v48, %v7270_v21  ;;  %v8233_v51 = vrot.slane %v8231_v40, 5  ;;  %v8247_v36 = vshll.u32 %v7887_v37, 16  ;;  %v6940_v35 = vld [vmem:[#allocation3 + $0xb4] sm:$0xf] }
 0x3d8   : > { %v10827_v28 = vrot.slane %v7452_v41, 9  ;;  %v11646_v17 = vpop.f32.mrb[179].mxu0  ;;  %v8239_v4 = vrot.slane %v8237_v34, 5  ;;  %v8243_v52 = vrot.slane %v8241_v45, 4  ;;  %v7606_v26 = vrot.slane %v7453_v20, 5 }
 0x3d9   : > { %v7266_v39 = vrot.slane %v7265_v3, 4  ;;  %v7276_v14 = vrot.slane %v7275_v47, 4  ;;  %v8234_v30 = vor.u32 %v8233_v51, %v8230_v33  ;;  %v8249_v23 = vrot.slane %v8247_v36, 5  ;;  %v6941_v41 = vld [vmem:[#allocation3 + $0xb8] sm:$0xf]  ;;  %v12427_v47 = vld [vmem:[#allocation3 + $0xc0] sm:$0xff]  }
 0x3da   : > { %v7609_v13 = vrot.slane %v7454_v59, 5  ;;  %v8244_v55 = vor.u32 %v8243_v52, %v8239_v4  ;;  %v7607_v43 = vsel %vm12912_vm13, %v10827_v28, %v7606_v26  ;;  %v7608_v61 = vrot.slane %v7606_v26, 4  ;;  %v15128_v58 = vld [vmem:[#allocation3 + $0x28] sm:$0xf]  ;;  %v7456_v33 = vld [vmem:[#allocation3 + $0xc4] sm:$0xf] }
 0x3db   : > { %v7271_v54 = vsel %vm12872_vm7, %v7266_v39, %v7270_v21  ;;  %v7281_v37 = vsel %vm12872_vm7, %v7276_v14, %v7280_v38  ;;  %v8235_v18 = vrot.slane %v8234_v30, 4  ;;  %v15122_v8 = vadd.f32 %v15062_v6, %v15050_v29  ;;  %v6942_v6 = vld [vmem:[#allocation3 + $0xbc] sm:$0x1] }
 0x3dc   : > { %v15126_v46 = vadd.f32 %v15034_v2, %v15028_v53  ;;  %v10810_v31 = vcombine.low %v7271_v54, %v7281_v37  ;;  %v8245_v32 = vrot.slane %v8244_v55, 4  ;;  %v7610_v20 = vsel %vm12912_vm13, %v7608_v61, %v7609_v13  ;;  %v6944_v37 = vld [vmem:[#allocation3 + $0xc4] sm:$0xf] }
 0x3dd   : > { %v15134_v21 = vadd.f32 %v15070_v24, %v15068_v22  ;;  %v8240_v29 = vsel %vm12872_vm7, %v8235_v18, %v8239_v4  ;;  %v10843_v53 = vcombine.low %v7607_v43, %v7610_v20  ;;  %v15142_v2 = vadd.f32 %v15052_v63, %v15038_v60  ;;  %v7455_v63 = vld [vmem:[#allocation3 + $0xc0] sm:$0xe]  ;;  %v7457_v4 = vld [vmem:[#allocation3 + $0xc8] sm:$0x1] }
 0x3de   : > { %v15136_v48 = vpop.f32.mrb[180].mxu0  ;;  %9829 = vmatmul.mubr.bf16.gmra.mrb[244].mxu1 %v10810_v31  ;;  %v8250_v40 = vsel %vm12872_vm7, %v8245_v32, %v8249_v23  ;;  %v7283_v3 = vshrl.u32 %v6940_v35, 16  ;;  %v7286_v22 = vshll.u32 %v6940_v35, 16  ;;  %v7292_v24 = vshll.u32 %v6941_v41, 16  ;;  %v6943_v23 = vld [vmem:[#allocation3 + $0xc0] sm:$0xf] }
 0x3df   : > { %v15144_v38 = vpop.f32.mrb[181].mxu0  ;;  %v10875_v59 = vcombine.low %v8240_v29, %v8250_v40  ;;  %9836 = vmatprep.mubr.bf16.mxu1 %v10843_v53  ;;  %v7296_v60 = vshrl.u32 %v6941_v41, 16  ;;  %v7302_v14 = vshll.u32 %v6942_v6, 16  ;;  %v7613_v30 = vrot.slane %v7456_v33, 5  ;;  %v6945_v20 = vld [vmem:[#allocation3 + $0xc8] sm:$0x1] }
 0x3e0   : > { %v15148_v34 = vpop.f32.mrb[182].mxu0  ;;  %v7285_v36 = vrot.slane %v7283_v3, 4  ;;  %v7288_v28 = vrot.slane %v7286_v22, 5  ;;  %v7294_v39 = vrot.slane %v7292_v24, 5  ;;  %v15159_v55 = vadd.f32 %v15110_v19, %v15108_v12  ;;  %v7888_v3 = vld [vmem:[#allocation3 + $0xcc] sm:$0xf] }
 0x3e1   : > { %v15151_v51 = vpop.f32.mrb[183].mxu0  ;;  %v15153_v52 = vpop.f32.mrb[148].mxu1  ;;  %9997 = vmatprep.mubr.bf16.mxu0 %v10875_v59  ;;  %v7298_v26 = vrot.slane %v7296_v60, 4  ;;  %v15163_v43 = vadd.f32 %v15096_v56, %v15092_v5  ;;  %v15166_v61 = vadd.f32 %v11646_v17, %v15112_v62  ;;  %v10828_v41 = vrot.slane %v7455_v63, 9  ;;  %v7889_v59 = vld [vmem:[#allocation3 + $0xd0] sm:$0xf] }
 0x3e2   : > { %v15155_v13 = vpop.f32.mrb[149].mxu1  ;;  %9998 = vmatmul.mubr.bf16.gmra.mrb[24].mxu0 %v12427_v47  ;;  %v7289_v54 = vor.u32 %v7288_v28, %v7285_v36  ;;  %v7615_v31 = vrot.slane %v7613_v30, 4  ;;  %v15172_v32 = vadd.f32 %v15106_v15, %v15104_v10  ;;  %v7616_v29 = vrot.slane %v7457_v4, 5  ;;  %v7890_v4 = vld [vmem:[#allocation3 + $0xd4] sm:$0x1] }
 0x3e3   : > { %v15168_v18 = vpop.f32.mrb[150].mxu1  ;;  %v7299_v35 = vor.u32 %v7298_v26, %v7294_v39  ;;  %v7307_v5 = vshrl.u32 %v6943_v23, 16  ;;  %v7310_v56 = vshll.u32 %v6943_v23, 16  ;;  %v7304_v17 = vrot.slane %v7302_v14, 5 }
 0x3e4   : > { %v15174_v12 = vpop.f32.mrb[151].mxu1  ;;  %v7290_v19 = vrot.slane %v7289_v54, 4  ;;  %v7614_v6 = vsel %vm12912_vm13, %v10828_v41, %v7613_v30  ;;  %v7316_v40 = vshll.u32 %v6944_v37, 16  ;;  %v7617_v15 = vsel %vm12912_vm13, %v7615_v31, %v7616_v29  ;;  %v8355_v54 = vld [vmem:[#allocation3 + $0x18] sm:$0xe] }
 0x3e5   : > { %v7300_v62 = vrot.slane %v7299_v35, 4  ;;  %v7309_v24 = vrot.slane %v7307_v5, 4  ;;  %v7312_v33 = vrot.slane %v7310_v56, 5  ;;  %v7320_v36 = vshrl.u32 %v6944_v37, 16  ;;  %v8356_v5 = vld [vmem:[#allocation3 + $0x1c] sm:$0xf] }
 0x3e6   : > { %v15176_v53 = vpop.f32.mrb[184].mxu0  ;;  %v7295_v10 = vsel %vm12872_vm7, %v7290_v19, %v7294_v39  ;;  %v7318_v63 = vrot.slane %v7316_v40, 5  ;;  %v7326_v28 = vshll.u32 %v6945_v20, 16  ;;  %v8252_v39 = vshrl.u32 %v7888_v3, 16 }
 0x3e7   : > { %v15180_v22 = vpop.f32.mrb[185].mxu0  ;;  %v7305_v60 = vsel %vm12872_vm7, %v7300_v62, %v7304_v17  ;;  %v7313_v30 = vor.u32 %v7312_v33, %v7309_v24  ;;  %v8255_v23 = vshll.u32 %v7888_v3, 16  ;;  %v10844_v41 = vcombine.low %v7614_v6, %v7617_v15 }
 0x3e8   : > { %v15186_v47 = vpop.f32.mrb[186].mxu0  ;;  %v10811_v14 = vcombine.low %v7295_v10, %v7305_v60  ;;  %v7322_v31 = vrot.slane %v7320_v36, 4  ;;  %v8261_v19 = vshll.u32 %v7889_v59, 16  ;;  %v8265_v29 = vshrl.u32 %v7889_v59, 16  ;;  %v8357_v60 = vld [vmem:[#allocation3 + $0x20] sm:$0x1] }
 0x3e9   : > { %v15190_v26 = vpop.f32.mrb[187].mxu0  ;;  %v15192_v35 = vpop.f32.mrb[152].mxu1  ;;  %v7314_v62 = vrot.slane %v7313_v30, 4  ;;  %v8254_v37 = vrot.slane %v8252_v39, 4  ;;  %v8257_v20 = vrot.slane %v8255_v23, 5  ;;  %v8271_v17 = vshll.u32 %v7890_v4, 16 }
 0x3ea   : > { %v11543_v56 = vpop.f32.mrb[153].mxu1  ;;  %9837 = vmatmul.mubr.bf16.gmra.mrb[248].mxu1 %v10811_v14  ;;  %v7323_v10 = vor.u32 %v7322_v31, %v7318_v63  ;;  %v7328_v24 = vrot.slane %v7326_v28, 5  ;;  %v8263_v33 = vrot.slane %v8261_v19, 5  ;;  %v8267_v3 = vrot.slane %v8265_v29, 4 }
 0x3eb   : > { %v11545_v40 = vpop.f32.mrb[154].mxu1  ;;  %9844 = vmatprep.mubr.bf16.mxu1 %v10844_v41  ;;  %v7319_v6 = vsel %vm12872_vm7, %v7314_v62, %v7318_v63  ;;  %v8258_v15 = vor.u32 %v8257_v20, %v8254_v37  ;;  %v10877_v59 = vrot.slane %v8355_v54, 9  ;;  %v8453_v36 = vrot.slane %v8356_v5, 5  ;;  %v8360_v20 = vld [vmem:[#allocation3 + $0x2c] sm:$0x1] }
 0x3ec   : > { %v11546_v45 = vpop.f32.mrb[155].mxu1  ;;  %v7324_v14 = vrot.slane %v7323_v10, 4  ;;  %v8268_v30 = vor.u32 %v8267_v3, %v8263_v33  ;;  %v8273_v39 = vrot.slane %v8271_v17, 5  ;;  %v15200_v4 = vadd.f32 %v15144_v38, %v15136_v48  ;;  %v8362_v17 = vld [vmem:[#allocation3 + $0x34] sm:$0xf] }
 0x3ed   : > { %v8259_v23 = vrot.slane %v8258_v15, 4  ;;  %v8455_v41 = vrot.slane %v8453_v36, 4  ;;  %v8456_v31 = vrot.slane %v8357_v60, 5  ;;  %v15204_v19 = vadd.f32 %v15155_v13, %v15153_v52  ;;  %v8363_v15 = vld [vmem:[#allocation3 + $0x38] sm:$0x1] }
 0x3ee   : > { %v15196_v7 = vpop.f32.mrb[188].mxu0  ;;  %v7329_v54 = vsel %vm12872_vm7, %v7324_v14, %v7328_v24  ;;  %v8269_v29 = vrot.slane %v8268_v30, 4  ;;  %v15210_v5 = vadd.f32 %v15151_v51, %v15148_v34  ;;  %v15214_v48 = vadd.f32 %v15174_v12, %v15168_v18  ;;  %v12429_v18 = vld [vmem:[#allocation3 + $0xcc] sm:$0xff]   ;;  %v8358_v12 = vld [vmem:[#allocation3 + $0x24] sm:$0xe] }
 0x3ef   : > { %v11661_v28 = vpop.f32.mrb[189].mxu0  ;;  %v10812_v62 = vcombine.low %v7319_v6, %v7329_v54  ;;  %v8264_v37 = vsel %vm12872_vm7, %v8259_v23, %v8263_v33  ;;  %v8454_v52 = vsel %vm12912_vm13, %v10877_v59, %v8453_v36  ;;  %v8457_v13 = vsel %vm12912_vm13, %v8455_v41, %v8456_v31  ;;  %v8361_v6 = vld [vmem:[#allocation3 + $0x30] sm:$0xe] }
 0x3f0   : > { %v11663_v63 = vpop.f32.mrb[190].mxu0  ;;  %v8274_v34 = vsel %vm12872_vm7, %v8269_v29, %v8273_v39  ;;  %v10893_v51 = vcombine.low %v8454_v52, %v8457_v13  ;;  %v15953_v33 = vrot.slane %v15128_v58, 5  ;;  %v8463_v36 = vrot.slane %v8360_v20, 5  ;;  %v8368_v29 = vld [vmem:[#allocation3 + $0x4c] sm:$0xf] }
 0x3f1   : > { %v11664_v38 = vpop.f32.mrb[191].mxu0  ;;  %v11548_v10 = vpop.f32.mrb[156].mxu1  ;;  %v10876_v3 = vcombine.low %v8264_v37, %v8274_v34  ;;  %v8467_v14 = vrot.slane %v8362_v17, 5  ;;  %v15228_v30 = vadd.f32 %v15180_v22, %v15176_v53  ;;  %v10878_v23 = vrot.slane %v8358_v12, 9  ;;  %v8366_v12 = vld [vmem:[#allocation3 + $0x44] sm:$0x1] }
 0x3f2   : > { %v11549_v24 = vpop.f32.mrb[157].mxu1  ;;  %9845 = vmatmul.mubr.bf16.gmra.mrb[252].mxu1 %v10812_v62  ;;  %v8462_v60 = vrot.slane %v15953_v33, 4  ;;  %v15231_v41 = vadd.f32 %v11543_v56, %v15192_v35  ;;  %v15235_v31 = vadd.f32 %v15190_v26, %v15186_v47  ;;  %v15237_v54 = vadd.f32 %v11546_v45, %v11545_v40  ;;  %v8364_v56 = vld [vmem:[#allocation3 + $0x3c] sm:$0xe] }
 0x3f3   : > { %v11551_v59 = vpop.f32.mrb[158].mxu1  ;;  %12043 = vmatprep.mubr.bf16.mxu1 %v10893_v51  ;;  %10005 = vmatprep.mubr.bf16.mxu0 %v10876_v3  ;;  %v10879_v22 = vrot.slane %v8361_v6, 9  ;;  %v8469_v37 = vrot.slane %v8467_v14, 4  ;;  %v8470_v52 = vrot.slane %v8363_v15, 5  ;;  %v8474_v20 = vrot.slane %v8365_v50, 5 }
 0x3f4   : > { %v11552_v39 = vpop.f32.mrb[159].mxu1  ;;  %10006 = vmatmul.mubr.bf16.gmra.mrb[28].mxu0 %v12429_v18  ;;  %v8464_v53 = vsel %vm12912_vm13, %v8462_v60, %v8463_v36  ;;  %v15954_v35 = vmov %v15953_v33  ;;  %v8481_v40 = vrot.slane %v8368_v29, 5  ;;  %v8369_v3 = vld [vmem:[#allocation3 + $0x50] sm:$0x1]  ;;  %v15250_v33 = vadd.f32 %v11661_v28, %v15196_v7  ;;  %v15260_v7 = vld [vmem:[#allocation3 + $0x64] sm:$0xf] }
 0x3f5   : > { %v8461_v47 = vsel %vm12912_vm13, %v10878_v23, %v15954_v35  ;;  %v8468_v45 = vsel %vm12912_vm13, %v10879_v22, %v8467_v14  ;;  %v8471_v26 = vsel %vm12912_vm13, %v8469_v37, %v8470_v52  ;;  %v8476_v60 = vrot.slane %v8474_v20, 4  ;;  %v15256_v14 = vld [vmem:[#allocation3 + $0x58] sm:$0xf]  ;;  %v8367_v23 = vld [vmem:[#allocation3 + $0x48] sm:$0xe] }
 0x3f6   : > { %v11666_v62 = vpop.f32.mrb[192].mxu0  ;;  %v10894_v51 = vcombine.low %v8461_v47, %v8464_v53  ;;  %v10895_v18 = vcombine.low %v8468_v45, %v8471_v26  ;;  %v8483_v6 = vrot.slane %v8481_v40, 4  ;;  %v15252_v15 = vadd.f32 %v11549_v24, %v11548_v10 }
 0x3f7   : > { %v11667_v13 = vpop.f32.mrb[193].mxu0  ;;  %v15254_v36 = vadd.f32 %v11664_v38, %v11663_v63  ;;  %v15258_v29 = vadd.f32 %v11552_v39, %v11551_v59  ;;  %v8477_v22 = vrot.slane %v8366_v12, 5  ;;  %v8484_v37 = vrot.slane %v8369_v3, 5  ;;  %v8372_v12 = vld [vmem:[#allocation3 + $0x5c] sm:$0x1] }
 0x3f8   : > { %v11669_v17 = vpop.f32.mrb[194].mxu0  ;;  %v10880_v52 = vrot.slane %v8364_v56, 9  ;;  %v8488_v10 = vrot.slane %v15256_v14, 5  ;;  %v10881_v38 = vrot.slane %v8367_v23, 9  ;;  %v15267_v59 = vadd.f32 %v11667_v13, %v11666_v62  ;;  %v8370_v13 = vld [vmem:[#allocation3 + $0x54] sm:$0xe] }
 0x3f9   : > { %v11670_v34 = vpop.f32.mrb[195].mxu0  ;;  %v11554_v58 = vpop.f32.mrb[160].mxu1  ;;  %v8478_v63 = vsel %vm12912_vm13, %v8476_v60, %v8477_v22  ;;  %v8485_v35 = vsel %vm12912_vm13, %v8483_v6, %v8484_v37  ;;  %v8495_v47 = vrot.slane %v15260_v7, 5  ;;  %v8373_v22 = vld [vmem:[#allocation3 + $0x60] sm:$0xe] }
 0x3fa   : > { %v11555_v50 = vpop.f32.mrb[161].mxu1  ;;  %12044 = vmatmul.mubr.bf16.vlgmr.msra.gmra.mrb[0].mxu1 %v10894_v51  ;;  %15955 = vst [vmem:[#allocation42_spill] sm:$0xff] %v15267_v59  ;;  %v15272_v26 = vadd.f32 %v11670_v34, %v11669_v17  ;;  %v8482_v62 = vsel %vm12912_vm13, %v10881_v38, %v8481_v40  ;;  %v8490_v6 = vrot.slane %v8488_v10, 4  ;;  %v8375_v34 = vld [vmem:[#allocation3 + $0x68] sm:$0x1] }
 0x3fb   : > { %v11557_v53 = vpop.f32.mrb[162].mxu1  ;;  %12047 = vmatprep.mubr.bf16.mxu1 %v10895_v18  ;;  %v15270_v45 = vadd.f32 %v11555_v50, %v11554_v58  ;;  %v8475_v18 = vsel %vm12912_vm13, %v10880_v52, %v8474_v20  ;;  %v15282_v58 = vadd.f32 %v15044_v9, %v14986_v42  ;;  %v10897_v17 = vcombine.low %v8482_v62, %v8485_v35  ;;  %v15284_v50 = vld [vmem:[#allocation3 + $0x70] sm:$0xf]  ;;  %v15296_v52 = vld [vmem:[#allocation3 + $0x7c] sm:$0xf] }
 0x3fc   : > { %v11558_v28 = vpop.f32.mrb[163].mxu1  ;;  %15956 = vst [vmem:[#allocation36_spill] sm:$0xff] %v15272_v26  ;;  %v10896_v60 = vcombine.low %v8475_v18, %v8478_v63  ;;  %v15288_v20 = vadd.f32 %v15060_v1, %v14986_v42  ;;  %v8497_v40 = vrot.slane %v8495_v47, 4  ;;  %v15294_v9 = vadd.f32 %v15082_v49, %v14986_v42  ;;  %v15319_v62 = vld [vmem:[#allocation3 + $0x88] sm:$0xf] }
 0x3fd   : > { %v15274_v56 = vadd.f32 %v11558_v28, %v11557_v53  ;;  %v8491_v53 = vrot.slane %v8372_v12, 5  ;;  %v10882_v28 = vrot.slane %v8370_v13, 9  ;;  %v8498_v18 = vrot.slane %v8375_v34, 5  ;;  %v15321_v13 = vld [vmem:[#allocation3 + $0x94] sm:$0xf] }
 0x3fe   : > { %v11672_v24 = vpop.f32.mrb[196].mxu0  ;;  %v15309_v49 = vadd.f32 %v15102_v11, %v14986_v42  ;;  %v15366_v26 = vld [vmem:[#allocation3 + $0xa0] sm:$0xf] }
 0x3ff   : > { %v11673_v39 = vpop.f32.mrb[197].mxu0  ;;  %v8492_v35 = vsel %vm12912_vm13, %v8490_v6, %v8491_v53  ;;  %v8489_v11 = vsel %vm12912_vm13, %v10882_v28, %v8488_v10 }
 0x400   : > { %v11675_v51 = vpop.f32.mrb[198].mxu0  ;;  %v15290_v37 = vadd.f32 %v11673_v39, %v11672_v24  ;;  %v8502_v24 = vrot.slane %v15284_v50, 5  ;;  %v15334_v50 = vadd.f32 %v15172_v32, %v14986_v42  ;;  %v15346_v32 = vadd.f32 %v15204_v19, %v14986_v42  ;;  %v8382_v19 = vld [vmem:[#allocation3 + $0x84] sm:$0xe] }
 0x401   : > { %v11676_v3 = vpop.f32.mrb[199].mxu0  ;;  %v11560_v14 = vpop.f32.mrb[164].mxu1 }
 0x402   : > { %v11561_v23 = vpop.f32.mrb[165].mxu1  ;;  %12048 = vmatmul.mubr.bf16.gmra.mrb[4].mxu1 %v10896_v60  ;;  %15957 = vst [vmem:[#allocation38_spill] sm:$0xff] %v15290_v37  ;;  %v15300_v38 = vadd.f32 %v11676_v3, %v11675_v51  ;;  %v15313_v60 = vadd.f32 %v15126_v46, %v14986_v42  ;;  %v15317_v51 = vadd.f32 %v15142_v2, %v14986_v42  ;;  %v10883_v3 = vrot.slane %v8373_v22, 9  ;;  %v8379_v22 = vld [vmem:[#allocation3 + $0x78] sm:$0xe] }
 0x403   : > { %v11563_v7 = vpop.f32.mrb[166].mxu1  ;;  %12051 = vmatprep.mubr.bf16.mxu1 %v10897_v17  ;;  %v15298_v63 = vadd.f32 %v11561_v23, %v11560_v14  ;;  %v15325_v14 = vadd.f32 %v15163_v43, %v14986_v42  ;;  %v8499_v46 = vsel %vm12912_vm13, %v8497_v40, %v8498_v18  ;;  %v8376_v17 = vld [vmem:[#allocation3 + $0x6c] sm:$0xe]  ;;  %v8509_v2 = vrot.slane %v15296_v52, 5  ;;  %v8378_v43 = vld [vmem:[#allocation3 + $0x74] sm:$0x1] }
 0x404   : > { %15958 = vst [vmem:[#allocation43_spill] sm:$0xff] %v15300_v38  ;;  %v11564_v1 = vpop.f32.mrb[167].mxu1  ;;  %v10898_v23 = vcombine.low %v8489_v11, %v8492_v35  ;;  %v8496_v53 = vsel %vm12912_vm13, %v10883_v3, %v8495_v47  ;;  %v8504_v28 = vrot.slane %v8502_v24, 4  ;;  %v8516_v40 = vrot.slane %v15319_v62, 5  ;;  %v8384_v3 = vld [vmem:[#allocation3 + $0x8c] sm:$0x1] }
 0x405   : > { %v15305_v39 = vadd.f32 %v11564_v1, %v11563_v7  ;;  %v8381_v1 = vld [vmem:[#allocation3 + $0x80] sm:$0x1]  ;;  %v8523_v52 = vrot.slane %v15321_v13, 5  ;;  %v15350_v47 = vadd.f32 %v15214_v48, %v14986_v42  ;;  %v15354_v35 = vadd.f32 %v15231_v41, %v14986_v42 }
 0x406   : > { %v11678_v12 = vpop.f32.mrb[200].mxu0  ;;  %v15358_v13 = vadd.f32 %v15237_v54, %v14986_v42  ;;  %v8511_v11 = vrot.slane %v8509_v2, 4  ;;  %v15362_v48 = vadd.f32 %v15252_v15, %v14986_v42  ;;  %v10884_v41 = vrot.slane %v8376_v17, 9 }
 0x407   : > { %v11679_v6 = vpop.f32.mrb[201].mxu0  ;;  %v15374_v15 = vadd.f32 %v15270_v45, %v14986_v42 }
 0x408   : > { %v11681_v34 = vpop.f32.mrb[202].mxu0  ;;  %v15338_v7 = vadd.f32 %v11679_v6, %v11678_v12  ;;  %v10899_v12 = vcombine.low %v8496_v53, %v8499_v46  ;;  %v8505_v6 = vrot.slane %v8378_v43, 5  ;;  %v10885_v46 = vrot.slane %v8379_v22, 9 }
 0x409   : > { %v11682_v10 = vpop.f32.mrb[203].mxu0  ;;  %v11566_v18 = vpop.f32.mrb[168].mxu1  ;;  %v8512_v53 = vrot.slane %v8381_v1, 5  ;;  %v8525_v43 = vrot.slane %v8523_v52, 4  ;;  %15961 = vst [vmem:[#allocation39_spill] sm:$0xff] %v15374_v15  ;;  %v8503_v17 = vsel %vm12912_vm13, %v10884_v41, %v8502_v24  ;;  %v8519_v1 = vrot.slane %v8384_v3, 5 }
 0x40a   : > { %15959 = vst [vmem:[#allocation44_spill] sm:$0xff] %v15338_v7  ;;  %v15342_v25 = vadd.f32 %v11682_v10, %v11681_v34  ;;  %v11567_v62 = vpop.f32.mrb[169].mxu1  ;;  %12052 = vmatmul.mubr.bf16.gmra.mrb[8].mxu1 %v10898_v23  ;;  %v8385_v34 = vld [vmem:[#allocation3 + $0x90] sm:$0xe]  ;;  %v8387_v7 = vld [vmem:[#allocation3 + $0x98] sm:$0x1]  ;;  %v8506_v54 = vsel %vm12912_vm13, %v8504_v28, %v8505_v6  ;;  %v8510_v22 = vsel %vm12912_vm13, %v10885_v46, %v8509_v2 }
 0x40b   : > { %v11568_v10 = vadd.f32 %v11567_v62, %v11566_v18  ;;  %12055 = vmatprep.mubr.bf16.mxu1 %v10899_v12  ;;  %v8518_v23 = vrot.slane %v8516_v40, 4  ;;  %v15370_v62 = vadd.f32 %v15258_v29, %v14986_v42  ;;  %v15380_v28 = vld [vmem:[#allocation3 + $0xac] sm:$0xf]  ;;  %v8526_v12 = vrot.slane %v8387_v7, 5 }
 0x40c   : > { %15960 = vst [vmem:[#allocation46_spill] sm:$0xff] %v15342_v25  ;;  %v11569_v25 = vpop.f32.mrb[170].mxu1  ;;  %v10900_v59 = vcombine.low %v8503_v17, %v8506_v54  ;;  %v10886_v42 = vrot.slane %v8382_v19, 9  ;;  %v10887_v45 = vrot.slane %v8385_v34, 9  ;;  %v8530_v15 = vrot.slane %v15366_v26, 5 }
 0x40d   : > { %v11570_v38 = vpop.f32.mrb[171].mxu1  ;;  %v8520_v2 = vsel %vm12912_vm13, %v8518_v23, %v8519_v1  ;;  %v15391_v41 = vsel %vm12912_vm13, %v8525_v43, %v8526_v12  ;;  %v15399_v19 = vld [vmem:[%s15808_s4] ss:$0 sm:$0xff]  ;;  %v8394_v26 = vld [vmem:[#allocation3 + $0xb4] sm:$0xe] }
 0x40e   : > { %v11571_v37 = vadd.f32 %v11570_v38, %v11569_v25  ;;  %v11684_v18 = vpop.f32.mrb[204].mxu0  ;;  %v8513_v38 = vsel %vm12912_vm13, %v8511_v11, %v8512_v53  ;;  %v8537_v11 = vrot.slane %v15380_v28, 5  ;;  %v9472_v34 = vadd.f32 %v15399_v19, %v15274_v56 }
 0x40f   : > { %v11685_v25 = vpop.f32.mrb[205].mxu0  ;;  %v10901_v46 = vcombine.low %v8510_v22, %v8513_v38  ;;  %v9477_v53 = vadd.f32 %v15399_v19, %v15298_v63  ;;  %v9480_v54 = vadd.f32 %v15399_v19, %v15305_v39  ;;  %v8517_v43 = vsel %vm12912_vm13, %v10886_v42, %v8516_v40 }
 0x410   : > { %v15384_v29 = vadd.f32 %v11685_v25, %v11684_v18  ;;  %v11687_v6 = vpop.f32.mrb[206].mxu0  ;;  %v8524_v18 = vsel %vm12912_vm13, %v10887_v45, %v8523_v52  ;;  %v15413_v56 = vadd.f32 %v15032_v0, %v15282_v58  ;;  %v10902_v22 = vcombine.low %v8517_v43, %v8520_v2  ;;  %v15966_v2 = vld [vmem:[#allocation43_spill] sm:$0xff] }
 0x411   : > { %v11688_v24 = vpop.f32.mrb[207].mxu0  ;;  %v11572_v3 = vpop.f32.mrb[172].mxu1  ;;  %v10903_v63 = vcombine.low %v8524_v18, %v15391_v41  ;;  %v8532_v39 = vrot.slane %v8530_v15, 4  ;;  %v15420_v40 = vadd.f32 %v15048_v44, %v15288_v20  ;;  %v9485_v52 = vadd.f32 %v15399_v19, %v11568_v10  ;;  %v15967_v18 = vld [vmem:[#allocation44_spill] sm:$0xff] }
 0x412   : > { %v15394_v7 = vadd.f32 %v11688_v24, %v11687_v6  ;;  %v11573_v23 = vpop.f32.mrb[173].mxu1  ;;  %12056 = vmatmul.mubr.bf16.gmra.mrb[12].mxu1 %v10900_v59  ;;  %v8539_v38 = vrot.slane %v8537_v11, 4  ;;  %v15427_v58 = vadd.f32 %v15078_v27, %v15294_v9  ;;  %v9488_v12 = vadd.f32 %v15399_v19, %v11571_v37 }
 0x413   : > { %v11574_v17 = vadd.f32 %v11573_v23, %v11572_v3  ;;  %v11575_v25 = vpop.f32.mrb[174].mxu1  ;;  %12059 = vmatprep.mubr.bf16.mxu1 %v10901_v46  ;;  %v15432_v42 = vadd.f32 %v15090_v57, %v15309_v49  ;;  %v15436_v44 = vadd.f32 %v15122_v8, %v15313_v60  ;;  %v15440_v20 = vadd.f32 %v15134_v21, %v15317_v51  ;;  %v8390_v51 = vld [vmem:[#allocation3 + $0xa4] sm:$0x1]  ;;  %v8391_v3 = vld [vmem:[#allocation3 + $0xa8] sm:$0xe] }
 0x414   : > { %v11576_v59 = vpop.f32.mrb[175].mxu1  ;;  %v15448_v45 = vadd.f32 %v15159_v55, %v15325_v14  ;;  %v15452_v8 = vadd.f32 %v15166_v61, %v15334_v50  ;;  %v15456_v21 = vadd.f32 %v15200_v4, %v15346_v32  ;;  %v15460_v49 = vadd.f32 %v15210_v5, %v15350_v47  ;;  %v10245_v50 = vld [vmem:[%s15809_s5 + $0x8] sm:$0xff]  ;;  %v8388_v32 = vld [vmem:[#allocation3 + $0x9c] sm:$0xe]  ;;  %v15499_v46 = vld [vmem:[#allocation3 + $0xb8] sm:$0xf] }
 0x415   : > { %v11577_v1 = vadd.f32 %v11576_v59, %v11575_v25  ;;  %v9493_v10 = vadd.f32 %v15399_v19, %v11574_v17  ;;  %v15464_v60 = vadd.f32 %v15228_v30, %v15354_v35  ;;  %v15470_v61 = vadd.f32 %v15235_v31, %v15358_v13  ;;  %v10244_v30 = vld [vmem:[%s15809_s5] sm:$0xff]  ;;  %v8393_v47 = vld [vmem:[#allocation3 + $0xb0] sm:$0x1]  ;;  %v15962_v35 = vld [vmem:[#allocation39_spill] sm:$0xff] }
 0x416   : > { %v11690_v0 = vpop.f32.mrb[208].mxu0  ;;  %v15474_v4 = vadd.f32 %v15250_v33, %v15362_v48  ;;  %v15478_v5 = vadd.f32 %v15254_v36, %v15370_v62  ;;  %v15963_v13 = vld [vmem:[#allocation42_spill] sm:$0xff]  ;;  %v15964_v33 = vld [vmem:[#allocation36_spill] sm:$0xff]  ;;  %v15497_v41 = vadd.f32 %v15966_v2, %v9480_v54  ;;  %v15502_v17 = vadd.f32 %v15967_v18, %v9485_v52 }
 0x417   : > { %v11691_v6 = vpop.f32.mrb[209].mxu0  ;;  %v9496_v27 = vadd.f32 %v15399_v19, %v11577_v1  ;;  %v15488_v24 = vadd.f32 %v15963_v13, %v15962_v35  ;;  %v15491_v48 = vadd.f32 %v15964_v33, %v9472_v34  ;;  %v15965_v36 = vld [vmem:[#allocation38_spill] sm:$0xff]  ;;  %v8533_v34 = vrot.slane %v8390_v51, 5  ;;  %v15507_v1 = vld [vmem:[#allocation3 + $0xc4] sm:$0xf] }
 0x418   : > { %v15444_v9 = vadd.f32 %v11691_v6, %v11690_v0  ;;  %v11693_v37 = vpop.f32.mrb[210].mxu0  ;;  %v15494_v62 = vadd.f32 %v15965_v36, %v9477_v53  ;;  %v15968_v25 = vld [vmem:[#allocation46_spill] sm:$0xff]  ;;  %v12532_v0 = vmov 0.0|0.0   ;;  %v12111_v54 = vpack.c.bf16 %v10245_v50, %v10244_v30  ;;  %v8396_v35 = vld [vmem:[#allocation3 + $0xbc] sm:$0x1] }
 0x419   : > { %v11694_v57 = vpop.f32.mrb[211].mxu0  ;;  %v11578_v55 = vpop.f32.mrb[176].mxu1  ;;  %v15505_v59 = vadd.f32 %v15968_v25, %v9488_v12  ;;  %12110 = vmatprep.subr.bf16.mxu0 %v12532_v0  ;;  %v8540_v6 = vrot.slane %v8393_v47, 5  ;;  %v10888_v52 = vrot.slane %v8388_v32, 9  ;;  %v8534_v12 = vsel %vm12912_vm13, %v8532_v39, %v8533_v34  ;;  %v8401_v13 = vld [vmem:[#allocation3 + $0xd0] sm:$0xf] }
 0x41a   : > { %v15466_v14 = vadd.f32 %v11694_v57, %v11693_v37  ;;  %v11579_v31 = vpop.f32.mrb[177].mxu1  ;;  %12060 = vmatmul.mubr.bf16.gmra.mrb[16].mxu1 %v10902_v22  ;;  %v15511_v22 = vadd.f32 %v15384_v29, %v9493_v10  ;;  %12112 = vmatpush3.bf16.msra.mxu0 %v12111_v54  ;;  %v8551_v30 = vrot.slane %v15507_v1, 5  ;;  %v15522_v10 = vadd.f32 %v15394_v7, %v9496_v27  ;;  %v8399_v2 = vld [vmem:[#allocation3 + $0xc8] sm:$0x1]  ;;  %v8402_v54 = vld [vmem:[#allocation3 + $0xd4] sm:$0x1] }
 0x41b   : > { %v11580_v23 = vadd.f32 %v11579_v31, %v11578_v55  ;;  %v11581_v43 = vpop.f32.mrb[178].mxu1  ;;  %12063 = vmatprep.mubr.bf16.mxu1 %v10903_v63  ;;  %v10889_v55 = vrot.slane %v8391_v3, 9  ;;  %v8544_v63 = vrot.slane %v15499_v46, 5  ;;  %v8541_v31 = vsel %vm12912_vm13, %v8539_v38, %v8540_v6  ;;  %12113 = vmatprep.subr.bf16.mxu0 %v12532_v0  ;;  %v8397_v46 = vld [vmem:[#allocation3 + $0xc0] sm:$0xe] }
 0x41c   : > { %v11582_v53 = vpop.f32.mrb[179].mxu1  ;;  %v8531_v39 = vsel %vm12912_vm13, %v10888_v52, %v8530_v15  ;;  %v8553_v15 = vrot.slane %v8551_v30, 4  ;;  %v8547_v25 = vrot.slane %v8396_v35, 5  ;;  %v8554_v1 = vrot.slane %v8399_v2, 5 }
 0x41d   : > { %v11583_v37 = vadd.f32 %v11582_v53, %v11581_v43  ;;  %v10904_v47 = vcombine.low %v8531_v39, %v8534_v12  ;;  %v8538_v38 = vsel %vm12912_vm13, %v10889_v55, %v8537_v11  ;;  %v8546_v27 = vrot.slane %v8544_v63, 4  ;;  %v8400_v53 = vld [vmem:[#allocation3 + $0xcc] sm:$0xe] }
 0x41e   : > { %v11696_v57 = vpop.f32.mrb[212].mxu0  ;;  %v10905_v7 = vcombine.low %v8538_v38, %v8541_v31  ;;  %v9501_v43 = vadd.f32 %v15399_v19, %v11580_v23  ;;  %v8558_v11 = vrot.slane %v8401_v13, 5  ;;  %v10890_v52 = vrot.slane %v8394_v26, 9 }
 0x41f   : > { %v11697_v51 = vpop.f32.mrb[213].mxu0  ;;  %v8548_v12 = vsel %vm12912_vm13, %v8546_v27, %v8547_v25  ;;  %v10891_v55 = vrot.slane %v8397_v46, 9  ;;  %v8555_v23 = vsel %vm12912_vm13, %v8553_v15, %v8554_v1  ;;  %v9504_v31 = vadd.f32 %v15399_v19, %v11583_v37  ;;  %v10247_v1 = vld [vmem:[%s15809_s5 + $0x18] sm:$0xff] }
 0x420   : > { %v15519_v50 = vadd.f32 %v11697_v51, %v11696_v57  ;;  %v11699_v29 = vpop.f32.mrb[214].mxu0  ;;  %v10892_v38 = vrot.slane %v8400_v53, 9  ;;  %v8560_v35 = vrot.slane %v8558_v11, 4  ;;  %v8561_v13 = vrot.slane %v8402_v54, 5 }
 0x421   : > { %v11700_v32 = vpop.f32.mrb[215].mxu0  ;;  %v11584_v33 = vpop.f32.mrb[180].mxu1  ;;  %v8552_v27 = vsel %vm12912_vm13, %v10891_v55, %v8551_v30 }
 0x422   : > { %v15533_v36 = vadd.f32 %v11700_v32, %v11699_v29  ;;  %v11585_v3 = vpop.f32.mrb[181].mxu1  ;;  %12064 = vmatmul.mubr.bf16.gmra.mrb[20].mxu1 %v10904_v47  ;;  %v15544_v32 = vadd.f32 %v15444_v9, %v9501_v43  ;;  %v8545_v47 = vsel %vm12912_vm13, %v10890_v52, %v8544_v63  ;;  %v10907_v37 = vcombine.low %v8552_v27, %v8555_v23 }
 0x423   : > { %v11586_v18 = vadd.f32 %v11585_v3, %v11584_v33  ;;  %v11587_v28 = vpop.f32.mrb[182].mxu1  ;;  %12067 = vmatprep.mubr.bf16.mxu1 %v10905_v7  ;;  %v10906_v7 = vcombine.low %v8545_v47, %v8548_v12  ;;  %v15551_v9 = vadd.f32 %v15466_v14, %v9504_v31  ;;  %v8559_v63 = vsel %vm12912_vm13, %v10892_v38, %v8558_v11 }
 0x424   : > { %v11588_v34 = vpop.f32.mrb[183].mxu1  ;;  %v8562_v43 = vsel %vm12912_vm13, %v8560_v35, %v8561_v13 }
 0x425   : > { %v11589_v6 = vadd.f32 %v11588_v34, %v11587_v28  ;;  %v10246_v34 = vld [vmem:[%s15809_s5 + $0x10] sm:$0xff]  ;;  %v9509_v14 = vadd.f32 %v15399_v19, %v11586_v18 }
 0x426   : > { %v11702_v57 = vpop.f32.mrb[216].mxu0  ;;  %v12114_v54 = vpack.c.bf16 %v10247_v1, %v10246_v34 }
 0x427   : > { %v11703_v51 = vpop.f32.mrb[217].mxu0  ;;  %v15567_v31 = vadd.f32 %v15519_v50, %v9509_v14 }
 0x428   : > { %v15541_v29 = vadd.f32 %v11703_v51, %v11702_v57  ;;  %v11705_v39 = vpop.f32.mrb[218].mxu0  ;;  %v10908_v57 = vcombine.low %v8559_v63, %v8562_v43  ;;  %12115 = vmatpush3.bf16.msra.mxu0 %v12114_v54  ;;  %v9512_v51 = vadd.f32 %v15399_v19, %v11589_v6  ;;  %v15970_v54 = vld [vmem:[#allocation37_spill] sm:$0xff] }
 0x429   : > { %v11706_v33 = vpop.f32.mrb[219].mxu0  ;;  %v11590_v2 = vpop.f32.mrb[184].mxu1  ;;  %12116 = vmatprep.subr.bf16.mxu0 %v12532_v0 }
 0x42a   : > { %v11707_v3 = vadd.f32 %v11706_v33, %v11705_v39  ;;  %v11591_v26 = vpop.f32.mrb[185].mxu1  ;;  %12068 = vmatmul.mubr.bf16.gmra.mrb[24].mxu1 %v10906_v7  ;;  %v15570_v33 = vadd.f32 %v15533_v36, %v9512_v51 }
 0x42b   : > { %v11592_v46 = vadd.f32 %v11591_v26, %v11590_v2  ;;  %v11593_v15 = vpop.f32.mrb[186].mxu1  ;;  %12071 = vmatprep.mubr.bf16.mxu1 %v10907_v37 }
 0x42c   : > { %v11594_v28 = vpop.f32.mrb[187].mxu1 }
 0x42d   : > { %v11595_v25 = vadd.f32 %v11594_v28, %v11593_v15  ;;  %v9517_v6 = vadd.f32 %v15399_v19, %v11592_v46  ;;  %v15969_v28 = vld [vmem:[#allocation35_spill] sm:$0xff] }
 0x42e   : > { %v11708_v30 = vpop.f32.mrb[220].mxu0 }
 0x42f   : > { %v11709_v53 = vpop.f32.mrb[221].mxu0  ;;  %v9520_v14 = vadd.f32 %v15399_v19, %v11595_v25  ;;  %v15576_v36 = vadd.f32 %v15541_v29, %v9517_v6  ;;  %v10248_v29 = vld [vmem:[%s15809_s5 + $0x20] sm:$0xff]  ;;  %v10249_v25 = vld [vmem:[%s15809_s5 + $0x28] sm:$0xff] }
 0x430   : > { %v11710_v11 = vadd.f32 %v11709_v53, %v11708_v30  ;;  %v11711_v52 = vpop.f32.mrb[222].mxu0 }
 0x431   : > { %v11712_v16 = vpop.f32.mrb[223].mxu0  ;;  %v11596_v12 = vpop.f32.mrb[188].mxu1 }
 0x432   : > { %v11713_v55 = vadd.f32 %v11712_v16, %v11711_v52  ;;  %v11597_v23 = vpop.f32.mrb[189].mxu1  ;;  %12072 = vmatmul.mubr.bf16.gmra.mrb[28].mxu1 %v10908_v57 }
 0x433   : > { %v11598_v39 = vadd.f32 %v11597_v23, %v11596_v12  ;;  %v11599_v18 = vpop.f32.mrb[190].mxu1 }
 0x434   : > { %v11600_v47 = vpop.f32.mrb[191].mxu1 }
 0x435   : > { %v11601_v38 = vadd.f32 %v11600_v47, %v11599_v18  ;;  %v9525_v23 = vadd.f32 %v15399_v19, %v11598_v39  ;;  %v15580_v47 = vadd.f32 %v11707_v3, %v9520_v14 }
 0x436   : > { %v11842_v35 = vpop.f32.mrb[224].mxu0 }
 0x437   : > { %v11843_v13 = vpop.f32.mrb[225].mxu0  ;;  %v9528_v39 = vadd.f32 %v15399_v19, %v11601_v38 }
 0x438   : > { %v11844_v7 = vadd.f32 %v11843_v13, %v11842_v35  ;;  %v11845_v27 = vpop.f32.mrb[226].mxu0 }
 0x439   : > { %v11846_v2 = vpop.f32.mrb[227].mxu0  ;;  %v11730_v37 = vpop.f32.mrb[192].mxu1 }
 0x43a   : > { %v11847_v26 = vadd.f32 %v11846_v2, %v11845_v27  ;;  %v11731_v15 = vpop.f32.mrb[193].mxu1 }
 0x43b   : > { %v11732_v50 = vadd.f32 %v11731_v15, %v11730_v37  ;;  %v11733_v63 = vpop.f32.mrb[194].mxu1  ;;  %v12117_v15 = vpack.c.bf16 %v10249_v25, %v10248_v29 }
 0x43c   : > { %v11734_v43 = vpop.f32.mrb[195].mxu1 }
 0x43d   : > { %v9727_v30 = vadd.f32 %v11732_v50, %v15969_v28  ;;  %v11735_v34 = vadd.f32 %v11734_v43, %v11733_v63  ;;  %v15590_v50 = vadd.f32 %v11710_v11, %v9525_v23  ;;  %12118 = vmatpush3.bf16.msra.mxu0 %v12117_v15 }
 0x43e   : > { %v11848_v1 = vpop.f32.mrb[228].mxu0  ;;  %12119 = vmatprep.subr.bf16.mxu0 %v12532_v0 }
 0x43f   : > { %v11849_v53 = vpop.f32.mrb[229].mxu0  ;;  %v9730_v57 = vadd.f32 %v11735_v34, %v15970_v54  ;;  %v15600_v25 = vadd.f32 %v11844_v7, %v9727_v30  ;;  %v10250_v7 = vld [vmem:[%s15809_s5 + $0x30] sm:$0xff] }
 0x440   : > { %v11850_v52 = vadd.f32 %v11849_v53, %v11848_v1  ;;  %v11851_v16 = vpop.f32.mrb[230].mxu0 }
 0x441   : > { %v11852_v12 = vpop.f32.mrb[231].mxu0  ;;  %v11736_v46 = vpop.f32.mrb[196].mxu1 }
 0x442   : > { %v11853_v51 = vadd.f32 %v11852_v12, %v11851_v16  ;;  %v11737_v18 = vpop.f32.mrb[197].mxu1 }
 0x443   : > { %v11738_v35 = vadd.f32 %v11737_v18, %v11736_v46  ;;  %v11739_v13 = vpop.f32.mrb[198].mxu1 }
 0x444   : > { %v11740_v27 = vpop.f32.mrb[199].mxu1 }
 0x445   : > { %v9735_v2 = vadd.f32 %v11738_v35, %v15413_v56  ;;  %v11741_v37 = vadd.f32 %v11740_v27, %v11739_v13  ;;  %v15594_v56 = vadd.f32 %v11713_v55, %v9528_v39 }
 0x446   : > { %v11854_v6 = vpop.f32.mrb[232].mxu0 }
 0x447   : > { %v11855_v3 = vpop.f32.mrb[233].mxu0  ;;  %v9738_v63 = vadd.f32 %v11741_v37, %v15420_v40  ;;  %v15597_v46 = vadd.f32 %v11850_v52, %v9735_v2 }
 0x448   : > { %v11856_v43 = vadd.f32 %v11855_v3, %v11854_v6  ;;  %v11857_v28 = vpop.f32.mrb[234].mxu0 }
 0x449   : > { %v11858_v34 = vpop.f32.mrb[235].mxu0  ;;  %v11742_v1 = vpop.f32.mrb[200].mxu1  ;;  %v15602_v37 = vadd.f32 %v11853_v51, %v9738_v63 }
 0x44a   : > { %v11859_v14 = vadd.f32 %v11858_v34, %v11857_v28  ;;  %v11743_v53 = vpop.f32.mrb[201].mxu1 }
 0x44b   : > { %v11744_v54 = vadd.f32 %v11743_v53, %v11742_v1  ;;  %v11745_v16 = vpop.f32.mrb[202].mxu1 }
 0x44c   : > { %v11746_v12 = vpop.f32.mrb[203].mxu1 }
 0x44d   : > { %v9743_v19 = vadd.f32 %v11744_v54, %v15427_v58  ;;  %v11747_v11 = vadd.f32 %v11746_v12, %v11745_v16  ;;  %v15604_v58 = vadd.f32 %v11847_v26, %v9730_v57  ;;  %v10251_v26 = vld [vmem:[%s15809_s5 + $0x38] sm:$0xff] }
 0x44e   : > { %v11860_v38 = vpop.f32.mrb[236].mxu0  ;;  %v12120_v51 = vpack.c.bf16 %v10251_v26, %v10250_v7 }
 0x44f   : > { %v11861_v40 = vpop.f32.mrb[237].mxu0  ;;  %v9746_v23 = vadd.f32 %v11747_v11, %v15432_v42  ;;  %v15616_v63 = vadd.f32 %v11856_v43, %v9743_v19 }
 0x450   : > { %v11862_v18 = vadd.f32 %v11861_v40, %v11860_v38  ;;  %v11863_v35 = vpop.f32.mrb[238].mxu0  ;;  %12121 = vmatpush3.bf16.msra.mxu0 %v12120_v51 }
 0x451   : > { %v11864_v13 = vpop.f32.mrb[239].mxu0  ;;  %v11748_v27 = vpop.f32.mrb[204].mxu1  ;;  %v15620_v38 = vadd.f32 %v11859_v14, %v9746_v23  ;;  %12122 = vmatprep.subr.bf16.mxu0 %v12532_v0 }
 0x452   : > { %v11865_v29 = vadd.f32 %v11864_v13, %v11863_v35  ;;  %v11749_v55 = vpop.f32.mrb[205].mxu1 }
 0x453   : > { %v11750_v6 = vadd.f32 %v11749_v55, %v11748_v27  ;;  %v11751_v15 = vpop.f32.mrb[206].mxu1 }
 0x454   : > { %v11752_v39 = vpop.f32.mrb[207].mxu1 }
 0x455   : > { %v9751_v52 = vadd.f32 %v11750_v6, %v15436_v44  ;;  %v11753_v2 = vadd.f32 %v11752_v39, %v11751_v15 }
 0x456   : > { %v11866_v3 = vpop.f32.mrb[240].mxu0 }
 0x457   : > { %v11867_v42 = vpop.f32.mrb[241].mxu0  ;;  %v9754_v28 = vadd.f32 %v11753_v2, %v15440_v20  ;;  %v15614_v30 = vadd.f32 %v11862_v18, %v9751_v52 }
 0x458   : > { %v11868_v34 = vadd.f32 %v11867_v42, %v11866_v3  ;;  %v11869_v1 = vpop.f32.mrb[242].mxu0 }
 0x459   : > { %v11870_v53 = vpop.f32.mrb[243].mxu0  ;;  %v11754_v57 = vpop.f32.mrb[208].mxu1  ;;  %v15618_v11 = vadd.f32 %v11865_v29, %v9754_v28 }
 0x45a   : > { %v11871_v44 = vadd.f32 %v11870_v53, %v11869_v1  ;;  %v11755_v54 = vpop.f32.mrb[209].mxu1 }
 0x45b   : > { %v11756_v20 = vadd.f32 %v11755_v54, %v11754_v57  ;;  %v11757_v16 = vpop.f32.mrb[210].mxu1  ;;  %v10253_v57 = vld [vmem:[%s15809_s5 + $0x48] sm:$0xff] }
 0x45c   : > { %v11758_v12 = vpop.f32.mrb[211].mxu1 }
 0x45d   : > { %v9759_v40 = vadd.f32 %v11756_v20, %v15448_v45  ;;  %v11759_v18 = vadd.f32 %v11758_v12, %v11757_v16 }
 0x45e   : > { %v11872_v35 = vpop.f32.mrb[244].mxu0 }
 0x45f   : > { %v11873_v13 = vpop.f32.mrb[245].mxu0  ;;  %v9762_v27 = vadd.f32 %v11759_v18, %v15452_v8  ;;  %v15625_v39 = vadd.f32 %v11868_v34, %v9759_v40  ;;  %v10252_v34 = vld [vmem:[%s15809_s5 + $0x40] sm:$0xff] }
 0x460   : > { %v11874_v43 = vadd.f32 %v11873_v13, %v11872_v35  ;;  %v11875_v19 = vpop.f32.mrb[246].mxu0  ;;  %v12123_v54 = vpack.c.bf16 %v10253_v57, %v10252_v34  ;;  %v10254_v57 = vld [vmem:[%s15809_s5 + $0x50] sm:$0xff] }
 0x461   : > { %v11876_v55 = vpop.f32.mrb[247].mxu0  ;;  %v11760_v6 = vpop.f32.mrb[212].mxu1  ;;  %v15627_v2 = vadd.f32 %v11871_v44, %v9762_v27 }
 0x462   : > { %v11877_v15 = vadd.f32 %v11876_v55, %v11875_v19  ;;  %v11761_v29 = vpop.f32.mrb[213].mxu1  ;;  %12124 = vmatpush3.bf16.msra.mxu0 %v12123_v54 }
 0x463   : > { %v11762_v52 = vadd.f32 %v11761_v29, %v11760_v6  ;;  %v11763_v14 = vpop.f32.mrb[214].mxu1  ;;  %12125 = vmatprep.subr.bf16.mxu0 %v12532_v0 }
 0x464   : > { %v11764_v23 = vpop.f32.mrb[215].mxu1 }
 0x465   : > { %v9767_v45 = vadd.f32 %v11762_v52, %v15456_v21  ;;  %v11765_v3 = vadd.f32 %v11764_v23, %v11763_v14 }
 0x466   : > { %v11878_v42 = vpop.f32.mrb[248].mxu0 }
 0x467   : > { %v11879_v28 = vpop.f32.mrb[249].mxu0  ;;  %v9770_v8 = vadd.f32 %v11765_v3, %v15460_v49  ;;  %v15631_v7 = vadd.f32 %v11874_v43, %v9767_v45 }
 0x468   : > { %v11880_v1 = vadd.f32 %v11879_v28, %v11878_v42  ;;  %v11881_v53 = vpop.f32.mrb[250].mxu0 }
 0x469   : > { %v11882_v26 = vpop.f32.mrb[251].mxu0  ;;  %v11766_v44 = vpop.f32.mrb[216].mxu1  ;;  %v15639_v51 = vadd.f32 %v11877_v15, %v9770_v8 }
 0x46a   : > { %v11883_v21 = vadd.f32 %v11882_v26, %v11881_v53  ;;  %v11767_v20 = vpop.f32.mrb[217].mxu1 }
 0x46b   : > { %v11768_v49 = vadd.f32 %v11767_v20, %v11766_v44  ;;  %v11769_v16 = vpop.f32.mrb[218].mxu1  ;;  %v10255_v44 = vld [vmem:[%s15809_s5 + $0x58] sm:$0xff] }
 0x46c   : > { %v11770_v12 = vpop.f32.mrb[219].mxu1  ;;  %v12126_v20 = vpack.c.bf16 %v10255_v44, %v10254_v57 }
 0x46d   : > { %v9775_v40 = vadd.f32 %v11768_v49, %v15464_v60  ;;  %v11771_v18 = vadd.f32 %v11770_v12, %v11769_v16 }
 0x46e   : > { %v11884_v35 = vpop.f32.mrb[252].mxu0  ;;  %12127 = vmatpush3.bf16.msra.mxu0 %v12126_v20 }
 0x46f   : > { %v11885_v13 = vpop.f32.mrb[253].mxu0  ;;  %v9778_v27 = vadd.f32 %v11771_v18, %v15470_v61  ;;  %v15644_v55 = vadd.f32 %v11880_v1, %v9775_v40  ;;  %12128 = vmatprep.subr.bf16.mxu0 %v12532_v0 }
 0x470   : > { %v11886_v43 = vadd.f32 %v11885_v13, %v11884_v35  ;;  %v11887_v19 = vpop.f32.mrb[254].mxu0 }
 0x471   : > { %v11888_v6 = vpop.f32.mrb[255].mxu0  ;;  %v11772_v15 = vpop.f32.mrb[220].mxu1  ;;  %v15646_v52 = vadd.f32 %v11883_v21, %v9778_v27 }
 0x472   : > { %v11889_v29 = vadd.f32 %v11888_v6, %v11887_v19  ;;  %v11773_v14 = vpop.f32.mrb[221].mxu1 }
 0x473   : > { %v11774_v23 = vadd.f32 %v11773_v14, %v11772_v15  ;;  %v11775_v45 = vpop.f32.mrb[222].mxu1 }
 0x474   : > { %v11776_v3 = vpop.f32.mrb[223].mxu1 }
 0x475   : > { %v9783_v60 = vadd.f32 %v11774_v23, %v15474_v4  ;;  %v11777_v42 = vadd.f32 %v11776_v3, %v11775_v45 }
 0x476   : > { %v11890_v28 = vpop.f32.mrb[0].mxu0 }
 0x477   : > { %v11891_v8 = vpop.f32.mrb[1].mxu0  ;;  %v9786_v61 = vadd.f32 %v11777_v42, %v15478_v5  ;;  %v15650_v1 = vadd.f32 %v11886_v43, %v9783_v60 }
 0x478   : > { %v11892_v53 = vadd.f32 %v11891_v8, %v11890_v28  ;;  %v11893_v26 = vpop.f32.mrb[2].mxu0 }
 0x479   : > { %v11894_v34 = vpop.f32.mrb[3].mxu0  ;;  %v11778_v21 = vpop.f32.mrb[224].mxu1  ;;  %v15658_v54 = vadd.f32 %v11889_v29, %v9786_v61  ;;  %v10257_v61 = vld [vmem:[%s15809_s5 + $0x68] sm:$0xff] }
 0x47a   : > { %v11895_v4 = vadd.f32 %v11894_v34, %v11893_v26  ;;  %v11779_v49 = vpop.f32.mrb[225].mxu1 }
 0x47b   : > { %v11780_v5 = vadd.f32 %v11779_v49, %v11778_v21  ;;  %v11781_v16 = vpop.f32.mrb[226].mxu1 }
 0x47c   : > { %v11782_v12 = vpop.f32.mrb[227].mxu1 }
 0x47d   : > { %v9791_v40 = vadd.f32 %v11780_v5, %v15488_v24  ;;  %v11783_v18 = vadd.f32 %v11782_v12, %v11781_v16 }
 0x47e   : > { %v11896_v35 = vpop.f32.mrb[4].mxu0 }
 0x47f   : > { %v9794_v13 = vadd.f32 %v11783_v18, %v15491_v48  ;;  %v11897_v27 = vpop.f32.mrb[5].mxu0  ;;  %v15663_v43 = vadd.f32 %v11892_v53, %v9791_v40  ;;  %v10256_v48 = vld [vmem:[%s15809_s5 + $0x60] sm:$0xff] }
 0x480   : > { %v11898_v19 = vadd.f32 %v11897_v27, %v11896_v35  ;;  %v11899_v6 = vpop.f32.mrb[6].mxu0  ;;  %v12129_v57 = vpack.c.bf16 %v10257_v61, %v10256_v48 }
 0x481   : > { %v11900_v15 = vpop.f32.mrb[7].mxu0  ;;  %v15665_v29 = vadd.f32 %v11895_v4, %v9794_v13 }
 0x482   : > { %v11901_v14 = vadd.f32 %v11900_v15, %v11899_v6  ;;  %12130 = vmatpush3.bf16.msra.mxu0 %v12129_v57 }
 0x483   : > { %12131 = vmatprep.subr.bf16.mxu0 %v12532_v0 }
 0x484   : > { %v11784_v23 = vpop.f32.mrb[228].mxu1 }
 0x485   : > { %v11785_v45 = vpop.f32.mrb[229].mxu1 }
 0x486   : > { %v11786_v3 = vadd.f32 %v11785_v45, %v11784_v23  ;;  %v11787_v60 = vpop.f32.mrb[230].mxu1 }
 0x487   : > { %v11788_v42 = vpop.f32.mrb[231].mxu1 }
 0x488   : > { %v9799_v24 = vadd.f32 %v11786_v3, %v15494_v62  ;;  %v11789_v28 = vadd.f32 %v11788_v42, %v11787_v60  ;;  %v11902_v8 = vpop.f32.mrb[8].mxu0 }
 0x489   : > { %v11903_v26 = vpop.f32.mrb[9].mxu0 }
 0x48a   : > { %v9802_v53 = vadd.f32 %v11789_v28, %v15497_v41  ;;  %v15675_v34 = vadd.f32 %v11898_v19, %v9799_v24  ;;  %v11904_v44 = vadd.f32 %v11903_v26, %v11902_v8  ;;  %v11905_v21 = vpop.f32.mrb[10].mxu0  ;;  %v12534_v26 = vmov 0.0  }
 0x48b   : > { %v11906_v4 = vpop.f32.mrb[11].mxu0  ;;  %12107 = vmatprep.mubr.msk.f32.mxu0 %vm12533_vm2, %v12534_v26 }
 0x48c   : > { %v15677_v62 = vadd.f32 %v11901_v14, %v9802_v53  ;;  %v11907_v20 = vadd.f32 %v11906_v4, %v11905_v21 }
 0x48e   : > { %v11790_v49 = vpop.f32.mrb[232].mxu1 }
 0x48f   : > { %v11791_v5 = vpop.f32.mrb[233].mxu1 }
 0x490   : > { %v11792_v16 = vadd.f32 %v11791_v5, %v11790_v49  ;;  %v11793_v12 = vpop.f32.mrb[234].mxu1 }
 0x491   : > { %v11794_v40 = vpop.f32.mrb[235].mxu1 }
 0x492   : > { %v9807_v41 = vadd.f32 %v11792_v16, %v15502_v17  ;;  %v11795_v18 = vadd.f32 %v11794_v40, %v11793_v12  ;;  %v10258_v17 = vld [vmem:[%s15809_s5 + $0x70] sm:$0xff] }
 0x493   : > { %v11908_v35 = vpop.f32.mrb[12].mxu0 }
 0x494   : > { %v11909_v13 = vpop.f32.mrb[13].mxu0  ;;  %v9810_v27 = vadd.f32 %v11795_v18, %v15505_v59  ;;  %v15682_v15 = vadd.f32 %v11904_v44, %v9807_v41  ;;  %v10259_v59 = vld [vmem:[%s15809_s5 + $0x78] sm:$0xff] }
 0x495   : > { %v11910_v19 = vadd.f32 %v11909_v13, %v11908_v35  ;;  %v11911_v6 = vpop.f32.mrb[14].mxu0  ;;  %v12132_v53 = vpack.c.bf16 %v10259_v59, %v10258_v17 }
 0x496   : > { %v11912_v14 = vpop.f32.mrb[15].mxu0  ;;  %v15684_v45 = vadd.f32 %v11907_v20, %v9810_v27 }
 0x497   : > { %v11913_v23 = vadd.f32 %v11912_v14, %v11911_v6  ;;  %12133 = vmatpush3.bf16.msra.mxu0 %v12132_v53 }
 0x49b   : > { %v11796_v0 = vpop.f32.mrb[236].mxu1 }
 0x49c   : > { %v11797_v3 = vpop.f32.mrb[237].mxu1 }
 0x49d   : > { %v11798_v60 = vadd.f32 %v11797_v3, %v11796_v0  ;;  %v11799_v42 = vpop.f32.mrb[238].mxu1 }
 0x49e   : > { %v11800_v24 = vpop.f32.mrb[239].mxu1  ;;  %v11914_v28 = vpop.f32.mrb[16].mxu0 }
 0x49f   : > { %v9815_v8 = vadd.f32 %v11798_v60, %v15511_v22  ;;  %v11801_v48 = vadd.f32 %v11800_v24, %v11799_v42  ;;  %v11915_v61 = vpop.f32.mrb[17].mxu0 }
 0x4a0   : > { %v11916_v57 = vadd.f32 %v11915_v61, %v11914_v28  ;;  %v11917_v44 = vpop.f32.mrb[18].mxu0 }
 0x4a1   : > { %v9818_v21 = vadd.f32 %v11801_v48, %v15522_v10  ;;  %v11918_v4 = vpop.f32.mrb[19].mxu0  ;;  %v15694_v20 = vadd.f32 %v11910_v19, %v9815_v8 }
 0x4a2   : > { %v11919_v49 = vadd.f32 %v11918_v4, %v11917_v44 }
 0x4a3   : > { %v15696_v5 = vadd.f32 %v11913_v23, %v9818_v21 }
 0x4a6   : > { %v11802_v16 = vpop.f32.mrb[240].mxu1 }
 0x4a7   : > { %v11803_v12 = vpop.f32.mrb[241].mxu1 }
 0x4a8   : > { %v11804_v22 = vadd.f32 %v11803_v12, %v11802_v16  ;;  %v11805_v40 = vpop.f32.mrb[242].mxu1 }
 0x4a9   : > { %v11806_v41 = vpop.f32.mrb[243].mxu1 }
 0x4aa   : > { %v11920_v18 = vpop.f32.mrb[20].mxu0  ;;  %v9823_v35 = vadd.f32 %v11804_v22, %v15544_v32  ;;  %v11807_v13 = vadd.f32 %v11806_v41, %v11805_v40 }
 0x4ab   : > { %v11921_v27 = vpop.f32.mrb[21].mxu0 }
 0x4ac   : > { %v11922_v6 = vadd.f32 %v11921_v27, %v11920_v18  ;;  %v11923_v14 = vpop.f32.mrb[22].mxu0  ;;  %v9826_v10 = vadd.f32 %v11807_v13, %v15551_v9  ;;  %v15700_v0 = vadd.f32 %v11916_v57, %v9823_v35 }
 0x4ad   : > { %v11924_v19 = vpop.f32.mrb[23].mxu0 }
 0x4ae   : > { %v11925_v3 = vadd.f32 %v11924_v19, %v11923_v14  ;;  %v15702_v23 = vadd.f32 %v11919_v49, %v9826_v10 }
 0x4b1   : > { %v11808_v60 = vpop.f32.mrb[244].mxu1 }
 0x4b2   : > { %v11809_v42 = vpop.f32.mrb[245].mxu1 }
 0x4b3   : > { %v11810_v24 = vadd.f32 %v11809_v42, %v11808_v60  ;;  %v11811_v28 = vpop.f32.mrb[246].mxu1 }
 0x4b4   : > { %v11812_v17 = vpop.f32.mrb[247].mxu1 }
 0x4b5   : > { %v9831_v59 = vadd.f32 %v11810_v24, %v15567_v31  ;;  %v11813_v32 = vadd.f32 %v11812_v17, %v11811_v28  ;;  %v11926_v8 = vpop.f32.mrb[24].mxu0 }
 0x4b6   : > { %v11927_v48 = vpop.f32.mrb[25].mxu0 }
 0x4b7   : > { %v9834_v61 = vadd.f32 %v11813_v32, %v15570_v33  ;;  %v11928_v53 = vadd.f32 %v11927_v48, %v11926_v8  ;;  %v11929_v9 = vpop.f32.mrb[26].mxu0  ;;  %v15706_v26 = vadd.f32 %v11922_v6, %v9831_v59 }
 0x4b8   : > { %v11930_v57 = vpop.f32.mrb[27].mxu0 }
 0x4b9   : > { %v11931_v44 = vadd.f32 %v11930_v57, %v11929_v9  ;;  %v15708_v21 = vadd.f32 %v11925_v3, %v9834_v61 }
 0x4bd   : > { %v11814_v4 = vpop.f32.mrb[248].mxu1 }
 0x4be   : > { %v11815_v49 = vpop.f32.mrb[249].mxu1 }
 0x4bf   : > { %v11816_v16 = vadd.f32 %v11815_v49, %v11814_v4  ;;  %v11817_v12 = vpop.f32.mrb[250].mxu1 }
 0x4c0   : > { %v11818_v22 = vpop.f32.mrb[251].mxu1 }
 0x4c1   : > { %v9839_v31 = vadd.f32 %v11816_v16, %v15576_v36  ;;  %v11819_v40 = vadd.f32 %v11818_v22, %v11817_v12 }
 0x4c3   : > { %v9842_v41 = vadd.f32 %v11819_v40, %v15580_v47  ;;  %v15712_v18 = vadd.f32 %v11928_v53, %v9839_v31 }
 0x4c5   : > { %v11820_v33 = vpop.f32.mrb[252].mxu1  ;;  %v15714_v35 = vadd.f32 %v11931_v44, %v9842_v41 }
 0x4c6   : > { %v11821_v13 = vpop.f32.mrb[253].mxu1 }
 0x4c7   : > { %v11822_v27 = vadd.f32 %v11821_v13, %v11820_v33  ;;  %v11823_v6 = vpop.f32.mrb[254].mxu1  ;;  %v11932_v14 = vpop.f32.mrb[28].mxu0 }
 0x4c8   : > { %v11824_v10 = vpop.f32.mrb[255].mxu1  ;;  %v11933_v60 = vpop.f32.mrb[29].mxu0 }
 0x4c9   : > { %v9847_v19 = vadd.f32 %v11822_v27, %v15590_v50  ;;  %v11825_v3 = vadd.f32 %v11824_v10, %v11823_v6  ;;  %v11934_v42 = vadd.f32 %v11933_v60, %v11932_v14  ;;  %v11935_v24 = vpop.f32.mrb[30].mxu0 }
 0x4ca   : > { %v11936_v28 = vpop.f32.mrb[31].mxu0 }
 0x4cb   : > { %v9850_v36 = vadd.f32 %v11825_v3, %v15594_v56  ;;  %v11937_v47 = vadd.f32 %v11936_v28, %v11935_v24  ;;  %v15718_v17 = vadd.f32 %v11934_v42, %v9847_v19 }
 0x4cd   : > { %v12045_v59 = vpop.f32.mrb[0].mxu1  ;;  %v15721_v48 = vadd.f32 %v11937_v47, %v9850_v36 }
 0x4ce   : > { %v10057_v32 = vadd.f32 %v12045_v59, %v15597_v46  ;;  %v10048_v8 = vpop.f32.mrb[1].mxu1 }
 0x4cf   : > { %v10049_v61 = vadd.f32 %v10048_v8, %v15600_v25  ;;  %v12046_v53 = vpop.f32.mrb[2].mxu1 }
 0x4d0   : > { %v10060_v50 = vadd.f32 %v12046_v53, %v15602_v37  ;;  %v10051_v9 = vpop.f32.mrb[3].mxu1  ;;  %v10177_v4 = vmax.f32 %v10057_v32, 0.0 }
 0x4d1   : > { %v10052_v57 = vadd.f32 %v10051_v9, %v15604_v58  ;;  %v10175_v44 = vmax.f32 %v10049_v61, 0.0 }
 0x4d2   : > { %v10178_v46 = vmax.f32 %v10060_v50, 0.0 }
 0x4d3   : > { %v10176_v56 = vmax.f32 %v10052_v57, 0.0 }
 0x4d5   : > { %v10207_v49 = vadd.f32 %v10176_v56, %v10175_v44  ;;  %v12049_v16 = vpop.f32.mrb[4].mxu1 }
 0x4d6   : > { %v10073_v12 = vadd.f32 %v12049_v16, %v15614_v30  ;;  %v10064_v22 = vpop.f32.mrb[5].mxu1 }
 0x4d7   : > { %v10208_v31 = vadd.f32 %v10207_v49, %v10177_v4  ;;  %v10065_v40 = vadd.f32 %v10064_v22, %v15616_v63  ;;  %v12050_v41 = vpop.f32.mrb[6].mxu1 }
 0x4d8   : > { %v10076_v25 = vadd.f32 %v12050_v41, %v15618_v11  ;;  %v10067_v33 = vpop.f32.mrb[7].mxu1  ;;  %v10181_v14 = vmax.f32 %v10073_v12, 0.0 }
 0x4d9   : > { %v10179_v37 = vmax.f32 %v10065_v40, 0.0  ;;  %v10209_v13 = vadd.f32 %v10208_v31, %v10178_v46  ;;  %v10068_v58 = vadd.f32 %v10067_v33, %v15620_v38 }
 0x4da   : > { %v10182_v60 = vmax.f32 %v10076_v25, 0.0 }
 0x4db   : > { %v10210_v27 = vadd.f32 %v10209_v13, %v10179_v37  ;;  %v10180_v6 = vmax.f32 %v10068_v58, 0.0 }
 0x4dd   : > { %v10211_v10 = vadd.f32 %v10210_v27, %v10180_v6  ;;  %v12053_v19 = vpop.f32.mrb[8].mxu1 }
 0x4de   : > { %v10089_v30 = vadd.f32 %v12053_v19, %v15631_v7  ;;  %v10080_v3 = vpop.f32.mrb[9].mxu1 }
 0x4df   : > { %v10212_v42 = vadd.f32 %v10211_v10, %v10181_v14  ;;  %v10081_v63 = vadd.f32 %v10080_v3, %v15625_v39  ;;  %v12054_v24 = vpop.f32.mrb[10].mxu1 }
 0x4e0   : > { %v10092_v11 = vadd.f32 %v12054_v24, %v15639_v51  ;;  %v10083_v36 = vpop.f32.mrb[11].mxu1  ;;  %v10185_v8 = vmax.f32 %v10089_v30, 0.0 }
 0x4e1   : > { %v10183_v28 = vmax.f32 %v10081_v63, 0.0  ;;  %v10213_v47 = vadd.f32 %v10212_v42, %v10182_v60  ;;  %v10084_v38 = vadd.f32 %v10083_v36, %v15627_v2 }
 0x4e2   : > { %v10186_v9 = vmax.f32 %v10092_v11, 0.0 }
 0x4e3   : > { %v10214_v59 = vadd.f32 %v10213_v47, %v10183_v28  ;;  %v10184_v32 = vmax.f32 %v10084_v38, 0.0 }
 0x4e5   : > { %v10215_v61 = vadd.f32 %v10214_v59, %v10184_v32  ;;  %v12057_v53 = vpop.f32.mrb[12].mxu1 }
 0x4e6   : > { %v10105_v7 = vadd.f32 %v12057_v53, %v15650_v1  ;;  %v10096_v50 = vpop.f32.mrb[13].mxu1 }
 0x4e7   : > { %v10216_v57 = vadd.f32 %v10215_v61, %v10185_v8  ;;  %v10097_v39 = vadd.f32 %v10096_v50, %v15644_v55  ;;  %v12058_v44 = vpop.f32.mrb[14].mxu1 }
 0x4e8   : > { %v10108_v51 = vadd.f32 %v12058_v44, %v15658_v54  ;;  %v10099_v56 = vpop.f32.mrb[15].mxu1  ;;  %v10189_v22 = vmax.f32 %v10105_v7, 0.0 }
 0x4e9   : > { %v10187_v4 = vmax.f32 %v10097_v39, 0.0  ;;  %v10217_v49 = vadd.f32 %v10216_v57, %v10186_v9  ;;  %v10100_v2 = vadd.f32 %v10099_v56, %v15646_v52 }
 0x4ea   : > { %v10190_v41 = vmax.f32 %v10108_v51, 0.0 }
 0x4eb   : > { %v10218_v16 = vadd.f32 %v10217_v49, %v10187_v4  ;;  %v10188_v12 = vmax.f32 %v10100_v2, 0.0 }
 0x4ed   : > { %v10219_v46 = vadd.f32 %v10218_v16, %v10188_v12  ;;  %v12061_v31 = vpop.f32.mrb[16].mxu1 }
 0x4ee   : > { %v10121_v1 = vadd.f32 %v12061_v31, %v15675_v34  ;;  %v10112_v40 = vpop.f32.mrb[17].mxu1 }
 0x4ef   : > { %v10220_v25 = vadd.f32 %v10219_v46, %v10189_v22  ;;  %v10113_v55 = vadd.f32 %v10112_v40, %v15663_v43  ;;  %v12062_v33 = vpop.f32.mrb[18].mxu1 }
 0x4f0   : > { %v10124_v54 = vadd.f32 %v12062_v33, %v15677_v62  ;;  %v10115_v37 = vpop.f32.mrb[19].mxu1  ;;  %v10193_v14 = vmax.f32 %v10121_v1, 0.0 }
 0x4f1   : > { %v10191_v13 = vmax.f32 %v10113_v55, 0.0  ;;  %v10221_v58 = vadd.f32 %v10220_v25, %v10190_v41  ;;  %v10116_v52 = vadd.f32 %v10115_v37, %v15665_v29 }
 0x4f2   : > { %v10194_v3 = vmax.f32 %v10124_v54, 0.0 }
 0x4f3   : > { %v10222_v27 = vadd.f32 %v10221_v58, %v10191_v13  ;;  %v10192_v6 = vmax.f32 %v10116_v52, 0.0 }
 0x4f5   : > { %v10223_v10 = vadd.f32 %v10222_v27, %v10192_v6  ;;  %v12065_v19 = vpop.f32.mrb[20].mxu1 }
 0x4f6   : > { %v10137_v34 = vadd.f32 %v12065_v19, %v15694_v20  ;;  %v10128_v30 = vpop.f32.mrb[21].mxu1 }
 0x4f7   : > { %v10224_v60 = vadd.f32 %v10223_v10, %v10193_v14  ;;  %v10129_v43 = vadd.f32 %v10128_v30, %v15682_v15  ;;  %v12066_v42 = vpop.f32.mrb[22].mxu1 }
 0x4f8   : > { %v10140_v62 = vadd.f32 %v12066_v42, %v15696_v5  ;;  %v10131_v63 = vpop.f32.mrb[23].mxu1  ;;  %v10197_v47 = vmax.f32 %v10137_v34, 0.0 }
 0x4f9   : > { %v10195_v24 = vmax.f32 %v10129_v43, 0.0  ;;  %v10225_v11 = vadd.f32 %v10224_v60, %v10194_v3  ;;  %v10132_v29 = vadd.f32 %v10131_v63, %v15684_v45 }
 0x4fa   : > { %v10198_v8 = vmax.f32 %v10140_v62, 0.0 }
 0x4fb   : > { %v10226_v36 = vadd.f32 %v10225_v11, %v10195_v24  ;;  %v10196_v28 = vmax.f32 %v10132_v29, 0.0 }
 0x4fd   : > { %v10227_v38 = vadd.f32 %v10226_v36, %v10196_v28  ;;  %v12069_v59 = vpop.f32.mrb[24].mxu1 }
 0x4fe   : > { %v10153_v20 = vadd.f32 %v12069_v59, %v15706_v26  ;;  %v10144_v32 = vpop.f32.mrb[25].mxu1 }
 0x4ff   : > { %v10228_v61 = vadd.f32 %v10227_v38, %v10197_v47  ;;  %v10145_v15 = vadd.f32 %v10144_v32, %v15700_v0  ;;  %v12070_v53 = vpop.f32.mrb[26].mxu1 }
 0x500   : > { %v10156_v5 = vadd.f32 %v12070_v53, %v15708_v21  ;;  %v10147_v7 = vpop.f32.mrb[27].mxu1  ;;  %v10201_v44 = vmax.f32 %v10153_v20, 0.0 }
 0x501   : > { %v10199_v50 = vmax.f32 %v10145_v15, 0.0  ;;  %v10229_v9 = vadd.f32 %v10228_v61, %v10198_v8  ;;  %v10148_v45 = vadd.f32 %v10147_v7, %v15702_v23 }
 0x502   : > { %v10202_v49 = vmax.f32 %v10156_v5, 0.0 }
 0x503   : > { %v10230_v57 = vadd.f32 %v10229_v9, %v10199_v50  ;;  %v10200_v39 = vmax.f32 %v10148_v45, 0.0 }
 0x505   : > { %v10231_v51 = vadd.f32 %v10230_v57, %v10200_v39  ;;  %v12073_v56 = vpop.f32.mrb[28].mxu1 }
 0x506   : > { %v10169_v26 = vadd.f32 %v12073_v56, %v15718_v17  ;;  %v10160_v4 = vpop.f32.mrb[29].mxu1 }
 0x507   : > { %v10232_v2 = vadd.f32 %v10231_v51, %v10201_v44  ;;  %v10161_v0 = vadd.f32 %v10160_v4, %v15712_v18  ;;  %v12074_v16 = vpop.f32.mrb[30].mxu1 }
 0x508   : > { %v10172_v21 = vadd.f32 %v12074_v16, %v15721_v48  ;;  %v10163_v12 = vpop.f32.mrb[31].mxu1  ;;  %v10205_v40 = vmax.f32 %v10169_v26, 0.0 }
 0x509   : > { %v10203_v22 = vmax.f32 %v10161_v0, 0.0  ;;  %v10233_v46 = vadd.f32 %v10232_v2, %v10202_v49  ;;  %v10164_v23 = vadd.f32 %v10163_v12, %v15714_v35  ;;  %v10260_v35 = vld [vmem:[%s15810_s6] sm:$0x1] }
 0x50a   : > { %v10206_v17 = vmax.f32 %v10172_v21, 0.0 }
 0x50b   : > { %v10234_v31 = vadd.f32 %v10233_v46, %v10203_v22  ;;  %v10204_v1 = vmax.f32 %v10164_v23, 0.0 }
 0x50d   : > { %v10235_v41 = vadd.f32 %v10234_v31, %v10204_v1 }
 0x50f   : > { %v10236_v25 = vadd.f32 %v10235_v41, %v10205_v40 }
 0x511   : > { %v10237_v55 = vadd.f32 %v10236_v25, %v10206_v17 }
 0x513   : > { %v10238_v33 = vrot.slane %v10237_v55, 4 }
 0x515   : > { %v10239_v54 = vadd.f32 %v10238_v33, %v10237_v55 }
 0x517   : > { %v10240_v18 = vrot.slane %v10239_v54, 2 }
 0x519   : > { %v10241_v37 = vadd.f32 %v10240_v18, %v10239_v54 }
 0x51b   : > { %v10242_v13 = vrot.slane %v10241_v37, 1 }
 0x51d   : > { %v10243_v48 = vadd.f32 %v10242_v13, %v10241_v37 }
 0x51f   : > { %12108 = vmatmul.mubr.f32.vlgmr.msra.gmra.mrb[32].mxu0 %v10243_v48 }
 0x5f2   : > { %v10327_v58 = vpop.f32.mrb[32].mxu0 }
 0x5f3   : > { %v10328_v52 = vadd.f32 %v10327_v58, %v10260_v35  ;;  %v12109_v27 = vpop.f32.mrb[33].mxu0 }
 0x5f5   : > { %10331 = vst [vmem:[%s285_s17] sm:$0x1] %v10328_v52 }
 0x5f6   : > { %12473 = shalt.err (!%p12470_p7)
}
 0x5f7   : > { %s12474_s23 = scalar_lea.hbm %s15762_s18, 16  ;;  %s12478_s9 = scalar_lea.hbm %s15811_s7, 32 }
 0x5f8   : > { %p12475_p8 = scmp.ne.s32.totalorder %s15762_s18, %s12474_s23  ;;  %p12479_p1 = scmp.lt.u32.totalorder %s15762_s18, %s15811_s7 }
 0x5f9   : > { %p12480_p0 = scmp.lt.u32.totalorder %s12478_s9, %s12474_s23  ;;  %p12482_p6 = scmp.lt.u32.totalorder %s12474_s23, %s15762_s18 }
 0x5fa   : > { %p12476_p11 = pnand %p12475_p8, %p15971_p9 }
 0x5fb   : > { %p12481_p5 = por %p12480_p0, %p12479_p1 }
 0x5fc   : > { %p12477_p13 = pneg %p12476_p11 }
 0x5fd   : > { %p12483_p10 = por %p12482_p6, %p12481_p5 }
 0x5ff   : > { %p12484_p12 = pnand %p12483_p10, %p12477_p13 }
 0x601   : > { %12487 = shalt.err (!%p12484_p12)
}
 0x602   : > { %12138 = dma.vmem_to_hbm [thread:$0]  (%p15971_p9), %s15764_s13, 16, %s15762_s18, %s10333_s19  }
 0x603 PF: > { %p12150_p2 = scmp.ge.s32.totalorder %s12526_s27, 2  ;;  %s10357_s15 = sand.u32 1, %s12514_s24  }
 0x604   : > { %p15972_p3 = scmp.ne.s32.totalorder %s15820_s12, 0  ;;  %s10358_s16 = scalar_lea.sflag [#allocation7], %s10357_s15 }
 0x606   : > { %p12145_p4 = pnand %p12150_p2, %p15972_p3 }
 0x608   : > { %12509 = dma.done.wait (!%p12145_p4), %s10358_s16, 16  }
 0x609   : > { %12511 = vsyncadd (!%p12145_p4), %s10358_s16, 4294967280  ;;  %p18_p7 = scmp.ge.s32.totalorder %s12601_s30, 4   ;;  %s15973_s24 = smov %s12518_s25 }
 0x60a   : > { %s15974_s25 = smov %s12522_s26  ;;  %s15975_s26 = smov %s12612_s10 }
 0x60b   : > { %s15976_s27 = smov %s12601_s30  ;;  %20 = sbr.rel (!%p18_p7) target bundleno = 4 (0x4), region = 92 }
 0x612   :  { %10362 = vsyncpa [#allocation6], 1 }
 0x613   :  { %10364 = vsyncpa [#allocation6 + $0x1], 1 }
 0x614   :  { %10365 = vsyncpa [#allocation7], 1 }
 0x615   :  { %10367 = vsyncpa [#allocation7 + $0x1], 1 }

</bundles_post_ra>
